<compile_context>
chip_gen: v7x
topology: tpu7x:2x2x1
jax: 0.10.0
libtpu: 0.0.40
codegen_flags: <defaults>
</compile_context>

<pallas_src>
import functools

import numpy as np

import jax
import jax.numpy as jnp
from jax.experimental import pallas as pl
from jax.experimental.pallas import tpu as pltpu

_LANE = 128
_SUBLANE = 8


def _conv_gn_kernel(x_ref, w_ref, bias_ref, gamma_ref, beta_ref, p_ref,
                    o_ref, xs_ref, acc_ref, *, k, pad, eps, hc):
    bt, H, W, cin_pl = x_ref.shape
    HW, Cp = acc_ref.shape
    nch = H // hc                     # GroupNorm epilogue chunks per sample
    CH = hc * W                       # rows per chunk (multiple of W >= 8)

    # W-coordinate of every flattened row, as a (HW, 1) sublane-only predicate.
    w_col = jax.lax.broadcasted_iota(jnp.int32, (HW, 1), 0) % W

    for b in range(bt):
        xb = x_ref[b].reshape(HW, cin_pl)              # compute dtype (bf16/f32)
        x32 = xb.astype(jnp.float32)                   # roll/mask in f32 (v5e-safe)

        # ---- k W-shifted, zero-filled copies, lane-concatenated so the dj taps
        #      of one kernel row fuse into a single wide-K matmul.
        for dj in range(k):
            s = dj - pad
            c0 = dj * cin_pl
            if s == 0:
                xs_ref[:, c0:c0 + cin_pl] = xb
            else:
                rolled = pltpu.roll(x32, shift=(-s) % HW, axis=0)
                valid = jnp.logical_and(w_col + s >= 0, w_col + s < W)
                xs_ref[:, c0:c0 + cin_pl] = jnp.where(
                    valid, rolled, 0.0).astype(xs_ref.dtype)

        # ---- convolution: bias-initialized f32 accumulator; one wide-K MXU
        #      matmul + one accumulator RMW per kernel row (k total).
        acc_ref[...] = jnp.broadcast_to(bias_ref[...], (HW, Cp)).astype(jnp.float32)
        for di in range(k):
            t = di - pad
            rows = (H - abs(t)) * W           # multiple of W -> sublane aligned
            if rows <= 0:
                continue
            src = max(0, t) * W
            dst = max(0, -t) * W
            contrib = jnp.dot(xs_ref[src:src + rows, :], w_ref[di],
                              preferred_element_type=jnp.float32)
            acc_ref[dst:dst + rows, :] = acc_ref[dst:dst + rows, :] + contrib

        # ---- GroupNorm: two-pass (mean, then centered 2nd moment), streamed
        #      over row chunks to bound vreg pressure.  Group reduce and
        #      broadcast-back are each one lane-dense (1,Cp)x(Cp,Cp) matmul.
        def _sum_body(i, s):
            r0 = pl.multiple_of(i * CH, CH)
            return s + jnp.sum(acc_ref[pl.ds(r0, CH), :], axis=0, keepdims=True)

        s1 = jax.lax.fori_loop(0, nch, _sum_body,
                               jnp.zeros((1, Cp), jnp.float32))
        mean_c = jnp.dot(s1, p_ref[...], preferred_element_type=jnp.float32)

        def _var_body(i, s):
            r0 = pl.multiple_of(i * CH, CH)
            d = acc_ref[pl.ds(r0, CH), :] - mean_c
            return s + jnp.sum(d * d, axis=0, keepdims=True)

        s2 = jax.lax.fori_loop(0, nch, _var_body,
                               jnp.zeros((1, Cp), jnp.float32))
        var_c = jnp.dot(s2, p_ref[...], preferred_element_type=jnp.float32)

        scale = jax.lax.rsqrt(var_c + eps) * gamma_ref[...]      # (1, Cp)
        shift = beta_ref[...] - mean_c * scale                   # (1, Cp)

        @pl.loop(0, nch)
        def _(i):
            r0 = pl.multiple_of(i * CH, CH)
            h0 = pl.multiple_of(i * hc, hc)
            y = acc_ref[pl.ds(r0, CH), :]
            o_ref[b, pl.ds(h0, hc), :, :] = (
                (y * scale + shift).reshape(hc, W, Cp).astype(o_ref.dtype))


def conv_gn(x, conv_w, conv_b, gamma, beta, *, gn_groups=8, eps=1e-5,
            compute_dtype=jnp.bfloat16):
    """ConvGN forward: GroupNorm(gn_groups)(Conv2d(x) + bias).

    x: (N, Cin, H, W) NCHW (PyTorch layout), conv_w: (Cout, Cin, k, k),
    conv_b / gamma / beta: (Cout,).  Returns (N, Cout, H, W) in x.dtype.
    """
    N, Cin, H, W = x.shape
    Cout, Cin_w, k, k2 = conv_w.shape
    assert Cin_w == Cin and k == k2 and k % 2 == 1
    assert Cout % gn_groups == 0
    assert W % _SUBLANE == 0, "W must be a multiple of 8 (relayout-free reshapes)"
    pad = k // 2
    gsize = Cout // gn_groups
    out_dtype = x.dtype

    cin_pl = -(-Cin // _LANE) * _LANE       # per-tap lane-aligned block width
    cout_p = -(-Cout // _LANE) * _LANE      # lane-dense output channels
    cpad = cout_p - Cout

    # ---- glue: NCHW -> NHWC, channel padding, fused-tap weight layout --------
    x_nhwc = jnp.transpose(x, (0, 2, 3, 1)).astype(compute_dtype)
    if cin_pl != Cin:
        x_nhwc = jnp.pad(x_nhwc, ((0, 0), (0, 0), (0, 0), (0, cin_pl - Cin)))

    # (Cout, Cin, k, k) -> (k_di, k_dj * cin_pl, cout_p): one wide-K weight block
    # per kernel row, dj-major / cin-minor to match the lane-concatenated scratch.
    wk = jnp.transpose(conv_w, (2, 3, 1, 0))                  # (k, k, Cin, Cout)
    wk = jnp.pad(wk, ((0, 0), (0, 0), (0, cin_pl - Cin), (0, cpad)))
    wk = wk.reshape(k, k * cin_pl, cout_p).astype(compute_dtype)

    def _pad_c(v):
        return jnp.pad(v.astype(jnp.float32).reshape(1, Cout), ((0, 0), (0, cpad)))

    bias2, gamma2, beta2 = _pad_c(conv_b), _pad_c(gamma), _pad_c(beta)

    # Group-mixing matrix: P[c, c'] = 1/(|group| * H * W) if c, c' share a group.
    # Padded channels go to a phantom group (their weights/bias/gamma/beta are
    # zero) so they never pollute real-group statistics.
    n_groups = gn_groups + (1 if cpad else 0)
    ch = np.arange(cout_p)
    gid = np.where(ch < Cout, ch // gsize, gn_groups)
    member = (gid[:, None] == np.arange(n_groups)[None, :]).astype(np.float32)
    counts = np.maximum(member.sum(axis=0), 1.0) * (H * W)
    p_mat = jnp.asarray((member / counts[None, :]) @ member.T, dtype=jnp.float32)

    # ---- per-grid-step batching + GN epilogue chunk size ----------------------
    in_item = np.dtype(compute_dtype).itemsize
    out_item = np.dtype(out_dtype).itemsize
    per_sample_io = H * W * (cin_pl * in_item + cout_p * out_item)
    bt = 1
    for cand in range(1, min(N, 4) + 1):        # small feature maps: batch samples
        if N % cand == 0 and cand * per_sample_io <= 2 * 1024 * 1024:
            bt = cand

    hc = 1                                      # epilogue rows per chunk (~<=64 KiB)
    for cand in range(H, 0, -1):
        if H % cand == 0 and cand * W * cout_p * 4 <= 64 * 1024:
            hc = cand
            break

    # ---- VMEM budget ----------------------------------------------------------
    vmem_est = (2 * bt * H * W * cin_pl * in_item       # input block (dbl buffered)
                + 2 * bt * H * W * cout_p * out_item    # output block (dbl buffered)
                + k * k * cin_pl * cout_p * in_item     # weights (single buffered)
                + (3 + cout_p) * cout_p * 4             # bias/gamma/beta + P
                + H * W * k * cin_pl * in_item          # lane-concat shifted input
                + H * W * cout_p * 4)                   # f32 conv accumulator
    try:
        vmem_cap = int(pltpu.get_tpu_info().vmem_capacity_bytes)
    except Exception:
        vmem_cap = 64 * 1024 * 1024                     # conservative (v7x)
    vmem_limit = int(min(0.85 * vmem_cap, max(48 * 1024 * 1024, 1.5 * vmem_est)))
    # TODO(synk): for feature maps too large for one resident slab (v7x has only
    # 64 MiB physical VMEM), add an H-tile grid axis with per-tile GN partial
    # sums and a second normalize pass.
    assert vmem_est < vmem_limit, f"block too large for VMEM: {vmem_est}"

    def _const_spec(shape):
        nd = len(shape)
        return pl.BlockSpec(shape, lambda b: (0,) * nd,
                            pipeline_mode=pl.Buffered(1))

    kernel = functools.partial(_conv_gn_kernel, k=k, pad=pad, eps=eps, hc=hc)
    out_nhwc = pl.pallas_call(
        kernel,
        out_shape=jax.ShapeDtypeStruct((N, H, W, cout_p), out_dtype),
        grid=(N // bt,),
        in_specs=[
            pl.BlockSpec((bt, H, W, cin_pl), lambda b: (b, 0, 0, 0)),
            _const_spec((k, k * cin_pl, cout_p)),
            _const_spec((1, cout_p)),
            _const_spec((1, cout_p)),
            _const_spec((1, cout_p)),
            _const_spec((cout_p, cout_p)),
        ],
        out_specs=pl.BlockSpec((bt, H, W, cout_p), lambda b: (b, 0, 0, 0)),
        scratch_shapes=[
            pltpu.VMEM((H * W, k * cin_pl), compute_dtype),  # lane-concat shifts
            pltpu.VMEM((H * W, cout_p), jnp.float32),        # conv accumulator
        ],
        compiler_params=pltpu.CompilerParams(
            dimension_semantics=("parallel",),
            vmem_limit_bytes=vmem_limit,
        ),
    )(x_nhwc, wk, bias2, gamma2, beta2, p_mat)

    # glue back: drop channel padding, NHWC -> NCHW
    return jnp.transpose(out_nhwc[..., :Cout], (0, 3, 1, 2))


def _conv_gn_reference(x, conv_w, conv_b, gamma, beta, gn_groups, eps=1e-5):
    y = jax.lax.conv_general_dilated(
        x, conv_w, window_strides=(1, 1), padding="SAME",
        dimension_numbers=("NCHW", "OIHW", "NCHW"),
        precision=jax.lax.Precision.HIGHEST)
    y = y + conv_b.reshape(1, -1, 1, 1)
    n, c, h, w = y.shape
    yg = y.reshape(n, gn_groups, -1)
    mu = jnp.mean(yg, axis=2, keepdims=True)
    var = jnp.mean((yg - mu) ** 2, axis=2, keepdims=True)
    yn = ((yg - mu) * jax.lax.rsqrt(var + eps)).reshape(n, c, h, w)
    return yn * gamma.reshape(1, -1, 1, 1) + beta.reshape(1, -1, 1, 1)


if __name__ == "__main__":
    N, CIN, COUT, H, W, K = 2, 32, 64, 16, 16, 3
    GROUPS = 8     # nn.GroupNorm default in ConvGN

    key = jax.random.PRNGKey(0)
    kx, kw, kb, kg, kbt = jax.random.split(key, 5)
    x = jax.random.normal(kx, (N, CIN, H, W), dtype=jnp.float32)
    conv_w = 0.05 * jax.random.normal(kw, (COUT, CIN, K, K), dtype=jnp.float32)
    conv_b = 0.1 * jax.random.normal(kb, (COUT,), dtype=jnp.float32)
    gamma = 1.0 + 0.1 * jax.random.normal(kg, (COUT,), dtype=jnp.float32)
    beta = 0.1 * jax.random.normal(kbt, (COUT,), dtype=jnp.float32)

    ref = jax.block_until_ready(
        _conv_gn_reference(x, conv_w, conv_b, gamma, beta, GROUPS))

    # Default path: bf16 conv operands with f32 accumulation / GroupNorm.
    fn_bf16 = jax.jit(functools.partial(conv_gn, gn_groups=GROUPS))
    out_bf16 = jax.block_until_ready(fn_bf16(x, conv_w, conv_b, gamma, beta))
    assert out_bf16.shape == (N, COUT, H, W)
    err_bf16 = float(jnp.max(jnp.abs(out_bf16 - ref)))
    assert err_bf16 < 5e-2, f"bf16 path mismatch vs reference: {err_bf16}"

    # Full-f32 path (same kernel, tighter tolerance).
    fn_f32 = jax.jit(functools.partial(conv_gn, gn_groups=GROUPS,
                                       compute_dtype=jnp.float32))
    out_f32 = jax.block_until_ready(fn_f32(x, conv_w, conv_b, gamma, beta))
    err_f32 = float(jnp.max(jnp.abs(out_f32 - ref)))
    assert err_f32 < 1e-2, f"f32 path mismatch vs reference: {err_f32}"

    print("KERNEL_OK")
</pallas_src>

<mosaic_0001>
module attributes {stable_mosaic.version = 11 : i64} {
  func.func @_conv_gn_kernel(%arg0: i32, %arg1: memref<2x16x16x128xbf16, #tpu.memory_space<vmem>>, %arg2: memref<3x384x128xbf16, #tpu.memory_space<vmem>>, %arg3: memref<1x128xf32, #tpu.memory_space<vmem>>, %arg4: memref<1x128xf32, #tpu.memory_space<vmem>>, %arg5: memref<1x128xf32, #tpu.memory_space<vmem>>, %arg6: memref<128x128xf32, #tpu.memory_space<vmem>>, %arg7: memref<2x16x16x128xf32, #tpu.memory_space<vmem>>, %arg8: memref<256x384xbf16, #tpu.memory_space<vmem>>, %arg9: memref<256x128xf32, #tpu.memory_space<vmem>>) attributes {dimension_semantics = [#tpu.dimension_semantics<parallel>], iteration_bounds = array<i64: 1>, scalar_prefetch = 0 : i64, scratch_operands = 2 : i64, tpu.core_type = #tpu.core_type<tc>, window_params = [{transform_indices = @transform_0, window_bounds = array<i64: 2, 16, 16, 128>}, {pipeline_mode = #tpu.pipeline_mode<synchronous>, transform_indices = @transform_1, window_bounds = array<i64: 3, 384, 128>}, {pipeline_mode = #tpu.pipeline_mode<synchronous>, transform_indices = @transform_2, window_bounds = array<i64: 1, 128>}, {pipeline_mode = #tpu.pipeline_mode<synchronous>, transform_indices = @transform_3, window_bounds = array<i64: 1, 128>}, {pipeline_mode = #tpu.pipeline_mode<synchronous>, transform_indices = @transform_4, window_bounds = array<i64: 1, 128>}, {pipeline_mode = #tpu.pipeline_mode<synchronous>, transform_indices = @transform_5, window_bounds = array<i64: 128, 128>}, {transform_indices = @transform_6, window_bounds = array<i64: 2, 16, 16, 128>}]} {
    %0 = tpu.iota {dimensions = array<i32: 0>} : vector<256x1xi32>
    %c16_i32 = arith.constant 16 : i32
    %c0_i32 = arith.constant 0 : i32
    %1 = arith.cmpi eq, %c16_i32, %c0_i32 : i32
    %c1_i32 = arith.constant 1 : i32
    %2 = arith.select %1, %c1_i32, %c16_i32 : i32
    %3 = vector.broadcast %2 : i32 to vector<256x1xi32>
    %4 = arith.remsi %0, %3 : vector<256x1xi32>
    %c0_i32_0 = arith.constant 0 : i32
    %5 = vector.broadcast %c0_i32_0 : i32 to vector<256x1xi32>
    %6 = arith.cmpi ne, %4, %5 : vector<256x1xi32>
    %c0_i32_1 = arith.constant 0 : i32
    %7 = vector.broadcast %c0_i32_1 : i32 to vector<256x1xi32>
    %8 = arith.cmpi slt, %4, %7 : vector<256x1xi32>
    %c0_i32_2 = arith.constant 0 : i32
    %9 = arith.cmpi slt, %2, %c0_i32_2 : i32
    %10 = vector.broadcast %9 : i1 to vector<256x1xi1>
    %11 = vector.broadcast %10 : vector<256x1xi1> to vector<256x1xi1>
    %12 = arith.xori %8, %11 : vector<256x1xi1>
    %13 = arith.andi %12, %6 : vector<256x1xi1>
    %14 = vector.broadcast %2 : i32 to vector<256x1xi32>
    %15 = arith.addi %4, %14 : vector<256x1xi32>
    %16 = arith.select %13, %15, %4 : vector<256x1xi1>, vector<256x1xi32>
    %c0 = arith.constant 0 : index
    %c0_3 = arith.constant 0 : index
    %c0_4 = arith.constant 0 : index
    %c0_5 = arith.constant 0 : index
    %17 = vector.load %arg1[%c0, %c0_3, %c0_4, %c0_5] : memref<2x16x16x128xbf16, #tpu.memory_space<vmem>>, vector<1x16x16x128xbf16>
    %18 = vector.shape_cast %17 : vector<1x16x16x128xbf16> to vector<16x16x128xbf16>
    %19 = vector.shape_cast %18 : vector<16x16x128xbf16> to vector<256x128xbf16>
    %20 = arith.extf %19 : vector<256x128xbf16> to vector<256x128xf32>
    %c1_i32_6 = arith.constant 1 : i32
    %21 = tpu.dynamic_rotate %20 by %c1_i32_6 dim 0 : vector<256x128xf32>, i32 -> vector<256x128xf32>
    %c-1_i32 = arith.constant -1 : i32
    %22 = vector.broadcast %c-1_i32 : i32 to vector<256x1xi32>
    %23 = arith.addi %16, %22 : vector<256x1xi32>
    %c0_i32_7 = arith.constant 0 : i32
    %24 = vector.broadcast %c0_i32_7 : i32 to vector<256x1xi32>
    %25 = arith.cmpi sge, %23, %24 : vector<256x1xi32>
    %c-1_i32_8 = arith.constant -1 : i32
    %26 = vector.broadcast %c-1_i32_8 : i32 to vector<256x1xi32>
    %27 = arith.addi %16, %26 : vector<256x1xi32>
    %c16_i32_9 = arith.constant 16 : i32
    %28 = vector.broadcast %c16_i32_9 : i32 to vector<256x1xi32>
    %29 = arith.cmpi slt, %27, %28 : vector<256x1xi32>
    %30 = arith.andi %25, %29 : vector<256x1xi1>
    %cst = arith.constant 0.000000e+00 : f32
    %31 = vector.shape_cast %30 : vector<256x1xi1> to vector<256x1xi1>
    %32 = vector.broadcast %31 : vector<256x1xi1> to vector<256x128xi1>
    %33 = vector.broadcast %cst : f32 to vector<256x128xf32>
    %34 = arith.select %32, %21, %33 : vector<256x128xi1>, vector<256x128xf32>
    %35 = arith.truncf %34 : vector<256x128xf32> to vector<256x128xbf16>
    %c0_10 = arith.constant 0 : index
    %c0_11 = arith.constant 0 : index
    %36 = vector.load %arg8[%c0_10, %c0_11] : memref<256x384xbf16, #tpu.memory_space<vmem>>, vector<256x128xbf16>
    tpu.vector_store %arg8[%c0_10, %c0_11], %35 {strides = array<i32>} : memref<256x384xbf16, #tpu.memory_space<vmem>>, vector<256x128xbf16>,
    %c0_12 = arith.constant 0 : index
    %c128 = arith.constant 128 : index
    %37 = vector.load %arg8[%c0_12, %c128] : memref<256x384xbf16, #tpu.memory_space<vmem>>, vector<256x128xbf16>
    tpu.vector_store %arg8[%c0_12, %c128], %19 {strides = array<i32>} : memref<256x384xbf16, #tpu.memory_space<vmem>>, vector<256x128xbf16>,
    %c255_i32 = arith.constant 255 : i32
    %38 = tpu.dynamic_rotate %20 by %c255_i32 dim 0 : vector<256x128xf32>, i32 -> vector<256x128xf32>
    %c1_i32_13 = arith.constant 1 : i32
    %39 = vector.broadcast %c1_i32_13 : i32 to vector<256x1xi32>
    %40 = arith.addi %16, %39 : vector<256x1xi32>
    %c0_i32_14 = arith.constant 0 : i32
    %41 = vector.broadcast %c0_i32_14 : i32 to vector<256x1xi32>
    %42 = arith.cmpi sge, %40, %41 : vector<256x1xi32>
    %c1_i32_15 = arith.constant 1 : i32
    %43 = vector.broadcast %c1_i32_15 : i32 to vector<256x1xi32>
    %44 = arith.addi %16, %43 : vector<256x1xi32>
    %c16_i32_16 = arith.constant 16 : i32
    %45 = vector.broadcast %c16_i32_16 : i32 to vector<256x1xi32>
    %46 = arith.cmpi slt, %44, %45 : vector<256x1xi32>
    %47 = arith.andi %42, %46 : vector<256x1xi1>
    %cst_17 = arith.constant 0.000000e+00 : f32
    %48 = vector.shape_cast %47 : vector<256x1xi1> to vector<256x1xi1>
    %49 = vector.broadcast %48 : vector<256x1xi1> to vector<256x128xi1>
    %50 = vector.broadcast %cst_17 : f32 to vector<256x128xf32>
    %51 = arith.select %49, %38, %50 : vector<256x128xi1>, vector<256x128xf32>
    %52 = arith.truncf %51 : vector<256x128xf32> to vector<256x128xbf16>
    %c0_18 = arith.constant 0 : index
    %c256 = arith.constant 256 : index
    %53 = vector.load %arg8[%c0_18, %c256] : memref<256x384xbf16, #tpu.memory_space<vmem>>, vector<256x128xbf16>
    tpu.vector_store %arg8[%c0_18, %c256], %52 {strides = array<i32>} : memref<256x384xbf16, #tpu.memory_space<vmem>>, vector<256x128xbf16>,
    %c0_19 = arith.constant 0 : index
    %c0_20 = arith.constant 0 : index
    %54 = vector.load %arg3[%c0_19, %c0_20] : memref<1x128xf32, #tpu.memory_space<vmem>>, vector<1x128xf32>
    %55 = vector.shape_cast %54 : vector<1x128xf32> to vector<1x128xf32>
    %56 = vector.broadcast %55 : vector<1x128xf32> to vector<256x128xf32>
    %c0_21 = arith.constant 0 : index
    %c0_22 = arith.constant 0 : index
    %57 = vector.load %arg9[%c0_21, %c0_22] : memref<256x128xf32, #tpu.memory_space<vmem>>, vector<256x128xf32>
    tpu.vector_store %arg9[%c0_21, %c0_22], %56 {strides = array<i32>} : memref<256x128xf32, #tpu.memory_space<vmem>>, vector<256x128xf32>,
    %c0_23 = arith.constant 0 : index
    %c0_24 = arith.constant 0 : index
    %58 = vector.load %arg8[%c0_23, %c0_24] : memref<256x384xbf16, #tpu.memory_space<vmem>>, vector<240x384xbf16>
    %c0_25 = arith.constant 0 : index
    %c0_26 = arith.constant 0 : index
    %c0_27 = arith.constant 0 : index
    %59 = vector.load %arg2[%c0_25, %c0_26, %c0_27] : memref<3x384x128xbf16, #tpu.memory_space<vmem>>, vector<1x384x128xbf16>
    %60 = vector.shape_cast %59 : vector<1x384x128xbf16> to vector<384x128xbf16>
    %cst_28 = arith.constant dense<0.000000e+00> : vector<240x128xf32>
    %61 = tpu.matmul %58, %60, %cst_28 {dimension_numbers = #tpu.dot_dimension_numbers<[1], [0], [0], [1], [0, 0, 1, 1], [], []>} : vector<240x384xbf16>, vector<384x128xbf16>, vector<240x128xf32> -> vector<240x128xf32>
    %c16 = arith.constant 16 : index
    %c0_29 = arith.constant 0 : index
    %62 = vector.load %arg9[%c16, %c0_29] : memref<256x128xf32, #tpu.memory_space<vmem>>, vector<240x128xf32>
    %63 = arith.addf %62, %61 : vector<240x128xf32>
    %c16_30 = arith.constant 16 : index
    %c0_31 = arith.constant 0 : index
    %64 = vector.load %arg9[%c16_30, %c0_31] : memref<256x128xf32, #tpu.memory_space<vmem>>, vector<240x128xf32>
    tpu.vector_store %arg9[%c16_30, %c0_31], %63 {strides = array<i32>} : memref<256x128xf32, #tpu.memory_space<vmem>>, vector<240x128xf32>,
    %c0_32 = arith.constant 0 : index
    %c0_33 = arith.constant 0 : index
    %65 = vector.load %arg8[%c0_32, %c0_33] : memref<256x384xbf16, #tpu.memory_space<vmem>>, vector<256x384xbf16>
    %c1 = arith.constant 1 : index
    %c0_34 = arith.constant 0 : index
    %c0_35 = arith.constant 0 : index
    %66 = vector.load %arg2[%c1, %c0_34, %c0_35] : memref<3x384x128xbf16, #tpu.memory_space<vmem>>, vector<1x384x128xbf16>
    %67 = vector.shape_cast %66 : vector<1x384x128xbf16> to vector<384x128xbf16>
    %cst_36 = arith.constant dense<0.000000e+00> : vector<256x128xf32>
    %68 = tpu.matmul %65, %67, %cst_36 {dimension_numbers = #tpu.dot_dimension_numbers<[1], [0], [0], [1], [0, 0, 1, 1], [], []>} : vector<256x384xbf16>, vector<384x128xbf16>, vector<256x128xf32> -> vector<256x128xf32>
    %c0_37 = arith.constant 0 : index
    %c0_38 = arith.constant 0 : index
    %69 = vector.load %arg9[%c0_37, %c0_38] : memref<256x128xf32, #tpu.memory_space<vmem>>, vector<256x128xf32>
    %70 = arith.addf %69, %68 : vector<256x128xf32>
    %c0_39 = arith.constant 0 : index
    %c0_40 = arith.constant 0 : index
    %71 = vector.load %arg9[%c0_39, %c0_40] : memref<256x128xf32, #tpu.memory_space<vmem>>, vector<256x128xf32>
    tpu.vector_store %arg9[%c0_39, %c0_40], %70 {strides = array<i32>} : memref<256x128xf32, #tpu.memory_space<vmem>>, vector<256x128xf32>,
    %c16_41 = arith.constant 16 : index
    %c0_42 = arith.constant 0 : index
    %72 = vector.load %arg8[%c16_41, %c0_42] : memref<256x384xbf16, #tpu.memory_space<vmem>>, vector<240x384xbf16>
    %c2 = arith.constant 2 : index
    %c0_43 = arith.constant 0 : index
    %c0_44 = arith.constant 0 : index
    %73 = vector.load %arg2[%c2, %c0_43, %c0_44] : memref<3x384x128xbf16, #tpu.memory_space<vmem>>, vector<1x384x128xbf16>
    %74 = vector.shape_cast %73 : vector<1x384x128xbf16> to vector<384x128xbf16>
    %cst_45 = arith.constant dense<0.000000e+00> : vector<240x128xf32>
    %75 = tpu.matmul %72, %74, %cst_45 {dimension_numbers = #tpu.dot_dimension_numbers<[1], [0], [0], [1], [0, 0, 1, 1], [], []>} : vector<240x384xbf16>, vector<384x128xbf16>, vector<240x128xf32> -> vector<240x128xf32>
    %c0_46 = arith.constant 0 : index
    %c0_47 = arith.constant 0 : index
    %76 = vector.load %arg9[%c0_46, %c0_47] : memref<256x128xf32, #tpu.memory_space<vmem>>, vector<240x128xf32>
    %77 = arith.addf %76, %75 : vector<240x128xf32>
    %c0_48 = arith.constant 0 : index
    %c0_49 = arith.constant 0 : index
    %78 = vector.load %arg9[%c0_48, %c0_49] : memref<256x128xf32, #tpu.memory_space<vmem>>, vector<240x128xf32>
    tpu.vector_store %arg9[%c0_48, %c0_49], %77 {strides = array<i32>} : memref<256x128xf32, #tpu.memory_space<vmem>>, vector<240x128xf32>,
    %cst_50 = arith.constant 0.000000e+00 : f32
    %79 = vector.broadcast %cst_50 : f32 to vector<1x128xf32>
    %c0_i32_51 = arith.constant 0 : i32
    %c2_i32 = arith.constant 2 : i32
    %80 = arith.addi %c0_i32_51, %c2_i32 : i32
    %c1_i32_52 = arith.constant 1 : i32
    %81 = scf.for %arg10 = %c0_i32_51 to %80 step %c1_i32_52 iter_args(%arg11 = %79) -> (vector<1x128xf32>)  : i32 {
      %c128_i32 = arith.constant 128 : i32
      %179 = arith.muli %arg10, %c128_i32 : i32
      %180 = tpu.assume_multiple %179, 128 : i32
      %181 = arith.index_cast %180 : i32 to index
      %c0_155 = arith.constant 0 : index
      %182 = vector.load %arg9[%181, %c0_155] : memref<256x128xf32, #tpu.memory_space<vmem>>, vector<128x128xf32>
      %cst_156 = arith.constant dense<0.000000e+00> : vector<128xf32>
      %183 = vector.multi_reduction <add>, %182, %cst_156 [0] : vector<128x128xf32> to vector<128xf32>
      %184 = vector.shape_cast %183 : vector<128xf32> to vector<1x128xf32>
      %185 = arith.addf %arg11, %184 : vector<1x128xf32>
      scf.yield %185 : vector<1x128xf32>
    }
    %c2_i32_53 = arith.constant 2 : i32
    %c0_54 = arith.constant 0 : index
    %c0_55 = arith.constant 0 : index
    %82 = vector.load %arg6[%c0_54, %c0_55] : memref<128x128xf32, #tpu.memory_space<vmem>>, vector<128x128xf32>
    %cst_56 = arith.constant dense<0.000000e+00> : vector<1x128xf32>
    %83 = tpu.matmul %81, %82, %cst_56 {dimension_numbers = #tpu.dot_dimension_numbers<[1], [0], [0], [1], [0, 0, 1, 1], [], []>} : vector<1x128xf32>, vector<128x128xf32>, vector<1x128xf32> -> vector<1x128xf32>
    %cst_57 = arith.constant 0.000000e+00 : f32
    %84 = vector.broadcast %cst_57 : f32 to vector<1x128xf32>
    %c0_i32_58 = arith.constant 0 : i32
    %c2_i32_59 = arith.constant 2 : i32
    %85 = arith.addi %c0_i32_58, %c2_i32_59 : i32
    %c1_i32_60 = arith.constant 1 : i32
    %86 = scf.for %arg10 = %c0_i32_58 to %85 step %c1_i32_60 iter_args(%arg11 = %84) -> (vector<1x128xf32>)  : i32 {
      %c128_i32 = arith.constant 128 : i32
      %179 = arith.muli %arg10, %c128_i32 : i32
      %180 = tpu.assume_multiple %179, 128 : i32
      %181 = arith.index_cast %180 : i32 to index
      %c0_155 = arith.constant 0 : index
      %182 = vector.load %arg9[%181, %c0_155] : memref<256x128xf32, #tpu.memory_space<vmem>>, vector<128x128xf32>
      %183 = vector.broadcast %83 : vector<1x128xf32> to vector<128x128xf32>
      %184 = arith.subf %182, %183 : vector<128x128xf32>
      %185 = arith.mulf %184, %184 : vector<128x128xf32>
      %cst_156 = arith.constant dense<0.000000e+00> : vector<128xf32>
      %186 = vector.multi_reduction <add>, %185, %cst_156 [0] : vector<128x128xf32> to vector<128xf32>
      %187 = vector.shape_cast %186 : vector<128xf32> to vector<1x128xf32>
      %188 = arith.addf %arg11, %187 : vector<1x128xf32>
      scf.yield %188 : vector<1x128xf32>
    }
    %c2_i32_61 = arith.constant 2 : i32
    %c0_62 = arith.constant 0 : index
    %c0_63 = arith.constant 0 : index
    %87 = vector.load %arg6[%c0_62, %c0_63] : memref<128x128xf32, #tpu.memory_space<vmem>>, vector<128x128xf32>
    %cst_64 = arith.constant dense<0.000000e+00> : vector<1x128xf32>
    %88 = tpu.matmul %86, %87, %cst_64 {dimension_numbers = #tpu.dot_dimension_numbers<[1], [0], [0], [1], [0, 0, 1, 1], [], []>} : vector<1x128xf32>, vector<128x128xf32>, vector<1x128xf32> -> vector<1x128xf32>
    %cst_65 = arith.constant 9.99999974E-6 : f32
    %89 = vector.broadcast %cst_65 : f32 to vector<1x128xf32>
    %90 = arith.addf %88, %89 : vector<1x128xf32>
    %91 = math.rsqrt %90 : vector<1x128xf32>
    %c0_66 = arith.constant 0 : index
    %c0_67 = arith.constant 0 : index
    %92 = vector.load %arg4[%c0_66, %c0_67] : memref<1x128xf32, #tpu.memory_space<vmem>>, vector<1x128xf32>
    %93 = arith.mulf %91, %92 : vector<1x128xf32>
    %c0_68 = arith.constant 0 : index
    %c0_69 = arith.constant 0 : index
    %94 = vector.load %arg5[%c0_68, %c0_69] : memref<1x128xf32, #tpu.memory_space<vmem>>, vector<1x128xf32>
    %95 = arith.mulf %83, %93 : vector<1x128xf32>
    %96 = arith.subf %94, %95 : vector<1x128xf32>
    %c0_i32_70 = arith.constant 0 : i32
    %c2_i32_71 = arith.constant 2 : i32
    %97 = arith.addi %c0_i32_70, %c2_i32_71 : i32
    %c1_i32_72 = arith.constant 1 : i32
    scf.for %arg10 = %c0_i32_70 to %97 step %c1_i32_72  : i32 {
      %c1_i32_155 = arith.constant 1 : i32
      %179 = arith.muli %arg10, %c1_i32_155 : i32
      %c0_i32_156 = arith.constant 0 : i32
      %180 = arith.addi %c0_i32_156, %179 : i32
      %c128_i32 = arith.constant 128 : i32
      %181 = arith.muli %180, %c128_i32 : i32
      %182 = tpu.assume_multiple %181, 128 : i32
      %c8_i32 = arith.constant 8 : i32
      %183 = arith.muli %180, %c8_i32 : i32
      %184 = tpu.assume_multiple %183, 8 : i32
      %185 = arith.index_cast %182 : i32 to index
      %c0_157 = arith.constant 0 : index
      %186 = vector.load %arg9[%185, %c0_157] : memref<256x128xf32, #tpu.memory_space<vmem>>, vector<128x128xf32>
      %187 = vector.broadcast %93 : vector<1x128xf32> to vector<128x128xf32>
      %188 = arith.mulf %186, %187 : vector<128x128xf32>
      %189 = vector.broadcast %96 : vector<1x128xf32> to vector<128x128xf32>
      %190 = arith.addf %188, %189 : vector<128x128xf32>
      %191 = vector.shape_cast %190 : vector<128x128xf32> to vector<8x16x128xf32>
      %c0_158 = arith.constant 0 : index
      %192 = arith.index_cast %184 : i32 to index
      %c0_159 = arith.constant 0 : index
      %c0_160 = arith.constant 0 : index
      %193 = vector.load %arg7[%c0_158, %192, %c0_159, %c0_160] : memref<2x16x16x128xf32, #tpu.memory_space<vmem>>, vector<1x8x16x128xf32>
      %194 = vector.shape_cast %193 : vector<1x8x16x128xf32> to vector<8x16x128xf32>
      %195 = vector.shape_cast %191 : vector<8x16x128xf32> to vector<1x8x16x128xf32>
      tpu.vector_store %arg7[%c0_158, %192, %c0_159, %c0_160], %195 {strides = array<i32>} : memref<2x16x16x128xf32, #tpu.memory_space<vmem>>, vector<1x8x16x128xf32>,
    }
    %c2_i32_73 = arith.constant 2 : i32
    %c1_74 = arith.constant 1 : index
    %c0_75 = arith.constant 0 : index
    %c0_76 = arith.constant 0 : index
    %c0_77 = arith.constant 0 : index
    %98 = vector.load %arg1[%c1_74, %c0_75, %c0_76, %c0_77] : memref<2x16x16x128xbf16, #tpu.memory_space<vmem>>, vector<1x16x16x128xbf16>
    %99 = vector.shape_cast %98 : vector<1x16x16x128xbf16> to vector<16x16x128xbf16>
    %100 = vector.shape_cast %99 : vector<16x16x128xbf16> to vector<256x128xbf16>
    %101 = arith.extf %100 : vector<256x128xbf16> to vector<256x128xf32>
    %c1_i32_78 = arith.constant 1 : i32
    %102 = tpu.dynamic_rotate %101 by %c1_i32_78 dim 0 : vector<256x128xf32>, i32 -> vector<256x128xf32>
    %c-1_i32_79 = arith.constant -1 : i32
    %103 = vector.broadcast %c-1_i32_79 : i32 to vector<256x1xi32>
    %104 = arith.addi %16, %103 : vector<256x1xi32>
    %c0_i32_80 = arith.constant 0 : i32
    %105 = vector.broadcast %c0_i32_80 : i32 to vector<256x1xi32>
    %106 = arith.cmpi sge, %104, %105 : vector<256x1xi32>
    %c-1_i32_81 = arith.constant -1 : i32
    %107 = vector.broadcast %c-1_i32_81 : i32 to vector<256x1xi32>
    %108 = arith.addi %16, %107 : vector<256x1xi32>
    %c16_i32_82 = arith.constant 16 : i32
    %109 = vector.broadcast %c16_i32_82 : i32 to vector<256x1xi32>
    %110 = arith.cmpi slt, %108, %109 : vector<256x1xi32>
    %111 = arith.andi %106, %110 : vector<256x1xi1>
    %cst_83 = arith.constant 0.000000e+00 : f32
    %112 = vector.shape_cast %111 : vector<256x1xi1> to vector<256x1xi1>
    %113 = vector.broadcast %112 : vector<256x1xi1> to vector<256x128xi1>
    %114 = vector.broadcast %cst_83 : f32 to vector<256x128xf32>
    %115 = arith.select %113, %102, %114 : vector<256x128xi1>, vector<256x128xf32>
    %116 = arith.truncf %115 : vector<256x128xf32> to vector<256x128xbf16>
    %c0_84 = arith.constant 0 : index
    %c0_85 = arith.constant 0 : index
    %117 = vector.load %arg8[%c0_84, %c0_85] : memref<256x384xbf16, #tpu.memory_space<vmem>>, vector<256x128xbf16>
    tpu.vector_store %arg8[%c0_84, %c0_85], %116 {strides = array<i32>} : memref<256x384xbf16, #tpu.memory_space<vmem>>, vector<256x128xbf16>,
    %c0_86 = arith.constant 0 : index
    %c128_87 = arith.constant 128 : index
    %118 = vector.load %arg8[%c0_86, %c128_87] : memref<256x384xbf16, #tpu.memory_space<vmem>>, vector<256x128xbf16>
    tpu.vector_store %arg8[%c0_86, %c128_87], %100 {strides = array<i32>} : memref<256x384xbf16, #tpu.memory_space<vmem>>, vector<256x128xbf16>,
    %c255_i32_88 = arith.constant 255 : i32
    %119 = tpu.dynamic_rotate %101 by %c255_i32_88 dim 0 : vector<256x128xf32>, i32 -> vector<256x128xf32>
    %c1_i32_89 = arith.constant 1 : i32
    %120 = vector.broadcast %c1_i32_89 : i32 to vector<256x1xi32>
    %121 = arith.addi %16, %120 : vector<256x1xi32>
    %c0_i32_90 = arith.constant 0 : i32
    %122 = vector.broadcast %c0_i32_90 : i32 to vector<256x1xi32>
    %123 = arith.cmpi sge, %121, %122 : vector<256x1xi32>
    %c1_i32_91 = arith.constant 1 : i32
    %124 = vector.broadcast %c1_i32_91 : i32 to vector<256x1xi32>
    %125 = arith.addi %16, %124 : vector<256x1xi32>
    %c16_i32_92 = arith.constant 16 : i32
    %126 = vector.broadcast %c16_i32_92 : i32 to vector<256x1xi32>
    %127 = arith.cmpi slt, %125, %126 : vector<256x1xi32>
    %128 = arith.andi %123, %127 : vector<256x1xi1>
    %cst_93 = arith.constant 0.000000e+00 : f32
    %129 = vector.shape_cast %128 : vector<256x1xi1> to vector<256x1xi1>
    %130 = vector.broadcast %129 : vector<256x1xi1> to vector<256x128xi1>
    %131 = vector.broadcast %cst_93 : f32 to vector<256x128xf32>
    %132 = arith.select %130, %119, %131 : vector<256x128xi1>, vector<256x128xf32>
    %133 = arith.truncf %132 : vector<256x128xf32> to vector<256x128xbf16>
    %c0_94 = arith.constant 0 : index
    %c256_95 = arith.constant 256 : index
    %134 = vector.load %arg8[%c0_94, %c256_95] : memref<256x384xbf16, #tpu.memory_space<vmem>>, vector<256x128xbf16>
    tpu.vector_store %arg8[%c0_94, %c256_95], %133 {strides = array<i32>} : memref<256x384xbf16, #tpu.memory_space<vmem>>, vector<256x128xbf16>,
    %c0_96 = arith.constant 0 : index
    %c0_97 = arith.constant 0 : index
    %135 = vector.load %arg3[%c0_96, %c0_97] : memref<1x128xf32, #tpu.memory_space<vmem>>, vector<1x128xf32>
    %136 = vector.shape_cast %135 : vector<1x128xf32> to vector<1x128xf32>
    %137 = vector.broadcast %136 : vector<1x128xf32> to vector<256x128xf32>
    %c0_98 = arith.constant 0 : index
    %c0_99 = arith.constant 0 : index
    %138 = vector.load %arg9[%c0_98, %c0_99] : memref<256x128xf32, #tpu.memory_space<vmem>>, vector<256x128xf32>
    tpu.vector_store %arg9[%c0_98, %c0_99], %137 {strides = array<i32>} : memref<256x128xf32, #tpu.memory_space<vmem>>, vector<256x128xf32>,
    %c0_100 = arith.constant 0 : index
    %c0_101 = arith.constant 0 : index
    %139 = vector.load %arg8[%c0_100, %c0_101] : memref<256x384xbf16, #tpu.memory_space<vmem>>, vector<240x384xbf16>
    %c0_102 = arith.constant 0 : index
    %c0_103 = arith.constant 0 : index
    %c0_104 = arith.constant 0 : index
    %140 = vector.load %arg2[%c0_102, %c0_103, %c0_104] : memref<3x384x128xbf16, #tpu.memory_space<vmem>>, vector<1x384x128xbf16>
    %141 = vector.shape_cast %140 : vector<1x384x128xbf16> to vector<384x128xbf16>
    %cst_105 = arith.constant dense<0.000000e+00> : vector<240x128xf32>
    %142 = tpu.matmul %139, %141, %cst_105 {dimension_numbers = #tpu.dot_dimension_numbers<[1], [0], [0], [1], [0, 0, 1, 1], [], []>} : vector<240x384xbf16>, vector<384x128xbf16>, vector<240x128xf32> -> vector<240x128xf32>
    %c16_106 = arith.constant 16 : index
    %c0_107 = arith.constant 0 : index
    %143 = vector.load %arg9[%c16_106, %c0_107] : memref<256x128xf32, #tpu.memory_space<vmem>>, vector<240x128xf32>
    %144 = arith.addf %143, %142 : vector<240x128xf32>
    %c16_108 = arith.constant 16 : index
    %c0_109 = arith.constant 0 : index
    %145 = vector.load %arg9[%c16_108, %c0_109] : memref<256x128xf32, #tpu.memory_space<vmem>>, vector<240x128xf32>
    tpu.vector_store %arg9[%c16_108, %c0_109], %144 {strides = array<i32>} : memref<256x128xf32, #tpu.memory_space<vmem>>, vector<240x128xf32>,
    %c0_110 = arith.constant 0 : index
    %c0_111 = arith.constant 0 : index
    %146 = vector.load %arg8[%c0_110, %c0_111] : memref<256x384xbf16, #tpu.memory_space<vmem>>, vector<256x384xbf16>
    %c1_112 = arith.constant 1 : index
    %c0_113 = arith.constant 0 : index
    %c0_114 = arith.constant 0 : index
    %147 = vector.load %arg2[%c1_112, %c0_113, %c0_114] : memref<3x384x128xbf16, #tpu.memory_space<vmem>>, vector<1x384x128xbf16>
    %148 = vector.shape_cast %147 : vector<1x384x128xbf16> to vector<384x128xbf16>
    %cst_115 = arith.constant dense<0.000000e+00> : vector<256x128xf32>
    %149 = tpu.matmul %146, %148, %cst_115 {dimension_numbers = #tpu.dot_dimension_numbers<[1], [0], [0], [1], [0, 0, 1, 1], [], []>} : vector<256x384xbf16>, vector<384x128xbf16>, vector<256x128xf32> -> vector<256x128xf32>
    %c0_116 = arith.constant 0 : index
    %c0_117 = arith.constant 0 : index
    %150 = vector.load %arg9[%c0_116, %c0_117] : memref<256x128xf32, #tpu.memory_space<vmem>>, vector<256x128xf32>
    %151 = arith.addf %150, %149 : vector<256x128xf32>
    %c0_118 = arith.constant 0 : index
    %c0_119 = arith.constant 0 : index
    %152 = vector.load %arg9[%c0_118, %c0_119] : memref<256x128xf32, #tpu.memory_space<vmem>>, vector<256x128xf32>
    tpu.vector_store %arg9[%c0_118, %c0_119], %151 {strides = array<i32>} : memref<256x128xf32, #tpu.memory_space<vmem>>, vector<256x128xf32>,
    %c16_120 = arith.constant 16 : index
    %c0_121 = arith.constant 0 : index
    %153 = vector.load %arg8[%c16_120, %c0_121] : memref<256x384xbf16, #tpu.memory_space<vmem>>, vector<240x384xbf16>
    %c2_122 = arith.constant 2 : index
    %c0_123 = arith.constant 0 : index
    %c0_124 = arith.constant 0 : index
    %154 = vector.load %arg2[%c2_122, %c0_123, %c0_124] : memref<3x384x128xbf16, #tpu.memory_space<vmem>>, vector<1x384x128xbf16>
    %155 = vector.shape_cast %154 : vector<1x384x128xbf16> to vector<384x128xbf16>
    %cst_125 = arith.constant dense<0.000000e+00> : vector<240x128xf32>
    %156 = tpu.matmul %153, %155, %cst_125 {dimension_numbers = #tpu.dot_dimension_numbers<[1], [0], [0], [1], [0, 0, 1, 1], [], []>} : vector<240x384xbf16>, vector<384x128xbf16>, vector<240x128xf32> -> vector<240x128xf32>
    %c0_126 = arith.constant 0 : index
    %c0_127 = arith.constant 0 : index
    %157 = vector.load %arg9[%c0_126, %c0_127] : memref<256x128xf32, #tpu.memory_space<vmem>>, vector<240x128xf32>
    %158 = arith.addf %157, %156 : vector<240x128xf32>
    %c0_128 = arith.constant 0 : index
    %c0_129 = arith.constant 0 : index
    %159 = vector.load %arg9[%c0_128, %c0_129] : memref<256x128xf32, #tpu.memory_space<vmem>>, vector<240x128xf32>
    tpu.vector_store %arg9[%c0_128, %c0_129], %158 {strides = array<i32>} : memref<256x128xf32, #tpu.memory_space<vmem>>, vector<240x128xf32>,
    %cst_130 = arith.constant 0.000000e+00 : f32
    %160 = vector.broadcast %cst_130 : f32 to vector<1x128xf32>
    %c0_i32_131 = arith.constant 0 : i32
    %c2_i32_132 = arith.constant 2 : i32
    %161 = arith.addi %c0_i32_131, %c2_i32_132 : i32
    %c1_i32_133 = arith.constant 1 : i32
    %162 = scf.for %arg10 = %c0_i32_131 to %161 step %c1_i32_133 iter_args(%arg11 = %160) -> (vector<1x128xf32>)  : i32 {
      %c128_i32 = arith.constant 128 : i32
      %179 = arith.muli %arg10, %c128_i32 : i32
      %180 = tpu.assume_multiple %179, 128 : i32
      %181 = arith.index_cast %180 : i32 to index
      %c0_155 = arith.constant 0 : index
      %182 = vector.load %arg9[%181, %c0_155] : memref<256x128xf32, #tpu.memory_space<vmem>>, vector<128x128xf32>
      %cst_156 = arith.constant dense<0.000000e+00> : vector<128xf32>
      %183 = vector.multi_reduction <add>, %182, %cst_156 [0] : vector<128x128xf32> to vector<128xf32>
      %184 = vector.shape_cast %183 : vector<128xf32> to vector<1x128xf32>
      %185 = arith.addf %arg11, %184 : vector<1x128xf32>
      scf.yield %185 : vector<1x128xf32>
    }
    %c2_i32_134 = arith.constant 2 : i32
    %c0_135 = arith.constant 0 : index
    %c0_136 = arith.constant 0 : index
    %163 = vector.load %arg6[%c0_135, %c0_136] : memref<128x128xf32, #tpu.memory_space<vmem>>, vector<128x128xf32>
    %cst_137 = arith.constant dense<0.000000e+00> : vector<1x128xf32>
    %164 = tpu.matmul %162, %163, %cst_137 {dimension_numbers = #tpu.dot_dimension_numbers<[1], [0], [0], [1], [0, 0, 1, 1], [], []>} : vector<1x128xf32>, vector<128x128xf32>, vector<1x128xf32> -> vector<1x128xf32>
    %cst_138 = arith.constant 0.000000e+00 : f32
    %165 = vector.broadcast %cst_138 : f32 to vector<1x128xf32>
    %c0_i32_139 = arith.constant 0 : i32
    %c2_i32_140 = arith.constant 2 : i32
    %166 = arith.addi %c0_i32_139, %c2_i32_140 : i32
    %c1_i32_141 = arith.constant 1 : i32
    %167 = scf.for %arg10 = %c0_i32_139 to %166 step %c1_i32_141 iter_args(%arg11 = %165) -> (vector<1x128xf32>)  : i32 {
      %c128_i32 = arith.constant 128 : i32
      %179 = arith.muli %arg10, %c128_i32 : i32
      %180 = tpu.assume_multiple %179, 128 : i32
      %181 = arith.index_cast %180 : i32 to index
      %c0_155 = arith.constant 0 : index
      %182 = vector.load %arg9[%181, %c0_155] : memref<256x128xf32, #tpu.memory_space<vmem>>, vector<128x128xf32>
      %183 = vector.broadcast %164 : vector<1x128xf32> to vector<128x128xf32>
      %184 = arith.subf %182, %183 : vector<128x128xf32>
      %185 = arith.mulf %184, %184 : vector<128x128xf32>
      %cst_156 = arith.constant dense<0.000000e+00> : vector<128xf32>
      %186 = vector.multi_reduction <add>, %185, %cst_156 [0] : vector<128x128xf32> to vector<128xf32>
      %187 = vector.shape_cast %186 : vector<128xf32> to vector<1x128xf32>
      %188 = arith.addf %arg11, %187 : vector<1x128xf32>
      scf.yield %188 : vector<1x128xf32>
    }
    %c2_i32_142 = arith.constant 2 : i32
    %c0_143 = arith.constant 0 : index
    %c0_144 = arith.constant 0 : index
    %168 = vector.load %arg6[%c0_143, %c0_144] : memref<128x128xf32, #tpu.memory_space<vmem>>, vector<128x128xf32>
    %cst_145 = arith.constant dense<0.000000e+00> : vector<1x128xf32>
    %169 = tpu.matmul %167, %168, %cst_145 {dimension_numbers = #tpu.dot_dimension_numbers<[1], [0], [0], [1], [0, 0, 1, 1], [], []>} : vector<1x128xf32>, vector<128x128xf32>, vector<1x128xf32> -> vector<1x128xf32>
    %cst_146 = arith.constant 9.99999974E-6 : f32
    %170 = vector.broadcast %cst_146 : f32 to vector<1x128xf32>
    %171 = arith.addf %169, %170 : vector<1x128xf32>
    %172 = math.rsqrt %171 : vector<1x128xf32>
    %c0_147 = arith.constant 0 : index
    %c0_148 = arith.constant 0 : index
    %173 = vector.load %arg4[%c0_147, %c0_148] : memref<1x128xf32, #tpu.memory_space<vmem>>, vector<1x128xf32>
    %174 = arith.mulf %172, %173 : vector<1x128xf32>
    %c0_149 = arith.constant 0 : index
    %c0_150 = arith.constant 0 : index
    %175 = vector.load %arg5[%c0_149, %c0_150] : memref<1x128xf32, #tpu.memory_space<vmem>>, vector<1x128xf32>
    %176 = arith.mulf %164, %174 : vector<1x128xf32>
    %177 = arith.subf %175, %176 : vector<1x128xf32>
    %c0_i32_151 = arith.constant 0 : i32
    %c2_i32_152 = arith.constant 2 : i32
    %178 = arith.addi %c0_i32_151, %c2_i32_152 : i32
    %c1_i32_153 = arith.constant 1 : i32
    scf.for %arg10 = %c0_i32_151 to %178 step %c1_i32_153  : i32 {
      %c1_i32_155 = arith.constant 1 : i32
      %179 = arith.muli %arg10, %c1_i32_155 : i32
      %c0_i32_156 = arith.constant 0 : i32
      %180 = arith.addi %c0_i32_156, %179 : i32
      %c128_i32 = arith.constant 128 : i32
      %181 = arith.muli %180, %c128_i32 : i32
      %182 = tpu.assume_multiple %181, 128 : i32
      %c8_i32 = arith.constant 8 : i32
      %183 = arith.muli %180, %c8_i32 : i32
      %184 = tpu.assume_multiple %183, 8 : i32
      %185 = arith.index_cast %182 : i32 to index
      %c0_157 = arith.constant 0 : index
      %186 = vector.load %arg9[%185, %c0_157] : memref<256x128xf32, #tpu.memory_space<vmem>>, vector<128x128xf32>
      %187 = vector.broadcast %174 : vector<1x128xf32> to vector<128x128xf32>
      %188 = arith.mulf %186, %187 : vector<128x128xf32>
      %189 = vector.broadcast %177 : vector<1x128xf32> to vector<128x128xf32>
      %190 = arith.addf %188, %189 : vector<128x128xf32>
      %191 = vector.shape_cast %190 : vector<128x128xf32> to vector<8x16x128xf32>
      %c1_158 = arith.constant 1 : index
      %192 = arith.index_cast %184 : i32 to index
      %c0_159 = arith.constant 0 : index
      %c0_160 = arith.constant 0 : index
      %193 = vector.load %arg7[%c1_158, %192, %c0_159, %c0_160] : memref<2x16x16x128xf32, #tpu.memory_space<vmem>>, vector<1x8x16x128xf32>
      %194 = vector.shape_cast %193 : vector<1x8x16x128xf32> to vector<8x16x128xf32>
      %195 = vector.shape_cast %191 : vector<8x16x128xf32> to vector<1x8x16x128xf32>
      tpu.vector_store %arg7[%c1_158, %192, %c0_159, %c0_160], %195 {strides = array<i32>} : memref<2x16x16x128xf32, #tpu.memory_space<vmem>>, vector<1x8x16x128xf32>,
    }
    %c2_i32_154 = arith.constant 2 : i32
    return
  }
  func.func @transform_0(%arg0: i32) -> (i32, i32, i32, i32) {
    %c0_i32 = arith.constant 0 : i32
    %c0_i32_0 = arith.constant 0 : i32
    %c0_i32_1 = arith.constant 0 : i32
    %c0_i32_2 = arith.constant 0 : i32
    return %arg0, %c0_i32, %c0_i32_0, %c0_i32_1 : i32, i32, i32, i32
  }
  func.func @transform_1(%arg0: i32) -> (i32, i32, i32) {
    %c0_i32 = arith.constant 0 : i32
    %c0_i32_0 = arith.constant 0 : i32
    %c0_i32_1 = arith.constant 0 : i32
    %c0_i32_2 = arith.constant 0 : i32
    return %c0_i32, %c0_i32_0, %c0_i32_1 : i32, i32, i32
  }
  func.func @transform_2(%arg0: i32) -> (i32, i32) {
    %c0_i32 = arith.constant 0 : i32
    %c0_i32_0 = arith.constant 0 : i32
    %c0_i32_1 = arith.constant 0 : i32
    return %c0_i32, %c0_i32_0 : i32, i32
  }
  func.func @transform_3(%arg0: i32) -> (i32, i32) {
    %c0_i32 = arith.constant 0 : i32
    %c0_i32_0 = arith.constant 0 : i32
    %c0_i32_1 = arith.constant 0 : i32
    return %c0_i32, %c0_i32_0 : i32, i32
  }
  func.func @transform_4(%arg0: i32) -> (i32, i32) {
    %c0_i32 = arith.constant 0 : i32
    %c0_i32_0 = arith.constant 0 : i32
    %c0_i32_1 = arith.constant 0 : i32
    return %c0_i32, %c0_i32_0 : i32, i32
  }
  func.func @transform_5(%arg0: i32) -> (i32, i32) {
    %c0_i32 = arith.constant 0 : i32
    %c0_i32_0 = arith.constant 0 : i32
    %c0_i32_1 = arith.constant 0 : i32
    return %c0_i32, %c0_i32_0 : i32, i32
  }
  func.func @transform_6(%arg0: i32) -> (i32, i32, i32, i32) {
    %c0_i32 = arith.constant 0 : i32
    %c0_i32_0 = arith.constant 0 : i32
    %c0_i32_1 = arith.constant 0 : i32
    %c0_i32_2 = arith.constant 0 : i32
    return %arg0, %c0_i32, %c0_i32_0, %c0_i32_1 : i32, i32, i32, i32
  }
}

</mosaic_0001>

<bundles_post_ra>
// kernel: conv_gn.1
= control target key start
LH: loop header
LB: loop body
LE: loop exit
PB: predicated region body
PF: predicated region fallthrough
CT: control target
= control target key end

     0   :  { %v13003_v1 = vmov 0.0   ;;  %vm13025_vm0 = vmmov 0   ;;  %v24_v3 = vlaneseq  ;;  %vm13034_vm8 = vmmov 1   ;;  %s10992_s11 = smov 0   ;;  %s12983_s1 = inlined_call_operand.vmem [shape: bf16[3,384,128], index: 1, kind: input, shape index: {}]   ;;  %s12984_s3 = inlined_call_operand.vmem [shape: f32[1,128], index: 3, kind: input, shape index: {}]   ;;  %s12985_s4 = inlined_call_operand.vmem [shape: f32[1,128], index: 4, kind: input, shape index: {}]   ;;  %s12986_s5 = inlined_call_operand.vmem [shape: f32[128,128], index: 5, kind: input, shape index: {}]   ;;  %s12987_s6 = inlined_call_operand.vmem [shape: f32[2,16,16,128], index: 6, kind: output, shape index: {}]   ;;  %s12988_s0 = inlined_call_operand.vmem [shape: bf16[2,16,16,128], index: 0, kind: input, shape index: {}]   ;;  %s12989_s2 = inlined_call_operand.vmem [shape: f32[1,128], index: 2, kind: input, shape index: {}]  }
   0x1   :  { %v8441_v0 = vld [vmem:[%s12983_s1 + $0x40] sm:$0xff]   ;;  %7722 = vmatprep.subr.bf16.mxu1 %v13003_v1  ;;  %7738 = vmatprep.mubr.msk.bf16.mxu1 %vm13025_vm0, %v13003_v1  ;;  %v8444_v5 = vld [vmem:[%s12983_s1 + $0x48] sm:$0xff]   ;;  %v8447_v9 = vld [vmem:[%s12983_s1 + $0x50] sm:$0xff]  }
   0x2   :  { %v8442_v2 = vld [vmem:[%s12983_s1] sm:$0xff]   ;;  %6866 = vmatprep.subr.bf16.mxu0 %v8441_v0  ;;  %v8445_v6 = vld [vmem:[%s12983_s1 + $0x8] sm:$0xff]   ;;  %v9160_v8 = vshrl.u32 %v24_v3, 7  ;;  %v8448_v10 = vld [vmem:[%s12983_s1 + $0x10] sm:$0xff]  }
   0x3   :  { %v8443_v4 = vld [vmem:[%s12983_s1 + $0x80] sm:$0xff]   ;;  %6867 = vmatpush3.bf16.msra.mxu0 %v8442_v2  ;;  %v8446_v7 = vld [vmem:[%s12983_s1 + $0x88] sm:$0xff]   ;;  %v8449_v11 = vld [vmem:[%s12983_s1 + $0x90] sm:$0xff]  }
   0x4   :  { %7723 = vmatpush3.bf16.msra.mxu1 %v8443_v4  ;;  %6868 = vmatprep.subr.bf16.mxu0 %v8444_v5  ;;  %13208 = vst [vmem:[#allocation4_spill] sm:$0xff] %v9160_v8  ;;  %v8450_v12 = vld [vmem:[%s12983_s1 + $0x58] sm:$0xff]   ;;  %v26_v13 = vadd.s32 8, %v9160_v8  ;;  %v61_v15 = vand.u32 15, %v9160_v8  ;;  %v27_v17 = vadd.s32 16, %v9160_v8  ;;  %v8453_v18 = vld [vmem:[%s12983_s1 + $0x60] sm:$0xff]  }
   0x5   :  { %7724 = vmatprep.subr.bf16.mxu1 %v13003_v1  ;;  %v8451_v14 = vld [vmem:[%s12983_s1 + $0x18] sm:$0xff]   ;;  %v8454_v19 = vld [vmem:[%s12983_s1 + $0x20] sm:$0xff]   ;;  %v28_v22 = vadd.s32 24, %v9160_v8  ;;  %v8456_v25 = vld [vmem:[%s12983_s1 + $0x68] sm:$0xff]   ;;  %vm13028_vm1 = vcmp.lt.s32.totalorder %v9160_v8, 1  ;;  %vm13036_vm2 = vcmp.lt.s32.totalorder %v9160_v8, 7 }
   0x6   :  { %v8452_v16 = vld [vmem:[%s12983_s1 + $0x98] sm:$0xff]   ;;  %v68_v20 = vand.u32 15, %v26_v13  ;;  %v75_v21 = vand.u32 15, %v27_v17  ;;  %v8455_v23 = vld [vmem:[%s12983_s1 + $0xa0] sm:$0xff]   ;;  %v9195_v24 = vadd.s32 4294967295, %v61_v15  ;;  %v8457_v28 = vld [vmem:[%s12983_s1 + $0x28] sm:$0xff]  }
   0x7   :  { %6869 = vmatpush3.bf16.msra.mxu0 %v8445_v6  ;;  %v82_v26 = vand.u32 15, %v28_v22  ;;  %v8458_v30 = vld [vmem:[%s12983_s1 + $0xa8] sm:$0xff]   ;;  %v29_v31 = vadd.s32 32, %v9160_v8  ;;  %v8459_v32 = vld [vmem:[%s12983_s1 + $0x70] sm:$0xff]   ;;  %v30_v37 = vadd.s32 40, %v9160_v8  ;;  %v441_v38 = vld [vmem:[%s12988_s0] sm:$0xff]  }
   0x8   :  { %7725 = vmatpush3.bf16.msra.mxu1 %v8446_v7  ;;  %6870 = vmatprep.subr.bf16.mxu0 %v8447_v9  ;;  %13209 = vst [vmem:[#allocation5_spill] sm:$0xff] %v9195_v24  ;;  %v9203_v27 = vadd.s32 1, %v68_v20  ;;  %v9208_v29 = vadd.s32 4294967295, %v75_v21  ;;  %vm12995_vm3 = vcmp.ge.s32.totalorder %v9195_v24, 0  ;;  %v8460_v34 = vld [vmem:[%s12983_s1 + $0x30] sm:$0xff]   ;;  %v8462_v40 = vld [vmem:[%s12983_s1 + $0x78] sm:$0xff]   ;;  %v473_v41 = vunpack.c.l.bf16 %v441_v38 }
   0x9   :  { %7726 = vmatprep.subr.bf16.mxu1 %v13003_v1  ;;  %v9218_v33 = vadd.s32 1, %v82_v26  ;;  %v89_v35 = vand.u32 15, %v29_v31  ;;  %v8461_v36 = vld [vmem:[%s12983_s1 + $0xb0] sm:$0xff]   ;;  %v474_v42 = vunpack.c.h.bf16 %v441_v38  ;;  %v9241_v43 = vld [vmem:[%s12988_s0 + $0x7c] sm:$0xf]  ;;  %v96_v44 = vand.u32 15, %v30_v37  ;;  %1567 = vmatprep.mubr.bf16.mxu0 %v441_v38  ;;  %vm9322_vm9 = vmpackc.low %vm13034_vm8, %vm12995_vm3 }
   0xa   :  { %13210 = vst [vmem:[#allocation6_spill] sm:$0xff] %v9203_v27  ;;  %13211 = vst [vmem:[#allocation7_spill] sm:$0xff] %v9208_v29  ;;  %vm12992_vm4 = vcmp.lt.s32.totalorder %v9203_v27, 16  ;;  %vm12991_vm5 = vcmp.ge.s32.totalorder %v9208_v29, 0  ;;  %v8463_v45 = vld [vmem:[%s12983_s1 + $0x38] sm:$0xff]   ;;  %v13001_v46 = vunpack.c.l.bf16 %v9241_v43  ;;  %v505_v47 = vrot.slane %v473_v41, 7 }
   0xb   :  { %6871 = vmatpush3.bf16.msra.mxu0 %v8448_v10  ;;  %13212 = vst [vmem:[#allocation8_spill] sm:$0xff] %v9218_v33  ;;  %v9233_v39 = vadd.s32 4294967295, %v89_v35  ;;  %vm12990_vm6 = vcmp.lt.s32.totalorder %v9218_v33, 16  ;;  %v506_v48 = vrot.slane %v474_v42, 7  ;;  %922 = vst [vmem:[#allocation2 + $0x8] sm:$0xff] %v441_v38  ;;  %v9249_v49 = vrot.slane %v473_v41, 1 }
   0xc   :  { %7727 = vmatpush3.bf16.msra.mxu1 %v8449_v11  ;;  %6872 = vmatprep.subr.bf16.mxu0 %v8450_v12  ;;  %v939_v50 = vrot.slane %v474_v42, 1  ;;  %v8465_v51 = vld [vmem:[%s12983_s1 + $0xb8] sm:$0xff]   ;;  %v9256_v52 = vrot.slane %v13001_v46, 7  ;;  %v443_v53 = vld [vmem:[%s12988_s0 + $0x8] sm:$0xff]   ;;  %v9264_v54 = vld [vmem:[%s12988_s0 + $0x10] sm:$0xff]   ;;  %v9267_v55 = vadd.s32 1, %v96_v44 }
   0xd   :  { %7728 = vmatprep.subr.bf16.mxu1 %v13003_v1  ;;  %13213 = vst [vmem:[#allocation9_spill] sm:$0xff] %v9233_v39  ;;  %vm12993_vm7 = vcmp.ge.s32.totalorder %v9233_v39, 0  ;;  %v9270_v56 = vadd.s32 48, %v9160_v8  ;;  %v568_v57 = vsel %vm13028_vm1, %v505_v47, %v506_v48  ;;  %v8466_v58 = vld [vmem:[%s12983_s1 + $0x100] sm:$0xff]   ;;  %v475_v59 = vunpack.c.l.bf16 %v443_v53  ;;  %923 = vst [vmem:[#allocation2 + $0x20] sm:$0xff] %v443_v53  ;;  %v8470_v12 = vld [vmem:[%s12983_s1 + $0x108] sm:$0xff]  }
   0xe   :  { %13214 = vst [vmem:[#allocation10_spill] sm:$0xff] %v9267_v55  ;;  %v1001_v60 = vsel %vm13036_vm2, %v9249_v49, %v939_v50  ;;  %v476_v61 = vunpack.c.h.bf16 %v443_v53  ;;  %v569_v62 = vsel %vm13028_vm1, %v9256_v52, %v505_v47  ;;  %v477_v63 = vunpack.c.l.bf16 %v9264_v54  ;;  %v8467_v3 = vld [vmem:[%s12983_s1 + $0xc0] sm:$0xff]   ;;  %924 = vst [vmem:[#allocation2 + $0x38] sm:$0xff] %v9264_v54  ;;  %v8473_v44 = vld [vmem:[%s12983_s1 + $0x110] sm:$0xff]  }
   0xf   :  { %6873 = vmatpush3.bf16.msra.mxu0 %v8451_v14  ;;  %v478_v0 = vunpack.c.h.bf16 %v9264_v54  ;;  %v762_v2 = vsel %vm12995_vm3, %v569_v62, 0.0  ;;  %v940_v4 = vrot.slane %v475_v59, 1  ;;  %v507_v9 = vrot.slane %v475_v59, 7  ;;  %vm9348_vm10 = vmpackc.low %vm12992_vm4, %vm13034_vm8  ;;  %v9367_v42 = vld [vmem:[%s12988_s0 + $0x20] sm:$0xff]   ;;  %v8477_v59 = vld [vmem:[%s12983_s1 + $0x118] sm:$0xff]  }
  0x10   :  { %7729 = vmatpush3.bf16.msra.mxu1 %v8452_v16  ;;  %6874 = vmatprep.subr.bf16.mxu0 %v8453_v18  ;;  %v508_v5 = vrot.slane %v476_v61, 7  ;;  %v941_v6 = vrot.slane %v476_v61, 1  ;;  %v794_v7 = vpack.c.bf16 %v568_v57, %v762_v2  ;;  %v942_v10 = vrot.slane %v477_v63, 1  ;;  %v9303_v16 = vld [vmem:[%s12988_s0 + $0x18] sm:$0xff]   ;;  %vm9425_vm13 = vmpackc.low %vm13034_vm8, %vm12991_vm5  ;;  %926 = vst [vmem:[#allocation2 + $0x68] sm:$0xff] %v9367_v42 }
  0x11   :  { %7730 = vmatprep.subr.bf16.mxu1 %v13003_v1  ;;  %v510_v11 = vrot.slane %v478_v0, 7  ;;  %v1000_v13 = vsel %vm13036_vm2, %v939_v50, %v940_v4  ;;  %v943_v15 = vrot.slane %v478_v0, 1  ;;  %v13215_v21 = vmov 0  ;;  %v8475_v50 = vld [vmem:[%s12983_s1 + $0xd0] sm:$0xff]   ;;  %925 = vst [vmem:[#allocation2 + $0x50] sm:$0xff] %v9303_v16  ;;  %vm9449_vm14 = vmpackc.low %vm12990_vm6, %vm13034_vm8 }
  0x12   :  { %v9298_v14 = vsel %vm13036_vm2, %v940_v4, %v941_v6  ;;  %810 = vst [vmem:[#allocation2] sm:$0xff] %v794_v7  ;;  %v1196_v17 = vsel %vm12992_vm4, %v1000_v13, 0.0  ;;  %v9309_v18 = vsel %vm13028_vm1, %v507_v9, %v508_v5  ;;  %v9317_v20 = vsel %vm13036_vm2, %v941_v6, %v942_v10  ;;  %v8483_v4 = vld [vmem:[%s12983_s1 + $0x140] sm:$0xff]  }
  0x13   :  { %6875 = vmatpush3.bf16.msra.mxu0 %v8454_v19  ;;  %v9313_v19 = vsel %vm13028_vm1, %v506_v48, %v507_v9  ;;  %v13216_v21 = vsel %vm9322_vm9, 4294967295, %v13215_v21  ;;  %v8657_v22 = vpack.c.bf16 %v568_v57, %v569_v62  ;;  %v1198_v26 = vsel %vm12990_vm6, %v9317_v20, 0.0  ;;  %v9417_v9 = vld [vmem:[%s12988_s0 + $0x28] sm:$0xff]  }
  0x14   :  { %7731 = vmatpush3.bf16.msra.mxu1 %v8455_v23  ;;  %6876 = vmatprep.subr.bf16.mxu0 %v8456_v25  ;;  %13217 = vst [vmem:[#allocation11_spill] sm:$0xff] %v13216_v21  ;;  %v1227_v23 = vpack.c.bf16 %v1196_v17, %v1001_v60  ;;  %v764_v25 = vsel %vm12991_vm5, %v9313_v19, 0.0  ;;  %v9343_v35 = vsel %vm13036_vm2, %v942_v10, %v943_v15  ;;  %vm12994_vm11 = vcmp.lt.s32.totalorder %v9267_v55, 16  ;;  %v8478_v10 = vld [vmem:[%s12983_s1 + $0xd8] sm:$0xff]   ;;  %vm9521_vm5 = vmpackc.low %vm13034_vm8, %vm12993_vm7 }
  0x15   :  { %7732 = vmatprep.subr.bf16.mxu1 %v13003_v1  ;;  %v795_v31 = vpack.c.bf16 %v9309_v18, %v764_v25  ;;  %v8660_v37 = vpack.c.bf16 %v1000_v13, %v1001_v60  ;;  %v480_v41 = vunpack.c.h.bf16 %v9303_v16  ;;  %v103_v48 = vand.u32 15, %v9270_v56  ;;  %927 = vst [vmem:[#allocation2 + $0x80] sm:$0xff] %v9417_v9 }
  0x16   :  { %1243 = vst [vmem:[#allocation2 + $0x10] sm:$0xff] %v1227_v23  ;;  %v32_v61 = vadd.s32 56, %v9160_v8  ;;  %v481_v62 = vunpack.c.l.bf16 %v9367_v42  ;;  %v33_v17 = vadd.s32 64, %v9160_v8  ;;  %v13226_v25 = vmov 0 }
  0x17   :  { %6877 = vmatpush3.bf16.msra.mxu0 %v8457_v28  ;;  %v509_v28 = vrot.slane %v477_v63, 7  ;;  %811 = vst [vmem:[#allocation2 + $0x18] sm:$0xff] %v795_v31  ;;  %v945_v57 = vrot.slane %v480_v41, 1  ;;  %v9390_v56 = vadd.s32 4294967295, %v103_v48  ;;  %v13227_v25 = vsel %vm9449_vm14, 4294967295, %v13226_v25  ;;  %v9486_v48 = vld [vmem:[%s12988_s0 + $0x30] sm:$0xff]  }
  0x18   :  { %7733 = vmatpush3.bf16.msra.mxu1 %v8458_v30  ;;  %6878 = vmatprep.subr.bf16.mxu0 %v8459_v32  ;;  %v8471_v30 = vld [vmem:[%s12983_s1 + $0xc8] sm:$0xff]   ;;  %v1228_v32 = vpack.c.bf16 %v1198_v26, %v9298_v14  ;;  %v110_v6 = vand.u32 15, %v32_v61  ;;  %v946_v7 = vrot.slane %v481_v62, 1  ;;  %v513_v23 = vrot.slane %v481_v62, 7  ;;  %13228 = vst [vmem:[#allocation16_spill] sm:$0xff] %v13227_v25  ;;  %13230 = vst [vmem:[#allocation18_spill] sm:$0xff] %v9486_v48 }
  0x19   :  { %7734 = vmatprep.subr.bf16.mxu1 %v13003_v1  ;;  %v9356_v38 = vsel %vm13028_vm1, %v509_v28, %v510_v11  ;;  %13221 = vst [vmem:[#allocation13_spill] sm:$0xff] %v9390_v56  ;;  %vm12997_vm12 = vcmp.ge.s32.totalorder %v9390_v56, 0  ;;  %v34_v31 = vadd.s32 72, %v9160_v8  ;;  %928 = vst [vmem:[#allocation2 + $0x98] sm:$0xff] %v9486_v48  ;;  %v13265_v56 = vmov 0 }
  0x1a   :  { %1244 = vst [vmem:[#allocation2 + $0x28] sm:$0xff] %v1228_v32  ;;  %v8481_v32 = vld [vmem:[%s12983_s1 + $0x120] sm:$0xff]   ;;  %v13288_v27 = vmov 0 }
  0x1b   :  { %6879 = vmatpush3.bf16.msra.mxu0 %v8460_v34  ;;  %v479_v34 = vunpack.c.l.bf16 %v9303_v16 }
  0x1c   :  { %7735 = vmatpush3.bf16.msra.mxu1 %v8461_v36  ;;  %6880 = vmatprep.subr.bf16.mxu0 %v8462_v40  ;;  %v13218_v36 = vmov 0  ;;  %v9360_v40 = vsel %vm13028_vm1, %v508_v5, %v509_v28 }
  0x1d   :  { %7736 = vmatprep.subr.bf16.mxu1 %v13003_v1  ;;  %v13219_v36 = vsel %vm9348_vm10, 4294967295, %v13218_v36  ;;  %v944_v47 = vrot.slane %v479_v34, 1 }
  0x1e   :  { %13220 = vst [vmem:[#allocation12_spill] sm:$0xff] %v13219_v36 }
  0x1f   :  { %6881 = vmatpush3.bf16.msra.mxu0 %v8463_v45  ;;  %v766_v45 = vsel %vm12993_vm7, %v9360_v40, 0.0  ;;  %v9387_v60 = vsel %vm13036_vm2, %v943_v15, %v944_v47  ;;  %v482_v15 = vunpack.c.h.bf16 %v9367_v42  ;;  %vm9550_vm7 = vmpackc.low %vm12994_vm11, %vm13034_vm8 }
  0x20   :  { %7737 = vmatpush3.bf16.msra.mxu1 %v8465_v51  ;;  %6995 = vmatprep.subr.bf16.mxu0 %v8466_v58  ;;  %v796_v51 = vpack.c.bf16 %v9356_v38, %v766_v45  ;;  %v511_v58 = vrot.slane %v479_v34, 7  ;;  %v1200_v63 = vsel %vm12994_vm11, %v9387_v60, 0.0  ;;  %v8488_v34 = vld [vmem:[%s12983_s1 + $0x148] sm:$0xff]  }
  0x21   :  { %v1229_v5 = vpack.c.bf16 %v1200_v63, %v9343_v35  ;;  %7798 = vmatprep.subr.bf16.mxu1 %v8483_v4  ;;  %v514_v26 = vrot.slane %v482_v15, 7  ;;  %v947_v28 = vrot.slane %v482_v15, 1  ;;  %v8493_v63 = vld [vmem:[%s12983_s1 + $0x150] sm:$0xff]  }
  0x22   :  { %8658 = vmatmul.mubr.msk.bf16.vlgmr.msra.gmra.mrb[0].mxu0 %vm9322_vm9, %v8657_v22  ;;  %812 = vst [vmem:[#allocation2 + $0x30] sm:$0xff] %v796_v51  ;;  %v9403_v2 = vsel %vm13028_vm1, %v510_v11, %v511_v58  ;;  %v13222_v11 = vmov 0 }
  0x23   :  { %6996 = vmatpush3.bf16.msra.mxu0 %v8467_v3  ;;  %1575 = vmatprep.mubr.bf16.mxu0 %v443_v53  ;;  %v512_v53 = vrot.slane %v480_v41, 7  ;;  %v9407_v3 = vsel %vm13036_vm2, %v944_v47, %v945_v57  ;;  %v13223_v11 = vsel %vm9425_vm13, 4294967295, %v13222_v11  ;;  %v768_v13 = vsel %vm12997_vm12, %v9403_v2, 0.0  ;;  %1245 = vst [vmem:[#allocation2 + $0x40] sm:$0xff] %v1229_v5 }
  0x24   :  { %8661 = vmatmul.mubr.msk.bf16.vlgmr.msra.gmra.mrb[0].mxu1 %vm9348_vm10, %v8660_v37  ;;  %6997 = vmatprep.subr.bf16.mxu0 %v8470_v12  ;;  %13224 = vst [vmem:[#allocation14_spill] sm:$0xff] %v13223_v11  ;;  %v8663_v12 = vpack.c.bf16 %v9309_v18, %v9313_v19  ;;  %v9442_v18 = vsel %vm13036_vm2, %v945_v57, %v946_v7  ;;  %v9444_v19 = vadd.s32 1, %v110_v6  ;;  %v484_v37 = vunpack.c.h.bf16 %v9417_v9 }
  0x25   :  { %7742 = vmatprep.mubr.msk.bf16.mxu1 %vm13025_vm0, %v13003_v1  ;;  %v9399_v0 = vsel %vm13028_vm1, %v511_v58, %v512_v53  ;;  %7799 = vmatpush3.bf16.msra.mxu1 %v8483_v4  ;;  %v124_v47 = vand.u32 15, %v34_v31  ;;  %v8482_v58 = vld [vmem:[%s12983_s1 + $0xe0] sm:$0xff]   ;;  %v35_v6 = vadd.s32 80, %v9160_v8 }
  0x26   :  { %v797_v22 = vpack.c.bf16 %v9399_v0, %v768_v13  ;;  %13225 = vst [vmem:[#allocation15_spill] sm:$0xff] %v9444_v19  ;;  %vm13000_vm15 = vcmp.lt.s32.totalorder %v9444_v19, 16  ;;  %7800 = vmatprep.subr.bf16.mxu1 %v8488_v34  ;;  %v9493_v57 = vrot.slane %v484_v37, 7  ;;  %v949_v62 = vrot.slane %v484_v37, 1 }
  0x27   :  { %6998 = vmatpush3.bf16.msra.mxu0 %v8471_v30  ;;  %v117_v30 = vand.u32 15, %v33_v17  ;;  %v1202_v41 = vsel %vm13000_vm15, %v9442_v18, 0.0  ;;  %v9502_v61 = vadd.s32 1, %v124_v47  ;;  %v8669_v13 = vpack.c.bf16 %v9356_v38, %v9360_v40  ;;  %v8492_v47 = vld [vmem:[%s12983_s1 + $0xf0] sm:$0xff]  }
  0x28   :  { %6999 = vmatprep.subr.bf16.mxu0 %v8473_v44  ;;  %813 = vst [vmem:[#allocation2 + $0x48] sm:$0xff] %v797_v22  ;;  %v9479_v44 = vsel %vm13028_vm1, %v513_v23, %v514_v26  ;;  %v36_v17 = vadd.s32 88, %v9160_v8  ;;  %v485_v22 = vunpack.c.l.bf16 %v9486_v48  ;;  %v131_v40 = vand.u32 15, %v35_v6 }
  0x29   :  { %v9481_v45 = vadd.s32 4294967295, %v117_v30  ;;  %13231 = vst [vmem:[#allocation19_spill] sm:$0xff] %v9502_v61  ;;  %7801 = vmatpush3.bf16.msra.mxu1 %v8488_v34  ;;  %vm12999_vm4 = vcmp.lt.s32.totalorder %v9502_v61, 16  ;;  %v8491_v34 = vld [vmem:[%s12983_s1 + $0x130] sm:$0xff]   ;;  %v37_v37 = vadd.s32 96, %v9160_v8  ;;  %v43_v19 = vadd.s32 144, %v9160_v8 }
  0x2a   :  { %8664 = vmatmul.mubr.msk.bf16.gmra.mrb[4].mxu0 %vm9425_vm13, %v8663_v12  ;;  %v13232_v12 = vmov 0  ;;  %7802 = vmatprep.subr.bf16.mxu1 %v8493_v63  ;;  %v138_v31 = vand.u32 15, %v36_v17  ;;  %v8497_v17 = vld [vmem:[%s12983_s1 + $0x138] sm:$0xff]  }
  0x2b   :  { %1583 = vmatprep.mubr.bf16.mxu0 %v9264_v54  ;;  %7000 = vmatpush3.bf16.msra.mxu0 %v8475_v50  ;;  %v8666_v54 = vpack.c.bf16 %v9317_v20, %v9298_v14  ;;  %v9470_v14 = vsel %vm13028_vm1, %v512_v53, %v513_v23  ;;  %v483_v20 = vunpack.c.l.bf16 %v9417_v9  ;;  %13229 = vst [vmem:[#allocation17_spill] sm:$0xff] %v9481_v45  ;;  %vm13006_vm6 = vcmp.ge.s32.totalorder %v9481_v45, 0 }
  0x2c   :  { %7001 = vmatprep.subr.bf16.mxu0 %v8477_v59  ;;  %v1230_v50 = vpack.c.bf16 %v1202_v41, %v9407_v3  ;;  %v9491_v53 = vsel %vm13036_vm2, %v946_v7, %v947_v28  ;;  %v8486_v59 = vld [vmem:[%s12983_s1 + $0x128] sm:$0xff]   ;;  %v770_v4 = vsel %vm13006_vm6, %v9470_v14, 0.0  ;;  %v13233_v12 = vsel %vm9521_vm5, 4294967295, %v13232_v12  ;;  %v9578_v41 = vld [vmem:[%s12988_s0 + $0x38] sm:$0xff]  }
  0x2d   :  { %8667 = vmatmul.mubr.msk.bf16.gmra.mrb[4].mxu1 %vm9449_vm14, %v8666_v54  ;;  %v948_v51 = vrot.slane %v483_v20, 1  ;;  %v515_v7 = vrot.slane %v483_v20, 7  ;;  %13234 = vst [vmem:[#allocation20_spill] sm:$0xff] %v13233_v12  ;;  %v798_v15 = vpack.c.bf16 %v9479_v44, %v770_v4  ;;  %v486_v20 = vunpack.c.h.bf16 %v9486_v48  ;;  %13239 = vst [vmem:[#allocation23_spill] sm:$0xff] %v9578_v41  ;;  %v8499_v4 = vld [vmem:[%s12983_s1 + $0x160] sm:$0xff]  }
  0x2e   :  { %7746 = vmatprep.mubr.msk.bf16.mxu1 %vm13025_vm0, %v13003_v1  ;;  %1246 = vst [vmem:[#allocation2 + $0x58] sm:$0xff] %v1230_v50  ;;  %7803 = vmatpush3.bf16.msra.mxu1 %v8493_v63  ;;  %929 = vst [vmem:[#allocation2 + $0xb0] sm:$0xff] %v9578_v41  ;;  %v187_v11 = vand.u32 15, %v43_v19 }
  0x2f   :  { %7002 = vmatpush3.bf16.msra.mxu0 %v8478_v10  ;;  %v9512_v5 = vsel %vm13036_vm2, %v947_v28, %v948_v51  ;;  %v8487_v10 = vld [vmem:[%s12983_s1 + $0xe8] sm:$0xff]   ;;  %v9541_v23 = vsel %vm13028_vm1, %v515_v7, %v9493_v57  ;;  %v9545_v54 = vsel %vm13028_vm1, %v514_v26, %v515_v7  ;;  %v8672_v28 = vpack.c.bf16 %v9387_v60, %v9343_v35  ;;  %v8495_v35 = vld [vmem:[%s12983_s1 + $0x158] sm:$0xff]  }
  0x30   :  { %7003 = vmatprep.subr.bf16.mxu0 %v8481_v32  ;;  %v1204_v38 = vsel %vm12999_vm4, %v9512_v5, 0.0  ;;  %814 = vst [vmem:[#allocation2 + $0x60] sm:$0xff] %v798_v15  ;;  %v950_v26 = vrot.slane %v485_v22, 1  ;;  %v9561_v32 = vsel %vm13036_vm2, %v948_v51, %v949_v62  ;;  %v9571_v60 = vadd.s32 4294967295, %v131_v40  ;;  %7804 = vmatprep.subr.bf16.mxu1 %v8495_v35 }
  0x31   :  { %v1231_v30 = vpack.c.bf16 %v1204_v38, %v9491_v53  ;;  %v9587_v51 = vadd.s32 1, %v138_v31  ;;  %v518_v6 = vrot.slane %v486_v20, 7  ;;  %v951_v63 = vrot.slane %v486_v20, 1 }
  0x32   :  { %8670 = vmatmul.mubr.msk.bf16.gmra.mrb[8].mxu0 %vm9521_vm5, %v8669_v13  ;;  %13238 = vst [vmem:[#allocation22_spill] sm:$0xff] %v9571_v60  ;;  %v9585_v50 = vsel %vm13036_vm2, %v949_v62, %v950_v26  ;;  %vm12996_vm11 = vcmp.ge.s32.totalorder %v9571_v60, 0  ;;  %v145_v7 = vand.u32 15, %v37_v37  ;;  %7805 = vmatpush3.bf16.msra.mxu1 %v8495_v35  ;;  %v8498_v37 = vld [vmem:[%s12983_s1 + $0xf8] sm:$0xff]  }
  0x33   :  { %1591 = vmatprep.mubr.bf16.mxu0 %v9303_v16  ;;  %7004 = vmatpush3.bf16.msra.mxu0 %v8482_v58  ;;  %v13235_v16 = vmov 0  ;;  %1247 = vst [vmem:[#allocation2 + $0x70] sm:$0xff] %v1231_v30  ;;  %13240 = vst [vmem:[#allocation24_spill] sm:$0xff] %v9587_v51  ;;  %v517_v58 = vrot.slane %v485_v22, 7  ;;  %v772_v62 = vsel %vm12996_vm11, %v9545_v54, 0.0  ;;  %vm12998_vm3 = vcmp.lt.s32.totalorder %v9587_v51, 16 }
  0x34   :  { %v13236_v16 = vsel %vm9550_vm7, 4294967295, %v13235_v16  ;;  %7005 = vmatprep.subr.bf16.mxu0 %v8486_v59  ;;  %v38_v59 = vadd.s32 104, %v9160_v8  ;;  %v799_v22 = vpack.c.bf16 %v9541_v23, %v772_v62  ;;  %v9615_v40 = vadd.s32 4294967295, %v145_v7  ;;  %vm9625_vm11 = vmpackc.low %vm13034_vm8, %vm12997_vm12  ;;  %7806 = vmatprep.subr.bf16.mxu1 %v8499_v4 }
  0x35   :  { %13237 = vst [vmem:[#allocation21_spill] sm:$0xff] %v13236_v16  ;;  %8673 = vmatmul.mubr.msk.bf16.gmra.mrb[8].mxu1 %vm9550_vm7, %v8672_v28  ;;  %v9602_v13 = vsel %vm13028_vm1, %v9493_v57, %v517_v58  ;;  %v9613_v38 = vsel %vm13028_vm1, %v517_v58, %v518_v6  ;;  %v9620_v57 = vld [vmem:[%s12988_s0 + $0x40] sm:$0xff]   ;;  %v13243_v28 = vmov 0  ;;  %v8675_v30 = vpack.c.bf16 %v9399_v0, %v9403_v2  ;;  %v8500_v0 = vld [vmem:[%s12983_s1 + $0x168] sm:$0xff]  }
  0x36   :  { %7750 = vmatprep.mubr.msk.bf16.mxu1 %vm13025_vm0, %v13003_v1  ;;  %v152_v15 = vand.u32 15, %v38_v59  ;;  %13241 = vst [vmem:[#allocation25_spill] sm:$0xff] %v9615_v40  ;;  %13242 = vst [vmem:[#allocation26_spill] sm:$0xff] %v9620_v57  ;;  %v13244_v28 = vsel %vm9625_vm11, 4294967295, %v13243_v28  ;;  %v9637_v35 = vsel %vm13036_vm2, %v950_v26, %v951_v63  ;;  %vm13008_vm12 = vcmp.ge.s32.totalorder %v9615_v40, 0  ;;  %7807 = vmatpush3.bf16.msra.mxu1 %v8499_v4 }
  0x37   :  { %7006 = vmatpush3.bf16.msra.mxu0 %v8487_v10  ;;  %v1206_v10 = vsel %vm12998_vm3, %v9585_v50, 0.0  ;;  %13245 = vst [vmem:[#allocation27_spill] sm:$0xff] %v13244_v28  ;;  %815 = vst [vmem:[#allocation2 + $0x78] sm:$0xff] %v799_v22  ;;  %v488_v2 = vunpack.c.h.bf16 %v9578_v41  ;;  %v39_v26 = vadd.s32 112, %v9160_v8  ;;  %v13247_v58 = vmov 0  ;;  %7808 = vmatprep.subr.bf16.mxu1 %v8500_v0 }
  0x38   :  { %7007 = vmatprep.subr.bf16.mxu0 %v8491_v34  ;;  %v1232_v31 = vpack.c.bf16 %v1206_v10, %v9561_v32  ;;  %v487_v34 = vunpack.c.l.bf16 %v9578_v41  ;;  %v9639_v20 = vadd.s32 1, %v152_v15  ;;  %vm9654_vm3 = vmpackc.low %vm13000_vm15, %vm13034_vm8  ;;  %v9660_v59 = vpack.c.bf16 %v9442_v18, %v9407_v3  ;;  %930 = vst [vmem:[#allocation2 + $0xc8] sm:$0xff] %v9620_v57 }
  0x39   :  { %v13248_v58 = vsel %vm9654_vm3, 4294967295, %v13247_v58  ;;  %v520_v18 = vrot.slane %v488_v2, 7  ;;  %v953_v62 = vrot.slane %v488_v2, 1  ;;  %v159_v15 = vand.u32 15, %v39_v26 }
  0x3a   :  { %8676 = vmatmul.mubr.msk.bf16.gmra.mrb[12].mxu0 %vm9625_vm11, %v8675_v30  ;;  %13246 = vst [vmem:[#allocation28_spill] sm:$0xff] %v9639_v20  ;;  %13249 = vst [vmem:[#allocation29_spill] sm:$0xff] %v13248_v58  ;;  %vm13002_vm4 = vcmp.lt.s32.totalorder %v9639_v20, 16  ;;  %v519_v7 = vrot.slane %v487_v34, 7  ;;  %v489_v30 = vunpack.c.l.bf16 %v9620_v57  ;;  %7809 = vmatpush3.bf16.msra.mxu1 %v8500_v0  ;;  %vm13281_vm11 = vmmov 1  }
  0x3b   :  { %1599 = vmatprep.mubr.bf16.mxu0 %v9367_v42  ;;  %7008 = vmatpush3.bf16.msra.mxu0 %v8492_v47  ;;  %1248 = vst [vmem:[#allocation2 + $0x88] sm:$0xff] %v1232_v31  ;;  %v774_v42 = vsel %vm13008_vm12, %v9602_v13, 0.0  ;;  %v952_v47 = vrot.slane %v487_v34, 1  ;;  %v8502_v31 = vld [vmem:[%s12983_s1 + $0x170] sm:$0xff]  }
  0x3c   :  { %7009 = vmatprep.subr.bf16.mxu0 %v8497_v17  ;;  %v800_v3 = vpack.c.bf16 %v9613_v38, %v774_v42  ;;  %v9679_v10 = vsel %vm13028_vm1, %v518_v6, %v519_v7  ;;  %v40_v17 = vadd.s32 120, %v9160_v8  ;;  %v9693_v6 = vadd.s32 4294967295, %v159_v15  ;;  %v9707_v15 = vld [vmem:[%s12988_s0 + $0x48] sm:$0xff]   ;;  %7810 = vmatprep.subr.bf16.mxu1 %v8502_v31 }
  0x3d   :  { %8679 = vmatmul.mubr.msk.bf16.gmra.mrb[12].mxu1 %vm9654_vm3, %v9660_v59  ;;  %v9675_v22 = vsel %vm13036_vm2, %v951_v63, %v952_v47  ;;  %v9691_v63 = vsel %vm13028_vm1, %v519_v7, %v520_v18  ;;  %v9697_v34 = vsel %vm13036_vm2, %v952_v47, %v953_v62  ;;  %v954_v42 = vrot.slane %v489_v30, 1  ;;  %13251 = vst [vmem:[#allocation31_spill] sm:$0xff] %v9707_v15 }
  0x3e   :  { %7754 = vmatprep.mubr.msk.bf16.mxu1 %vm13025_vm0, %v13003_v1  ;;  %816 = vst [vmem:[#allocation2 + $0x90] sm:$0xff] %v800_v3  ;;  %v1208_v4 = vsel %vm13002_vm4, %v9675_v22, 0.0  ;;  %13250 = vst [vmem:[#allocation30_spill] sm:$0xff] %v9693_v6  ;;  %v166_v26 = vand.u32 15, %v40_v17  ;;  %v490_v3 = vunpack.c.h.bf16 %v9620_v57  ;;  %vm13007_vm15 = vcmp.ge.s32.totalorder %v9693_v6, 0  ;;  %7811 = vmatpush3.bf16.msra.mxu1 %v8502_v31 }
  0x3f   :  { %7010 = vmatpush3.bf16.msra.mxu0 %v8498_v37  ;;  %v1233_v2 = vpack.c.bf16 %v1208_v4, %v9637_v35  ;;  %v41_v7 = vadd.s32 128, %v9160_v8  ;;  %v521_v46 = vrot.slane %v489_v30, 7  ;;  %vm9712_vm4 = vmpackc.low %vm13034_vm8, %vm13006_vm6  ;;  %v13252_v37 = vmov 0  ;;  %931 = vst [vmem:[#allocation2 + $0xe0] sm:$0xff] %v9707_v15 }
  0x40   :  { %7846 = vmatprep.subr.bf16.mxu0 %v13003_v1  ;;  %v13253_v37 = vsel %vm9712_vm4, 4294967295, %v13252_v37  ;;  %v9718_v47 = vpack.c.bf16 %v9479_v44, %v9470_v14  ;;  %v776_v0 = vsel %vm13007_vm15, %v9679_v10, 0.0  ;;  %v9728_v17 = vsel %vm13036_vm2, %v953_v62, %v954_v42  ;;  %v8503_v14 = vld [vmem:[%s12983_s1 + $0x178] sm:$0xff]  }
  0x41   :  { %13254 = vst [vmem:[#allocation32_spill] sm:$0xff] %v13253_v37  ;;  %1249 = vst [vmem:[#allocation2 + $0xa0] sm:$0xff] %v1233_v2  ;;  %v9730_v30 = vadd.s32 1, %v166_v26  ;;  %v522_v4 = vrot.slane %v490_v3, 7  ;;  %v801_v44 = vpack.c.bf16 %v9691_v63, %v776_v0  ;;  %v955_v2 = vrot.slane %v490_v3, 1  ;;  %v9766_v0 = vld [vmem:[%s12988_s0 + $0x50] sm:$0xff]   ;;  %7812 = vmatprep.subr.bf16.mxu1 %v8503_v14 }
  0x42   :  { %13255 = vst [vmem:[#allocation33_spill] sm:$0xff] %v9718_v47  ;;  %8682 = vmatmul.mubr.msk.bf16.gmra.mrb[16].mxu0 %vm9712_vm4, %v9718_v47  ;;  %v173_v1 = vand.u32 15, %v41_v7  ;;  %v9740_v62 = vsel %vm13028_vm1, %v520_v18, %v521_v46  ;;  %vm13257_vm6 = vcmp.lt.s32.totalorder %v9502_v61, 16  ;;  %v13258_v26 = vmov 0  ;;  %7813 = vmatpush3.bf16.msra.mxu1 %v8503_v14  ;;  %932 = vst [vmem:[#allocation2 + $0xf8] sm:$0xff] %v9766_v0 }
  0x43   :  { %13256 = vst [vmem:[#allocation34_spill] sm:$0xff] %v9730_v30  ;;  %1607 = vmatprep.mubr.bf16.mxu0 %v9417_v9  ;;  %vm9745_vm15 = vmpackc.low %vm13257_vm6, %vm13034_vm8  ;;  %v9751_v9 = vpack.c.bf16 %v9512_v5, %v9491_v53  ;;  %vm13022_vm12 = vcmp.lt.s32.totalorder %v9730_v30, 16  ;;  %v9759_v18 = vsel %vm13028_vm1, %v521_v46, %v522_v4  ;;  %v42_v3 = vadd.s32 136, %v9160_v8 }
  0x44   :  { %v13259_v26 = vsel %vm9745_vm15, 4294967295, %v13258_v26  ;;  %v491_v7 = vunpack.c.l.bf16 %v9707_v15  ;;  %v13261_v53 = vmov 0.0   ;;  %817 = vst [vmem:[#allocation2 + $0xa8] sm:$0xff] %v801_v44  ;;  %v1210_v5 = vsel %vm13022_vm12, %v9728_v17, 0.0 }
  0x45   :  { %13260 = vst [vmem:[#allocation35_spill] sm:$0xff] %v13259_v26  ;;  %8685 = vmatmul.mubr.msk.bf16.gmra.mrb[16].mxu1 %vm9745_vm15, %v9751_v9  ;;  %v9773_v28 = vadd.s32 4294967295, %v173_v1  ;;  %v9777_v46 = vsel %vm13036_vm2, %v954_v42, %v955_v2  ;;  %v492_v16 = vunpack.c.h.bf16 %v9707_v15  ;;  %v1234_v12 = vpack.c.bf16 %v1210_v5, %v9697_v34 }
  0x46   :  { %7758 = vmatprep.mubr.msk.bf16.mxu1 %vm13025_vm0, %v13261_v53  ;;  %v180_v61 = vand.u32 15, %v42_v3  ;;  %v956_v45 = vrot.slane %v491_v7, 1  ;;  %v523_v3 = vrot.slane %v491_v7, 7  ;;  %vm13264_vm12 = vcmp.ge.s32.totalorder %v9571_v60, 0 }
  0x47   :  { %13262 = vst [vmem:[#allocation36_spill] sm:$0xff] %v9773_v28  ;;  %vm13023_vm6 = vcmp.ge.s32.totalorder %v9773_v28, 0  ;;  %v524_v44 = vrot.slane %v492_v16, 7  ;;  %v957_v25 = vrot.slane %v492_v16, 1  ;;  %1250 = vst [vmem:[#allocation2 + $0xb8] sm:$0xff] %v1234_v12  ;;  %v44_v16 = vadd.s32 152, %v9160_v8 }
  0x48   :  { %v778_v1 = vsel %vm13023_vm6, %v9740_v62, 0.0  ;;  %v9788_v42 = vsel %vm13036_vm2, %v955_v2, %v956_v45  ;;  %v9790_v31 = vadd.s32 1, %v180_v61  ;;  %v493_v12 = vunpack.c.l.bf16 %v9766_v0  ;;  %vm9799_vm6 = vmpackc.low %vm13034_vm8, %vm13264_vm12 }
  0x49   :  { %v802_v5 = vpack.c.bf16 %v9759_v18, %v778_v1  ;;  %v13266_v56 = vsel %vm9799_vm6, 4294967295, %v13265_v56  ;;  %v9805_v61 = vpack.c.bf16 %v9541_v23, %v9545_v54  ;;  %v9813_v19 = vsel %vm13028_vm1, %v523_v3, %v524_v44 }
  0x4a   :  { %13263 = vst [vmem:[#allocation37_spill] sm:$0xff] %v9790_v31  ;;  %13267 = vst [vmem:[#allocation38_spill] sm:$0xff] %v13266_v56  ;;  %vm13029_vm0 = vcmp.lt.s32.totalorder %v9790_v31, 16  ;;  %v9817_v14 = vsel %vm13028_vm1, %v522_v4, %v523_v3  ;;  %v9821_v2 = vsel %vm13036_vm2, %v956_v45, %v957_v25  ;;  %v9827_v54 = vadd.s32 4294967295, %v187_v11  ;;  %v9966_v56 = vld [vmem:[%s12988_s0 + $0x68] sm:$0xff]  }
  0x4b   :  { %13268 = vst [vmem:[#allocation39_spill] sm:$0xff] %v9805_v61  ;;  %8688 = vmatmul.mubr.msk.bf16.gmra.mrb[20].mxu0 %vm9799_vm6, %v9805_v61  ;;  %818 = vst [vmem:[#allocation2 + $0xc0] sm:$0xff] %v802_v5  ;;  %v1212_v23 = vsel %vm13029_vm0, %v9788_v42, 0.0  ;;  %v194_v7 = vand.u32 15, %v44_v16  ;;  %v958_v1 = vrot.slane %v493_v12, 1  ;;  %vm13270_vm12 = vcmp.lt.s32.totalorder %v9587_v51, 16 }
  0x4c   :  { %1615 = vmatprep.mubr.bf16.mxu0 %v9486_v48  ;;  %13269 = vst [vmem:[#allocation40_spill] sm:$0xff] %v9827_v54  ;;  %vm9832_vm1 = vmpackc.low %vm13270_vm12, %vm13034_vm8  ;;  %v13271_v4 = vmov 0  ;;  %v9838_v45 = vpack.c.bf16 %v9585_v50, %v9561_v32  ;;  %v1235_v11 = vpack.c.bf16 %v1212_v23, %v9777_v46  ;;  %v494_v3 = vunpack.c.h.bf16 %v9766_v0  ;;  %v9858_v23 = vld [vmem:[%s12988_s0 + $0x58] sm:$0xff]  }
  0x4d   :  { %v13272_v4 = vsel %vm9832_vm1, 4294967295, %v13271_v4  ;;  %v45_v5 = vadd.s32 160, %v9160_v8  ;;  %vm13274_vm0 = vmmov 0   ;;  %vm13037_vm12 = vcmp.ge.s32.totalorder %v9827_v54, 0  ;;  %933 = vst [vmem:[#allocation2 + $0x110] sm:$0xff] %v9858_v23  ;;  %935 = vst [vmem:[#allocation2 + $0x140] sm:$0xff] %v9966_v56 }
  0x4e   :  { %13273 = vst [vmem:[#allocation41_spill] sm:$0xff] %v13272_v4  ;;  %8691 = vmatmul.mubr.msk.bf16.gmra.mrb[20].mxu1 %vm9832_vm1, %v9838_v45  ;;  %v9851_v16 = vsel %vm13036_vm2, %v957_v25, %v958_v1  ;;  %v9853_v32 = vadd.s32 1, %v194_v7  ;;  %v525_v50 = vrot.slane %v493_v12, 7  ;;  %1251 = vst [vmem:[#allocation2 + $0xd0] sm:$0xff] %v1235_v11  ;;  %v780_v51 = vsel %vm13037_vm12, %v9817_v14, 0.0  ;;  %v8546_v4 = vld [vmem:[#allocation2 + $0x80] sm:$0xff] }
  0x4f   :  { %7762 = vmatprep.mubr.msk.bf16.mxu1 %vm13274_vm0, %v13261_v53  ;;  %v526_v60 = vrot.slane %v494_v3, 7  ;;  %v959_v55 = vrot.slane %v494_v3, 1  ;;  %v201_v39 = vand.u32 15, %v45_v5  ;;  %v803_v25 = vpack.c.bf16 %v9813_v19, %v780_v51 }
  0x50   :  { %13275 = vst [vmem:[#allocation42_spill] sm:$0xff] %v9853_v32  ;;  %vm13043_vm8 = vcmp.lt.s32.totalorder %v9853_v32, 16  ;;  %vm13276_vm2 = vcmp.lt.s32.totalorder %v9160_v8, 1  ;;  %v46_v7 = vadd.s32 168, %v9160_v8  ;;  %v495_v51 = vunpack.c.l.bf16 %v9858_v23 }
  0x51   :  { %v9868_v12 = vsel %vm13276_vm2, %v524_v44, %v525_v50  ;;  %v1214_v11 = vsel %vm13043_vm8, %v9851_v16, 0.0  ;;  %vm13277_vm12 = vmmov %vm13276_vm2  ;;  %v9878_v3 = vadd.s32 4294967295, %v201_v39  ;;  %819 = vst [vmem:[#allocation2 + $0xd8] sm:$0xff] %v803_v25  ;;  %vm13279_vm2 = vcmp.lt.s32.totalorder %v9160_v8, 7 }
  0x52   :  { %v9876_v36 = vsel %vm13277_vm12, %v525_v50, %v526_v60  ;;  %v1236_v5 = vpack.c.bf16 %v1214_v11, %v9821_v2  ;;  %v208_v33 = vand.u32 15, %v46_v7  ;;  %v9884_v44 = vsel %vm13279_vm2, %v958_v1, %v959_v55  ;;  %v9906_v7 = vld [vmem:[%s12988_s0 + $0x60] sm:$0xff]  }
  0x53   :  { %13278 = vst [vmem:[#allocation43_spill] sm:$0xff] %v9878_v3  ;;  %v496_v21 = vunpack.c.h.bf16 %v9858_v23  ;;  %vm13280_vm8 = vcmp.ge.s32.totalorder %v9615_v40, 0  ;;  %v13282_v50 = vmov 0  ;;  %v9896_v39 = vpack.c.bf16 %v9613_v38, %v9602_v13  ;;  %v8508_v11 = vld [vmem:[%s12983_s1 + $0x1c0] sm:$0xff]   ;;  %934 = vst [vmem:[#allocation2 + $0x128] sm:$0xff] %v9906_v7 }
  0x54   :  { %vm9890_vm7 = vmpackc.low %vm13281_vm11, %vm13280_vm8  ;;  %vm13052_vm12 = vcmp.ge.s32.totalorder %v9878_v3, 0  ;;  %v960_v1 = vrot.slane %v495_v51, 1  ;;  %v47_v25 = vadd.s32 176, %v9160_v8  ;;  %1252 = vst [vmem:[#allocation2 + $0xe8] sm:$0xff] %v1236_v5  ;;  %v9915_v38 = vadd.s32 1, %v208_v33  ;;  %7131 = vmatprep.subr.bf16.mxu1 %v8508_v11 }
  0x55   :  { %v13283_v50 = vsel %vm9890_vm7, 4294967295, %v13282_v50  ;;  %13285 = vst [vmem:[#allocation45_spill] sm:$0xff] %v9896_v39  ;;  %8694 = vmatmul.mubr.msk.bf16.gmra.mrb[24].mxu0 %vm9890_vm7, %v9896_v39  ;;  %v782_v13 = vsel %vm13052_vm12, %v9868_v12, 0.0  ;;  %v528_v40 = vrot.slane %v496_v21, 7  ;;  %v961_v29 = vrot.slane %v496_v21, 1 }
  0x56   :  { %13284 = vst [vmem:[#allocation44_spill] sm:$0xff] %v13283_v50  ;;  %1623 = vmatprep.mubr.bf16.mxu0 %v9578_v41  ;;  %13286 = vst [vmem:[#allocation46_spill] sm:$0xff] %v9915_v38  ;;  %vm13287_vm8 = vcmp.lt.s32.totalorder %v9639_v20, 16  ;;  %v9926_v24 = vpack.c.bf16 %v9675_v22, %v9637_v35  ;;  %v804_v33 = vpack.c.bf16 %v9876_v36, %v782_v13  ;;  %vm13291_vm12 = vcmp.lt.s32.totalorder %v9160_v8, 7 }
  0x57   :  { %vm9920_vm2 = vmpackc.low %vm13287_vm8, %vm13281_vm11  ;;  %v9934_v21 = vsel %vm13291_vm12, %v959_v55, %v960_v1  ;;  %v215_v5 = vand.u32 15, %v47_v25  ;;  %v527_v20 = vrot.slane %v495_v51, 7  ;;  %vm13065_vm8 = vcmp.lt.s32.totalorder %v9915_v38, 16 }
  0x58   :  { %v13289_v27 = vsel %vm9920_vm2, 4294967295, %v13288_v27  ;;  %8697 = vmatmul.mubr.msk.bf16.gmra.mrb[24].mxu1 %vm9920_vm2, %v9926_v24  ;;  %v48_v35 = vadd.s32 184, %v9160_v8  ;;  %v497_v22 = vunpack.c.l.bf16 %v9906_v7  ;;  %vm13292_vm5 = vmmov %vm13291_vm12  ;;  %820 = vst [vmem:[#allocation2 + $0xf0] sm:$0xff] %v804_v33  ;;  %v1216_v55 = vsel %vm13065_vm8, %v9934_v21, 0.0 }
  0x59   :  { %13290 = vst [vmem:[#allocation47_spill] sm:$0xff] %v13289_v27  ;;  %7766 = vmatprep.mubr.msk.bf16.mxu1 %vm13274_vm0, %v13261_v53  ;;  %v9944_v13 = vsel %vm13292_vm5, %v960_v1, %v961_v29  ;;  %vm13293_vm12 = vcmp.lt.s32.totalorder %v9160_v8, 1  ;;  %v9957_v11 = vadd.s32 4294967295, %v215_v5  ;;  %v1237_v41 = vpack.c.bf16 %v1216_v55, %v9884_v44 }
  0x5a   :  { %v9951_v51 = vsel %vm13293_vm12, %v527_v20, %v528_v40  ;;  %vm13294_vm14 = vmmov %vm13293_vm12  ;;  %v222_v50 = vand.u32 15, %v48_v35  ;;  %v962_v1 = vrot.slane %v497_v22, 1  ;;  %v498_v33 = vunpack.c.h.bf16 %v9906_v7 }
  0x5b   :  { %v9955_v25 = vsel %vm13294_vm14, %v526_v60, %v527_v20  ;;  %13295 = vst [vmem:[#allocation48_spill] sm:$0xff] %v9957_v11  ;;  %vm13067_vm5 = vcmp.ge.s32.totalorder %v9957_v11, 0  ;;  %v49_v39 = vadd.s32 192, %v9160_v8  ;;  %v529_v48 = vrot.slane %v497_v22, 7  ;;  %1253 = vst [vmem:[#allocation2 + $0x100] sm:$0xff] %v1237_v41 }
  0x5c   :  { %v784_v60 = vsel %vm13067_vm5, %v9955_v25, 0.0  ;;  %vm13296_vm14 = vcmp.lt.s32.totalorder %v9160_v8, 7  ;;  %v9975_v5 = vadd.s32 1, %v222_v50  ;;  %v530_v35 = vrot.slane %v498_v33, 7 }
  0x5d   :  { %v9973_v20 = vsel %vm13296_vm14, %v961_v29, %v962_v1  ;;  %vm13298_vm12 = vcmp.ge.s32.totalorder %v9693_v6, 0  ;;  %v13299_v22 = vmov 0  ;;  %v9986_v41 = vpack.c.bf16 %v9691_v63, %v9679_v10 }
  0x5e   :  { %13297 = vst [vmem:[#allocation49_spill] sm:$0xff] %v9975_v5  ;;  %vm9980_vm8 = vmpackc.low %vm13281_vm11, %vm13298_vm12  ;;  %v805_v29 = vpack.c.bf16 %v9951_v51, %v784_v60  ;;  %v963_v50 = vrot.slane %v498_v33, 1  ;;  %v229_v55 = vand.u32 15, %v49_v39  ;;  %vm13303_vm14 = vcmp.lt.s32.totalorder %v9160_v8, 1  ;;  %v10008_v39 = vld [vmem:[%s12988_s0 + $0x70] sm:$0xff]  }
  0x5f   :  { %v13300_v22 = vsel %vm9980_vm8, 4294967295, %v13299_v22  ;;  %13302 = vst [vmem:[#allocation51_spill] sm:$0xff] %v9986_v41  ;;  %8700 = vmatmul.mubr.msk.bf16.gmra.mrb[28].mxu0 %vm9980_vm8, %v9986_v41  ;;  %v9995_v6 = vsel %vm13303_vm14, %v528_v40, %v529_v48  ;;  %vm13081_vm12 = vcmp.lt.s32.totalorder %v9975_v5, 16  ;;  %vm13304_vm5 = vmmov %vm13303_vm14  ;;  %v50_v63 = vadd.s32 200, %v9160_v8 }
  0x60   :  { %13301 = vst [vmem:[#allocation50_spill] sm:$0xff] %v13300_v22  ;;  %1631 = vmatprep.mubr.bf16.mxu0 %v9620_v57  ;;  %v10001_v10 = vsel %vm13304_vm5, %v529_v48, %v530_v35  ;;  %v499_v60 = vunpack.c.l.bf16 %v9966_v56  ;;  %vm13305_vm14 = vcmp.lt.s32.totalorder %v9730_v30, 16  ;;  %v13306_v40 = vmov 0  ;;  %821 = vst [vmem:[#allocation2 + $0x108] sm:$0xff] %v805_v29 }
  0x61   :  { %vm10013_vm13 = vmpackc.low %vm13305_vm14, %vm13281_vm11  ;;  %v10019_v48 = vpack.c.bf16 %v9728_v17, %v9697_v34  ;;  %v1218_v33 = vsel %vm13081_vm12, %v9973_v20, 0.0  ;;  %v10027_v57 = vadd.s32 4294967295, %v229_v55  ;;  %vm13311_vm5 = vcmp.lt.s32.totalorder %v9160_v8, 7  ;;  %936 = vst [vmem:[#allocation2 + $0x158] sm:$0xff] %v10008_v39 }
  0x62   :  { %v13307_v40 = vsel %vm10013_vm13, 4294967295, %v13306_v40  ;;  %v10031_v30 = vsel %vm13311_vm5, %v962_v1, %v963_v50  ;;  %v500_v22 = vunpack.c.h.bf16 %v9966_v56  ;;  %v1238_v34 = vpack.c.bf16 %v1218_v33, %v9944_v13 }
  0x63   :  { %13308 = vst [vmem:[#allocation52_spill] sm:$0xff] %v13307_v40  ;;  %13309 = vst [vmem:[#allocation53_spill] sm:$0xff] %v10019_v48  ;;  %8703 = vmatmul.mubr.msk.bf16.gmra.mrb[28].mxu1 %vm10013_vm13, %v10019_v48  ;;  %v236_v17 = vand.u32 15, %v50_v63  ;;  %v964_v41 = vrot.slane %v499_v60, 1  ;;  %vm13082_vm14 = vcmp.ge.s32.totalorder %v10027_v57, 0  ;;  %v51_v55 = vadd.s32 208, %v9160_v8 }
  0x64   :  { %13310 = vst [vmem:[#allocation54_spill] sm:$0xff] %v10027_v57  ;;  %7770 = vmatprep.mubr.msk.bf16.mxu1 %vm13274_vm0, %v13261_v53  ;;  %v532_v29 = vrot.slane %v500_v22, 7  ;;  %v965_v61 = vrot.slane %v500_v22, 1  ;;  %1254 = vst [vmem:[#allocation2 + $0x118] sm:$0xff] %v1238_v34  ;;  %v786_v1 = vsel %vm13082_vm14, %v9995_v6, 0.0  ;;  %v531_v63 = vrot.slane %v499_v60, 7 }
  0x65   :  { %v10044_v37 = vsel %vm13311_vm5, %v963_v50, %v964_v41  ;;  %v10046_v47 = vadd.s32 1, %v236_v17  ;;  %v806_v33 = vpack.c.bf16 %v10001_v10, %v786_v1  ;;  %v243_v40 = vand.u32 15, %v51_v55 }
  0x66   :  { %v52_v22 = vadd.s32 216, %v9160_v8  ;;  %v501_v34 = vunpack.c.l.bf16 %v10008_v39  ;;  %vm13313_vm14 = vcmp.lt.s32.totalorder %v9160_v8, 1  ;;  %vm13315_vm10 = vcmp.ge.s32.totalorder %v9773_v28, 0 }
  0x67   :  { %13312 = vst [vmem:[#allocation55_spill] sm:$0xff] %v10046_v47  ;;  %vm13089_vm12 = vcmp.lt.s32.totalorder %v10046_v47, 16  ;;  %v10055_v48 = vsel %vm13313_vm14, %v531_v63, %v532_v29  ;;  %vm13314_vm5 = vmmov %vm13313_vm14  ;;  %v13316_v60 = vmov 0  ;;  %v10070_v17 = vpack.c.bf16 %v9759_v18, %v9740_v62 }
  0x68   :  { %v10059_v50 = vsel %vm13314_vm5, %v530_v35, %v531_v63  ;;  %vm10064_vm9 = vmpackc.low %vm13281_vm11, %vm13315_vm10  ;;  %822 = vst [vmem:[#allocation2 + $0x120] sm:$0xff] %v806_v33  ;;  %v1220_v35 = vsel %vm13089_vm12, %v10044_v37, 0.0  ;;  %v10078_v55 = vadd.s32 4294967295, %v243_v40  ;;  %v250_v1 = vand.u32 15, %v52_v22 }
  0x69   :  { %v13317_v60 = vsel %vm10064_vm9, 4294967295, %v13316_v60  ;;  %13319 = vst [vmem:[#allocation57_spill] sm:$0xff] %v10070_v17  ;;  %8706 = vmatmul.mubr.msk.bf16.gmra.mrb[32].mxu0 %vm10064_vm9, %v10070_v17  ;;  %v966_v63 = vrot.slane %v501_v34, 1  ;;  %v1239_v28 = vpack.c.bf16 %v1220_v35, %v10031_v30  ;;  %v502_v62 = vunpack.c.h.bf16 %v10008_v39 }
  0x6a   :  { %13318 = vst [vmem:[#allocation56_spill] sm:$0xff] %v13317_v60  ;;  %13320 = vst [vmem:[#allocation58_spill] sm:$0xff] %v10078_v55  ;;  %1639 = vmatprep.mubr.bf16.mxu0 %v9707_v15  ;;  %v53_v18 = vadd.s32 224, %v9160_v8  ;;  %vm13321_vm10 = vcmp.lt.s32.totalorder %v9790_v31, 16  ;;  %v13322_v33 = vmov 0  ;;  %v10093_v40 = vpack.c.bf16 %v9788_v42, %v9777_v46 }
  0x6b   :  { %vm10087_vm14 = vmpackc.low %vm13321_vm10, %vm13281_vm11  ;;  %vm13097_vm5 = vcmp.ge.s32.totalorder %v10078_v55, 0  ;;  %vm13326_vm12 = vcmp.lt.s32.totalorder %v9160_v8, 7  ;;  %v10103_v35 = vadd.s32 1, %v250_v1  ;;  %v533_v31 = vrot.slane %v501_v34, 7  ;;  %v10108_v15 = vld [vmem:[%s12988_s0 + $0x78] sm:$0xf] }
  0x6c   :  { %v13323_v33 = vsel %vm10087_vm14, 4294967295, %v13322_v33  ;;  %13325 = vst [vmem:[#allocation60_spill] sm:$0xff] %v10093_v40  ;;  %8709 = vmatmul.mubr.msk.bf16.gmra.mrb[32].mxu1 %vm10087_vm14, %v10093_v40  ;;  %v10101_v22 = vsel %vm13326_vm12, %v965_v61, %v966_v63  ;;  %1255 = vst [vmem:[#allocation2 + $0x130] sm:$0xff] %v1239_v28  ;;  %v788_v46 = vsel %vm13097_vm5, %v10059_v50, 0.0  ;;  %v10119_v1 = vrot.slane %v502_v62, 7 }
  0x6d   :  { %13324 = vst [vmem:[#allocation59_spill] sm:$0xff] %v13323_v33  ;;  %13327 = vst [vmem:[#allocation61_spill] sm:$0xff] %v10103_v35  ;;  %7774 = vmatprep.mubr.msk.bf16.mxu1 %vm13274_vm0, %v13261_v53  ;;  %v257_v34 = vand.u32 15, %v53_v18  ;;  %v807_v60 = vpack.c.bf16 %v10055_v48, %v788_v46  ;;  %v967_v17 = vrot.slane %v502_v62, 1  ;;  %v54_v28 = vadd.s32 232, %v9160_v8 }
  0x6e   :  { %vm13328_vm10 = vmmov %vm13326_vm12  ;;  %vm13103_vm12 = vcmp.lt.s32.totalorder %v10103_v35, 16  ;;  %vm13329_vm5 = vcmp.lt.s32.totalorder %v9160_v8, 1  ;;  %v13118_v40 = vunpack.c.l.bf16 %v10108_v15 }
  0x6f   :  { %v10117_v42 = vsel %vm13328_vm10, %v964_v41, %v965_v61  ;;  %v1222_v33 = vsel %vm13103_vm12, %v10101_v22, 0.0  ;;  %v10130_v61 = vsel %vm13329_vm5, %v532_v29, %v533_v31  ;;  %v10132_v41 = vadd.s32 4294967295, %v257_v34  ;;  %823 = vst [vmem:[#allocation2 + $0x138] sm:$0xff] %v807_v60  ;;  %vm13331_vm10 = vmmov %vm13329_vm5 }
  0x70   :  { %v1240_v18 = vpack.c.bf16 %v1222_v33, %v10117_v42  ;;  %v10139_v62 = vsel %vm13331_vm10, %v533_v31, %v10119_v1  ;;  %v264_v46 = vand.u32 15, %v54_v28  ;;  %v968_v27 = vrot.slane %v13118_v40, 1 }
  0x71   :  { %13330 = vst [vmem:[#allocation62_spill] sm:$0xff] %v10132_v41  ;;  %vm13109_vm9 = vcmp.ge.s32.totalorder %v10132_v41, 0  ;;  %vm13332_vm5 = vcmp.ge.s32.totalorder %v9827_v54, 0  ;;  %v13333_v29 = vmov 0  ;;  %v10153_v60 = vpack.c.bf16 %v9813_v19, %v9817_v14 }
  0x72   :  { %vm10147_vm12 = vmpackc.low %vm13281_vm11, %vm13332_vm5  ;;  %1256 = vst [vmem:[#allocation2 + $0x148] sm:$0xff] %v1240_v18  ;;  %v790_v31 = vsel %vm13109_vm9, %v10130_v61, 0.0  ;;  %v10161_v33 = vadd.s32 1, %v264_v46  ;;  %vm13337_vm10 = vcmp.lt.s32.totalorder %v9160_v8, 7  ;;  %v13340_v14 = vmov 0 }
  0x73   :  { %v13334_v29 = vsel %vm10147_vm12, 4294967295, %v13333_v29  ;;  %8712 = vmatmul.mubr.msk.bf16.gmra.mrb[36].mxu0 %vm10147_vm12, %v10153_v60  ;;  %v808_v34 = vpack.c.bf16 %v10139_v62, %v790_v31  ;;  %v10167_v28 = vsel %vm13337_vm10, %v967_v17, %v968_v27  ;;  %vm13338_vm5 = vmmov %vm13337_vm10  ;;  %vm13339_vm12 = vcmp.lt.s32.totalorder %v9853_v32, 16 }
  0x74   :  { %13335 = vst [vmem:[#allocation63_spill] sm:$0xff] %v13334_v29  ;;  %13336 = vst [vmem:[#allocation64_spill] sm:$0xff] %v10161_v33  ;;  %1647 = vmatprep.mubr.bf16.mxu0 %v9766_v0  ;;  %v10171_v19 = vsel %vm13338_vm5, %v966_v63, %v967_v17  ;;  %v10182_v18 = vpack.c.bf16 %v9851_v16, %v9821_v2  ;;  %vm13108_vm10 = vcmp.lt.s32.totalorder %v10161_v33, 16  ;;  %v13344_v2 = vmov 0 }
  0x75   :  { %vm10176_vm8 = vmpackc.low %vm13339_vm12, %vm13281_vm11  ;;  %824 = vst [vmem:[#allocation2 + $0x150] sm:$0xff] %v808_v34  ;;  %v1224_v17 = vsel %vm13108_vm10, %v10167_v28, 0.0  ;;  %vm13343_vm12 = vcmp.ge.s32.totalorder %v9878_v3, 0  ;;  %v10203_v16 = vpack.c.bf16 %v9876_v36, %v9868_v12  ;;  %vm13347_vm10 = vcmp.lt.s32.totalorder %v9915_v38, 16 }
  0x76   :  { %v13341_v14 = vsel %vm10176_vm8, 4294967295, %v13340_v14  ;;  %8715 = vmatmul.mubr.msk.bf16.gmra.mrb[36].mxu1 %vm10176_vm8, %v10182_v18  ;;  %v1241_v63 = vpack.c.bf16 %v1224_v17, %v10171_v19  ;;  %vm10197_vm5 = vmpackc.low %vm13281_vm11, %vm13343_vm12  ;;  %v13348_v46 = vmov 0  ;;  %v10218_v31 = vpack.c.bf16 %v9934_v21, %v9884_v44 }
  0x77   :  { %13342 = vst [vmem:[#allocation65_spill] sm:$0xff] %v13341_v14  ;;  %7778 = vmatprep.mubr.msk.bf16.mxu1 %vm13274_vm0, %v13261_v53  ;;  %v13345_v2 = vsel %vm10197_vm5, 4294967295, %v13344_v2  ;;  %vm10212_vm9 = vmpackc.low %vm13347_vm10, %vm13281_vm11  ;;  %vm13351_vm12 = vcmp.ge.s32.totalorder %v9957_v11, 0  ;;  %v13352_v36 = vmov 0  ;;  %v10234_v12 = vpack.c.bf16 %v9951_v51, %v9955_v25 }
  0x78   :  { %1257 = vst [vmem:[#allocation2 + $0x160] sm:$0xff] %v1241_v63  ;;  %13346 = vst [vmem:[#allocation66_spill] sm:$0xff] %v13345_v2  ;;  %v13349_v46 = vsel %vm10212_vm9, 4294967295, %v13348_v46  ;;  %vm13355_vm10 = vcmp.lt.s32.totalorder %v9975_v5, 16  ;;  %v13356_v44 = vmov 0  ;;  %v10249_v21 = vpack.c.bf16 %v9973_v20, %v9944_v13 }
  0x79   :  { %13350 = vst [vmem:[#allocation67_spill] sm:$0xff] %v13349_v46  ;;  %vm10243_vm7 = vmpackc.low %vm13355_vm10, %vm13281_vm11  ;;  %v13360_v51 = vmov 0  ;;  %v10265_v25 = vpack.c.bf16 %v10001_v10, %v9995_v6  ;;  %v56_v13 = vadd.s32 248, %v9160_v8  ;;  %vm13363_vm10 = vcmp.lt.s32.totalorder %v10046_v47, 16  ;;  %v10448_v47 = vld [vmem:[#allocation2 + $0x50] sm:$0xff] }
  0x7a   :  { %v13357_v44 = vsel %vm10243_vm7, 4294967295, %v13356_v44  ;;  %v13364_v20 = vmov 0  ;;  %v10281_v34 = vpack.c.bf16 %v10044_v37, %v10031_v30  ;;  %v13367_v10 = vunpack.c.l.bf16 %v9241_v43 }
  0x7b   :  { %8718 = vmatmul.mubr.msk.bf16.gmra.mrb[40].mxu0 %vm10197_vm5, %v10203_v16  ;;  %vm10228_vm5 = vmpackc.low %vm13281_vm11, %vm13351_vm12  ;;  %13358 = vst [vmem:[#allocation69_spill] sm:$0xff] %v13357_v44  ;;  %vm13359_vm12 = vcmp.ge.s32.totalorder %v10027_v57, 0  ;;  %v278_v6 = vand.u32 15, %v56_v13  ;;  %v55_v37 = vadd.s32 240, %v9160_v8  ;;  %v13371_v43 = vmov 0  ;;  %v13396_v57 = vld [vmem:[#allocation39_spill] sm:$0xff] }
  0x7c   :  { %1655 = vmatprep.mubr.bf16.mxu0 %v9858_v23  ;;  %v13353_v36 = vsel %vm10228_vm5, 4294967295, %v13352_v36  ;;  %v969_v17 = vrot.slane %v13367_v10, 1  ;;  %v10312_v13 = vpack.c.bf16 %v10055_v48, %v10059_v50  ;;  %v13378_v48 = vunpack.c.l.bf16 %v10108_v15 }
  0x7d   :  { %13354 = vst [vmem:[#allocation68_spill] sm:$0xff] %v13353_v36  ;;  %v10290_v63 = vadd.s32 1, %v278_v6  ;;  %v10327_v6 = vpack.c.bf16 %v10101_v22, %v10117_v42  ;;  %v8544_v22 = vld [vmem:[%s12988_s0 + $0x7c] sm:$0xf] }
  0x7e   :  { %8721 = vmatmul.mubr.msk.bf16.gmra.mrb[40].mxu1 %vm10212_vm9, %v10218_v31  ;;  %v535_v50 = vrot.slane %v13378_v48, 7  ;;  %v10348_v42 = vcombine.low %v10108_v15, %v8544_v22  ;;  %v10364_v48 = vpack.c.bf16 %v10139_v62, %v10130_v61  ;;  %v1933_v15 = vld [vmem:[#allocation2 + $0x10] sm:$0xff]  ;;  %v1931_v61 = vld [vmem:[#allocation2] sm:$0xff] }
  0x7f   :  { %7782 = vmatprep.mubr.msk.bf16.mxu1 %vm13274_vm0, %v13261_v53  ;;  %v8504_v62 = vld [vmem:[%s12983_s1 + $0x200] sm:$0xff]  }
  0x80   :  { %v10386_v22 = vld [vmem:[#allocation2 + $0x20] sm:$0xff] }
  0x83   :  { %8724 = vmatmul.mubr.msk.bf16.gmra.mrb[44].mxu0 %vm10228_vm5, %v10234_v12  ;;  %vm10259_vm5 = vmpackc.low %vm13281_vm11, %vm13359_vm12  ;;  %vm13368_vm12 = vcmp.lt.s32.totalorder %v9160_v8, 7 }
  0x84   :  { %1663 = vmatprep.mubr.bf16.mxu0 %v9906_v7  ;;  %v13361_v51 = vsel %vm10259_vm5, 4294967295, %v13360_v51  ;;  %v10295_v40 = vsel %vm13368_vm12, %v969_v17, %v9249_v49  ;;  %v271_v49 = vand.u32 15, %v55_v37 }
  0x85   :  { %13362 = vst [vmem:[#allocation70_spill] sm:$0xff] %v13361_v51 }
  0x86   :  { %8727 = vmatmul.mubr.msk.bf16.gmra.mrb[44].mxu1 %vm10243_vm7, %v10249_v21  ;;  %vm10275_vm7 = vmpackc.low %vm13363_vm10, %vm13281_vm11  ;;  %v10334_v10 = vadd.s32 4294967295, %v271_v49  ;;  %v1932_v49 = vld [vmem:[#allocation2 + $0x8] sm:$0xff] }
  0x87   :  { %7786 = vmatprep.mubr.msk.bf16.mxu1 %vm13274_vm0, %v13261_v53  ;;  %v13365_v20 = vsel %vm10275_vm7, 4294967295, %v13364_v20 }
  0x88   :  { %13366 = vst [vmem:[#allocation71_spill] sm:$0xff] %v13365_v20 }
  0x8b   :  { %8730 = vmatmul.mubr.msk.bf16.gmra.mrb[48].mxu0 %vm10259_vm5, %v10265_v25  ;;  %vm13369_vm5 = vmmov %vm13368_vm12 }
  0x8c   :  { %1671 = vmatprep.mubr.bf16.mxu0 %v9966_v56  ;;  %v10301_v30 = vsel %vm13369_vm5, %v968_v27, %v969_v17  ;;  %vm13374_vm5 = vcmp.lt.s32.totalorder %v10103_v35, 16  ;;  %v13375_v27 = vmov 0  ;;  %v8506_v35 = vld [vmem:[%s12983_s1 + $0x210] sm:$0xff]  }
  0x8d   :  { %vm10321_vm12 = vmpackc.low %vm13374_vm5, %vm13281_vm11 }
  0x8e   :  { %8733 = vmatmul.mubr.msk.bf16.gmra.mrb[48].mxu1 %vm10275_vm7, %v10281_v34  ;;  %vm13370_vm7 = vcmp.ge.s32.totalorder %v10078_v55, 0  ;;  %v13376_v27 = vsel %vm10321_vm12, 4294967295, %v13375_v27  ;;  %v10416_v55 = vld [vmem:[#allocation2 + $0x38] sm:$0xff] }
  0x8f   :  { %7790 = vmatprep.mubr.msk.bf16.mxu1 %vm13274_vm0, %v13261_v53  ;;  %vm10306_vm6 = vmpackc.low %vm13281_vm11, %vm13370_vm7  ;;  %13377 = vst [vmem:[#allocation73_spill] sm:$0xff] %v13376_v27  ;;  %vm13379_vm7 = vcmp.lt.s32.totalorder %v9160_v8, 1 }
  0x90   :  { %v13372_v43 = vsel %vm10306_vm6, 4294967295, %v13371_v43  ;;  %v10341_v17 = vsel %vm13379_vm7, %v10119_v1, %v535_v50  ;;  %vm13380_vm10 = vmmov %vm13379_vm7  ;;  %v13382_v1 = vmov 0 }
  0x91   :  { %13373 = vst [vmem:[#allocation72_spill] sm:$0xff] %v13372_v43  ;;  %v10353_v37 = vsel %vm13380_vm10, %v535_v50, %v9256_v52  ;;  %vm13385_vm10 = vcmp.lt.s32.totalorder %v10161_v33, 16  ;;  %v13386_v52 = vmov 0  ;;  %v10378_v50 = vpack.c.bf16 %v10167_v28, %v10171_v19  ;;  %v8509_v33 = vld [vmem:[%s12983_s1 + $0x180] sm:$0xff]   ;;  %v8511_v19 = vld [vmem:[%s12983_s1 + $0x1c8] sm:$0xff]  }
  0x92   :  { %vm10372_vm5 = vmpackc.low %vm13385_vm10, %vm13281_vm11  ;;  %v10393_v28 = vld [vmem:[#allocation2 + $0x40] sm:$0xff]  ;;  %vm13400_vm10 = vnez %v13357_v44 }
  0x93   :  { %8736 = vmatmul.mubr.msk.bf16.gmra.mrb[52].mxu0 %vm10306_vm6, %v10312_v13  ;;  %v13387_v52 = vsel %vm10372_vm5, 4294967295, %v13386_v52 }
  0x94   :  { %1679 = vmatprep.mubr.bf16.mxu0 %v10008_v39  ;;  %13388 = vst [vmem:[#allocation75_spill] sm:$0xff] %v13387_v52 }
  0x96   :  { %8739 = vmatmul.mubr.msk.bf16.gmra.mrb[52].mxu1 %vm10321_vm12, %v10327_v6 }
  0x97   :  { %7794 = vmatprep.mubr.msk.bf16.mxu1 %vm13274_vm0, %v13261_v53  ;;  %vm13381_vm0 = vcmp.ge.s32.totalorder %v10132_v41, 0  ;;  %v10411_v41 = vld [vmem:[#allocation2 + $0x18] sm:$0xff] }
  0x98   :  { %vm10358_vm7 = vmpackc.low %vm13281_vm11, %vm13381_vm0 }
  0x99   :  { %v13383_v1 = vsel %vm10358_vm7, 4294967295, %v13382_v1 }
  0x9a   :  { %13384 = vst [vmem:[#allocation74_spill] sm:$0xff] %v13383_v1 }
  0x9b   :  { %8742 = vmatmul.mubr.msk.bf16.gmra.mrb[56].mxu0 %vm10358_vm7, %v10364_v48 }
  0x9c   :  { %2204 = vmatprep.mubr.bf16.mxu0 %v1932_v49  ;;  %v10388_v49 = vld [vmem:[#allocation2 + $0x28] sm:$0xff] }
  0x9e   :  { %8745 = vmatmul.mubr.msk.bf16.gmra.mrb[56].mxu1 %vm10372_vm5, %v10378_v50 }
  0x9f   :  { %7814 = vmatprep.mubr.bf16.mxu1 %v1933_v15  ;;  %v8505_v15 = vld [vmem:[%s12983_s1 + $0x208] sm:$0xff]  }
  0xa3   :  { %2205 = vmatmul.mubr.bf16.vlgmr.msra.gmra.mrb[60].mxu0 %v1931_v61  ;;  %v8512_v61 = vld [vmem:[%s12983_s1 + $0x188] sm:$0xff]  }
  0xa4   :  { %7847 = vmatpush3.bf16.msra.mxu0 %v8504_v62  ;;  %2212 = vmatprep.mubr.bf16.mxu0 %v10386_v22  ;;  %v8513_v62 = vld [vmem:[%s12983_s1 + $0x1d0] sm:$0xff]  }
  0xa5   :  { %7848 = vmatprep.subr.bf16.mxu0 %v13261_v53 }
  0xa6   :  { %7815 = vmatmul.mubr.bf16.vlgmr.msra.gmra.mrb[60].mxu1 %v10388_v49 }
  0xa7   :  { %7818 = vmatprep.mubr.bf16.mxu1 %v10393_v28  ;;  %7132 = vmatpush3.bf16.msra.mxu1 %v8509_v33  ;;  %v8514_v33 = vld [vmem:[%s12983_s1 + $0x190] sm:$0xff]  }
  0xa8   :  { %7133 = vmatprep.subr.bf16.mxu1 %v8511_v19  ;;  %7849 = vmatpush3.bf16.msra.mxu0 %v8505_v15  ;;  %v8516_v19 = vld [vmem:[%s12983_s1 + $0x1d8] sm:$0xff]  }
  0xa9   :  { %7850 = vmatprep.subr.bf16.mxu0 %v13261_v53  ;;  %v8507_v15 = vld [vmem:[%s12983_s1 + $0x218] sm:$0xff]  }
  0xab   :  { %7134 = vmatpush3.bf16.msra.mxu1 %v8512_v61  ;;  %2213 = vmatmul.mubr.bf16.gmra.mrb[64].mxu0 %v10411_v41  ;;  %v8517_v61 = vld [vmem:[%s12983_s1 + $0x198] sm:$0xff]  }
  0xac   :  { %7135 = vmatprep.subr.bf16.mxu1 %v8513_v62  ;;  %2220 = vmatprep.mubr.bf16.mxu0 %v10416_v55  ;;  %v10443_v62 = vld [vmem:[#allocation2 + $0x30] sm:$0xff] }
  0xad   :  { %7851 = vmatpush3.bf16.msra.mxu0 %v8506_v35  ;;  %v8518_v35 = vld [vmem:[%s12983_s1 + $0x1e0] sm:$0xff]  }
  0xae   :  { %8748 = vmatmul.mubr.msk.bf16.gmra.mrb[64].mxu1 %vm9654_vm3, %v9660_v59  ;;  %7852 = vmatprep.subr.bf16.mxu0 %v13261_v53  ;;  %v8510_v59 = vld [vmem:[%s12983_s1 + $0x220] sm:$0xff]  }
  0xaf   :  { %8751 = vmatprep.mubr.msk.bf16.mxu1 %vm9745_vm15, %v9751_v9  ;;  %7136 = vmatpush3.bf16.msra.mxu1 %v8514_v33  ;;  %v8519_v9 = vld [vmem:[%s12983_s1 + $0x1a0] sm:$0xff]   ;;  %v8521_v33 = vld [vmem:[%s12983_s1 + $0x1e8] sm:$0xff]  }
  0xb0   :  { %7137 = vmatprep.subr.bf16.mxu1 %v8516_v19  ;;  %v8515_v19 = vld [vmem:[%s12983_s1 + $0x228] sm:$0xff]  }
  0xb1   :  { %7853 = vmatpush3.bf16.msra.mxu0 %v8507_v15  ;;  %v13390_v15 = vld [vmem:[#allocation53_spill] sm:$0xff] }
  0xb2   :  { %7854 = vmatprep.subr.bf16.mxu0 %v13261_v53 }
  0xb3   :  { %7138 = vmatpush3.bf16.msra.mxu1 %v8517_v61  ;;  %2221 = vmatmul.mubr.bf16.gmra.mrb[68].mxu0 %v10443_v62  ;;  %v8522_v61 = vld [vmem:[%s12983_s1 + $0x1a8] sm:$0xff]  }
  0xb4   :  { %7139 = vmatprep.subr.bf16.mxu1 %v8518_v35  ;;  %2228 = vmatprep.mubr.bf16.mxu0 %v10448_v47  ;;  %v8523_v35 = vld [vmem:[%s12983_s1 + $0x1f0] sm:$0xff]  }
  0xb5   :  { %7855 = vmatpush3.bf16.msra.mxu0 %v8510_v59  ;;  %v1940_v59 = vld [vmem:[#allocation2 + $0x48] sm:$0xff] }
  0xb6   :  { %8754 = vmatmul.mubr.msk.bf16.gmra.mrb[68].mxu1 %vm9832_vm1, %v9838_v45  ;;  %7856 = vmatprep.subr.bf16.mxu0 %v13261_v53  ;;  %v8520_v45 = vld [vmem:[%s12983_s1 + $0x230] sm:$0xff]  }
  0xb7   :  { %8757 = vmatprep.mubr.msk.bf16.mxu1 %vm9920_vm2, %v9926_v24  ;;  %7140 = vmatpush3.bf16.msra.mxu1 %v8519_v9  ;;  %v8524_v24 = vld [vmem:[%s12983_s1 + $0x1b0] sm:$0xff]   ;;  %v8526_v9 = vld [vmem:[%s12983_s1 + $0x1f8] sm:$0xff]  }
  0xb8   :  { %7141 = vmatprep.subr.bf16.mxu1 %v8521_v33  ;;  %v8545_v33 = vld [vmem:[#allocation2 + $0x68] sm:$0xff] }
  0xb9   :  { %7857 = vmatpush3.bf16.msra.mxu0 %v8515_v19  ;;  %v8525_v19 = vld [vmem:[%s12983_s1 + $0x238] sm:$0xff]  }
  0xba   :  { %7858 = vmatprep.subr.bf16.mxu0 %v13261_v53 }
  0xbb   :  { %7142 = vmatpush3.bf16.msra.mxu1 %v8522_v61  ;;  %2229 = vmatmul.mubr.bf16.gmra.mrb[72].mxu0 %v1940_v59  ;;  %v13392_v61 = vld [vmem:[#allocation60_spill] sm:$0xff] }
  0xbc   :  { %7143 = vmatprep.subr.bf16.mxu1 %v8523_v35  ;;  %2236 = vmatprep.mubr.bf16.mxu0 %v8545_v33  ;;  %v8527_v35 = vld [vmem:[%s12983_s1 + $0x1b8] sm:$0xff]  }
  0xbd   :  { %7859 = vmatpush3.bf16.msra.mxu0 %v8520_v45  ;;  %v13394_v45 = vld [vmem:[#allocation33_spill] sm:$0xff]  ;;  %v2602_v33 = vld [vmem:[#allocation2 + $0x78] sm:$0xff] }
  0xbe   :  { %8760 = vmatmul.mubr.msk.bf16.gmra.mrb[72].mxu1 %vm10013_vm13, %v13390_v15  ;;  %7860 = vmatprep.subr.bf16.mxu0 %v13261_v53  ;;  %v13405_v15 = vld [vmem:[#allocation23_spill] sm:$0xff] }
  0xbf   :  { %8763 = vmatprep.mubr.msk.bf16.mxu1 %vm10087_vm14, %v13392_v61  ;;  %7144 = vmatpush3.bf16.msra.mxu1 %v8524_v24  ;;  %v13397_v24 = vld [vmem:[#allocation38_spill] sm:$0xff]  ;;  %vm13401_vm14 = vnez %v13365_v20 }
  0xc0   :  { %7145 = vmatprep.subr.bf16.mxu1 %v8526_v9  ;;  %vm13398_vm0 = vnez %v13397_v24  ;;  %v13399_v9 = vld [vmem:[#allocation18_spill] sm:$0xff] }
  0xc1   :  { %7861 = vmatpush3.bf16.msra.mxu0 %v8525_v19  ;;  %v13402_v19 = vld [vmem:[#allocation45_spill] sm:$0xff]  ;;  %v13409_v61 = vld [vmem:[#allocation26_spill] sm:$0xff] }
  0xc3   :  { %7146 = vmatpush3.bf16.msra.mxu1 %v8527_v35  ;;  %8766 = vmatmul.mubr.msk.bf16.gmra.mrb[76].mxu0 %vm9712_vm4, %v13394_v45  ;;  %v13415_v35 = vld [vmem:[#allocation56_spill] sm:$0xff]  ;;  %v13417_v45 = vld [vmem:[#allocation31_spill] sm:$0xff] }
  0xc4   :  { %2244 = vmatprep.mubr.bf16.mxu0 %v8546_v4 }
  0xc6   :  { %8769 = vmatmul.mubr.msk.bf16.gmra.mrb[76].mxu1 %vm10176_vm8, %v10182_v18  ;;  %v13403_v18 = vld [vmem:[#allocation44_spill] sm:$0xff] }
  0xc7   :  { %8772 = vmatprep.mubr.msk.bf16.mxu1 %vm10212_vm9, %v10218_v31  ;;  %vm13404_vm8 = vnez %v13403_v18  ;;  %v13406_v31 = vld [vmem:[#allocation51_spill] sm:$0xff] }
  0xcb   :  { %8775 = vmatmul.mubr.msk.bf16.gmra.mrb[80].mxu0 %vm13398_vm0, %v13396_v57 }
  0xcc   :  { %2252 = vmatprep.mubr.bf16.mxu0 %v13399_v9 }
  0xce   :  { %8778 = vmatmul.mubr.msk.bf16.gmra.mrb[80].mxu1 %vm13400_vm10, %v10249_v21  ;;  %v13407_v21 = vld [vmem:[#allocation50_spill] sm:$0xff]  ;;  %vm13416_vm10 = vnez %v13415_v35 }
  0xcf   :  { %8781 = vmatprep.mubr.msk.bf16.mxu1 %vm13401_vm14, %v10281_v34  ;;  %vm13408_vm0 = vnez %v13407_v21  ;;  %vm13410_vm14 = vcmp.lt.s32.totalorder %v10290_v63, 16  ;;  %v13411_v34 = vmov 0 }
  0xd3   :  { %8784 = vmatmul.mubr.msk.bf16.gmra.mrb[84].mxu0 %vm13404_vm8, %v13402_v19  ;;  %vm10534_vm8 = vmpackc.low %vm13410_vm14, %vm13281_vm11  ;;  %vm13419_vm14 = vnez %v13345_v2 }
  0xd4   :  { %2260 = vmatprep.mubr.bf16.mxu0 %v13405_v15  ;;  %v13412_v34 = vsel %vm10534_vm8, 4294967295, %v13411_v34 }
  0xd5   :  { %13413 = vst [vmem:[#allocation53_spill] sm:$0xff] %v13412_v34 }
  0xd6   :  { %8787 = vmatmul.mubr.msk.bf16.gmra.mrb[84].mxu1 %vm10321_vm12, %v10327_v6  ;;  %v10540_v6 = vpack.c.bf16 %v10295_v40, %v10301_v30  ;;  %v2600_v40 = vld [vmem:[#allocation2 + $0x68] sm:$0xff] }
  0xd7   :  { %8790 = vmatprep.mubr.msk.bf16.mxu1 %vm10372_vm5, %v10378_v50  ;;  %v13414_v50 = vld [vmem:[#allocation57_spill] sm:$0xff] }
  0xdb   :  { %8793 = vmatmul.mubr.msk.bf16.gmra.mrb[88].mxu0 %vm13408_vm0, %v13406_v31  ;;  %vm13418_vm0 = vnez %v13334_v29 }
  0xdc   :  { %2268 = vmatprep.mubr.bf16.mxu0 %v13409_v61 }
  0xde   :  { %8796 = vmatmul.mubr.msk.bf16.gmra.mrb[88].mxu1 %vm10534_vm8, %v10540_v6 }
  0xdf   :  { %2860 = vmatprep.mubr.bf16.mxu1 %v10386_v22 }
  0xe3   :  { %8799 = vmatmul.mubr.msk.bf16.gmra.mrb[92].mxu0 %vm13416_vm10, %v13414_v50  ;;  %vm13420_vm10 = vnez %v13353_v36 }
  0xe4   :  { %2276 = vmatprep.mubr.bf16.mxu0 %v13417_v45 }
  0xe6   :  { %2861 = vmatmul.mubr.bf16.vlgmr.msra.gmra.mrb[92].mxu1 %v10411_v41  ;;  %v2603_v41 = vld [vmem:[#allocation2 + $0x80] sm:$0xff] }
  0xe7   :  { %2868 = vmatprep.mubr.bf16.mxu1 %v10416_v55  ;;  %v2599_v55 = vld [vmem:[#allocation2 + $0x60] sm:$0xff] }
  0xeb   :  { %8802 = vmatmul.mubr.msk.bf16.gmra.mrb[96].mxu0 %vm13418_vm0, %v10153_v60  ;;  %vm13421_vm0 = vnez %v13361_v51 }
  0xec   :  { %2284 = vmatprep.mubr.bf16.mxu0 %v9766_v0 }
  0xee   :  { %2869 = vmatmul.mubr.bf16.gmra.mrb[96].mxu1 %v10443_v62 }
  0xef   :  { %2876 = vmatprep.mubr.bf16.mxu1 %v10448_v47 }
  0xf3   :  { %8805 = vmatmul.mubr.msk.bf16.gmra.mrb[100].mxu0 %vm13419_vm14, %v10203_v16  ;;  %vm13422_vm14 = vcmp.ge.s32.totalorder %v10334_v10, 0 }
  0xf4   :  { %2292 = vmatprep.mubr.bf16.mxu0 %v9858_v23 }
  0xf5   :  { %v6882_v0 = vpop.f32.mrb[0].mxu0 }
  0xf6   :  { %2877 = vmatmul.mubr.bf16.gmra.mrb[100].mxu1 %v1940_v59  ;;  %v6883_v47 = vpop.f32.mrb[1].mxu0 }
  0xf7   :  { %2884 = vmatprep.mubr.bf16.mxu1 %v2600_v40  ;;  %v6884_v60 = vadd.f32 %v6883_v47, %v6882_v0  ;;  %v6885_v63 = vpop.f32.mrb[2].mxu0  ;;  %v1722_v16 = vpop.f32.mrb[0].mxu1 }
  0xf8   :  { %v6886_v30 = vpop.f32.mrb[3].mxu0  ;;  %v7740_v22 = vpop.f32.mrb[1].mxu1 }
  0xf9   :  { %v6887_v23 = vadd.f32 %v6886_v30, %v6885_v63  ;;  %v10566_v62 = vadd.f32 %v6884_v60, %v1722_v16  ;;  %v1725_v59 = vpop.f32.mrb[2].mxu1 }
  0xfb   :  { %8808 = vmatmul.mubr.msk.bf16.gmra.mrb[104].mxu0 %vm13420_vm10, %v10234_v12  ;;  %v7741_v12 = vpop.f32.mrb[3].mxu1  ;;  %v10571_v4 = vadd.f32 %v6887_v23, %v1725_v59  ;;  %vm10595_vm10 = vmpackc.low %vm13281_vm11, %vm13422_vm14 }
  0xfc   :  { %2300 = vmatprep.mubr.bf16.mxu0 %v9906_v7  ;;  %v2606_v7 = vld [vmem:[#allocation2 + $0x98] sm:$0xff] }
  0xfd   :  { %v6888_v57 = vpop.f32.mrb[4].mxu0 }
  0xfe   :  { %2885 = vmatmul.mubr.bf16.gmra.mrb[104].mxu1 %v2599_v55  ;;  %v6889_v24 = vpop.f32.mrb[5].mxu0 }
  0xff   :  { %2892 = vmatprep.mubr.bf16.mxu1 %v2603_v41  ;;  %v6890_v9 = vadd.f32 %v6889_v24, %v6888_v57  ;;  %v6891_v19 = vpop.f32.mrb[6].mxu0 }
 0x100   :  { %v1730_v18 = vpop.f32.mrb[4].mxu1  ;;  %v6892_v15 = vpop.f32.mrb[7].mxu0 }
 0x101   :  { %v7744_v31 = vpop.f32.mrb[5].mxu1  ;;  %v6893_v21 = vadd.f32 %v6892_v15, %v6891_v19  ;;  %v10574_v61 = vadd.f32 %v6890_v9, %v1730_v18 }
 0x102   :  { %v1733_v50 = vpop.f32.mrb[6].mxu1 }
 0x103   :  { %8811 = vmatmul.mubr.msk.bf16.gmra.mrb[108].mxu0 %vm13421_vm0, %v10265_v25  ;;  %v2605_v25 = vld [vmem:[#allocation2 + $0x90] sm:$0xff]  ;;  %v7745_v35 = vpop.f32.mrb[7].mxu1  ;;  %v10579_v45 = vadd.f32 %v6893_v21, %v1733_v50  ;;  %v13423_v21 = vmov 0  ;;  %v10601_v50 = vpack.c.bf16 %v10353_v37, %v10341_v17  ;;  %vm13426_vm0 = vmmov 0  }
 0x104   :  { %2308 = vmatprep.mubr.bf16.mxu0 %v9966_v56  ;;  %v2609_v56 = vld [vmem:[#allocation2 + $0xb0] sm:$0xff]  ;;  %v13424_v21 = vsel %vm10595_vm10, 4294967295, %v13423_v21  ;;  %v2615_v35 = vld [vmem:[#allocation2 + $0xe0] sm:$0xff] }
 0x105   :  { %v6894_v40 = vpop.f32.mrb[8].mxu0  ;;  %13425 = vst [vmem:[#allocation60_spill] sm:$0xff] %v13424_v21 }
 0x106   :  { %2893 = vmatmul.mubr.bf16.gmra.mrb[108].mxu1 %v2602_v33  ;;  %v6895_v55 = vpop.f32.mrb[9].mxu0 }
 0x107   :  { %2900 = vmatprep.mubr.bf16.mxu1 %v2606_v7  ;;  %v6896_v41 = vadd.f32 %v6895_v55, %v6894_v40  ;;  %v6897_v0 = vpop.f32.mrb[10].mxu0 }
 0x108   :  { %v1738_v47 = vpop.f32.mrb[8].mxu1  ;;  %v6898_v60 = vpop.f32.mrb[11].mxu0 }
 0x109   :  { %v7748_v63 = vpop.f32.mrb[9].mxu1  ;;  %v6899_v16 = vadd.f32 %v6898_v60, %v6897_v0  ;;  %v10582_v30 = vadd.f32 %v6896_v41, %v1738_v47 }
 0x10a   :  { %v1741_v22 = vpop.f32.mrb[10].mxu1 }
 0x10b   :  { %8814 = vmatmul.mubr.msk.bf16.gmra.mrb[112].mxu0 %vm10306_vm6, %v10312_v13  ;;  %v2608_v13 = vld [vmem:[#allocation2 + $0xa8] sm:$0xff]  ;;  %v7749_v23 = vpop.f32.mrb[11].mxu1  ;;  %v10587_v59 = vadd.f32 %v6899_v16, %v1741_v22  ;;  %v2614_v16 = vld [vmem:[#allocation2 + $0xd8] sm:$0xff] }
 0x10c   :  { %2316 = vmatprep.mubr.bf16.mxu0 %v10008_v39  ;;  %v2612_v39 = vld [vmem:[#allocation2 + $0xc8] sm:$0xff] }
 0x10d   :  { %v6900_v33 = vpop.f32.mrb[12].mxu0 }
 0x10e   :  { %2901 = vmatmul.mubr.bf16.gmra.mrb[112].mxu1 %v2605_v25  ;;  %v6901_v12 = vpop.f32.mrb[13].mxu0 }
 0x10f   :  { %2908 = vmatprep.mubr.bf16.mxu1 %v2609_v56  ;;  %v6902_v7 = vadd.f32 %v6901_v12, %v6900_v33  ;;  %v6903_v57 = vpop.f32.mrb[14].mxu0 }
 0x110   :  { %v1746_v24 = vpop.f32.mrb[12].mxu1  ;;  %v6904_v9 = vpop.f32.mrb[15].mxu0 }
 0x111   :  { %v7752_v19 = vpop.f32.mrb[13].mxu1  ;;  %v6905_v18 = vadd.f32 %v6904_v9, %v6903_v57  ;;  %v10590_v15 = vadd.f32 %v6902_v7, %v1746_v24 }
 0x112   :  { %v1749_v31 = vpop.f32.mrb[14].mxu1 }
 0x113   :  { %8817 = vmatmul.mubr.msk.bf16.gmra.mrb[116].mxu0 %vm10358_vm7, %v10364_v48  ;;  %v2611_v48 = vld [vmem:[#allocation2 + $0xc0] sm:$0xff]  ;;  %v7753_v25 = vpop.f32.mrb[15].mxu1  ;;  %v10606_v56 = vadd.f32 %v6905_v18, %v1749_v31  ;;  %v2617_v31 = vld [vmem:[#allocation2 + $0xf0] sm:$0xff] }
 0x114   :  { %2324 = vmatprep.mubr.bf16.mxu0 %v10348_v42  ;;  %v2621_v25 = vld [vmem:[#allocation2 + $0x110] sm:$0xff] }
 0x115   :  { %v6906_v10 = vpop.f32.mrb[16].mxu0 }
 0x116   :  { %2909 = vmatmul.mubr.bf16.gmra.mrb[116].mxu1 %v2608_v13  ;;  %v6907_v40 = vpop.f32.mrb[17].mxu0  ;;  %v2618_v13 = vld [vmem:[#allocation2 + $0xf8] sm:$0xff] }
 0x117   :  { %2916 = vmatprep.mubr.bf16.mxu1 %v2612_v39  ;;  %v6908_v55 = vadd.f32 %v6907_v40, %v6906_v10  ;;  %v6909_v41 = vpop.f32.mrb[18].mxu0 }
 0x118   :  { %v1754_v0 = vpop.f32.mrb[16].mxu1  ;;  %v6910_v17 = vpop.f32.mrb[19].mxu0 }
 0x119   :  { %v7756_v37 = vpop.f32.mrb[17].mxu1  ;;  %v6911_v47 = vadd.f32 %v6910_v17, %v6909_v41  ;;  %v10610_v60 = vadd.f32 %v6908_v55, %v1754_v0  ;;  %v2598_v17 = vld [vmem:[#allocation2 + $0x58] sm:$0xff] }
 0x11a   :  { %v1757_v63 = vpop.f32.mrb[18].mxu1 }
 0x11b   :  { %8820 = vmatmul.mubr.msk.bf16.gmra.mrb[120].mxu0 %vm10595_vm10, %v10601_v50  ;;  %v7757_v22 = vpop.f32.mrb[19].mxu1  ;;  %v10613_v23 = vadd.f32 %v6911_v47, %v1757_v63 }
 0x11c   :  { %7862 = vmatprep.mubr.msk.bf16.mxu0 %vm13426_vm0, %v13261_v53  ;;  %v2620_v22 = vld [vmem:[#allocation2 + $0x108] sm:$0xff] }
 0x11e   :  { %2917 = vmatmul.mubr.bf16.gmra.mrb[120].mxu1 %v2611_v48  ;;  %v6912_v39 = vpop.f32.mrb[20].mxu0 }
 0x11f   :  { %2924 = vmatprep.mubr.bf16.mxu1 %v2615_v35  ;;  %v6913_v33 = vpop.f32.mrb[21].mxu0 }
 0x120   :  { %v6914_v12 = vadd.f32 %v6913_v33, %v6912_v39  ;;  %v6915_v7 = vpop.f32.mrb[22].mxu0  ;;  %v2624_v39 = vld [vmem:[#allocation2 + $0x128] sm:$0xff] }
 0x121   :  { %v1762_v57 = vpop.f32.mrb[20].mxu1  ;;  %v6916_v24 = vpop.f32.mrb[23].mxu0 }
 0x122   :  { %v7760_v9 = vpop.f32.mrb[21].mxu1  ;;  %v6917_v19 = vadd.f32 %v6916_v24, %v6915_v7  ;;  %v10617_v18 = vadd.f32 %v6914_v12, %v1762_v57 }
 0x123   :  { %7863 = vmatmul.mubr.bf16.vlgmr.msra.gmra.mrb[124].mxu0 %v10388_v49  ;;  %v1765_v49 = vpop.f32.mrb[22].mxu1 }
 0x124   :  { %7866 = vmatprep.mubr.msk.bf16.mxu0 %vm13426_vm0, %v13261_v53  ;;  %v7761_v48 = vpop.f32.mrb[23].mxu1  ;;  %v10620_v35 = vadd.f32 %v6917_v19, %v1765_v49  ;;  %v2601_v19 = vld [vmem:[#allocation2 + $0x70] sm:$0xff] }
 0x126   :  { %2925 = vmatmul.mubr.bf16.gmra.mrb[124].mxu1 %v2614_v16 }
 0x127   :  { %2932 = vmatprep.mubr.bf16.mxu1 %v2618_v13 }
 0x128   :  { %v6918_v10 = vpop.f32.mrb[24].mxu0 }
 0x129   :  { %v6919_v40 = vpop.f32.mrb[25].mxu0 }
 0x12a   :  { %v6920_v55 = vadd.f32 %v6919_v40, %v6918_v10  ;;  %v6921_v41 = vpop.f32.mrb[26].mxu0  ;;  %v2623_v40 = vld [vmem:[#allocation2 + $0x120] sm:$0xff] }
 0x12b   :  { %7867 = vmatmul.mubr.bf16.gmra.mrb[128].mxu0 %v10393_v28  ;;  %v1770_v0 = vpop.f32.mrb[24].mxu1  ;;  %v6922_v37 = vpop.f32.mrb[27].mxu0 }
 0x12c   :  { %7870 = vmatprep.mubr.msk.bf16.mxu0 %vm13426_vm0, %v13261_v53  ;;  %v7764_v47 = vpop.f32.mrb[25].mxu1  ;;  %v6923_v63 = vadd.f32 %v6922_v37, %v6921_v41  ;;  %v10624_v16 = vadd.f32 %v6920_v55, %v1770_v0  ;;  %v2627_v41 = vld [vmem:[#allocation2 + $0x140] sm:$0xff] }
 0x12d   :  { %v1773_v28 = vpop.f32.mrb[26].mxu1 }
 0x12e   :  { %2933 = vmatmul.mubr.bf16.gmra.mrb[128].mxu1 %v2617_v31  ;;  %v7765_v13 = vpop.f32.mrb[27].mxu1  ;;  %v10626_v33 = vadd.f32 %v6923_v63, %v1773_v28 }
 0x12f   :  { %2940 = vmatprep.mubr.bf16.mxu1 %v2621_v25 }
 0x132   :  { %v6924_v12 = vpop.f32.mrb[28].mxu0 }
 0x133   :  { %7871 = vmatmul.mubr.bf16.gmra.mrb[132].mxu0 %v2598_v17  ;;  %v6925_v7 = vpop.f32.mrb[29].mxu0 }
 0x134   :  { %7874 = vmatprep.mubr.msk.bf16.mxu0 %vm13426_vm0, %v13261_v53  ;;  %v6926_v57 = vadd.f32 %v6925_v7, %v6924_v12  ;;  %v6927_v24 = vpop.f32.mrb[30].mxu0 }
 0x135   :  { %v6928_v49 = vpop.f32.mrb[31].mxu0 }
 0x136   :  { %2941 = vmatmul.mubr.bf16.gmra.mrb[132].mxu1 %v2620_v22  ;;  %v1778_v9 = vpop.f32.mrb[28].mxu1  ;;  %v6929_v48 = vadd.f32 %v6928_v49, %v6927_v24  ;;  %v2604_v22 = vld [vmem:[#allocation2 + $0x88] sm:$0xff]  ;;  %v2626_v24 = vld [vmem:[#allocation2 + $0x138] sm:$0xff] }
 0x137   :  { %2948 = vmatprep.mubr.bf16.mxu1 %v2624_v39  ;;  %v7768_v31 = vpop.f32.mrb[29].mxu1  ;;  %v10630_v25 = vadd.f32 %v6926_v57, %v1778_v9 }
 0x138   :  { %v1781_v10 = vpop.f32.mrb[30].mxu1 }
 0x139   :  { %v7769_v55 = vpop.f32.mrb[31].mxu1  ;;  %v10632_v0 = vadd.f32 %v6929_v48, %v1781_v10 }
 0x13b   :  { %7875 = vmatmul.mubr.bf16.gmra.mrb[136].mxu0 %v2601_v19  ;;  %v2630_v19 = vld [vmem:[#allocation2 + $0x158] sm:$0xff] }
 0x13c   :  { %7878 = vmatprep.mubr.msk.bf16.mxu0 %vm13426_vm0, %v13261_v53  ;;  %v6930_v17 = vpop.f32.mrb[32].mxu0 }
 0x13d   :  { %v6931_v37 = vpop.f32.mrb[33].mxu0 }
 0x13e   :  { %2949 = vmatmul.mubr.bf16.gmra.mrb[136].mxu1 %v2623_v40  ;;  %v6932_v47 = vadd.f32 %v6931_v37, %v6930_v17  ;;  %v6933_v63 = vpop.f32.mrb[34].mxu0 }
 0x13f   :  { %2956 = vmatprep.mubr.bf16.mxu1 %v2627_v41  ;;  %v1786_v28 = vpop.f32.mrb[32].mxu1  ;;  %v6934_v13 = vpop.f32.mrb[35].mxu0  ;;  %v2607_v41 = vld [vmem:[#allocation2 + $0xa0] sm:$0xff] }
 0x140   :  { %v7772_v39 = vpop.f32.mrb[33].mxu1  ;;  %v6935_v12 = vadd.f32 %v6934_v13, %v6933_v63  ;;  %v10636_v7 = vadd.f32 %v6932_v47, %v1786_v28 }
 0x141   :  { %v1789_v57 = vpop.f32.mrb[34].mxu1 }
 0x142   :  { %v7773_v9 = vpop.f32.mrb[35].mxu1  ;;  %v10638_v49 = vadd.f32 %v6935_v12, %v1789_v57 }
 0x143   :  { %7879 = vmatmul.mubr.bf16.gmra.mrb[140].mxu0 %v2604_v22  ;;  %v2629_v22 = vld [vmem:[#allocation2 + $0x150] sm:$0xff] }
 0x144   :  { %7882 = vmatprep.mubr.msk.bf16.mxu0 %vm13426_vm0, %v13261_v53 }
 0x146   :  { %2957 = vmatmul.mubr.bf16.gmra.mrb[140].mxu1 %v2626_v24  ;;  %v6936_v31 = vpop.f32.mrb[36].mxu0 }
 0x147   :  { %2964 = vmatprep.mubr.bf16.mxu1 %v2630_v19  ;;  %v6937_v48 = vpop.f32.mrb[37].mxu0 }
 0x148   :  { %v6938_v10 = vadd.f32 %v6937_v48, %v6936_v31  ;;  %v6939_v40 = vpop.f32.mrb[38].mxu0  ;;  %v2610_v31 = vld [vmem:[#allocation2 + $0xb8] sm:$0xff] }
 0x149   :  { %v1794_v55 = vpop.f32.mrb[36].mxu1  ;;  %v6940_v17 = vpop.f32.mrb[39].mxu0 }
 0x14a   :  { %v7776_v37 = vpop.f32.mrb[37].mxu1  ;;  %v6941_v47 = vadd.f32 %v6940_v17, %v6939_v40  ;;  %v10642_v63 = vadd.f32 %v6938_v10, %v1794_v55 }
 0x14b   :  { %v1797_v28 = vpop.f32.mrb[38].mxu1  ;;  %7883 = vmatmul.mubr.bf16.gmra.mrb[144].mxu0 %v2607_v41 }
 0x14c   :  { %v7777_v13 = vpop.f32.mrb[39].mxu1  ;;  %v10644_v39 = vadd.f32 %v6941_v47, %v1797_v28  ;;  %7886 = vmatprep.mubr.msk.bf16.mxu0 %vm13426_vm0, %v13261_v53 }
 0x14e   :  { %2965 = vmatmul.mubr.bf16.gmra.mrb[144].mxu1 %v2629_v22  ;;  %v6942_v12 = vpop.f32.mrb[40].mxu0 }
 0x14f   :  { %2972 = vmatprep.mubr.bf16.mxu1 %v10348_v42  ;;  %v6943_v57 = vpop.f32.mrb[41].mxu0 }
 0x150   :  { %v6944_v24 = vadd.f32 %v6943_v57, %v6942_v12  ;;  %v6945_v9 = vpop.f32.mrb[42].mxu0  ;;  %v2613_v12 = vld [vmem:[#allocation2 + $0xd0] sm:$0xff] }
 0x151   :  { %v1802_v19 = vpop.f32.mrb[40].mxu1  ;;  %v6946_v48 = vpop.f32.mrb[43].mxu0 }
 0x152   :  { %v7780_v10 = vpop.f32.mrb[41].mxu1  ;;  %v6947_v40 = vadd.f32 %v6946_v48, %v6945_v9  ;;  %v10649_v55 = vadd.f32 %v6944_v24, %v1802_v19 }
 0x153   :  { %v1805_v41 = vpop.f32.mrb[42].mxu1  ;;  %7887 = vmatmul.mubr.bf16.gmra.mrb[148].mxu0 %v2610_v31 }
 0x154   :  { %v7781_v17 = vpop.f32.mrb[43].mxu1  ;;  %v10651_v37 = vadd.f32 %v6947_v40, %v1805_v41  ;;  %7890 = vmatprep.mubr.msk.bf16.mxu0 %vm13426_vm0, %v13261_v53 }
 0x156   :  { %8823 = vmatmul.mubr.msk.bf16.gmra.mrb[148].mxu1 %vm10595_vm10, %v10601_v50  ;;  %v6948_v42 = vpop.f32.mrb[44].mxu0 }
 0x157   :  { %v6949_v47 = vpop.f32.mrb[45].mxu0 }
 0x158   :  { %v6950_v28 = vadd.f32 %v6949_v47, %v6948_v42  ;;  %v6951_v22 = vpop.f32.mrb[46].mxu0  ;;  %v2616_v47 = vld [vmem:[#allocation2 + $0xe8] sm:$0xff] }
 0x159   :  { %v1810_v13 = vpop.f32.mrb[44].mxu1  ;;  %v6952_v57 = vpop.f32.mrb[47].mxu0 }
 0x15a   :  { %v7784_v24 = vpop.f32.mrb[45].mxu1  ;;  %v6953_v9 = vadd.f32 %v6952_v57, %v6951_v22  ;;  %v10658_v19 = vadd.f32 %v6950_v28, %v1810_v13 }
 0x15b   :  { %v1813_v31 = vpop.f32.mrb[46].mxu1  ;;  %7891 = vmatmul.mubr.bf16.gmra.mrb[152].mxu0 %v2613_v12 }
 0x15c   :  { %v7785_v48 = vpop.f32.mrb[47].mxu1  ;;  %v10660_v10 = vadd.f32 %v6953_v9, %v1813_v31  ;;  %7894 = vmatprep.mubr.msk.bf16.mxu0 %vm13426_vm0, %v13261_v53 }
 0x15e   :  { %v6954_v50 = vpop.f32.mrb[48].mxu0 }
 0x15f   :  { %v6955_v40 = vpop.f32.mrb[49].mxu0 }
 0x160   :  { %v6956_v41 = vadd.f32 %v6955_v40, %v6954_v50  ;;  %v6957_v17 = vpop.f32.mrb[50].mxu0  ;;  %v2619_v40 = vld [vmem:[#allocation2 + $0x100] sm:$0xff] }
 0x161   :  { %v1818_v42 = vpop.f32.mrb[48].mxu1  ;;  %v6958_v21 = vpop.f32.mrb[51].mxu0 }
 0x162   :  { %v7788_v52 = vpop.f32.mrb[49].mxu1  ;;  %v6959_v24 = vadd.f32 %v6958_v21, %v6957_v17  ;;  %v10664_v22 = vadd.f32 %v6956_v41, %v1818_v42 }
 0x163   :  { %v1821_v28 = vpop.f32.mrb[50].mxu1  ;;  %7895 = vmatmul.mubr.bf16.gmra.mrb[156].mxu0 %v2616_v47 }
 0x164   :  { %v7789_v13 = vpop.f32.mrb[51].mxu1  ;;  %v10666_v12 = vadd.f32 %v6959_v24, %v1821_v28  ;;  %7898 = vmatprep.mubr.msk.bf16.mxu0 %vm13426_vm0, %v13261_v53 }
 0x166   :  { %v6960_v57 = vpop.f32.mrb[52].mxu0 }
 0x167   :  { %v6961_v9 = vpop.f32.mrb[53].mxu0 }
 0x168   :  { %v6962_v31 = vadd.f32 %v6961_v9, %v6960_v57  ;;  %v6963_v48 = vpop.f32.mrb[54].mxu0  ;;  %v2622_v9 = vld [vmem:[#allocation2 + $0x118] sm:$0xff] }
 0x169   :  { %v1826_v50 = vpop.f32.mrb[52].mxu1  ;;  %v6964_v1 = vpop.f32.mrb[55].mxu0 }
 0x16a   :  { %v7792_v27 = vpop.f32.mrb[53].mxu1  ;;  %v6965_v52 = vadd.f32 %v6964_v1, %v6963_v48  ;;  %v10670_v21 = vadd.f32 %v6962_v31, %v1826_v50 }
 0x16b   :  { %v1829_v41 = vpop.f32.mrb[54].mxu1  ;;  %7899 = vmatmul.mubr.bf16.gmra.mrb[160].mxu0 %v2619_v40 }
 0x16c   :  { %v7793_v17 = vpop.f32.mrb[55].mxu1  ;;  %v10672_v42 = vadd.f32 %v6965_v52, %v1829_v41  ;;  %7902 = vmatprep.mubr.msk.bf16.mxu0 %vm13426_vm0, %v13261_v53 }
 0x16e   :  { %v6966_v47 = vpop.f32.mrb[56].mxu0 }
 0x16f   :  { %v6967_v24 = vpop.f32.mrb[57].mxu0 }
 0x170   :  { %v6968_v28 = vadd.f32 %v6967_v24, %v6966_v47  ;;  %v6969_v13 = vpop.f32.mrb[58].mxu0  ;;  %v2625_v24 = vld [vmem:[#allocation2 + $0x130] sm:$0xff] }
 0x171   :  { %v1834_v57 = vpop.f32.mrb[56].mxu1  ;;  %v6970_v43 = vpop.f32.mrb[59].mxu0 }
 0x172   :  { %v7796_v20 = vpop.f32.mrb[57].mxu1  ;;  %v6971_v27 = vadd.f32 %v6970_v43, %v6969_v13  ;;  %v10676_v1 = vadd.f32 %v6968_v28, %v1834_v57 }
 0x173   :  { %v1837_v31 = vpop.f32.mrb[58].mxu1  ;;  %7903 = vmatmul.mubr.bf16.gmra.mrb[164].mxu0 %v2622_v9 }
 0x174   :  { %v7797_v48 = vpop.f32.mrb[59].mxu1  ;;  %v10678_v50 = vadd.f32 %v6971_v27, %v1837_v31  ;;  %7906 = vmatprep.mubr.msk.bf16.mxu0 %vm13426_vm0, %v13261_v53  ;;  %v10691_v27 = vld [vmem:[%s12989_s2] ss:$0 sm:$0xff] }
 0x175   :  { %v1872_v46 = vadd.f32 %v10691_v27, %v10571_v4 }
 0x176   :  { %v7011_v40 = vpop.f32.mrb[60].mxu0 }
 0x177   :  { %v7012_v52 = vpop.f32.mrb[61].mxu0 }
 0x178   :  { %v7013_v41 = vadd.f32 %v7012_v52, %v7011_v40  ;;  %v7014_v17 = vpop.f32.mrb[62].mxu0 }
 0x179   :  { %v7816_v47 = vpop.f32.mrb[60].mxu1  ;;  %v7015_v51 = vpop.f32.mrb[63].mxu0 }
 0x17a   :  { %v2367_v44 = vpop.f32.mrb[61].mxu1  ;;  %v7016_v20 = vadd.f32 %v7015_v51, %v7014_v17  ;;  %v2628_v51 = vld [vmem:[#allocation2 + $0x148] sm:$0xff]  ;;  %v1871_v17 = vadd.f32 %v10691_v27, %v10566_v62 }
 0x17b   :  { %v10682_v43 = vadd.f32 %v7013_v41, %v2367_v44  ;;  %v7817_v28 = vpop.f32.mrb[62].mxu1  ;;  %7907 = vmatmul.mubr.bf16.gmra.mrb[168].mxu0 %v2625_v24 }
 0x17c   :  { %v2370_v13 = vpop.f32.mrb[63].mxu1  ;;  %7910 = vmatprep.mubr.msk.bf16.mxu0 %vm13426_vm0, %v13261_v53 }
 0x17d   :  { %v10684_v57 = vadd.f32 %v7016_v20, %v2370_v13 }
 0x17e   :  { %v7017_v9 = vpop.f32.mrb[64].mxu0 }
 0x17f   :  { %v7018_v31 = vpop.f32.mrb[65].mxu0 }
 0x180   :  { %v7019_v48 = vadd.f32 %v7018_v31, %v7017_v9  ;;  %v7020_v40 = vpop.f32.mrb[66].mxu0 }
 0x181   :  { %v7820_v44 = vpop.f32.mrb[64].mxu1  ;;  %v7021_v52 = vpop.f32.mrb[67].mxu0 }
 0x182   :  { %v2383_v41 = vpop.f32.mrb[65].mxu1  ;;  %v2376_v24 = vadd.f32 %v7816_v47, %v7019_v48  ;;  %v7022_v20 = vadd.f32 %v7021_v52, %v7020_v40  ;;  %v2631_v47 = vld [vmem:[#allocation2 + $0x160] sm:$0xff]  ;;  %v1873_v52 = vadd.f32 %v10691_v27, %v10574_v61 }
 0x183   :  { %v7821_v13 = vpop.f32.mrb[66].mxu1  ;;  %7911 = vmatmul.mubr.bf16.gmra.mrb[172].mxu0 %v2628_v51 }
 0x184   :  { %v2386_v36 = vpop.f32.mrb[67].mxu1  ;;  %v10697_v2 = vadd.f32 %v2376_v24, %v1871_v17  ;;  %v2379_v14 = vadd.f32 %v7817_v28, %v7022_v20  ;;  %7914 = vmatprep.mubr.msk.bf16.mxu0 %vm13426_vm0, %v13261_v53 }
 0x186   :  { %v10701_v9 = vadd.f32 %v2379_v14, %v1872_v46  ;;  %v7023_v31 = vpop.f32.mrb[68].mxu0  ;;  %v1874_v14 = vadd.f32 %v10691_v27, %v10579_v45 }
 0x187   :  { %v7024_v29 = vpop.f32.mrb[69].mxu0 }
 0x188   :  { %v7025_v5 = vadd.f32 %v7024_v29, %v7023_v31  ;;  %v7026_v62 = vpop.f32.mrb[70].mxu0 }
 0x189   :  { %v7824_v48 = vpop.f32.mrb[68].mxu1  ;;  %v7027_v40 = vpop.f32.mrb[71].mxu0 }
 0x18a   :  { %v2399_v51 = vpop.f32.mrb[69].mxu1  ;;  %v7028_v4 = vadd.f32 %v7027_v40, %v7026_v62  ;;  %v2384_v17 = vadd.f32 %v7025_v5, %v2383_v41 }
 0x18b   :  { %v7825_v24 = vpop.f32.mrb[70].mxu1  ;;  %7915 = vmatmul.mubr.bf16.gmra.mrb[176].mxu0 %v2631_v47  ;;  %v1875_v47 = vadd.f32 %v10691_v27, %v10582_v30 }
 0x18c   :  { %v2402_v28 = vpop.f32.mrb[71].mxu1  ;;  %v10707_v46 = vadd.f32 %v2384_v17, %v1873_v52  ;;  %v2387_v20 = vadd.f32 %v7028_v4, %v2386_v36  ;;  %7918 = vmatprep.mubr.msk.bf16.mxu0 %vm13426_vm0, %v13261_v53 }
 0x18e   :  { %v10711_v29 = vadd.f32 %v2387_v20, %v1874_v14  ;;  %v7029_v31 = vpop.f32.mrb[72].mxu0 }
 0x18f   :  { %v7030_v11 = vpop.f32.mrb[73].mxu0 }
 0x190   :  { %v7031_v38 = vadd.f32 %v7030_v11, %v7029_v31  ;;  %v7032_v61 = vpop.f32.mrb[74].mxu0  ;;  %v1876_v11 = vadd.f32 %v10691_v27, %v10587_v59 }
 0x191   :  { %v10713_v62 = vpop.f32.mrb[72].mxu1  ;;  %v7033_v5 = vpop.f32.mrb[75].mxu0 }
 0x192   :  { %v2415_v41 = vpop.f32.mrb[73].mxu1  ;;  %v2392_v45 = vadd.f32 %v7820_v44, %v7031_v38  ;;  %v7034_v40 = vadd.f32 %v7033_v5, %v7032_v61 }
 0x193   :  { %v10717_v52 = vpop.f32.mrb[74].mxu1  ;;  %8826 = vmatmul.mubr.msk.bf16.gmra.mrb[180].mxu0 %vm10534_vm8, %v10540_v6  ;;  %v1877_v6 = vadd.f32 %v10691_v27, %v10590_v15 }
 0x194   :  { %v2418_v53 = vpop.f32.mrb[75].mxu1  ;;  %v10724_v36 = vadd.f32 %v2392_v45, %v1875_v47  ;;  %v2395_v4 = vadd.f32 %v7821_v13, %v7034_v40  ;;  %v1878_v13 = vadd.f32 %v10691_v27, %v10606_v56 }
 0x196   :  { %v10726_v17 = vadd.f32 %v2395_v4, %v1876_v11  ;;  %v7035_v14 = vpop.f32.mrb[76].mxu0 }
 0x197   :  { %v7036_v20 = vpop.f32.mrb[77].mxu0 }
 0x198   :  { %v7037_v30 = vadd.f32 %v7036_v20, %v7035_v14  ;;  %v7038_v38 = vpop.f32.mrb[78].mxu0 }
 0x199   :  { %v10728_v44 = vpop.f32.mrb[76].mxu1  ;;  %v7039_v31 = vpop.f32.mrb[79].mxu0 }
 0x19a   :  { %v10730_v61 = vpop.f32.mrb[77].mxu1  ;;  %v7040_v5 = vadd.f32 %v7039_v31, %v7038_v38  ;;  %v2400_v34 = vadd.f32 %v7037_v30, %v2399_v51  ;;  %v1879_v30 = vadd.f32 %v10691_v27, %v10610_v60 }
 0x19b   :  { %v10734_v59 = vpop.f32.mrb[78].mxu1 }
 0x19c   :  { %v10736_v47 = vpop.f32.mrb[79].mxu1  ;;  %v10740_v45 = vadd.f32 %v2400_v34, %v1877_v6  ;;  %v2403_v40 = vadd.f32 %v7040_v5, %v2402_v28  ;;  %v1880_v28 = vadd.f32 %v10691_v27, %v10613_v23 }
 0x19e   :  { %v10742_v11 = vadd.f32 %v2403_v40, %v1878_v13  ;;  %v7041_v4 = vpop.f32.mrb[80].mxu0 }
 0x19f   :  { %v7042_v14 = vpop.f32.mrb[81].mxu0 }
 0x1a0   :  { %v7043_v20 = vadd.f32 %v7042_v14, %v7041_v4  ;;  %v7044_v26 = vpop.f32.mrb[82].mxu0 }
 0x1a1   :  { %v10744_v3 = vpop.f32.mrb[80].mxu1  ;;  %v7045_v15 = vpop.f32.mrb[83].mxu0 }
 0x1a2   :  { %v10746_v51 = vpop.f32.mrb[81].mxu1  ;;  %v2408_v38 = vadd.f32 %v7824_v48, %v7043_v20  ;;  %v7046_v31 = vadd.f32 %v7045_v15, %v7044_v26  ;;  %v1881_v48 = vadd.f32 %v10691_v27, %v10617_v18 }
 0x1a3   :  { %v10750_v56 = vpop.f32.mrb[82].mxu1 }
 0x1a4   :  { %v10752_v34 = vpop.f32.mrb[83].mxu1  ;;  %v10756_v6 = vadd.f32 %v2408_v38, %v1879_v30  ;;  %v2411_v5 = vadd.f32 %v7825_v24, %v7046_v31  ;;  %v1882_v24 = vadd.f32 %v10691_v27, %v10620_v35 }
 0x1a6   :  { %v10758_v13 = vadd.f32 %v2411_v5, %v1880_v28  ;;  %v7047_v40 = vpop.f32.mrb[84].mxu0 }
 0x1a7   :  { %v7048_v4 = vpop.f32.mrb[85].mxu0 }
 0x1a8   :  { %v7049_v14 = vadd.f32 %v7048_v4, %v7047_v40  ;;  %v7050_v32 = vpop.f32.mrb[86].mxu0 }
 0x1a9   :  { %v10760_v54 = vpop.f32.mrb[84].mxu1  ;;  %v7051_v60 = vpop.f32.mrb[87].mxu0 }
 0x1aa   :  { %v10762_v26 = vpop.f32.mrb[85].mxu1  ;;  %v7052_v20 = vadd.f32 %v7051_v60, %v7050_v32  ;;  %v2416_v15 = vadd.f32 %v7049_v14, %v2415_v41  ;;  %v1883_v41 = vadd.f32 %v10691_v27, %v10624_v16 }
 0x1ab   :  { %v10766_v23 = vpop.f32.mrb[86].mxu1 }
 0x1ac   :  { %v10768_v30 = vpop.f32.mrb[87].mxu1  ;;  %v10772_v38 = vadd.f32 %v2416_v15, %v1881_v48  ;;  %v2419_v31 = vadd.f32 %v7052_v20, %v2418_v53  ;;  %v1884_v48 = vadd.f32 %v10691_v27, %v10626_v33 }
 0x1ae   :  { %13427 = vst [vmem:[#allocation33_spill] sm:$0xff] %v10772_v38  ;;  %v10774_v28 = vadd.f32 %v2419_v31, %v1882_v24  ;;  %v7053_v5 = vpop.f32.mrb[88].mxu0 }
 0x1af   :  { %v7054_v40 = vpop.f32.mrb[89].mxu0 }
 0x1b0   :  { %13428 = vst [vmem:[#allocation39_spill] sm:$0xff] %v10774_v28  ;;  %v7055_v4 = vadd.f32 %v7054_v40, %v7053_v5  ;;  %v7056_v58 = vpop.f32.mrb[90].mxu0 }
 0x1b1   :  { %v10776_v8 = vpop.f32.mrb[88].mxu1  ;;  %v7057_v32 = vpop.f32.mrb[91].mxu0 }
 0x1b2   :  { %v10778_v18 = vpop.f32.mrb[89].mxu1  ;;  %v2424_v14 = vadd.f32 %v10713_v62, %v7055_v4  ;;  %v7058_v35 = vadd.f32 %v7057_v32, %v7056_v58  ;;  %v1885_v4 = vadd.f32 %v10691_v27, %v10630_v25 }
 0x1b3   :  { %v10783_v60 = vpop.f32.mrb[90].mxu1 }
 0x1b4   :  { %v10785_v53 = vpop.f32.mrb[91].mxu1  ;;  %v10789_v20 = vadd.f32 %v2424_v14, %v1883_v41  ;;  %v2427_v15 = vadd.f32 %v10717_v52, %v7058_v35  ;;  %v1886_v52 = vadd.f32 %v10691_v27, %v10632_v0 }
 0x1b6   :  { %v10792_v24 = vadd.f32 %v2427_v15, %v1884_v48  ;;  %v7059_v31 = vpop.f32.mrb[92].mxu0 }
 0x1b7   :  { %v7060_v5 = vpop.f32.mrb[93].mxu0 }
 0x1b8   :  { %v7061_v40 = vadd.f32 %v7060_v5, %v7059_v31  ;;  %v7062_v16 = vpop.f32.mrb[94].mxu0 }
 0x1b9   :  { %v7147_v28 = vpop.f32.mrb[92].mxu1  ;;  %v7063_v62 = vpop.f32.mrb[95].mxu0 }
 0x1ba   :  { %v7148_v58 = vpop.f32.mrb[93].mxu1  ;;  %v7064_v32 = vadd.f32 %v7063_v62, %v7062_v16  ;;  %v2432_v38 = vadd.f32 %v7061_v40, %v10730_v61 }
 0x1bb   :  { %v10797_v33 = vadd.f32 %v7148_v58, %v7147_v28  ;;  %v7150_v41 = vpop.f32.mrb[94].mxu1  ;;  %v1887_v58 = vadd.f32 %v10691_v27, %v10636_v7 }
 0x1bc   :  { %v7151_v14 = vpop.f32.mrb[95].mxu1  ;;  %v10801_v35 = vadd.f32 %v2432_v38, %v1885_v4  ;;  %v2435_v48 = vadd.f32 %v7064_v32, %v10736_v47 }
 0x1bd   :  { %v10804_v15 = vadd.f32 %v7151_v14, %v7150_v41  ;;  %v1888_v41 = vadd.f32 %v10691_v27, %v10638_v49 }
 0x1be   :  { %v10806_v31 = vadd.f32 %v2435_v48, %v1886_v52  ;;  %v7065_v5 = vpop.f32.mrb[96].mxu0 }
 0x1bf   :  { %v7066_v25 = vpop.f32.mrb[97].mxu0 }
 0x1c0   :  { %13429 = vst [vmem:[#allocation18_spill] sm:$0xff] %v10806_v31  ;;  %v7067_v16 = vadd.f32 %v7066_v25, %v7065_v5  ;;  %v7068_v62 = vpop.f32.mrb[98].mxu0 }
 0x1c1   :  { %v7153_v61 = vpop.f32.mrb[96].mxu1  ;;  %v7069_v28 = vpop.f32.mrb[99].mxu0 }
 0x1c2   :  { %v7154_v40 = vpop.f32.mrb[97].mxu1  ;;  %v2440_v0 = vadd.f32 %v10728_v44, %v7067_v16  ;;  %v7070_v38 = vadd.f32 %v7069_v28, %v7068_v62  ;;  %v1889_v28 = vadd.f32 %v10691_v27, %v10642_v63 }
 0x1c3   :  { %v10811_v4 = vadd.f32 %v7154_v40, %v7153_v61  ;;  %v7156_v47 = vpop.f32.mrb[98].mxu1 }
 0x1c4   :  { %v7157_v32 = vpop.f32.mrb[99].mxu1  ;;  %v10815_v14 = vadd.f32 %v2440_v0, %v1887_v58  ;;  %v2443_v52 = vadd.f32 %v10734_v59, %v7070_v38  ;;  %v1890_v38 = vadd.f32 %v10691_v27, %v10644_v39 }
 0x1c5   :  { %v10818_v48 = vadd.f32 %v7157_v32, %v7156_v47 }
 0x1c6   :  { %v10820_v5 = vadd.f32 %v2443_v52, %v1888_v41  ;;  %v7071_v25 = vpop.f32.mrb[100].mxu0 }
 0x1c7   :  { %v7072_v7 = vpop.f32.mrb[101].mxu0 }
 0x1c8   :  { %v7073_v31 = vadd.f32 %v7072_v7, %v7071_v25  ;;  %v7074_v44 = vpop.f32.mrb[102].mxu0 }
 0x1c9   :  { %v7159_v16 = vpop.f32.mrb[100].mxu1  ;;  %v7075_v62 = vpop.f32.mrb[103].mxu0 }
 0x1ca   :  { %v7160_v61 = vpop.f32.mrb[101].mxu1  ;;  %v7076_v40 = vadd.f32 %v7075_v62, %v7074_v44  ;;  %v2448_v49 = vadd.f32 %v7073_v31, %v10746_v51  ;;  %v1891_v62 = vadd.f32 %v10691_v27, %v10649_v55 }
 0x1cb   :  { %v10825_v58 = vadd.f32 %v7160_v61, %v7159_v16  ;;  %v7162_v59 = vpop.f32.mrb[102].mxu1 }
 0x1cc   :  { %v7163_v0 = vpop.f32.mrb[103].mxu1  ;;  %v10829_v47 = vadd.f32 %v2448_v49, %v1889_v28  ;;  %v2451_v32 = vadd.f32 %v7076_v40, %v10752_v34  ;;  %v1892_v49 = vadd.f32 %v10691_v27, %v10651_v37 }
 0x1cd   :  { %v10832_v41 = vadd.f32 %v7163_v0, %v7162_v59 }
 0x1ce   :  { %v10834_v52 = vadd.f32 %v2451_v32, %v1890_v38  ;;  %v7077_v25 = vpop.f32.mrb[104].mxu0 }
 0x1cf   :  { %v7078_v63 = vpop.f32.mrb[105].mxu0 }
 0x1d0   :  { %v7079_v7 = vadd.f32 %v7078_v63, %v7077_v25  ;;  %v7080_v44 = vpop.f32.mrb[106].mxu0 }
 0x1d1   :  { %v7165_v51 = vpop.f32.mrb[104].mxu1  ;;  %v7081_v31 = vpop.f32.mrb[107].mxu0 }
 0x1d2   :  { %v7166_v16 = vpop.f32.mrb[105].mxu1  ;;  %v2456_v39 = vadd.f32 %v10744_v3, %v7079_v7  ;;  %v7082_v61 = vadd.f32 %v7081_v31, %v7080_v44  ;;  %v1893_v31 = vadd.f32 %v10691_v27, %v10658_v19 }
 0x1d3   :  { %v10839_v28 = vadd.f32 %v7166_v16, %v7165_v51  ;;  %v7168_v34 = vpop.f32.mrb[106].mxu1 }
 0x1d4   :  { %v7169_v40 = vpop.f32.mrb[107].mxu1  ;;  %v10843_v59 = vadd.f32 %v2456_v39, %v1891_v62  ;;  %v2459_v0 = vadd.f32 %v10750_v56, %v7082_v61  ;;  %v1894_v61 = vadd.f32 %v10691_v27, %v10660_v10 }
 0x1d5   :  { %v10846_v38 = vadd.f32 %v7169_v40, %v7168_v34 }
 0x1d6   :  { %v10848_v32 = vadd.f32 %v2459_v0, %v1892_v49  ;;  %v7083_v25 = vpop.f32.mrb[108].mxu0 }
 0x1d7   :  { %v7084_v55 = vpop.f32.mrb[109].mxu0 }
 0x1d8   :  { %v7085_v63 = vadd.f32 %v7084_v55, %v7083_v25  ;;  %v7086_v3 = vpop.f32.mrb[110].mxu0 }
 0x1d9   :  { %v7171_v7 = vpop.f32.mrb[108].mxu1  ;;  %v7087_v44 = vpop.f32.mrb[111].mxu0 }
 0x1da   :  { %v7172_v51 = vpop.f32.mrb[109].mxu1  ;;  %v7088_v16 = vadd.f32 %v7087_v44, %v7086_v3  ;;  %v2464_v37 = vadd.f32 %v7085_v63, %v10762_v26  ;;  %v1895_v44 = vadd.f32 %v10691_v27, %v10664_v22 }
 0x1db   :  { %v10853_v62 = vadd.f32 %v7172_v51, %v7171_v7  ;;  %v7174_v56 = vpop.f32.mrb[110].mxu1 }
 0x1dc   :  { %v7175_v39 = vpop.f32.mrb[111].mxu1  ;;  %v10857_v34 = vadd.f32 %v2464_v37, %v1893_v31  ;;  %v2467_v40 = vadd.f32 %v7088_v16, %v10768_v30  ;;  %v1896_v37 = vadd.f32 %v10691_v27, %v10666_v12 }
 0x1dd   :  { %v10860_v49 = vadd.f32 %v7175_v39, %v7174_v56 }
 0x1de   :  { %v10862_v0 = vadd.f32 %v2467_v40, %v1894_v61  ;;  %v7089_v25 = vpop.f32.mrb[112].mxu0 }
 0x1df   :  { %v7090_v19 = vpop.f32.mrb[113].mxu0 }
 0x1e0   :  { %v7091_v55 = vadd.f32 %v7090_v19, %v7089_v25  ;;  %v7092_v3 = vpop.f32.mrb[114].mxu0 }
 0x1e1   :  { %v7177_v26 = vpop.f32.mrb[112].mxu1  ;;  %v7093_v63 = vpop.f32.mrb[115].mxu0 }
 0x1e2   :  { %v7178_v7 = vpop.f32.mrb[113].mxu1  ;;  %v2472_v10 = vadd.f32 %v10760_v54, %v7091_v55  ;;  %v7094_v51 = vadd.f32 %v7093_v63, %v7092_v3  ;;  %v1897_v63 = vadd.f32 %v10691_v27, %v10670_v21 }
 0x1e3   :  { %v10867_v31 = vadd.f32 %v7178_v7, %v7177_v26  ;;  %v7180_v30 = vpop.f32.mrb[114].mxu1 }
 0x1e4   :  { %v7181_v16 = vpop.f32.mrb[115].mxu1  ;;  %v10871_v56 = vadd.f32 %v2472_v10, %v1895_v44  ;;  %v2475_v39 = vadd.f32 %v10766_v23, %v7094_v51  ;;  %v1898_v51 = vadd.f32 %v10691_v27, %v10672_v42 }
 0x1e5   :  { %v10874_v61 = vadd.f32 %v7181_v16, %v7180_v30 }
 0x1e6   :  { %v10876_v40 = vadd.f32 %v2475_v39, %v1896_v37  ;;  %v7095_v25 = vpop.f32.mrb[116].mxu0 }
 0x1e7   :  { %v7096_v22 = vpop.f32.mrb[117].mxu0 }
 0x1e8   :  { %v7097_v19 = vadd.f32 %v7096_v22, %v7095_v25  ;;  %v7098_v54 = vpop.f32.mrb[118].mxu0 }
 0x1e9   :  { %v7183_v55 = vpop.f32.mrb[116].mxu1  ;;  %v7099_v3 = vpop.f32.mrb[119].mxu0 }
 0x1ea   :  { %v7184_v26 = vpop.f32.mrb[117].mxu1  ;;  %v7100_v7 = vadd.f32 %v7099_v3, %v7098_v54  ;;  %v2480_v12 = vadd.f32 %v7097_v19, %v10778_v18  ;;  %v1899_v3 = vadd.f32 %v10691_v27, %v10676_v1  ;;  %v2526_v1 = vadd.f32 %v10691_v27, %v10682_v43 }
 0x1eb   :  { %v10881_v44 = vadd.f32 %v7184_v26, %v7183_v55  ;;  %v7186_v23 = vpop.f32.mrb[118].mxu1 }
 0x1ec   :  { %v7187_v10 = vpop.f32.mrb[119].mxu1  ;;  %v10885_v30 = vadd.f32 %v2480_v12, %v1897_v63  ;;  %v2483_v16 = vadd.f32 %v7100_v7, %v10785_v53  ;;  %v1900_v12 = vadd.f32 %v10691_v27, %v10678_v50  ;;  %v2527_v50 = vadd.f32 %v10691_v27, %v10684_v57 }
 0x1ed   :  { %v10888_v37 = vadd.f32 %v7187_v10, %v7186_v23 }
 0x1ee   :  { %v10890_v39 = vadd.f32 %v2483_v16, %v1898_v51  ;;  %v7101_v25 = vpop.f32.mrb[120].mxu0 }
 0x1ef   :  { %v7102_v21 = vpop.f32.mrb[121].mxu0 }
 0x1f0   :  { %v7103_v22 = vadd.f32 %v7102_v21, %v7101_v25  ;;  %v7104_v54 = vpop.f32.mrb[122].mxu0 }
 0x1f1   :  { %v7189_v18 = vpop.f32.mrb[120].mxu1  ;;  %v7105_v19 = vpop.f32.mrb[123].mxu0 }
 0x1f2   :  { %v7190_v55 = vpop.f32.mrb[121].mxu1  ;;  %v2488_v42 = vadd.f32 %v10776_v8, %v7103_v22  ;;  %v7106_v26 = vadd.f32 %v7105_v19, %v7104_v54 }
 0x1f3   :  { %v10895_v63 = vadd.f32 %v7190_v55, %v7189_v18  ;;  %v7192_v53 = vpop.f32.mrb[122].mxu1 }
 0x1f4   :  { %v7193_v7 = vpop.f32.mrb[123].mxu1  ;;  %v2556_v23 = vadd.f32 %v2488_v42, %v1899_v3  ;;  %v2491_v10 = vadd.f32 %v10783_v60, %v7106_v26 }
 0x1f5   :  { %v10900_v51 = vadd.f32 %v7193_v7, %v7192_v53 }
 0x1f6   :  { %2588 = vst [vmem:[#allocation3 + $0xf0] sm:$0xff] %v2556_v23  ;;  %v2557_v16 = vadd.f32 %v2491_v10, %v1900_v12  ;;  %v3015_v25 = vpop.f32.mrb[124].mxu0 }
 0x1f7   :  { %v3016_v8 = vadd.f32 %v10797_v33, %v3015_v25  ;;  %v7864_v21 = vpop.f32.mrb[125].mxu0 }
 0x1f8   :  { %2589 = vst [vmem:[#allocation3 + $0xf8] sm:$0xff] %v2557_v16  ;;  %v3018_v22 = vpop.f32.mrb[126].mxu0 }
 0x1f9   :  { %v7195_v54 = vpop.f32.mrb[124].mxu1  ;;  %v3164_v18 = vadd.f32 %v3016_v8, %v2526_v1  ;;  %v3019_v60 = vadd.f32 %v10804_v15, %v3018_v22  ;;  %v7865_v19 = vpop.f32.mrb[127].mxu0 }
 0x1fa   :  { %v7196_v55 = vpop.f32.mrb[125].mxu1 }
 0x1fb   :  { %v10908_v3 = vadd.f32 %v7196_v55, %v7195_v54  ;;  %v7198_v42 = vpop.f32.mrb[126].mxu1  ;;  %3194 = vst [vmem:[#allocation3] sm:$0xff] %v3164_v18  ;;  %v3165_v26 = vadd.f32 %v3019_v60, %v2527_v50 }
 0x1fc   :  { %v7199_v43 = vpop.f32.mrb[127].mxu1 }
 0x1fd   :  { %v10910_v53 = vadd.f32 %v7199_v43, %v7198_v42  ;;  %3195 = vst [vmem:[#allocation3 + $0x8] sm:$0xff] %v3165_v26 }
 0x1fe   :  { %v3023_v33 = vpop.f32.mrb[128].mxu0 }
 0x1ff   :  { %v3024_v7 = vadd.f32 %v10811_v4, %v3023_v33  ;;  %v7868_v12 = vpop.f32.mrb[129].mxu0 }
 0x200   :  { %v3026_v23 = vpop.f32.mrb[130].mxu0 }
 0x201   :  { %v7201_v57 = vpop.f32.mrb[128].mxu1  ;;  %v3166_v27 = vadd.f32 %v3024_v7, %v10697_v2  ;;  %v3027_v15 = vadd.f32 %v10818_v48, %v3026_v23  ;;  %v7869_v10 = vpop.f32.mrb[131].mxu0 }
 0x202   :  { %v7202_v16 = vpop.f32.mrb[129].mxu1 }
 0x203   :  { %v10915_v25 = vadd.f32 %v7202_v16, %v7201_v57  ;;  %v7204_v1 = vpop.f32.mrb[130].mxu1  ;;  %3196 = vst [vmem:[#allocation3 + $0x10] sm:$0xff] %v3166_v27  ;;  %v3167_v8 = vadd.f32 %v3027_v15, %v10701_v9 }
 0x204   :  { %v7205_v21 = vpop.f32.mrb[131].mxu1 }
 0x205   :  { %v10918_v22 = vadd.f32 %v7205_v21, %v7204_v1  ;;  %3197 = vst [vmem:[#allocation3 + $0x18] sm:$0xff] %v3167_v8 }
 0x206   :  { %v3031_v4 = vpop.f32.mrb[132].mxu0 }
 0x207   :  { %v3032_v54 = vadd.f32 %v10825_v58, %v3031_v4  ;;  %v7872_v50 = vpop.f32.mrb[133].mxu0 }
 0x208   :  { %v3034_v18 = vpop.f32.mrb[134].mxu0 }
 0x209   :  { %v7207_v2 = vpop.f32.mrb[132].mxu1  ;;  %v3168_v48 = vadd.f32 %v3032_v54, %v10707_v46  ;;  %v3035_v60 = vadd.f32 %v10832_v41, %v3034_v18  ;;  %v7873_v19 = vpop.f32.mrb[135].mxu0 }
 0x20a   :  { %v7208_v55 = vpop.f32.mrb[133].mxu1 }
 0x20b   :  { %v10923_v42 = vadd.f32 %v7208_v55, %v7207_v2  ;;  %v7210_v26 = vpop.f32.mrb[134].mxu1  ;;  %3198 = vst [vmem:[#allocation3 + $0x20] sm:$0xff] %v3168_v48  ;;  %v3169_v9 = vadd.f32 %v3035_v60, %v10711_v29 }
 0x20c   :  { %v7211_v43 = vpop.f32.mrb[135].mxu1 }
 0x20d   :  { %v10926_v33 = vadd.f32 %v7211_v43, %v7210_v26  ;;  %3199 = vst [vmem:[#allocation3 + $0x28] sm:$0xff] %v3169_v9 }
 0x20e   :  { %v3039_v58 = vpop.f32.mrb[136].mxu0 }
 0x20f   :  { %v3040_v7 = vadd.f32 %v10839_v28, %v3039_v58  ;;  %v7876_v12 = vpop.f32.mrb[137].mxu0 }
 0x210   :  { %v3042_v23 = vpop.f32.mrb[138].mxu0 }
 0x211   :  { %v7213_v46 = vpop.f32.mrb[136].mxu1  ;;  %v3170_v41 = vadd.f32 %v3040_v7, %v10724_v36  ;;  %v3043_v57 = vadd.f32 %v10846_v38, %v3042_v23  ;;  %v7877_v27 = vpop.f32.mrb[139].mxu0 }
 0x212   :  { %v7214_v15 = vpop.f32.mrb[137].mxu1 }
 0x213   :  { %v10931_v10 = vadd.f32 %v7214_v15, %v7213_v46  ;;  %v7216_v16 = vpop.f32.mrb[138].mxu1  ;;  %3200 = vst [vmem:[#allocation3 + $0x30] sm:$0xff] %v3170_v41  ;;  %v3171_v29 = vadd.f32 %v3043_v57, %v10726_v17 }
 0x214   :  { %v7217_v1 = vpop.f32.mrb[139].mxu1 }
 0x215   :  { %v10934_v8 = vadd.f32 %v7217_v1, %v7216_v16  ;;  %3201 = vst [vmem:[#allocation3 + $0x38] sm:$0xff] %v3171_v29  ;;  %v13430_v29 = vld [vmem:[#allocation33_spill] sm:$0xff] }
 0x216   :  { %v3047_v28 = vpop.f32.mrb[140].mxu0 }
 0x217   :  { %v3048_v21 = vadd.f32 %v10853_v62, %v3047_v28  ;;  %v7880_v4 = vpop.f32.mrb[141].mxu0 }
 0x218   :  { %v3050_v54 = vpop.f32.mrb[142].mxu0 }
 0x219   :  { %v7219_v36 = vpop.f32.mrb[140].mxu1  ;;  %v3172_v38 = vadd.f32 %v3048_v21, %v10740_v45  ;;  %v3051_v50 = vadd.f32 %v10860_v49, %v3050_v54  ;;  %v7881_v18 = vpop.f32.mrb[143].mxu0 }
 0x21a   :  { %v7220_v2 = vpop.f32.mrb[141].mxu1 }
 0x21b   :  { %v10939_v48 = vadd.f32 %v7220_v2, %v7219_v36  ;;  %v7222_v60 = vpop.f32.mrb[142].mxu1  ;;  %3202 = vst [vmem:[#allocation3 + $0x40] sm:$0xff] %v3172_v38  ;;  %v3173_v17 = vadd.f32 %v3051_v50, %v10742_v11 }
 0x21c   :  { %v7223_v19 = vpop.f32.mrb[143].mxu1 }
 0x21d   :  { %v10942_v55 = vadd.f32 %v7223_v19, %v7222_v60  ;;  %3203 = vst [vmem:[#allocation3 + $0x48] sm:$0xff] %v3173_v17 }
 0x21e   :  { %v3055_v62 = vpop.f32.mrb[144].mxu0 }
 0x21f   :  { %v3056_v26 = vadd.f32 %v10867_v31, %v3055_v62  ;;  %v7884_v9 = vpop.f32.mrb[145].mxu0 }
 0x220   :  { %v3058_v43 = vpop.f32.mrb[146].mxu0 }
 0x221   :  { %v7225_v45 = vpop.f32.mrb[144].mxu1  ;;  %v3174_v49 = vadd.f32 %v3056_v26, %v10756_v6  ;;  %v3059_v58 = vadd.f32 %v10874_v61, %v3058_v43  ;;  %v7885_v7 = vpop.f32.mrb[147].mxu0 }
 0x222   :  { %v7226_v12 = vpop.f32.mrb[145].mxu1  ;;  %v13432_v7 = vld [vmem:[#allocation18_spill] sm:$0xff] }
 0x223   :  { %v10947_v23 = vadd.f32 %v7226_v12, %v7225_v45  ;;  %v7228_v46 = vpop.f32.mrb[146].mxu1  ;;  %3204 = vst [vmem:[#allocation3 + $0x50] sm:$0xff] %v3174_v49  ;;  %v3175_v11 = vadd.f32 %v3059_v58, %v10758_v13  ;;  %v13431_v13 = vld [vmem:[#allocation39_spill] sm:$0xff] }
 0x224   :  { %v7229_v41 = vpop.f32.mrb[147].mxu1 }
 0x225   :  { %v10950_v57 = vadd.f32 %v7229_v41, %v7228_v46  ;;  %3205 = vst [vmem:[#allocation3 + $0x58] sm:$0xff] %v3175_v11 }
 0x226   :  { %v3063_v31 = vpop.f32.mrb[148].mxu0 }
 0x227   :  { %v3064_v27 = vadd.f32 %v10881_v44, %v3063_v31  ;;  %v7888_v15 = vpop.f32.mrb[149].mxu0 }
 0x228   :  { %v3066_v16 = vpop.f32.mrb[150].mxu0 }
 0x229   :  { %v7231_v6 = vpop.f32.mrb[148].mxu1  ;;  %v3176_v61 = vadd.f32 %v3064_v27, %v13430_v29  ;;  %v3067_v1 = vadd.f32 %v10888_v37, %v3066_v16  ;;  %v7889_v28 = vpop.f32.mrb[151].mxu0 }
 0x22a   :  { %v7232_v21 = vpop.f32.mrb[149].mxu1 }
 0x22b   :  { %v10955_v4 = vadd.f32 %v7232_v21, %v7231_v6  ;;  %v7234_v54 = vpop.f32.mrb[150].mxu1  ;;  %3206 = vst [vmem:[#allocation3 + $0x60] sm:$0xff] %v3176_v61  ;;  %v3177_v36 = vadd.f32 %v3067_v1, %v13431_v13 }
 0x22c   :  { %v7235_v38 = vpop.f32.mrb[151].mxu1 }
 0x22d   :  { %v10958_v50 = vadd.f32 %v7235_v38, %v7234_v54  ;;  %3207 = vst [vmem:[#allocation3 + $0x68] sm:$0xff] %v3177_v36 }
 0x22e   :  { %v3071_v44 = vpop.f32.mrb[152].mxu0 }
 0x22f   :  { %v3072_v18 = vadd.f32 %v10895_v63, %v3071_v44  ;;  %v7892_v2 = vpop.f32.mrb[153].mxu0 }
 0x230   :  { %v3074_v60 = vpop.f32.mrb[154].mxu0 }
 0x231   :  { %v3178_v17 = vadd.f32 %v3072_v18, %v10789_v20  ;;  %v3075_v37 = vadd.f32 %v10900_v51, %v3074_v60  ;;  %v7893_v19 = vpop.f32.mrb[155].mxu0 }
 0x233   :  { %3208 = vst [vmem:[#allocation3 + $0x70] sm:$0xff] %v3178_v17  ;;  %v3179_v62 = vadd.f32 %v3075_v37, %v10792_v24 }
 0x235   :  { %3209 = vst [vmem:[#allocation3 + $0x78] sm:$0xff] %v3179_v62 }
 0x236   :  { %v3079_v26 = vpop.f32.mrb[156].mxu0 }
 0x237   :  { %v3080_v9 = vadd.f32 %v10908_v3, %v3079_v26  ;;  %v7896_v43 = vpop.f32.mrb[157].mxu0 }
 0x238   :  { %v3082_v45 = vpop.f32.mrb[158].mxu0 }
 0x239   :  { %v3180_v49 = vadd.f32 %v3080_v9, %v10801_v35  ;;  %v3083_v63 = vadd.f32 %v10910_v53, %v3082_v45  ;;  %v7897_v58 = vpop.f32.mrb[159].mxu0 }
 0x23b   :  { %3210 = vst [vmem:[#allocation3 + $0x80] sm:$0xff] %v3180_v49  ;;  %v3181_v20 = vadd.f32 %v3083_v63, %v13432_v7 }
 0x23d   :  { %3211 = vst [vmem:[#allocation3 + $0x88] sm:$0xff] %v3181_v20 }
 0x23e   :  { %v3087_v51 = vpop.f32.mrb[160].mxu0 }
 0x23f   :  { %v3088_v12 = vadd.f32 %v10915_v25, %v3087_v51  ;;  %v7900_v46 = vpop.f32.mrb[161].mxu0 }
 0x240   :  { %v3090_v24 = vpop.f32.mrb[162].mxu0 }
 0x241   :  { %v3182_v11 = vadd.f32 %v3088_v12, %v10815_v14  ;;  %v3091_v3 = vadd.f32 %v10918_v22, %v3090_v24  ;;  %v7901_v41 = vpop.f32.mrb[163].mxu0 }
 0x243   :  { %3212 = vst [vmem:[#allocation3 + $0x90] sm:$0xff] %v3182_v11  ;;  %v3183_v35 = vadd.f32 %v3091_v3, %v10820_v5 }
 0x245   :  { %3213 = vst [vmem:[#allocation3 + $0x98] sm:$0xff] %v3183_v35 }
 0x246   :  { %v3095_v53 = vpop.f32.mrb[164].mxu0 }
 0x247   :  { %v3096_v31 = vadd.f32 %v10923_v42, %v3095_v53  ;;  %v7904_v27 = vpop.f32.mrb[165].mxu0 }
 0x248   :  { %v3098_v15 = vpop.f32.mrb[166].mxu0 }
 0x249   :  { %v3184_v16 = vadd.f32 %v3096_v31, %v10829_v47  ;;  %v3099_v25 = vadd.f32 %v10926_v33, %v3098_v15  ;;  %v7905_v6 = vpop.f32.mrb[167].mxu0 }
 0x24b   :  { %3214 = vst [vmem:[#allocation3 + $0xa0] sm:$0xff] %v3184_v16  ;;  %v3185_v14 = vadd.f32 %v3099_v25, %v10834_v52 }
 0x24d   :  { %3215 = vst [vmem:[#allocation3 + $0xa8] sm:$0xff] %v3185_v14 }
 0x24e   :  { %v3103_v22 = vpop.f32.mrb[168].mxu0 }
 0x24f   :  { %v3104_v29 = vadd.f32 %v10931_v10, %v3103_v22  ;;  %v7908_v61 = vpop.f32.mrb[169].mxu0 }
 0x250   :  { %v3106_v5 = vpop.f32.mrb[170].mxu0 }
 0x251   :  { %v3186_v1 = vadd.f32 %v3104_v29, %v10843_v59  ;;  %v3107_v42 = vadd.f32 %v10934_v8, %v3106_v5  ;;  %v7909_v28 = vpop.f32.mrb[171].mxu0 }
 0x253   :  { %3216 = vst [vmem:[#allocation3 + $0xb0] sm:$0xff] %v3186_v1  ;;  %v3187_v47 = vadd.f32 %v3107_v42, %v10848_v32 }
 0x255   :  { %3217 = vst [vmem:[#allocation3 + $0xb8] sm:$0xff] %v3187_v47 }
 0x256   :  { %v3111_v33 = vpop.f32.mrb[172].mxu0 }
 0x257   :  { %v3112_v21 = vadd.f32 %v10939_v48, %v3111_v33  ;;  %v7912_v54 = vpop.f32.mrb[173].mxu0 }
 0x258   :  { %v3114_v52 = vpop.f32.mrb[174].mxu0 }
 0x259   :  { %v3188_v13 = vadd.f32 %v3112_v21, %v10857_v34  ;;  %v3115_v10 = vadd.f32 %v10942_v55, %v3114_v52  ;;  %v7913_v36 = vpop.f32.mrb[175].mxu0 }
 0x25b   :  { %3218 = vst [vmem:[#allocation3 + $0xc0] sm:$0xff] %v3188_v13  ;;  %v3189_v59 = vadd.f32 %v3115_v10, %v10862_v0 }
 0x25d   :  { %3219 = vst [vmem:[#allocation3 + $0xc8] sm:$0xff] %v3189_v59 }
 0x25e   :  { %v3119_v8 = vpop.f32.mrb[176].mxu0 }
 0x25f   :  { %v3120_v38 = vadd.f32 %v10947_v23, %v3119_v8  ;;  %v7916_v44 = vpop.f32.mrb[177].mxu0 }
 0x260   :  { %v3122_v32 = vpop.f32.mrb[178].mxu0 }
 0x261   :  { %v3190_v18 = vadd.f32 %v3120_v38, %v10871_v56  ;;  %v3123_v48 = vadd.f32 %v10950_v57, %v3122_v32  ;;  %v7917_v2 = vpop.f32.mrb[179].mxu0  ;;  %v9059_v57 = vmov 0.0  }
 0x263   :  { %3220 = vst [vmem:[#allocation3 + $0xd0] sm:$0xff] %v3190_v18  ;;  %v3191_v34 = vadd.f32 %v3123_v48, %v10876_v40 }
 0x265   :  { %3221 = vst [vmem:[#allocation3 + $0xd8] sm:$0xff] %v3191_v34 }
 0x266   :  { %v3127_v55 = vpop.f32.mrb[180].mxu0 }
 0x267   :  { %v3128_v60 = vadd.f32 %v10955_v4, %v3127_v55  ;;  %v7920_v17 = vpop.f32.mrb[181].mxu0 }
 0x268   :  { %v3130_v0 = vpop.f32.mrb[182].mxu0 }
 0x269   :  { %v3192_v37 = vadd.f32 %v3128_v60, %v10885_v30  ;;  %v3131_v23 = vadd.f32 %v10958_v50, %v3130_v0  ;;  %v7921_v19 = vpop.f32.mrb[183].mxu0 }
 0x26b   :  { %3222 = vst [vmem:[#allocation3 + $0xe0] sm:$0xff] %v3192_v37  ;;  %v3193_v56 = vadd.f32 %v3131_v23, %v10890_v39 }
 0x26d   :  { %3223 = vst [vmem:[#allocation3 + $0xe8] sm:$0xff] %v3193_v56 }
 0x26e LB: > { %s6623_s12 = sshll.u32 %s9065_s11, 7  ;;  %s3229_s11 = sadd.s32 1, %s9065_s11   ;;  %s9065_s11 = sphi %s10992_s11, %s3229_s11   ;;  %v9061_v57 = vphi %v9059_v57, %v9060_v57  }
 0x26f   : > { %s3232_s13 = scalar_lea.vmem [#allocation3], %s6623_s12  ;;  %p3226_p0 = scmp.ge.s32.totalorder %s3229_s11, 2  }
 0x270   :  { %v3271_v47 = vld [vmem:[%s12986_s5] sm:$0xff] (%p3226_p0)  ;;  %v3272_v33 = vld [vmem:[%s12986_s5 + $0x8] sm:$0xff] (%p3226_p0)  ;;  %v3273_v21 = vld [vmem:[%s12986_s5 + $0x10] sm:$0xff] (%p3226_p0)  ;;  %v13433_v54 = vmov (%p3226_p0), 0.0   ;;  %vm13434_vm11 = vmmov (%p3226_p0), 0   ;;  %v13184_v52 = vmov (%p3226_p0), 0.0|0.0  }
 0x271   :  { %7954 = vmatprep.mubr.msk.f32.mxu1 (%p3226_p0), %vm13434_vm11, %v13433_v54  ;;  %8262 = vmatprep.subr.bf16.mxu1 (%p3226_p0), %v13184_v52  ;;  %v11013_v13 = vpack.c.bf16 (%p3226_p0), %v3272_v33, %v3271_v47  ;;  %v3274_v10 = vld [vmem:[%s12986_s5 + $0x18] sm:$0xff] (%p3226_p0)  ;;  %v3275_v59 = vld [vmem:[%s12986_s5 + $0x20] sm:$0xff] (%p3226_p0)  ;;  %v3276_v8 = vld [vmem:[%s12986_s5 + $0x28] sm:$0xff] (%p3226_p0)  ;;  %s11087_s22 = smov (%p3226_p0), 0  }
 0x272   :  { %v11019_v36 = vpack.c.bf16 (%p3226_p0), %v3274_v10, %v3273_v21  ;;  %v11029_v38 = vpack.c.bf16 (%p3226_p0), %v3276_v8, %v3275_v59  ;;  %v3277_v44 = vld [vmem:[%s12986_s5 + $0x30] sm:$0xff] (%p3226_p0)  ;;  %v3278_v32 = vld [vmem:[%s12986_s5 + $0x38] sm:$0xff] (%p3226_p0)  ;;  %v3279_v48 = vld [vmem:[%s12986_s5 + $0x40] sm:$0xff] (%p3226_p0) }
 0x273   :  { %8264 = vmatpush3.bf16.msra.mxu1 (%p3226_p0), %v11013_v13  ;;  %v11039_v18 = vpack.c.bf16 (%p3226_p0), %v3278_v32, %v3277_v44  ;;  %v3280_v2 = vld [vmem:[%s12986_s5 + $0x48] sm:$0xff] (%p3226_p0)  ;;  %v3281_v55 = vld [vmem:[%s12986_s5 + $0x50] sm:$0xff] (%p3226_p0)  ;;  %v3282_v60 = vld [vmem:[%s12986_s5 + $0x58] sm:$0xff] (%p3226_p0) }
 0x274   : > { %v3233_v40 = vld [vmem:[%s3232_s13] sm:$0xff]  ;;  %v3234_v30 = vld [vmem:[%s3232_s13 + $0x8] sm:$0xff]  ;;  %v3235_v4 = vld [vmem:[%s3232_s13 + $0x10] sm:$0xff]  ;;  %8265 = vmatprep.subr.bf16.mxu1 (%p3226_p0), %v13184_v52  ;;  %v11049_v34 = vpack.c.bf16 (%p3226_p0), %v3280_v2, %v3279_v48  ;;  %v11059_v17 = vpack.c.bf16 (%p3226_p0), %v3282_v60, %v3281_v55 }
 0x275   : > { %v3249_v50 = vadd.f32 %v3234_v30, %v3233_v40  ;;  %v3236_v62 = vld [vmem:[%s3232_s13 + $0x18] sm:$0xff]  ;;  %v3237_v39 = vld [vmem:[%s3232_s13 + $0x20] sm:$0xff]  ;;  %v3238_v43 = vld [vmem:[%s3232_s13 + $0x28] sm:$0xff] }
 0x276   : > { %v3239_v49 = vld [vmem:[%s3232_s13 + $0x30] sm:$0xff]  ;;  %v3240_v58 = vld [vmem:[%s3232_s13 + $0x38] sm:$0xff]  ;;  %v3241_v20 = vld [vmem:[%s3232_s13 + $0x40] sm:$0xff] }
 0x277   : > { %v3250_v26 = vadd.f32 %v3249_v50, %v3235_v4  ;;  %v3242_v12 = vld [vmem:[%s3232_s13 + $0x48] sm:$0xff]  ;;  %v3243_v24 = vld [vmem:[%s3232_s13 + $0x50] sm:$0xff]  ;;  %v3244_v3 = vld [vmem:[%s3232_s13 + $0x58] sm:$0xff]  ;;  %8267 = vmatpush3.bf16.msra.mxu1 (%p3226_p0), %v11019_v36  ;;  %v11085_v4 = vmov (%p3226_p0), 0.0  }
 0x278   : > { %v3245_v35 = vld [vmem:[%s3232_s13 + $0x60] sm:$0xff]  ;;  %v3246_v31 = vld [vmem:[%s3232_s13 + $0x68] sm:$0xff]  ;;  %v3247_v15 = vld [vmem:[%s3232_s13 + $0x70] sm:$0xff]  ;;  %8268 = vmatprep.subr.bf16.mxu1 (%p3226_p0), %v13184_v52 }
 0x279   : > { %v3251_v9 = vadd.f32 %v3250_v26, %v3236_v62  ;;  %v3248_v25 = vld [vmem:[%s3232_s13 + $0x78] sm:$0xff]  ;;  %v3283_v0 = vld [vmem:[%s12986_s5 + $0x60] sm:$0xff] (%p3226_p0)  ;;  %v3284_v37 = vld [vmem:[%s12986_s5 + $0x68] sm:$0xff] (%p3226_p0) }
 0x27a   :  { %v11069_v23 = vpack.c.bf16 (%p3226_p0), %v3284_v37, %v3283_v0  ;;  %v3285_v19 = vld [vmem:[%s12986_s5 + $0x70] sm:$0xff] (%p3226_p0)  ;;  %v3286_v56 = vld [vmem:[%s12986_s5 + $0x78] sm:$0xff] (%p3226_p0) }
 0x27b   : > { %v3252_v45 = vadd.f32 %v3251_v9, %v3237_v39  ;;  %8270 = vmatpush3.bf16.msra.mxu1 (%p3226_p0), %v11029_v38 }
 0x27c   :  { %8271 = vmatprep.subr.bf16.mxu1 (%p3226_p0), %v13184_v52 }
 0x27d   : > { %v3253_v63 = vadd.f32 %v3252_v45, %v3238_v43 }
 0x27f   : > { %v3254_v7 = vadd.f32 %v3253_v63, %v3239_v49  ;;  %8273 = vmatpush3.bf16.msra.mxu1 (%p3226_p0), %v11039_v18 }
 0x280   :  { %8274 = vmatprep.subr.bf16.mxu1 (%p3226_p0), %v13184_v52 }
 0x281   : > { %v3255_v51 = vadd.f32 %v3254_v7, %v3240_v58 }
 0x283   : > { %v3256_v46 = vadd.f32 %v3255_v51, %v3241_v20  ;;  %8276 = vmatpush3.bf16.msra.mxu1 (%p3226_p0), %v11049_v34 }
 0x284   :  { %8277 = vmatprep.subr.bf16.mxu1 (%p3226_p0), %v13184_v52 }
 0x285   : > { %v3257_v11 = vadd.f32 %v3256_v46, %v3242_v12 }
 0x287   : > { %v3258_v41 = vadd.f32 %v3257_v11, %v3243_v24  ;;  %8279 = vmatpush3.bf16.msra.mxu1 (%p3226_p0), %v11059_v17 }
 0x288   :  { %8280 = vmatprep.subr.bf16.mxu1 (%p3226_p0), %v13184_v52 }
 0x289   : > { %v3259_v53 = vadd.f32 %v3258_v41, %v3244_v3 }
 0x28b   : > { %v3260_v27 = vadd.f32 %v3259_v53, %v3245_v35  ;;  %8282 = vmatpush3.bf16.msra.mxu1 (%p3226_p0), %v11069_v23 }
 0x28c   :  { %8283 = vmatprep.subr.bf16.mxu1 (%p3226_p0), %v13184_v52 }
 0x28d   : > { %v3261_v16 = vadd.f32 %v3260_v27, %v3246_v31 }
 0x28f   : > { %v3262_v6 = vadd.f32 %v3261_v16, %v3247_v15 }
 0x291   : > { %v3263_v14 = vadd.f32 %v3262_v6, %v3248_v25 }
 0x293   : > { %v3264_v22 = vrot.slane %v3263_v14, 4 }
 0x295   : > { %v3265_v29 = vadd.f32 %v3264_v22, %v3263_v14 }
 0x297   : > { %v3266_v61 = vrot.slane %v3265_v29, 2 }
 0x299   : > { %v3267_v5 = vadd.f32 %v3266_v61, %v3265_v29 }
 0x29b   : > { %v3268_v1 = vrot.slane %v3267_v5, 1  ;;  %3228 = sbr.rel (!%p3226_p0) target bundleno = 622 (0x26e), region = 97 }
 0x29d   : > { %v3269_v42 = vadd.f32 %v3268_v1, %v3267_v5 }
 0x29f   : > { %v3270_v28 = vadd.f32 %v9061_v57, %v3269_v42  }
 0x2a1   : > { %v9060_v57 = vmov %v3270_v28  }
 0x2a2   :  { %v11079_v57 = vpack.c.bf16 %v3286_v56, %v3285_v19 }
 0x2a4   :  { %8285 = vmatpush3.bf16.msra.mxu1 %v11079_v57 }
 0x2a7   :  { %7955 = vmatmul.mubr.f32.vlgmr.msra.gmra.mrb[152].mxu1 %v3270_v28 }
 0x37a   :  { %v11083_v40 = vpop.f32.mrb[152].mxu1 }
 0x37b   :  { %v7956_v30 = vpop.f32.mrb[153].mxu1 }
 0x37c LB: > { %v13435_v50 = vld [vmem:[#allocation4_spill] sm:$0xff]  ;;  %s6624_s23 = sshll.u32 %s9073_s22, 7  ;;  %s3362_s22 = sadd.s32 1, %s9073_s22   ;;  %s9073_s22 = sphi %s11087_s22, %s3362_s22   ;;  %v9069_v4 = vphi %v11085_v4, %v13437_v4  }
 0x37d   : > { %v11096_v62 = vsub.s32 0, %v13435_v50  ;;  %s11101_s24 = scalar_lea.vmem [#allocation3], %s6624_s23  ;;  %p3359_p1 = scmp.ge.s32.totalorder %s3362_s22, 2  }
 0x37e   : > { %v3366_v39 = vld [vmem:[%s11101_s24] sm:$0xff]  ;;  %v3367_v9 = vld [vmem:[%s11101_s24 + $0x8] sm:$0xff]  ;;  %v3368_v43 = vld [vmem:[%s11101_s24 + $0x10] sm:$0xff]  ;;  %8286 = vmatprep.subr.bf16.mxu1 (%p3359_p1), %v13184_v52  ;;  %vm13439_vm14 = vmmov (%p3359_p1), 0   ;;  %s11159_s29 = smov (%p3359_p1), 0  }
 0x37f   : > { %13436 = vst [vmem:[#allocation45_spill] sm:$0xff] %v11096_v62  ;;  %v3385_v26 = vrot.slane %v11083_v40, %v11096_v62  ;;  %v3369_v63 = vld [vmem:[%s11101_s24 + $0x18] sm:$0xff]  ;;  %v3370_v7 = vld [vmem:[%s11101_s24 + $0x20] sm:$0xff]  ;;  %v3371_v46 = vld [vmem:[%s11101_s24 + $0x28] sm:$0xff]  ;;  %8288 = vmatpush3.bf16.msra.mxu1 (%p3359_p1), %v11013_v13 }
 0x380   : > { %v3372_v3 = vld [vmem:[%s11101_s24 + $0x30] sm:$0xff]  ;;  %v3373_v31 = vld [vmem:[%s11101_s24 + $0x38] sm:$0xff]  ;;  %v3374_v25 = vld [vmem:[%s11101_s24 + $0x40] sm:$0xff]  ;;  %8289 = vmatprep.subr.bf16.mxu1 (%p3359_p1), %v13184_v52 }
 0x381   : > { %v3386_v45 = vsub.f32 %v3366_v39, %v3385_v26  ;;  %v3387_v49 = vsub.f32 %v3367_v9, %v3385_v26  ;;  %v3388_v58 = vsub.f32 %v3368_v43, %v3385_v26  ;;  %v3389_v20 = vsub.f32 %v3369_v63, %v3385_v26  ;;  %v3375_v29 = vld [vmem:[%s11101_s24 + $0x48] sm:$0xff]  ;;  %v3376_v42 = vld [vmem:[%s11101_s24 + $0x50] sm:$0xff]  ;;  %v3377_v21 = vld [vmem:[%s11101_s24 + $0x58] sm:$0xff] }
 0x382   : > { %v3390_v24 = vsub.f32 %v3370_v7, %v3385_v26  ;;  %v3391_v41 = vsub.f32 %v3371_v46, %v3385_v26  ;;  %v3392_v27 = vsub.f32 %v3372_v3, %v3385_v26  ;;  %v3393_v6 = vsub.f32 %v3373_v31, %v3385_v26  ;;  %v3378_v8 = vld [vmem:[%s11101_s24 + $0x60] sm:$0xff]  ;;  %v3379_v2 = vld [vmem:[%s11101_s24 + $0x68] sm:$0xff]  ;;  %v3380_v37 = vld [vmem:[%s11101_s24 + $0x70] sm:$0xff] }
 0x383   : > { %v3402_v51 = vmul.f32 %v3386_v45, %v3386_v45  ;;  %v3403_v12 = vmul.f32 %v3387_v49, %v3387_v49  ;;  %v3404_v11 = vmul.f32 %v3388_v58, %v3388_v58  ;;  %v3405_v35 = vmul.f32 %v3389_v20, %v3389_v20  ;;  %v3381_v50 = vld [vmem:[%s11101_s24 + $0x78] sm:$0xff]  ;;  %8291 = vmatpush3.bf16.msra.mxu1 (%p3359_p1), %v11019_v36 }
 0x384   : > { %v3406_v15 = vmul.f32 %v3390_v24, %v3390_v24  ;;  %v3407_v14 = vmul.f32 %v3391_v41, %v3391_v41  ;;  %v3394_v61 = vsub.f32 %v3374_v25, %v3385_v26  ;;  %v3408_v5 = vmul.f32 %v3392_v27, %v3392_v27  ;;  %8292 = vmatprep.subr.bf16.mxu1 (%p3359_p1), %v13184_v52 }
 0x385   : > { %v3418_v53 = vadd.f32 %v3403_v12, %v3402_v51  ;;  %v3395_v28 = vsub.f32 %v3375_v29, %v3385_v26  ;;  %v3409_v47 = vmul.f32 %v3393_v6, %v3393_v6  ;;  %v3396_v54 = vsub.f32 %v3376_v42, %v3385_v26 }
 0x386   : > { %v3410_v10 = vmul.f32 %v3394_v61, %v3394_v61  ;;  %v3397_v44 = vsub.f32 %v3377_v21, %v3385_v26  ;;  %v3398_v55 = vsub.f32 %v3378_v8, %v3385_v26  ;;  %v3399_v19 = vsub.f32 %v3379_v2, %v3385_v26 }
 0x387   : > { %v3419_v16 = vadd.f32 %v3418_v53, %v3404_v11  ;;  %v3411_v32 = vmul.f32 %v3395_v28, %v3395_v28  ;;  %v3412_v60 = vmul.f32 %v3396_v54, %v3396_v54  ;;  %v3400_v39 = vsub.f32 %v3380_v37, %v3385_v26  ;;  %8294 = vmatpush3.bf16.msra.mxu1 (%p3359_p1), %v11029_v38 }
 0x388   : > { %v3413_v56 = vmul.f32 %v3397_v44, %v3397_v44  ;;  %v3414_v9 = vmul.f32 %v3398_v55, %v3398_v55  ;;  %v3401_v45 = vsub.f32 %v3381_v50, %v3385_v26  ;;  %v3415_v49 = vmul.f32 %v3399_v19, %v3399_v19  ;;  %8295 = vmatprep.subr.bf16.mxu1 (%p3359_p1), %v13184_v52 }
 0x389   : > { %v3420_v22 = vadd.f32 %v3419_v16, %v3405_v35  ;;  %v3416_v58 = vmul.f32 %v3400_v39, %v3400_v39  ;;  %v13438_v26 = vmov (%p3359_p1), 0.0  }
 0x38a   : > { %v3417_v20 = vmul.f32 %v3401_v45, %v3401_v45  ;;  %7989 = vmatprep.mubr.msk.f32.mxu1 (%p3359_p1), %vm13439_vm14, %v13438_v26 }
 0x38b   : > { %v3421_v1 = vadd.f32 %v3420_v22, %v3406_v15  ;;  %8297 = vmatpush3.bf16.msra.mxu1 (%p3359_p1), %v11039_v18  ;;  %v3511_v18 = vld [vmem:[%s12984_s3] sm:$0x1] (%p3359_p1) }
 0x38c   :  { %8298 = vmatprep.subr.bf16.mxu1 (%p3359_p1), %v13184_v52 }
 0x38d   : > { %v3422_v33 = vadd.f32 %v3421_v1, %v3407_v14 }
 0x38f   : > { %v3423_v59 = vadd.f32 %v3422_v33, %v3408_v5  ;;  %8300 = vmatpush3.bf16.msra.mxu1 (%p3359_p1), %v11049_v34 }
 0x390   :  { %8301 = vmatprep.subr.bf16.mxu1 (%p3359_p1), %v13184_v52 }
 0x391   : > { %v3424_v48 = vadd.f32 %v3423_v59, %v3409_v47 }
 0x393   : > { %v3425_v0 = vadd.f32 %v3424_v48, %v3410_v10  ;;  %8303 = vmatpush3.bf16.msra.mxu1 (%p3359_p1), %v11059_v17  ;;  %v11151_v17 = vld [vmem:[%s12985_s4] sm:$0x1] (%p3359_p1) }
 0x394   :  { %8304 = vmatprep.subr.bf16.mxu1 (%p3359_p1), %v13184_v52 }
 0x395   : > { %v3426_v30 = vadd.f32 %v3425_v0, %v3411_v32 }
 0x397   : > { %v3427_v43 = vadd.f32 %v3426_v30, %v3412_v60  ;;  %8306 = vmatpush3.bf16.msra.mxu1 (%p3359_p1), %v11069_v23 }
 0x398   :  { %8307 = vmatprep.subr.bf16.mxu1 (%p3359_p1), %v13184_v52 }
 0x399   : > { %v3428_v63 = vadd.f32 %v3427_v43, %v3413_v56 }
 0x39b   : > { %v3429_v7 = vadd.f32 %v3428_v63, %v3414_v9  ;;  %8309 = vmatpush3.bf16.msra.mxu1 (%p3359_p1), %v11079_v57 }
 0x39d   : > { %v3430_v51 = vadd.f32 %v3429_v7, %v3415_v49 }
 0x39f   : > { %v3431_v12 = vadd.f32 %v3430_v51, %v3416_v58 }
 0x3a1   : > { %v3432_v46 = vadd.f32 %v3431_v12, %v3417_v20 }
 0x3a3   : > { %v3433_v24 = vrot.slane %v3432_v46, 4 }
 0x3a5   : > { %v3434_v11 = vadd.f32 %v3433_v24, %v3432_v46 }
 0x3a7   : > { %v3435_v3 = vrot.slane %v3434_v11, 2 }
 0x3a9   : > { %v3436_v41 = vadd.f32 %v3435_v3, %v3434_v11 }
 0x3ab   : > { %v3437_v35 = vrot.slane %v3436_v41, 1  ;;  %3361 = sbr.rel (!%p3359_p1) target bundleno = 892 (0x37c), region = 108 }
 0x3ad   : > { %v3438_v53 = vadd.f32 %v3437_v35, %v3436_v41 }
 0x3af   : > { %v3439_v31 = vadd.f32 %v9069_v4, %v3438_v53  }
 0x3b1   : > { %v13437_v4 = vmov %v3439_v31  ;;  %7990 = vmatmul.mubr.f32.vlgmr.msra.gmra.mrb[154].mxu1 (%p3359_p1), %v3439_v31 }
 0x484   :  { %v3506_v13 = vpop.f32.mrb[154].mxu1 }
 0x485   :  { %v3507_v36 = vadd.f32 1e-05, %v3506_v13  ;;  %v7991_v38 = vpop.f32.mrb[155].mxu1 }
 0x487   :  { %8547 = vrsqrt.f32 %v3507_v36 }
 0x491   :  { %v8548_v34 = vpop.eup %8547 }
 0x492   :  { %v11146_v4 = vmul.f32 %v8548_v34, %v3511_v18 }
 0x494   :  { %v11155_v23 = vmul.f32 %v11146_v4, %v11083_v40 }
 0x496   :  { %v3515_v57 = vsub.f32 %v11151_v17, %v11155_v23 }
 0x497 LB: > { %v3544_v27 = vrot.slane %v11146_v4, %v11096_v62  ;;  %s6625_s30 = sshll.u32 %s9077_s29, 7  ;;  %s3521_s29 = sadd.s32 1, %s9077_s29   ;;  %s9077_s29 = sphi %s11159_s29, %s3521_s29  }
 0x498   : > { %v11171_v40 = vrot.slane %v3515_v57, %v11096_v62  ;;  %s11173_s7 = scalar_lea.vmem [#allocation3], %s6625_s30  ;;  %s11184_s10 = scalar_lea.vmem %s12987_s6, %s6625_s30 }
 0x499   : > { %v3525_v15 = vld [vmem:[%s11173_s7] sm:$0xff]  ;;  %v3526_v16 = vld [vmem:[%s11173_s7 + $0x8] sm:$0xff]  ;;  %v3527_v25 = vld [vmem:[%s11173_s7 + $0x10] sm:$0xff]  ;;  %p3518_p2 = scmp.ge.s32.totalorder %s3521_s29, 2  }
 0x49a   : > { %v3545_v6 = vmul.f32 %v3544_v27, %v3525_v15  ;;  %v3546_v14 = vmul.f32 %v3544_v27, %v3526_v16  ;;  %v3547_v22 = vmul.f32 %v3544_v27, %v3527_v25  ;;  %v3528_v29 = vld [vmem:[%s11173_s7 + $0x18] sm:$0xff]  ;;  %v3529_v61 = vld [vmem:[%s11173_s7 + $0x20] sm:$0xff]  ;;  %v3530_v5 = vld [vmem:[%s11173_s7 + $0x28] sm:$0xff]  ;;  %v13440_v31 = vmov (%p3518_p2), 0.0  }
 0x49b   : > { %v3548_v1 = vmul.f32 %v3544_v27, %v3528_v29  ;;  %v3549_v42 = vmul.f32 %v3544_v27, %v3529_v61  ;;  %v3550_v28 = vmul.f32 %v3544_v27, %v3530_v5  ;;  %v3531_v47 = vld [vmem:[%s11173_s7 + $0x30] sm:$0xff]  ;;  %v3532_v33 = vld [vmem:[%s11173_s7 + $0x38] sm:$0xff]  ;;  %v3533_v21 = vld [vmem:[%s11173_s7 + $0x40] sm:$0xff]  ;;  %7992 = vmatprep.subr.bf16.mxu1 (%p3518_p2), %v13440_v31  ;;  %vm13441_vm0 = vmmov (%p3518_p2), 0  }
 0x49c   : > { %v3567_v54 = vadd.f32 %v11171_v40, %v3545_v6  ;;  %v3568_v10 = vadd.f32 %v11171_v40, %v3546_v14  ;;  %v3569_v59 = vadd.f32 %v11171_v40, %v3547_v22  ;;  %v3551_v8 = vmul.f32 %v3544_v27, %v3531_v47  ;;  %v3534_v44 = vld [vmem:[%s11173_s7 + $0x48] sm:$0xff]  ;;  %v3535_v32 = vld [vmem:[%s11173_s7 + $0x50] sm:$0xff]  ;;  %v3536_v48 = vld [vmem:[%s11173_s7 + $0x58] sm:$0xff]  ;;  %8008 = vmatprep.mubr.msk.bf16.mxu1 (%p3518_p2), %vm13441_vm0, %v13440_v31 }
 0x49d   : > { %v3570_v2 = vadd.f32 %v11171_v40, %v3548_v1  ;;  %v3571_v55 = vadd.f32 %v11171_v40, %v3549_v42  ;;  %v3572_v60 = vadd.f32 %v11171_v40, %v3550_v28  ;;  %v3552_v0 = vmul.f32 %v3544_v27, %v3532_v33  ;;  %v3537_v37 = vld [vmem:[%s11173_s7 + $0x60] sm:$0xff]  ;;  %v3538_v19 = vld [vmem:[%s11173_s7 + $0x68] sm:$0xff]  ;;  %v3539_v56 = vld [vmem:[%s11173_s7 + $0x70] sm:$0xff] }
 0x49e   : > { %3585 = vst [vmem:[%s11184_s10] sm:$0xff] %v3567_v54  ;;  %3586 = vst [vmem:[%s11184_s10 + $0x8] sm:$0xff] %v3568_v10  ;;  %v3573_v30 = vadd.f32 %v11171_v40, %v3551_v8  ;;  %v3553_v50 = vmul.f32 %v3544_v27, %v3533_v21  ;;  %v3554_v39 = vmul.f32 %v3544_v27, %v3534_v44  ;;  %v3540_v43 = vld [vmem:[%s11173_s7 + $0x78] sm:$0xff]  ;;  %v8549_v53 = vld [vmem:[%s12983_s1 + $0x40] sm:$0xff] (%p3518_p2)  }
 0x49f   : > { %3587 = vst [vmem:[%s11184_s10 + $0x10] sm:$0xff] %v3569_v59  ;;  %v3555_v9 = vmul.f32 %v3544_v27, %v3535_v32  ;;  %3588 = vst [vmem:[%s11184_s10 + $0x18] sm:$0xff] %v3570_v2  ;;  %v3574_v45 = vadd.f32 %v11171_v40, %v3552_v0  ;;  %v3556_v49 = vmul.f32 %v3544_v27, %v3536_v48  ;;  %v8550_v26 = vld [vmem:[%s12983_s1] sm:$0xff] (%p3518_p2)   ;;  %7294 = vmatprep.subr.bf16.mxu0 (%p3518_p2), %v8549_v53  ;;  %v8552_v36 = vld [vmem:[%s12983_s1 + $0x48] sm:$0xff] (%p3518_p2)  }
 0x4a0   : > { %3589 = vst [vmem:[%s11184_s10 + $0x20] sm:$0xff] %v3571_v55  ;;  %3590 = vst [vmem:[%s11184_s10 + $0x28] sm:$0xff] %v3572_v60  ;;  %v3557_v63 = vmul.f32 %v3544_v27, %v3537_v37  ;;  %v3558_v58 = vmul.f32 %v3544_v27, %v3538_v19  ;;  %v3575_v7 = vadd.f32 %v11171_v40, %v3553_v50  ;;  %3520 = sbr.rel (!%p3518_p2) target bundleno = 1175 (0x497), region = 119  ;;  %v8551_v13 = vld [vmem:[%s12983_s1 + $0x80] sm:$0xff] (%p3518_p2)   ;;  %7295 = vmatpush3.bf16.msra.mxu0 (%p3518_p2), %v8550_v26  ;;  %v8553_v38 = vld [vmem:[%s12983_s1 + $0x8] sm:$0xff] (%p3518_p2)  }
 0x4a1   : > { %3591 = vst [vmem:[%s11184_s10 + $0x30] sm:$0xff] %v3573_v30  ;;  %v3576_v20 = vadd.f32 %v11171_v40, %v3554_v39  ;;  %v3577_v51 = vadd.f32 %v11171_v40, %v3555_v9  ;;  %v3559_v12 = vmul.f32 %v3544_v27, %v3539_v56  ;;  %3592 = vst [vmem:[%s11184_s10 + $0x38] sm:$0xff] %v3574_v45  ;;  %7993 = vmatpush3.bf16.msra.mxu1 (%p3518_p2), %v8551_v13  ;;  %v8554_v18 = vld [vmem:[%s12983_s1 + $0x88] sm:$0xff] (%p3518_p2)   ;;  %v8555_v34 = vld [vmem:[%s12983_s1 + $0x50] sm:$0xff] (%p3518_p2)  }
 0x4a2   : > { %v3578_v46 = vadd.f32 %v11171_v40, %v3556_v49  ;;  %v3579_v24 = vadd.f32 %v11171_v40, %v3557_v63  ;;  %v3580_v11 = vadd.f32 %v11171_v40, %v3558_v58  ;;  %v3560_v3 = vmul.f32 %v3544_v27, %v3540_v43  ;;  %3593 = vst [vmem:[%s11184_s10 + $0x40] sm:$0xff] %v3575_v7  ;;  %v8556_v4 = vld [vmem:[%s12983_s1 + $0x10] sm:$0xff] (%p3518_p2)   ;;  %v8558_v23 = vld [vmem:[%s12983_s1 + $0x58] sm:$0xff] (%p3518_p2)   ;;  %v8562_v15 = vld [vmem:[%s12983_s1 + $0x20] sm:$0xff] (%p3518_p2)  }
 0x4a3   : > { %3594 = vst [vmem:[%s11184_s10 + $0x48] sm:$0xff] %v3576_v20  ;;  %3595 = vst [vmem:[%s11184_s10 + $0x50] sm:$0xff] %v3577_v51  ;;  %v3581_v41 = vadd.f32 %v11171_v40, %v3559_v12  ;;  %7296 = vmatprep.subr.bf16.mxu0 (%p3518_p2), %v8552_v36  ;;  %7994 = vmatprep.subr.bf16.mxu1 (%p3518_p2), %v13440_v31  ;;  %v8557_v17 = vld [vmem:[%s12983_s1 + $0x90] sm:$0xff] (%p3518_p2)   ;;  %v8559_v57 = vld [vmem:[%s12983_s1 + $0x18] sm:$0xff] (%p3518_p2)  }
 0x4a4   : > { %3596 = vst [vmem:[%s11184_s10 + $0x58] sm:$0xff] %v3578_v46  ;;  %3597 = vst [vmem:[%s11184_s10 + $0x60] sm:$0xff] %v3579_v24  ;;  %v3582_v35 = vadd.f32 %v11171_v40, %v3560_v3  ;;  %7297 = vmatpush3.bf16.msra.mxu0 (%p3518_p2), %v8553_v38  ;;  %v8560_v27 = vld [vmem:[%s12983_s1 + $0x98] sm:$0xff] (%p3518_p2)   ;;  %v8561_v40 = vld [vmem:[%s12983_s1 + $0x60] sm:$0xff] (%p3518_p2)  }
 0x4a5   : > { %3598 = vst [vmem:[%s11184_s10 + $0x68] sm:$0xff] %v3580_v11  ;;  %3599 = vst [vmem:[%s11184_s10 + $0x70] sm:$0xff] %v3581_v41  ;;  %7995 = vmatpush3.bf16.msra.mxu1 (%p3518_p2), %v8554_v18  ;;  %7298 = vmatprep.subr.bf16.mxu0 (%p3518_p2), %v8555_v34  ;;  %v8563_v16 = vld [vmem:[%s12983_s1 + $0xa0] sm:$0xff] (%p3518_p2)   ;;  %v8564_v25 = vld [vmem:[%s12983_s1 + $0x68] sm:$0xff] (%p3518_p2)  }
 0x4a6   : > { %3600 = vst [vmem:[%s11184_s10 + $0x78] sm:$0xff] %v3582_v35  ;;  %7996 = vmatprep.subr.bf16.mxu1 (%p3518_p2), %v13440_v31  ;;  %v8565_v6 = vld [vmem:[%s12983_s1 + $0x28] sm:$0xff] (%p3518_p2)   ;;  %v8567_v22 = vld [vmem:[%s12983_s1 + $0x70] sm:$0xff] (%p3518_p2)   ;;  %v6628_v5 = vld [vmem:[%s12988_s0 + $0x80] sm:$0xff] (%p3518_p2)  }
 0x4a7   :  { %v8566_v14 = vld [vmem:[%s12983_s1 + $0xa8] sm:$0xff]   ;;  %v8568_v29 = vld [vmem:[%s12983_s1 + $0x30] sm:$0xff]   ;;  %v8570_v1 = vld [vmem:[%s12983_s1 + $0x78] sm:$0xff]   ;;  %v3634_v42 = vunpack.c.l.bf16 %v6628_v5  ;;  %v3635_v28 = vunpack.c.h.bf16 %v6628_v5  ;;  %3890 = vst [vmem:[#allocation2 + $0x8] sm:$0xff] %v6628_v5  ;;  %4342 = vmatprep.mubr.bf16.mxu0 %v6628_v5 }
 0x4a8   :  { %7299 = vmatpush3.bf16.msra.mxu0 %v8556_v4  ;;  %v8569_v61 = vld [vmem:[%s12983_s1 + $0xb0] sm:$0xff]   ;;  %v11311_v47 = vld [vmem:[%s12988_s0 + $0xfc] sm:$0xf]  ;;  %v11330_v48 = vld [vmem:[%s12988_s0 + $0x88] sm:$0xff]  }
 0x4a9   :  { %7997 = vmatpush3.bf16.msra.mxu1 %v8557_v17  ;;  %7300 = vmatprep.subr.bf16.mxu0 %v8558_v23  ;;  %v8571_v33 = vld [vmem:[%s12983_s1 + $0x38] sm:$0xff]   ;;  %v13187_v21 = vunpack.c.l.bf16 %v11311_v47  ;;  %v3666_v54 = vrot.slane %v3634_v42, 7  ;;  %v3667_v10 = vrot.slane %v3635_v28, 7  ;;  %v11318_v59 = vrot.slane %v3634_v42, 1  ;;  %13442 = vst [vmem:[#allocation23_spill] sm:$0xff] %v11330_v48  ;;  %v11335_v2 = vld [vmem:[%s12988_s0 + $0x90] sm:$0xff]  }
 0x4aa   :  { %7998 = vmatprep.subr.bf16.mxu1 %v13440_v31  ;;  %v3907_v8 = vrot.slane %v3635_v28, 1  ;;  %v8573_v44 = vld [vmem:[%s12983_s1 + $0xb8] sm:$0xff]   ;;  %13443 = vst [vmem:[#allocation51_spill] sm:$0xff] %v11335_v2  ;;  %v13444_v55 = vld [vmem:[#allocation4_spill] sm:$0xff]  ;;  %v3636_v37 = vunpack.c.l.bf16 %v11330_v48  ;;  %v3637_v56 = vunpack.c.h.bf16 %v11330_v48  ;;  %v3638_v50 = vunpack.c.l.bf16 %v11335_v2  ;;  %v13448_v9 = vld [vmem:[#allocation5_spill] sm:$0xff] }
 0x4ab   :  { %v11325_v32 = vrot.slane %v13187_v21, 7  ;;  %vm13445_vm11 = vcmp.lt.s32.totalorder %v13444_v55, 1  ;;  %v8574_v0 = vld [vmem:[%s12983_s1 + $0x100] sm:$0xff]   ;;  %vm13446_vm14 = vcmp.lt.s32.totalorder %v13444_v55, 7  ;;  %v3639_v39 = vunpack.c.h.bf16 %v11335_v2  ;;  %v8578_v7 = vld [vmem:[%s12983_s1 + $0x108] sm:$0xff]   ;;  %3891 = vst [vmem:[#allocation2 + $0x20] sm:$0xff] %v11330_v48 }
 0x4ac   :  { %7301 = vmatpush3.bf16.msra.mxu0 %v8559_v57  ;;  %v3728_v60 = vsel %vm13445_vm11, %v3666_v54, %v3667_v10  ;;  %v3968_v19 = vsel %vm13446_vm14, %v11318_v59, %v3907_v8  ;;  %vm13447_vm10 = vmmov %vm13445_vm11  ;;  %vm13449_vm11 = vcmp.ge.s32.totalorder %v13448_v9, 0  ;;  %v8575_v45 = vld [vmem:[%s12983_s1 + $0xc0] sm:$0xff]   ;;  %v3908_v49 = vrot.slane %v3636_v37, 1  ;;  %v11375_v41 = vld [vmem:[%s12988_s0 + $0x98] sm:$0xff]   ;;  %3892 = vst [vmem:[#allocation2 + $0x38] sm:$0xff] %v11335_v2 }
 0x4ad   :  { %7999 = vmatpush3.bf16.msra.mxu1 %v8560_v27  ;;  %7302 = vmatprep.subr.bf16.mxu0 %v8561_v40  ;;  %v3729_v30 = vsel %vm13447_vm10, %v11325_v32, %v3666_v54  ;;  %v3668_v63 = vrot.slane %v3636_v37, 7  ;;  %v3669_v58 = vrot.slane %v3637_v56, 7  ;;  %v3909_v51 = vrot.slane %v3637_v56, 1  ;;  %vm13450_vm10 = vmmov %vm13446_vm14  ;;  %13453 = vst [vmem:[#allocation26_spill] sm:$0xff] %v11375_v41  ;;  %v13454_v35 = vld [vmem:[#allocation6_spill] sm:$0xff]  ;;  %v13456_v26 = vld [vmem:[#allocation7_spill] sm:$0xff] }
 0x4ae   :  { %8000 = vmatprep.subr.bf16.mxu1 %v13440_v31  ;;  %v3730_v43 = vsel %vm13449_vm11, %v3729_v30, 0.0  ;;  %v3910_v12 = vrot.slane %v3638_v50, 1  ;;  %v3967_v46 = vsel %vm13450_vm10, %v3907_v8, %v3908_v49  ;;  %vm13451_vm14 = vcmp.lt.s32.totalorder %v13444_v55, 1  ;;  %v8579_v18 = vld [vmem:[%s12983_s1 + $0xc8] sm:$0xff]   ;;  %v13460_v4 = vld [vmem:[#allocation11_spill] sm:$0xff]  ;;  %v13462_v57 = vld [vmem:[#allocation8_spill] sm:$0xff] }
 0x4af   :  { %v3762_v20 = vpack.c.bf16 %v3728_v60, %v3730_v43  ;;  %v11366_v24 = vsel %vm13451_vm14, %v3668_v63, %v3669_v58  ;;  %vm13452_vm11 = vmmov %vm13451_vm14  ;;  %v3670_v3 = vrot.slane %v3638_v50, 7  ;;  %vm13455_vm8 = vcmp.lt.s32.totalorder %v13454_v35, 16  ;;  %v13469_v5 = vld [vmem:[#allocation9_spill] sm:$0xff]  ;;  %v8581_v28 = vld [vmem:[%s12983_s1 + $0x110] sm:$0xff]   ;;  %3893 = vst [vmem:[#allocation2 + $0x50] sm:$0xff] %v11375_v41 }
 0x4b0   :  { %7303 = vmatpush3.bf16.msra.mxu0 %v8562_v15  ;;  %v11370_v11 = vsel %vm13452_vm11, %v3667_v10, %v3668_v63  ;;  %v3971_v53 = vsel %vm13455_vm8, %v3967_v46, 0.0  ;;  %vm13457_vm10 = vcmp.ge.s32.totalorder %v13456_v26, 0  ;;  %vm13458_vm14 = vcmp.lt.s32.totalorder %v13444_v55, 7  ;;  %v8583_v56 = vld [vmem:[%s12983_s1 + $0xd0] sm:$0xff]  }
 0x4b1   :  { %8001 = vmatpush3.bf16.msra.mxu1 %v8563_v16  ;;  %7304 = vmatprep.subr.bf16.mxu0 %v8564_v25  ;;  %3778 = vst [vmem:[#allocation2] sm:$0xff] %v3762_v20  ;;  %v3732_v13 = vsel %vm13457_vm10, %v11370_v11, 0.0  ;;  %v11384_v36 = vsel %vm13458_vm14, %v3909_v51, %v3910_v12  ;;  %vm13459_vm11 = vmmov %vm13458_vm14  ;;  %v11394_v34 = vpack.c.bf16 %v3728_v60, %v3729_v30  ;;  %vm13461_vm8 = vnez %v13460_v4  ;;  %v13475_v9 = vld [vmem:[#allocation10_spill] sm:$0xff]  ;;  %v8591_v20 = vld [vmem:[%s12983_s1 + $0x140] sm:$0xff]  }
 0x4b2   :  { %8002 = vmatprep.subr.bf16.mxu1 %v13440_v31  ;;  %v11388_v38 = vsel %vm13459_vm11, %v3908_v49, %v3909_v51  ;;  %v4002_v17 = vpack.c.bf16 %v3971_v53, %v3968_v19  ;;  %v3763_v23 = vpack.c.bf16 %v11366_v24, %v3732_v13  ;;  %vm13463_vm10 = vcmp.lt.s32.totalorder %v13462_v57, 16  ;;  %v13478_v49 = vld [vmem:[#allocation13_spill] sm:$0xff]  ;;  %v11484_v35 = vld [vmem:[%s12988_s0 + $0xb0] sm:$0xff]   ;;  %v8586_v57 = vld [vmem:[%s12983_s1 + $0xd8] sm:$0xff]  }
 0x4b3   :  { %v3973_v27 = vsel %vm13463_vm10, %v11384_v36, 0.0  ;;  %v3671_v40 = vrot.slane %v3639_v39, 7  ;;  %vm13464_vm14 = vcmp.lt.s32.totalorder %v13444_v55, 1  ;;  %v3640_v25 = vunpack.c.l.bf16 %v11375_v41  ;;  %13481 = vst [vmem:[#allocation33_spill] sm:$0xff] %v11484_v35  ;;  %v13483_v26 = vld [vmem:[#allocation14_spill] sm:$0xff]  ;;  %3896 = vst [vmem:[#allocation2 + $0x98] sm:$0xff] %v11484_v35 }
 0x4b4   :  { %7305 = vmatpush3.bf16.msra.mxu0 %v8565_v6  ;;  %v4003_v15 = vpack.c.bf16 %v3973_v27, %v11388_v38  ;;  %v11407_v16 = vsel %vm13464_vm14, %v3669_v58, %v3670_v3  ;;  %v3911_v6 = vrot.slane %v3639_v39, 1  ;;  %4018 = vst [vmem:[#allocation2 + $0x10] sm:$0xff] %v4002_v17  ;;  %3779 = vst [vmem:[#allocation2 + $0x18] sm:$0xff] %v3763_v23  ;;  %v3641_v42 = vunpack.c.h.bf16 %v11375_v41 }
 0x4b5   :  { %8003 = vmatpush3.bf16.msra.mxu1 %v8566_v14  ;;  %7306 = vmatprep.subr.bf16.mxu0 %v8567_v22  ;;  %v11413_v14 = vld [vmem:[%s12988_s0 + $0xa0] sm:$0xff]   ;;  %v11415_v22 = vpack.c.bf16 %v3967_v46, %v3968_v19  ;;  %vm13468_vm10 = vmmov %vm13464_vm14  ;;  %vm13470_vm14 = vcmp.ge.s32.totalorder %v13469_v5, 0  ;;  %v3912_v10 = vrot.slane %v3640_v25, 1  ;;  %vm13479_vm5 = vcmp.ge.s32.totalorder %v13478_v49, 0 }
 0x4b6   :  { %8004 = vmatprep.subr.bf16.mxu1 %v13440_v31  ;;  %13465 = vst [vmem:[#allocation57_spill] sm:$0xff] %v11413_v14  ;;  %4019 = vst [vmem:[#allocation2 + $0x28] sm:$0xff] %v4003_v15  ;;  %v3673_v60 = vrot.slane %v3641_v42, 7  ;;  %v3913_v37 = vrot.slane %v3641_v42, 1  ;;  %v3643_v19 = vunpack.c.h.bf16 %v11413_v14  ;;  %v11488_v53 = vpack.c.bf16 %v11366_v24, %v11370_v11  ;;  %v13486_v24 = vld [vmem:[#allocation15_spill] sm:$0xff]  ;;  %v8596_v15 = vld [vmem:[%s12983_s1 + $0x148] sm:$0xff]  }
 0x4b7   :  { %3894 = vst [vmem:[#allocation2 + $0x68] sm:$0xff] %v11413_v14  ;;  %v13492_v42 = vld [vmem:[#allocation17_spill] sm:$0xff]  ;;  %v8590_v49 = vld [vmem:[%s12983_s1 + $0xe0] sm:$0xff]  }
 0x4b8   :  { %7307 = vmatpush3.bf16.msra.mxu0 %v8568_v29  ;;  %v13466_v29 = vld [vmem:[#allocation12_spill] sm:$0xff]  ;;  %13482 = vst [vmem:[#allocation39_spill] sm:$0xff] %v11488_v53  ;;  %v3915_v17 = vrot.slane %v3643_v19, 1 }
 0x4b9   :  { %8005 = vmatpush3.bf16.msra.mxu1 %v8569_v61  ;;  %7308 = vmatprep.subr.bf16.mxu0 %v8570_v1  ;;  %vm13467_vm11 = vnez %v13466_v29  ;;  %v11422_v61 = vsel %vm13468_vm10, %v3670_v3, %v3671_v40  ;;  %v3734_v1 = vsel %vm13470_vm14, %v11407_v16, 0.0  ;;  %vm13472_vm10 = vcmp.lt.s32.totalorder %v13444_v55, 7 }
 0x4ba   :  { %8006 = vmatprep.subr.bf16.mxu1 %v13440_v31  ;;  %v3764_v54 = vpack.c.bf16 %v11422_v61, %v3734_v1  ;;  %v11441_v8 = vsel %vm13472_vm10, %v3910_v12, %v3911_v6  ;;  %vm13473_vm14 = vmmov %vm13472_vm10  ;;  %vm13474_vm10 = vcmp.lt.s32.totalorder %v13444_v55, 1 }
 0x4bb   :  { %v11451_v30 = vsel %vm13473_vm14, %v3911_v6, %v3912_v10  ;;  %v13489_v6 = vld [vmem:[#allocation16_spill] sm:$0xff] }
 0x4bc   :  { %7309 = vmatpush3.bf16.msra.mxu0 %v8571_v33  ;;  %v11434_v33 = vld [vmem:[%s12988_s0 + $0xa8] sm:$0xff]   ;;  %3780 = vst [vmem:[#allocation2 + $0x30] sm:$0xff] %v3764_v54 }
 0x4bd   :  { %8007 = vmatpush3.bf16.msra.mxu1 %v8573_v44  ;;  %7423 = vmatprep.subr.bf16.mxu0 %v8574_v0  ;;  %13471 = vst [vmem:[#allocation31_spill] sm:$0xff] %v11434_v33  ;;  %v3672_v44 = vrot.slane %v3640_v25, 7  ;;  %v3642_v0 = vunpack.c.l.bf16 %v11413_v14  ;;  %v3644_v39 = vunpack.c.l.bf16 %v11434_v33  ;;  %v11514_v25 = vpack.c.bf16 %v11384_v36, %v11388_v38  ;;  %v11534_v36 = vld [vmem:[%s12988_s0 + $0xb8] sm:$0xff]   ;;  %v8589_v38 = vld [vmem:[%s12983_s1 + $0x120] sm:$0xff]   ;;  %3895 = vst [vmem:[#allocation2 + $0x80] sm:$0xff] %v11434_v33 }
 0x4be   :  { %8068 = vmatprep.subr.bf16.mxu1 %v8591_v20  ;;  %3897 = vst [vmem:[#allocation2 + $0xb0] sm:$0xff] %v11534_v36 }
 0x4bf   :  { %8829 = vmatmul.mubr.msk.bf16.vlgmr.msra.gmra.mrb[184].mxu0 %vm13461_vm8, %v11394_v34  ;;  %v11455_v50 = vsel %vm13474_vm10, %v3671_v40, %v3672_v44  ;;  %vm13476_vm8 = vcmp.lt.s32.totalorder %v13475_v9, 16  ;;  %v3914_v58 = vrot.slane %v3642_v0, 1  ;;  %v3674_v3 = vrot.slane %v3642_v0, 7  ;;  %13488 = vst [vmem:[#allocation18_spill] sm:$0xff] %v11514_v25 }
 0x4c0   :  { %7424 = vmatpush3.bf16.msra.mxu0 %v8575_v45  ;;  %4350 = vmatprep.mubr.bf16.mxu0 %v11330_v48  ;;  %v3975_v43 = vsel %vm13476_vm8, %v11451_v30, 0.0  ;;  %v3736_v63 = vsel %vm13479_vm5, %v11455_v50, 0.0  ;;  %vm13480_vm8 = vmmov %vm13473_vm14  ;;  %vm13484_vm5 = vnez %v13483_v26  ;;  %v3916_v23 = vrot.slane %v3644_v39, 1 }
 0x4c1   :  { %8832 = vmatmul.mubr.msk.bf16.vlgmr.msra.gmra.mrb[156].mxu1 %vm13467_vm11, %v11415_v22  ;;  %7425 = vmatprep.subr.bf16.mxu0 %v8578_v7  ;;  %vm13477_vm11 = vmmov %vm13474_vm10  ;;  %v8585_v7 = vld [vmem:[%s12983_s1 + $0x118] sm:$0xff]   ;;  %v4004_v51 = vpack.c.bf16 %v3975_v43, %v11441_v8  ;;  %v11478_v46 = vsel %vm13480_vm8, %v3912_v10, %v3913_v37  ;;  %vm13487_vm14 = vcmp.lt.s32.totalorder %v13486_v24, 16  ;;  %v11506_v27 = vsel %vm13474_vm10, %v3673_v60, %v3674_v3 }
 0x4c2   :  { %8012 = vmatprep.mubr.msk.bf16.mxu1 %vm13441_vm0, %v13440_v31  ;;  %v11463_v45 = vsel %vm13477_vm11, %v3672_v44, %v3673_v60  ;;  %vm13485_vm11 = vmmov %vm13480_vm8  ;;  %v3645_v40 = vunpack.c.h.bf16 %v11434_v33  ;;  %vm13490_vm8 = vnez %v13489_v6  ;;  %v13496_v60 = vld [vmem:[#allocation19_spill] sm:$0xff]  ;;  %8069 = vmatpush3.bf16.msra.mxu1 %v8591_v20  ;;  %v3646_v9 = vunpack.c.l.bf16 %v11484_v35  ;;  %v13500_v20 = vld [vmem:[#allocation22_spill] sm:$0xff] }
 0x4c3   :  { %v3765_v12 = vpack.c.bf16 %v11463_v45, %v3736_v63  ;;  %v11495_v13 = vsel %vm13485_vm11, %v3913_v37, %v3914_v58  ;;  %4020 = vst [vmem:[#allocation2 + $0x40] sm:$0xff] %v4004_v51  ;;  %vm13491_vm11 = vmmov %vm13474_vm10  ;;  %vm13494_vm10 = vcmp.lt.s32.totalorder %v13444_v55, 7  ;;  %v3676_v37 = vrot.slane %v3644_v39, 7  ;;  %8070 = vmatprep.subr.bf16.mxu1 %v8596_v15 }
 0x4c4   :  { %7426 = vmatpush3.bf16.msra.mxu0 %v8579_v18  ;;  %v3675_v18 = vrot.slane %v3643_v19, 7  ;;  %v3977_v11 = vsel %vm13487_vm14, %v11495_v13, 0.0  ;;  %vm13493_vm14 = vcmp.ge.s32.totalorder %v13492_v42, 0  ;;  %v11529_v54 = vsel %vm13494_vm10, %v3915_v17, %v3916_v23  ;;  %v13504_v42 = vld [vmem:[#allocation20_spill] sm:$0xff] }
 0x4c5   :  { %7427 = vmatprep.subr.bf16.mxu0 %v8581_v28  ;;  %3781 = vst [vmem:[#allocation2 + $0x48] sm:$0xff] %v3765_v12  ;;  %v4005_v5 = vpack.c.bf16 %v3977_v11, %v11478_v46  ;;  %v3738_v28 = vsel %vm13493_vm14, %v11506_v27, 0.0  ;;  %vm13497_vm14 = vcmp.lt.s32.totalorder %v13496_v60, 16  ;;  %v3917_v43 = vrot.slane %v3645_v40, 1 }
 0x4c6   :  { %v11522_v1 = vsel %vm13491_vm11, %v3674_v3, %v3675_v18  ;;  %vm13495_vm11 = vmmov %vm13494_vm10  ;;  %v3979_v0 = vsel %vm13497_vm14, %v11529_v54, 0.0  ;;  %vm13498_vm10 = vcmp.lt.s32.totalorder %v13444_v55, 1  ;;  %v3647_v39 = vunpack.c.h.bf16 %v11484_v35  ;;  %8071 = vmatpush3.bf16.msra.mxu1 %v8596_v15  ;;  %v8603_v15 = vld [vmem:[%s12983_s1 + $0x158] sm:$0xff]  }
 0x4c7   :  { %8835 = vmatmul.mubr.msk.bf16.gmra.mrb[188].mxu0 %vm13484_vm5, %v11488_v53  ;;  %v3766_v10 = vpack.c.bf16 %v11522_v1, %v3738_v28  ;;  %v11544_v44 = vsel %vm13495_vm11, %v3914_v58, %v3915_v17  ;;  %4021 = vst [vmem:[#allocation2 + $0x58] sm:$0xff] %v4005_v5  ;;  %v11557_v63 = vsel %vm13498_vm10, %v3675_v18, %v3676_v37  ;;  %v3648_v58 = vunpack.c.l.bf16 %v11534_v36  ;;  %vm13499_vm11 = vmmov %vm13498_vm10  ;;  %v8594_v18 = vld [vmem:[%s12983_s1 + $0x128] sm:$0xff]   ;;  %v8601_v17 = vld [vmem:[%s12983_s1 + $0x150] sm:$0xff]  }
 0x4c8   :  { %4358 = vmatprep.mubr.bf16.mxu0 %v11335_v2  ;;  %7428 = vmatpush3.bf16.msra.mxu0 %v8583_v56  ;;  %v4006_v19 = vpack.c.bf16 %v3979_v0, %v11544_v44  ;;  %v3677_v56 = vrot.slane %v3645_v40, 7  ;;  %vm13501_vm14 = vcmp.ge.s32.totalorder %v13500_v20, 0  ;;  %v3918_v12 = vrot.slane %v3646_v9, 1 }
 0x4c9   :  { %8838 = vmatmul.mubr.msk.bf16.gmra.mrb[160].mxu1 %vm13490_vm8, %v11514_v25  ;;  %7429 = vmatprep.subr.bf16.mxu0 %v8585_v7  ;;  %3782 = vst [vmem:[#allocation2 + $0x60] sm:$0xff] %v3766_v10  ;;  %v3740_v51 = vsel %vm13501_vm14, %v11557_v63, 0.0  ;;  %vm13502_vm5 = vcmp.lt.s32.totalorder %v13444_v55, 7  ;;  %v3678_v24 = vrot.slane %v3646_v9, 7  ;;  %v3679_v11 = vrot.slane %v3647_v39, 7 }
 0x4ca   :  { %8016 = vmatprep.mubr.msk.bf16.mxu1 %vm13441_vm0, %v13440_v31  ;;  %4022 = vst [vmem:[#allocation2 + $0x70] sm:$0xff] %v4006_v19  ;;  %v11563_v7 = vsel %vm13499_vm11, %v3676_v37, %v3677_v56  ;;  %v11570_v3 = vsel %vm13502_vm5, %v3916_v23, %v3917_v43  ;;  %v3919_v40 = vrot.slane %v3647_v39, 1  ;;  %v11583_v23 = vld [vmem:[%s12988_s0 + $0xc0] sm:$0xff]   ;;  %v11587_v5 = vpack.c.bf16 %v11422_v61, %v11407_v16  ;;  %v8595_v19 = vld [vmem:[%s12983_s1 + $0xe8] sm:$0xff]  }
 0x4cb   :  { %vm13505_vm5 = vnez %v13504_v42  ;;  %vm13506_vm10 = vcmp.lt.s32.totalorder %v13444_v55, 7  ;;  %v3649_v10 = vunpack.c.h.bf16 %v11534_v36  ;;  %8072 = vmatprep.subr.bf16.mxu1 %v8601_v17  ;;  %v13507_v16 = vld [vmem:[#allocation24_spill] sm:$0xff]  ;;  %vm13509_vm14 = vcmp.lt.s32.totalorder %v13444_v55, 1  ;;  %v13515_v39 = vld [vmem:[#allocation25_spill] sm:$0xff]  ;;  %3898 = vst [vmem:[#allocation2 + $0xc8] sm:$0xff] %v11583_v23 }
 0x4cc   :  { %7430 = vmatpush3.bf16.msra.mxu0 %v8586_v57  ;;  %v3767_v57 = vpack.c.bf16 %v11563_v7, %v3740_v51  ;;  %13503 = vst [vmem:[#allocation4_spill] sm:$0xff] %v11587_v5  ;;  %v11594_v28 = vsel %vm13506_vm10, %v3917_v43, %v3918_v12  ;;  %vm13508_vm11 = vcmp.lt.s32.totalorder %v13507_v16, 16  ;;  %v11606_v60 = vsel %vm13509_vm14, %v3678_v24, %v3679_v11  ;;  %vm13510_vm10 = vmmov %vm13509_vm14  ;;  %v13513_v43 = vld [vmem:[#allocation21_spill] sm:$0xff] }
 0x4cd   :  { %7431 = vmatprep.subr.bf16.mxu0 %v8589_v38  ;;  %v3920_v38 = vrot.slane %v3648_v58, 1  ;;  %v3981_v61 = vsel %vm13508_vm11, %v11594_v28, 0.0  ;;  %v11610_v0 = vsel %vm13510_vm10, %v3677_v56, %v3678_v24  ;;  %v11621_v9 = vpack.c.bf16 %v11451_v30, %v11441_v8  ;;  %v11638_v8 = vld [vmem:[%s12988_s0 + $0xc8] sm:$0xff]   ;;  %v8599_v30 = vld [vmem:[%s12983_s1 + $0x130] sm:$0xff]   ;;  %8073 = vmatpush3.bf16.msra.mxu1 %v8601_v17 }
 0x4ce   :  { %3783 = vst [vmem:[#allocation2 + $0x78] sm:$0xff] %v3767_v57  ;;  %vm13514_vm11 = vnez %v13513_v43  ;;  %v4007_v56 = vpack.c.bf16 %v3981_v61, %v11570_v3  ;;  %vm13516_vm14 = vcmp.ge.s32.totalorder %v13515_v39, 0  ;;  %v3680_v51 = vrot.slane %v3648_v58, 7  ;;  %v13517_v57 = vld [vmem:[#allocation28_spill] sm:$0xff]  ;;  %8074 = vmatprep.subr.bf16.mxu1 %v8603_v15  ;;  %3899 = vst [vmem:[#allocation2 + $0xe0] sm:$0xff] %v11638_v8 }
 0x4cf   :  { %8841 = vmatmul.mubr.msk.bf16.gmra.mrb[192].mxu0 %vm13505_vm5, %v11587_v5  ;;  %vm13511_vm5 = vcmp.lt.s32.totalorder %v13444_v55, 7  ;;  %13512 = vst [vmem:[#allocation5_spill] sm:$0xff] %v11621_v9  ;;  %v3742_v20 = vsel %vm13516_vm14, %v11610_v0, 0.0  ;;  %vm13518_vm10 = vcmp.lt.s32.totalorder %v13517_v57, 16  ;;  %v3681_v58 = vrot.slane %v3649_v10, 7  ;;  %v8607_v57 = vld [vmem:[%s12983_s1 + $0x160] sm:$0xff]  }
 0x4d0   :  { %4366 = vmatprep.mubr.bf16.mxu0 %v11375_v41  ;;  %v11614_v37 = vsel %vm13511_vm5, %v3918_v12, %v3919_v40  ;;  %7432 = vmatpush3.bf16.msra.mxu0 %v8590_v49  ;;  %v11632_v49 = vsel %vm13511_vm5, %v3919_v40, %v3920_v38  ;;  %v3768_v12 = vpack.c.bf16 %v11606_v60, %v3742_v20  ;;  %v3650_v40 = vunpack.c.l.bf16 %v11583_v23  ;;  %v8600_v20 = vld [vmem:[%s12983_s1 + $0xf0] sm:$0xff]   ;;  %v13542_v5 = vld [vmem:[#allocation40_spill] sm:$0xff] }
 0x4d1   :  { %8844 = vmatmul.mubr.msk.bf16.gmra.mrb[164].mxu1 %vm13514_vm11, %v11621_v9  ;;  %7433 = vmatprep.subr.bf16.mxu0 %v8594_v18  ;;  %v3983_v24 = vsel %vm13518_vm10, %v11632_v49, 0.0  ;;  %4023 = vst [vmem:[#allocation2 + $0x88] sm:$0xff] %v4007_v56  ;;  %vm13519_vm14 = vcmp.lt.s32.totalorder %v13444_v55, 1  ;;  %v3921_v61 = vrot.slane %v3649_v10, 1  ;;  %v3651_v39 = vunpack.c.h.bf16 %v11583_v23  ;;  %v13566_v9 = vld [vmem:[#allocation38_spill] sm:$0xff] }
 0x4d2   :  { %8020 = vmatprep.mubr.msk.bf16.mxu1 %vm13441_vm0, %v13440_v31  ;;  %v4008_v18 = vpack.c.bf16 %v3983_v24, %v11614_v37  ;;  %v11653_v16 = vsel %vm13519_vm14, %v3679_v11, %v3680_v51  ;;  %3784 = vst [vmem:[#allocation2 + $0x90] sm:$0xff] %v3768_v12  ;;  %vm13520_vm5 = vmmov %vm13519_vm14  ;;  %v13521_v11 = vld [vmem:[#allocation30_spill] sm:$0xff]  ;;  %v3922_v56 = vrot.slane %v3650_v40, 1  ;;  %vm13523_vm14 = vcmp.lt.s32.totalorder %v13444_v55, 7  ;;  %v8605_v12 = vld [vmem:[%s12983_s1 + $0x138] sm:$0xff]   ;;  %8075 = vmatpush3.bf16.msra.mxu1 %v8603_v15 }
 0x4d3   :  { %v11664_v17 = vsel %vm13520_vm5, %v3680_v51, %v3681_v58  ;;  %vm13522_vm10 = vcmp.ge.s32.totalorder %v13521_v11, 0  ;;  %v11672_v52 = vsel %vm13523_vm14, %v3920_v38, %v3921_v61  ;;  %v3682_v21 = vrot.slane %v3650_v40, 7  ;;  %v11677_v51 = vld [vmem:[%s12988_s0 + $0xd0] sm:$0xff]   ;;  %vm13524_vm5 = vmmov %vm13523_vm14  ;;  %8076 = vmatprep.subr.bf16.mxu1 %v8607_v57 }
 0x4d4   :  { %v3744_v10 = vsel %vm13522_vm10, %v11653_v16, 0.0  ;;  %7434 = vmatpush3.bf16.msra.mxu0 %v8595_v19  ;;  %4024 = vst [vmem:[#allocation2 + $0xa0] sm:$0xff] %v4008_v18  ;;  %v3683_v62 = vrot.slane %v3651_v39, 7  ;;  %v11684_v19 = vsel %vm13524_vm5, %v3921_v61, %v3922_v56  ;;  %v3652_v38 = vunpack.c.l.bf16 %v11638_v8  ;;  %v13528_v61 = vld [vmem:[#allocation34_spill] sm:$0xff]  ;;  %3900 = vst [vmem:[#allocation2 + $0xf8] sm:$0xff] %v11677_v51 }
 0x4d5   :  { %v3769_v24 = vpack.c.bf16 %v11664_v17, %v3744_v10  ;;  %7435 = vmatprep.subr.bf16.mxu0 %v8599_v30  ;;  %v3923_v40 = vrot.slane %v3651_v39, 1  ;;  %v3653_v18 = vunpack.c.h.bf16 %v11638_v8  ;;  %v8606_v30 = vld [vmem:[%s12983_s1 + $0xf8] sm:$0xff]   ;;  %v11694_v11 = vpack.c.bf16 %v11463_v45, %v11455_v50  ;;  %v8608_v50 = vld [vmem:[%s12983_s1 + $0x168] sm:$0xff]  }
 0x4d6   :  { %v13526_v10 = vld [vmem:[#allocation27_spill] sm:$0xff]  ;;  %vm13529_vm14 = vcmp.lt.s32.totalorder %v13528_v61, 16  ;;  %vm13530_vm5 = vcmp.lt.s32.totalorder %v13444_v55, 1  ;;  %v3654_v42 = vunpack.c.l.bf16 %v11677_v51  ;;  %8077 = vmatpush3.bf16.msra.mxu1 %v8607_v57  ;;  %v11792_v26 = vpack.c.bf16 %v11522_v1, %v11506_v27 }
 0x4d7   :  { %13525 = vst [vmem:[#allocation6_spill] sm:$0xff] %v11694_v11  ;;  %vm13527_vm10 = vnez %v13526_v10  ;;  %3785 = vst [vmem:[#allocation2 + $0xa8] sm:$0xff] %v3769_v24  ;;  %v3985_v39 = vsel %vm13529_vm14, %v11684_v19, 0.0  ;;  %v11704_v15 = vsel %vm13530_vm5, %v3682_v21, %v3683_v62  ;;  %v13532_v24 = vld [vmem:[#allocation36_spill] sm:$0xff]  ;;  %v3924_v10 = vrot.slane %v3652_v38, 1  ;;  %8078 = vmatprep.subr.bf16.mxu1 %v8608_v50 }
 0x4d8   :  { %8847 = vmatmul.mubr.msk.bf16.gmra.mrb[196].mxu0 %vm13527_vm10, %v11694_v11  ;;  %vm13531_vm11 = vmmov %vm13530_vm5  ;;  %v4009_v45 = vpack.c.bf16 %v3985_v39, %v11672_v52  ;;  %vm13533_vm14 = vcmp.ge.s32.totalorder %v13532_v24, 0  ;;  %vm13534_vm5 = vcmp.lt.s32.totalorder %v13444_v55, 7  ;;  %v3684_v24 = vrot.slane %v3652_v38, 7  ;;  %v8610_v38 = vld [vmem:[%s12983_s1 + $0x170] sm:$0xff]   ;;  %13549 = vst [vmem:[#allocation8_spill] sm:$0xff] %v11792_v26 }
 0x4d9   :  { %v11708_v41 = vsel %vm13531_vm11, %v3681_v58, %v3682_v21  ;;  %4374 = vmatprep.mubr.bf16.mxu0 %v11413_v14  ;;  %v11720_v11 = vsel %vm13534_vm5, %v3922_v56, %v3923_v40  ;;  %7436 = vmatpush3.bf16.msra.mxu0 %v8600_v20  ;;  %v11724_v21 = vpack.c.bf16 %v11495_v13, %v11478_v46  ;;  %v3685_v14 = vrot.slane %v3653_v18, 7  ;;  %v11735_v20 = vld [vmem:[%s12988_s0 + $0xd8] sm:$0xff]   ;;  %vm13537_vm11 = vmmov %vm13534_vm5 }
 0x4da   :  { %v3746_v61 = vsel %vm13533_vm14, %v11708_v41, 0.0  ;;  %7437 = vmatprep.subr.bf16.mxu0 %v8605_v12  ;;  %4025 = vst [vmem:[#allocation2 + $0xb8] sm:$0xff] %v4009_v45  ;;  %v11741_v46 = vsel %vm13537_vm11, %v3923_v40, %v3924_v10  ;;  %v3925_v13 = vrot.slane %v3653_v18, 1  ;;  %v3655_v56 = vunpack.c.h.bf16 %v11677_v51  ;;  %8079 = vmatpush3.bf16.msra.mxu1 %v8608_v50  ;;  %3901 = vst [vmem:[#allocation2 + $0x110] sm:$0xff] %v11735_v20 }
 0x4db   :  { %13535 = vst [vmem:[#allocation7_spill] sm:$0xff] %v11724_v21  ;;  %8850 = vmatmul.mubr.msk.bf16.gmra.mrb[168].mxu1 %vm9654_vm3, %v11724_v21  ;;  %v3770_v39 = vpack.c.bf16 %v11704_v15, %v3746_v61  ;;  %v13538_v61 = vld [vmem:[#allocation37_spill] sm:$0xff]  ;;  %vm13540_vm5 = vcmp.lt.s32.totalorder %v13444_v55, 1  ;;  %v3926_v18 = vrot.slane %v3654_v42, 1  ;;  %vm13543_vm10 = vcmp.ge.s32.totalorder %v13542_v5, 0  ;;  %8080 = vmatprep.subr.bf16.mxu1 %v8610_v38 }
 0x4dc   :  { %8024 = vmatprep.mubr.msk.bf16.mxu1 %vm13441_vm0, %v13440_v31  ;;  %vm13539_vm14 = vcmp.lt.s32.totalorder %v13538_v61, 16  ;;  %v11752_v45 = vsel %vm13540_vm5, %v3684_v24, %v3685_v14  ;;  %vm13541_vm11 = vmmov %vm13540_vm5  ;;  %vm13544_vm3 = vcmp.lt.s32.totalorder %v13444_v55, 7  ;;  %v3686_v58 = vrot.slane %v3654_v42, 7  ;;  %v13546_v42 = vld [vmem:[#allocation42_spill] sm:$0xff] }
 0x4dd   :  { %3786 = vst [vmem:[#allocation2 + $0xc0] sm:$0xff] %v3770_v39  ;;  %v3987_v12 = vsel %vm13539_vm14, %v11741_v46, 0.0  ;;  %v11756_v40 = vsel %vm13541_vm11, %v3683_v62, %v3684_v24  ;;  %v11764_v61 = vsel %vm13544_vm3, %v3924_v10, %v3925_v13  ;;  %v11770_v62 = vld [vmem:[%s12988_s0 + $0xe0] sm:$0xff]   ;;  %7438 = vmatpush3.bf16.msra.mxu0 %v8606_v30  ;;  %vm13545_vm14 = vmmov %vm13544_vm3  ;;  %v3687_v5 = vrot.slane %v3655_v56, 7  ;;  %v8611_v10 = vld [vmem:[%s12983_s1 + $0x178] sm:$0xff]  }
 0x4de   :  { %v4010_v57 = vpack.c.bf16 %v3987_v12, %v11720_v11  ;;  %v3748_v39 = vsel %vm13543_vm10, %v11756_v40, 0.0  ;;  %v11775_v12 = vsel %vm13545_vm14, %v3925_v13, %v3926_v18  ;;  %v3656_v21 = vunpack.c.l.bf16 %v11735_v20  ;;  %8116 = vmatprep.subr.bf16.mxu0 %v13440_v31  ;;  %vm13548_vm10 = vmmov %vm13540_vm5  ;;  %8081 = vmatpush3.bf16.msra.mxu1 %v8610_v38  ;;  %3902 = vst [vmem:[#allocation2 + $0x128] sm:$0xff] %v11770_v62 }
 0x4df   :  { %v3771_v24 = vpack.c.bf16 %v11752_v45, %v3748_v39  ;;  %vm13547_vm3 = vcmp.lt.s32.totalorder %v13546_v42, 16  ;;  %v11787_v39 = vsel %vm13548_vm10, %v3685_v14, %v3686_v58  ;;  %v3927_v13 = vrot.slane %v3655_v56, 1  ;;  %v13551_v14 = vld [vmem:[#allocation43_spill] sm:$0xff]  ;;  %8082 = vmatprep.subr.bf16.mxu1 %v8611_v10 }
 0x4e0   :  { %4026 = vst [vmem:[#allocation2 + $0xd0] sm:$0xff] %v4010_v57  ;;  %v3989_v30 = vsel %vm13547_vm3, %v11775_v12, 0.0  ;;  %v3657_v2 = vunpack.c.h.bf16 %v11735_v20  ;;  %8853 = vmatmul.mubr.msk.bf16.gmra.mrb[200].mxu0 %vm9712_vm4, %v11792_v26  ;;  %v11800_v42 = vsel %vm13540_vm5, %v3686_v58, %v3687_v5  ;;  %vm13552_vm11 = vcmp.ge.s32.totalorder %v13551_v14, 0  ;;  %vm13555_vm3 = vmmov %vm13545_vm14 }
 0x4e1   :  { %3787 = vst [vmem:[#allocation2 + $0xd8] sm:$0xff] %v3771_v24  ;;  %v4011_v57 = vpack.c.bf16 %v3989_v30, %v11764_v61  ;;  %v3750_v56 = vsel %vm13552_vm11, %v11787_v39, 0.0  ;;  %v3928_v50 = vrot.slane %v3656_v21, 1  ;;  %4382 = vmatprep.mubr.bf16.mxu0 %v11434_v33  ;;  %v11809_v1 = vsel %vm13545_vm14, %v3926_v18, %v3927_v13  ;;  %vm13558_vm11 = vmmov %vm13540_vm5 }
 0x4e2   :  { %v3772_v27 = vpack.c.bf16 %v11800_v42, %v3750_v56  ;;  %v3688_v24 = vrot.slane %v3656_v21, 7  ;;  %v11813_v30 = vpack.c.bf16 %v11529_v54, %v11544_v44  ;;  %v3689_v33 = vrot.slane %v3657_v2, 7  ;;  %v13556_v54 = vld [vmem:[#allocation46_spill] sm:$0xff]  ;;  %8083 = vmatpush3.bf16.msra.mxu1 %v8611_v10 }
 0x4e3   :  { %4027 = vst [vmem:[#allocation2 + $0xe8] sm:$0xff] %v4011_v57  ;;  %v11820_v14 = vsel %vm13555_vm3, %v3927_v13, %v3928_v50  ;;  %v3658_v56 = vunpack.c.l.bf16 %v11770_v62  ;;  %v3929_v53 = vrot.slane %v3657_v2, 1  ;;  %vm13557_vm10 = vcmp.lt.s32.totalorder %v13556_v54, 16  ;;  %v11837_v2 = vld [vmem:[%s12988_s0 + $0xe8] sm:$0xff]  }
 0x4e4   :  { %13553 = vst [vmem:[#allocation12_spill] sm:$0xff] %v11813_v30  ;;  %8856 = vmatmul.mubr.msk.bf16.gmra.mrb[172].mxu1 %vm9745_vm15, %v11813_v30  ;;  %3788 = vst [vmem:[#allocation2 + $0xf0] sm:$0xff] %v3772_v27  ;;  %v3991_v44 = vsel %vm13557_vm10, %v11820_v14, 0.0  ;;  %v11831_v21 = vsel %vm13540_vm5, %v3687_v5, %v3688_v24  ;;  %v3659_v18 = vunpack.c.h.bf16 %v11770_v62  ;;  %v11842_v57 = vsel %vm13558_vm11, %v3688_v24, %v3689_v33  ;;  %v13559_v27 = vld [vmem:[#allocation48_spill] sm:$0xff] }
 0x4e5   :  { %8028 = vmatprep.mubr.msk.bf16.mxu1 %vm13441_vm0, %v13440_v31  ;;  %v4012_v13 = vpack.c.bf16 %v3991_v44, %v11809_v1  ;;  %vm13560_vm14 = vcmp.ge.s32.totalorder %v13559_v27, 0  ;;  %v3930_v5 = vrot.slane %v3658_v56, 1  ;;  %v11850_v58 = vsel %vm13555_vm3, %v3928_v50, %v3929_v53  ;;  %vm13561_vm10 = vmmov %vm13555_vm3  ;;  %v13562_v50 = vld [vmem:[#allocation49_spill] sm:$0xff]  ;;  %3903 = vst [vmem:[#allocation2 + $0x140] sm:$0xff] %v11837_v2 }
 0x4e6   :  { %v3752_v54 = vsel %vm13560_vm14, %v11831_v21, 0.0  ;;  %v3690_v38 = vrot.slane %v3658_v56, 7  ;;  %v3691_v44 = vrot.slane %v3659_v18, 7  ;;  %v3660_v27 = vunpack.c.l.bf16 %v11837_v2  ;;  %vm13564_vm14 = vmmov %vm13558_vm11 }
 0x4e7   :  { %v3773_v26 = vpack.c.bf16 %v11842_v57, %v3752_v54  ;;  %4028 = vst [vmem:[#allocation2 + $0x100] sm:$0xff] %v4012_v13  ;;  %v11855_v24 = vsel %vm13561_vm10, %v3929_v53, %v3930_v5  ;;  %v3931_v30 = vrot.slane %v3659_v18, 1  ;;  %v3661_v43 = vunpack.c.h.bf16 %v11837_v2  ;;  %v11862_v54 = vld [vmem:[%s12988_s0 + $0xf0] sm:$0xff]  }
 0x4e8   :  { %vm13563_vm5 = vcmp.lt.s32.totalorder %v13562_v50, 16  ;;  %v11869_v13 = vsel %vm13558_vm11, %v3690_v38, %v3691_v44  ;;  %v11873_v53 = vsel %vm13564_vm14, %v3689_v33, %v3690_v38  ;;  %v11877_v18 = vpack.c.bf16 %v11563_v7, %v11557_v63  ;;  %v13568_v50 = vld [vmem:[#allocation54_spill] sm:$0xff]  ;;  %v11893_v63 = vld [vmem:[%s12988_s0 + $0xf8] sm:$0xf]  ;;  %3904 = vst [vmem:[#allocation2 + $0x158] sm:$0xff] %v11862_v54 }
 0x4e9   :  { %3789 = vst [vmem:[#allocation2 + $0x108] sm:$0xff] %v3773_v26  ;;  %v3993_v56 = vsel %vm13563_vm5, %v11855_v24, 0.0  ;;  %vm13567_vm3 = vnez %v13566_v9  ;;  %vm13569_vm10 = vcmp.ge.s32.totalorder %v13568_v50, 0  ;;  %v3932_v25 = vrot.slane %v3660_v27, 1 }
 0x4ea   :  { %13565 = vst [vmem:[#allocation9_spill] sm:$0xff] %v11877_v18  ;;  %8859 = vmatmul.mubr.msk.bf16.gmra.mrb[204].mxu0 %vm13567_vm3, %v11877_v18  ;;  %v4013_v26 = vpack.c.bf16 %v3993_v56, %v11850_v58  ;;  %v3754_v6 = vsel %vm13569_vm10, %v11873_v53, 0.0  ;;  %vm13570_vm5 = vcmp.lt.s32.totalorder %v13444_v55, 7  ;;  %v3692_v10 = vrot.slane %v3660_v27, 7  ;;  %v13574_v27 = vld [vmem:[#allocation55_spill] sm:$0xff]  ;;  %v13578_v18 = vld [vmem:[#allocation58_spill] sm:$0xff] }
 0x4eb   :  { %v11888_v33 = vsel %vm13570_vm5, %v3930_v5, %v3931_v30  ;;  %4390 = vmatprep.mubr.bf16.mxu0 %v11484_v35  ;;  %v3774_v7 = vpack.c.bf16 %v11869_v13, %v3754_v6  ;;  %v3693_v38 = vrot.slane %v3661_v43, 7  ;;  %v3662_v56 = vunpack.c.l.bf16 %v11862_v54  ;;  %vm13573_vm11 = vmmov %vm13570_vm5 }
 0x4ec   :  { %v11901_v50 = vpack.c.bf16 %v11594_v28, %v11570_v3  ;;  %4029 = vst [vmem:[#allocation2 + $0x118] sm:$0xff] %v4013_v26  ;;  %v11908_v35 = vsel %vm13573_vm11, %v3931_v30, %v3932_v25  ;;  %v3933_v6 = vrot.slane %v3661_v43, 1  ;;  %v3663_v9 = vunpack.c.h.bf16 %v11862_v54 }
 0x4ed   :  { %3790 = vst [vmem:[#allocation2 + $0x120] sm:$0xff] %v3774_v7  ;;  %vm13575_vm14 = vcmp.lt.s32.totalorder %v13574_v27, 16  ;;  %vm13576_vm10 = vcmp.lt.s32.totalorder %v13444_v55, 1  ;;  %v3934_v30 = vrot.slane %v3662_v56, 1  ;;  %vm13579_vm11 = vcmp.ge.s32.totalorder %v13578_v18, 0  ;;  %v13582_v18 = vld [vmem:[#allocation61_spill] sm:$0xff] }
 0x4ee   :  { %13571 = vst [vmem:[#allocation10_spill] sm:$0xff] %v11901_v50  ;;  %8862 = vmatmul.mubr.msk.bf16.gmra.mrb[176].mxu1 %vm9832_vm1, %v11901_v50  ;;  %v3995_v3 = vsel %vm13575_vm14, %v11908_v35, 0.0  ;;  %v11918_v28 = vsel %vm13576_vm10, %v3692_v10, %v3693_v38  ;;  %vm13577_vm5 = vmmov %vm13576_vm10  ;;  %vm13580_vm3 = vcmp.lt.s32.totalorder %v13444_v55, 7  ;;  %v3694_v27 = vrot.slane %v3662_v56, 7 }
 0x4ef   :  { %8032 = vmatprep.mubr.msk.bf16.mxu1 %vm13441_vm0, %v13440_v31  ;;  %v11922_v26 = vsel %vm13577_vm5, %v3691_v44, %v3692_v10  ;;  %v4014_v43 = vpack.c.bf16 %v3995_v3, %v11888_v33  ;;  %v11930_v7 = vsel %vm13580_vm3, %v3932_v25, %v3933_v6  ;;  %vm13581_vm14 = vmmov %vm13580_vm3  ;;  %v11938_v10 = vrot.slane %v3663_v9, 7  ;;  %v13586_v3 = vld [vmem:[#allocation62_spill] sm:$0xff] }
 0x4f0   :  { %v3756_v5 = vsel %vm13579_vm11, %v11922_v26, 0.0  ;;  %v11936_v44 = vsel %vm13581_vm14, %v3933_v6, %v3934_v30  ;;  %vm13583_vm10 = vcmp.lt.s32.totalorder %v13582_v18, 16  ;;  %vm13584_vm3 = vmmov %vm13577_vm5  ;;  %v3935_v56 = vrot.slane %v3663_v9, 1  ;;  %v13589_v9 = vld [vmem:[#allocation44_spill] sm:$0xff] }
 0x4f1   :  { %v3775_v50 = vpack.c.bf16 %v11918_v28, %v3756_v5  ;;  %4030 = vst [vmem:[#allocation2 + $0x130] sm:$0xff] %v4014_v43  ;;  %v3997_v48 = vsel %vm13583_vm10, %v11936_v44, 0.0  ;;  %v11946_v25 = vsel %vm13584_vm3, %v3693_v38, %v3694_v27  ;;  %vm13585_vm5 = vmmov %vm13584_vm3  ;;  %vm13587_vm11 = vcmp.ge.s32.totalorder %v13586_v3, 0  ;;  %v13653_v3 = vld [vmem:[#allocation6_spill] sm:$0xff] }
 0x4f2   :  { %v4015_v5 = vpack.c.bf16 %v3997_v48, %v11930_v7  ;;  %v11952_v6 = vsel %vm13585_vm5, %v3694_v27, %v11938_v10  ;;  %v3758_v43 = vsel %vm13587_vm11, %v11946_v25, 0.0  ;;  %v13588_v18 = vunpack.c.l.bf16 %v11893_v63  ;;  %v8616_v27 = vld [vmem:[%s12983_s1 + $0x1c0] sm:$0xff]  }
 0x4f3   :  { %3791 = vst [vmem:[#allocation2 + $0x138] sm:$0xff] %v3775_v50  ;;  %v11961_v38 = vpack.c.bf16 %v11606_v60, %v11610_v0  ;;  %vm13590_vm14 = vnez %v13589_v9  ;;  %v3776_v48 = vpack.c.bf16 %v11952_v6, %v3758_v43  ;;  %vm13591_vm10 = vcmp.lt.s32.totalorder %v13444_v55, 7  ;;  %7559 = vmatprep.subr.bf16.mxu1 %v8616_v27 }
 0x4f4   :  { %v3936_v4 = vrot.slane %v13588_v18, 1  ;;  %v11969_v50 = vsel %vm13591_vm10, %v3934_v30, %v3935_v56  ;;  %4031 = vst [vmem:[#allocation2 + $0x148] sm:$0xff] %v4015_v5  ;;  %vm13592_vm3 = vmmov %vm13591_vm10  ;;  %v11981_v0 = vpack.c.bf16 %v11632_v49, %v11614_v37  ;;  %v13594_v30 = vld [vmem:[#allocation64_spill] sm:$0xff]  ;;  %v11994_v37 = vpack.c.bf16 %v11664_v17, %v11653_v16  ;;  %v13596_v49 = vld [vmem:[#allocation50_spill] sm:$0xff] }
 0x4f5   :  { %8865 = vmatmul.mubr.msk.bf16.gmra.mrb[208].mxu0 %vm13590_vm14, %v11961_v38  ;;  %3792 = vst [vmem:[#allocation2 + $0x150] sm:$0xff] %v3776_v48  ;;  %vm13595_vm5 = vcmp.lt.s32.totalorder %v13594_v30, 16  ;;  %vm13597_vm11 = vnez %v13596_v49  ;;  %v12002_v5 = vpack.c.bf16 %v11684_v19, %v11672_v52  ;;  %v12011_v16 = vpack.c.bf16 %v11704_v15, %v11708_v41  ;;  %v13599_v17 = vld [vmem:[#allocation56_spill] sm:$0xff]  ;;  %v13601_v19 = vld [vmem:[#allocation59_spill] sm:$0xff] }
 0x4f6   :  { %4398 = vmatprep.mubr.bf16.mxu0 %v11534_v36  ;;  %v11977_v60 = vsel %vm13592_vm3, %v3935_v56, %v3936_v4  ;;  %8868 = vmatmul.mubr.msk.bf16.gmra.mrb[180].mxu1 %vm9920_vm2, %v11981_v0  ;;  %vm13600_vm10 = vnez %v13599_v17  ;;  %v12019_v52 = vpack.c.bf16 %v11741_v46, %v11720_v11  ;;  %vm13602_vm3 = vnez %v13601_v19  ;;  %v13603_v15 = vld [vmem:[#allocation63_spill] sm:$0xff]  ;;  %v13605_v46 = vld [vmem:[#allocation65_spill] sm:$0xff] }
 0x4f7   :  { %v3999_v43 = vsel %vm13595_vm5, %v11977_v60, 0.0  ;;  %8036 = vmatprep.mubr.msk.bf16.mxu1 %vm13441_vm0, %v13440_v31  ;;  %v12028_v41 = vpack.c.bf16 %v11752_v45, %v11756_v40  ;;  %vm13604_vm5 = vnez %v13603_v15  ;;  %v12036_v11 = vpack.c.bf16 %v11775_v12, %v11764_v61  ;;  %v13607_v40 = vld [vmem:[#allocation66_spill] sm:$0xff]  ;;  %v13659_v18 = vld [vmem:[#allocation31_spill] sm:$0xff]  ;;  %v13663_v19 = vld [vmem:[#allocation33_spill] sm:$0xff] }
 0x4f8   :  { %v4016_v56 = vpack.c.bf16 %v3999_v43, %v11969_v50  ;;  %v12045_v45 = vpack.c.bf16 %v11800_v42, %v11787_v39  ;;  %v12053_v61 = vpack.c.bf16 %v11820_v14, %v11809_v1  ;;  %v12062_v39 = vpack.c.bf16 %v11842_v57, %v11831_v21  ;;  %v13610_v42 = vld [vmem:[#allocation68_spill] sm:$0xff]  ;;  %v13612_v14 = vld [vmem:[#allocation69_spill] sm:$0xff]  ;;  %v13614_v57 = vld [vmem:[#allocation70_spill] sm:$0xff] }
 0x4f9   :  { %v12070_v1 = vpack.c.bf16 %v11855_v24, %v11850_v58  ;;  %v12079_v21 = vpack.c.bf16 %v11869_v13, %v11873_v53  ;;  %v12087_v58 = vpack.c.bf16 %v11908_v35, %v11888_v33  ;;  %v13616_v24 = vld [vmem:[#allocation71_spill] sm:$0xff]  ;;  %v13618_v13 = vunpack.c.l.bf16 %v11311_v47 }
 0x4fa   :  { %4032 = vst [vmem:[#allocation2 + $0x160] sm:$0xff] %v4016_v56  ;;  %vm13617_vm14 = vnez %v13616_v24  ;;  %v12107_v35 = vpack.c.bf16 %v11918_v28, %v11922_v26  ;;  %v12115_v47 = vpack.c.bf16 %v11936_v44, %v11930_v7  ;;  %v8652_v26 = vld [vmem:[%s12988_s0 + $0xfc] sm:$0xf]  ;;  %v12142_v43 = vpack.c.bf16 %v11952_v6, %v11946_v25  ;;  %v8619_v6 = vld [vmem:[%s12983_s1 + $0x1c8] sm:$0xff]  }
 0x4fb   :  { %v3937_v53 = vrot.slane %v13618_v13, 1  ;;  %v12133_v7 = vcombine.low %v11893_v63, %v8652_v26  ;;  %v12149_v13 = vpack.c.bf16 %v11977_v60, %v11969_v50  ;;  %v13630_v25 = vld [vmem:[#allocation11_spill] sm:$0xff]  ;;  %v8614_v26 = vld [vmem:[%s12983_s1 + $0x210] sm:$0xff]   ;;  %v13645_v60 = vld [vmem:[#allocation12_spill] sm:$0xff] }
 0x4fc   :  { %v13632_v50 = vld [vmem:[#allocation23_spill] sm:$0xff] }
 0x4fd   :  { %8871 = vmatmul.mubr.msk.bf16.gmra.mrb[212].mxu0 %vm13597_vm11, %v11994_v37  ;;  %vm13613_vm11 = vnez %v13612_v14 }
 0x4fe   :  { %4406 = vmatprep.mubr.bf16.mxu0 %v11583_v23  ;;  %8874 = vmatmul.mubr.msk.bf16.gmra.mrb[184].mxu1 %vm10013_vm13, %v12002_v5 }
 0x4ff   :  { %8040 = vmatprep.mubr.msk.bf16.mxu1 %vm13441_vm0, %v13440_v31 }
 0x505   :  { %8877 = vmatmul.mubr.msk.bf16.gmra.mrb[216].mxu0 %vm13600_vm10, %v12011_v16  ;;  %vm13606_vm10 = vnez %v13605_v46  ;;  %v5368_v46 = vld [vmem:[#allocation2 + $0x38] sm:$0xff] }
 0x506   :  { %4414 = vmatprep.mubr.bf16.mxu0 %v11638_v8  ;;  %8880 = vmatmul.mubr.msk.bf16.gmra.mrb[188].mxu1 %vm13602_vm3, %v12019_v52 }
 0x507   :  { %8044 = vmatprep.mubr.msk.bf16.mxu1 %vm13441_vm0, %v13440_v31 }
 0x50d   :  { %8883 = vmatmul.mubr.msk.bf16.gmra.mrb[220].mxu0 %vm13604_vm5, %v12028_v41  ;;  %vm13608_vm5 = vnez %v13607_v40 }
 0x50e   :  { %4422 = vmatprep.mubr.bf16.mxu0 %v11677_v51  ;;  %8886 = vmatmul.mubr.msk.bf16.gmra.mrb[192].mxu1 %vm13606_vm10, %v12036_v11 }
 0x50f   :  { %8048 = vmatprep.mubr.msk.bf16.mxu1 %vm13441_vm0, %v13440_v31 }
 0x515   :  { %8889 = vmatmul.mubr.msk.bf16.gmra.mrb[224].mxu0 %vm13608_vm5, %v12045_v45  ;;  %vm13611_vm5 = vnez %v13610_v42 }
 0x516   :  { %4430 = vmatprep.mubr.bf16.mxu0 %v11735_v20  ;;  %8892 = vmatmul.mubr.msk.bf16.gmra.mrb[196].mxu1 %vm10212_vm9, %v12053_v61 }
 0x517   :  { %8052 = vmatprep.mubr.msk.bf16.mxu1 %vm13441_vm0, %v13440_v31 }
 0x51d   :  { %8895 = vmatmul.mubr.msk.bf16.gmra.mrb[228].mxu0 %vm13611_vm5, %v12062_v39  ;;  %vm13615_vm5 = vnez %v13614_v57 }
 0x51e   :  { %4438 = vmatprep.mubr.bf16.mxu0 %v11770_v62  ;;  %8898 = vmatmul.mubr.msk.bf16.gmra.mrb[200].mxu1 %vm13613_vm11, %v12070_v1  ;;  %vm13619_vm11 = vcmp.lt.s32.totalorder %v13444_v55, 7 }
 0x51f   :  { %8056 = vmatprep.mubr.msk.bf16.mxu1 %vm13441_vm0, %v13440_v31  ;;  %v12099_v48 = vsel %vm13619_vm11, %v3937_v53, %v11318_v59 }
 0x525   :  { %8901 = vmatmul.mubr.msk.bf16.gmra.mrb[232].mxu0 %vm13615_vm5, %v12079_v21  ;;  %vm13620_vm5 = vmmov %vm13619_vm11  ;;  %vm13624_vm11 = vcmp.lt.s32.totalorder %v13444_v55, 1  ;;  %v8617_v55 = vld [vmem:[%s12983_s1 + $0x180] sm:$0xff]  }
 0x526   :  { %4446 = vmatprep.mubr.bf16.mxu0 %v11837_v2  ;;  %8904 = vmatmul.mubr.msk.bf16.gmra.mrb[204].mxu1 %vm13617_vm14, %v12087_v58  ;;  %v12103_v27 = vsel %vm13620_vm5, %v3936_v4, %v3937_v53  ;;  %v13623_v4 = vunpack.c.l.bf16 %v11893_v63  ;;  %vm13625_vm5 = vmmov %vm13624_vm11  ;;  %v13627_v63 = vld [vmem:[#allocation75_spill] sm:$0xff]  ;;  %v13635_v53 = vld [vmem:[#allocation5_spill] sm:$0xff] }
 0x527   :  { %8060 = vmatprep.mubr.msk.bf16.mxu1 %vm13441_vm0, %v13440_v31 }
 0x528   :  { %v3696_v30 = vrot.slane %v13623_v4, 7  ;;  %v13636_v4 = vld [vmem:[#allocation21_spill] sm:$0xff] }
 0x52a   :  { %v12127_v28 = vsel %vm13624_vm11, %v11938_v10, %v3696_v30  ;;  %v12138_v44 = vsel %vm13625_vm5, %v3696_v30, %v11325_v32  ;;  %v8653_v10 = vld [vmem:[#allocation2 + $0x8] sm:$0xff]  ;;  %vm13628_vm11 = vnez %v13627_v63  ;;  %vm13629_vm5 = vnez %v13466_v29  ;;  %v8612_v32 = vld [vmem:[%s12983_s1 + $0x200] sm:$0xff]   ;;  %v13633_v29 = vld [vmem:[#allocation18_spill] sm:$0xff] }
 0x52b   :  { %v8621_v30 = vld [vmem:[%s12983_s1 + $0x1d0] sm:$0xff]  }
 0x52d   :  { %8907 = vmatmul.mubr.msk.bf16.gmra.mrb[236].mxu0 %vm10306_vm6, %v12107_v35 }
 0x52e   :  { %4454 = vmatprep.mubr.bf16.mxu0 %v11862_v54  ;;  %8910 = vmatmul.mubr.msk.bf16.gmra.mrb[208].mxu1 %vm10321_vm12, %v12115_v47 }
 0x52f   :  { %8064 = vmatprep.mubr.msk.bf16.mxu1 %vm13441_vm0, %v13440_v31  ;;  %vm13631_vm0 = vnez %v13630_v25  ;;  %v8624_v25 = vld [vmem:[%s12983_s1 + $0x1d8] sm:$0xff]  }
 0x535   :  { %8913 = vmatmul.mubr.msk.bf16.gmra.mrb[240].mxu0 %vm10358_vm7, %v12142_v43 }
 0x536   :  { %4978 = vmatprep.mubr.bf16.mxu0 %v8653_v10  ;;  %8916 = vmatmul.mubr.msk.bf16.gmra.mrb[212].mxu1 %vm13628_vm11, %v12149_v13  ;;  %v8622_v10 = vld [vmem:[%s12983_s1 + $0x190] sm:$0xff]  }
 0x537   :  { %8919 = vmatprep.mubr.msk.bf16.mxu1 %vm13629_vm5, %v11415_v22  ;;  %v8613_v22 = vld [vmem:[%s12983_s1 + $0x208] sm:$0xff]  }
 0x53d   :  { %8922 = vmatmul.mubr.msk.bf16.vlgmr.msra.gmra.mrb[244].mxu0 %vm13631_vm0, %v11394_v34  ;;  %vm13637_vm0 = vnez %v13636_v4  ;;  %v8620_v34 = vld [vmem:[%s12983_s1 + $0x188] sm:$0xff]   ;;  %v8625_v4 = vld [vmem:[%s12983_s1 + $0x198] sm:$0xff]  }
 0x53e   :  { %8117 = vmatpush3.bf16.msra.mxu0 %v8612_v32  ;;  %4986 = vmatprep.mubr.bf16.mxu0 %v13632_v50  ;;  %v13638_v32 = vld [vmem:[#allocation39_spill] sm:$0xff] }
 0x53f   :  { %8925 = vmatmul.mubr.msk.bf16.vlgmr.msra.gmra.mrb[216].mxu1 %vm13490_vm8, %v13633_v29  ;;  %8118 = vmatprep.subr.bf16.mxu0 %v13440_v31  ;;  %v8615_v50 = vld [vmem:[%s12983_s1 + $0x218] sm:$0xff]   ;;  %v13643_v29 = vld [vmem:[#allocation29_spill] sm:$0xff] }
 0x540   :  { %8928 = vmatprep.mubr.msk.bf16.mxu1 %vm13637_vm0, %v13635_v53  ;;  %7560 = vmatpush3.bf16.msra.mxu1 %v8617_v55  ;;  %v13639_v55 = vld [vmem:[#allocation14_spill] sm:$0xff]  ;;  %vm13644_vm5 = vnez %v13643_v29  ;;  %v8630_v29 = vld [vmem:[%s12983_s1 + $0x1a8] sm:$0xff]   ;;  %vm13673_vm0 = vnez %v13614_v57 }
 0x541   :  { %7561 = vmatprep.subr.bf16.mxu1 %v8619_v6  ;;  %vm13640_vm8 = vnez %v13639_v55  ;;  %v13641_v6 = vld [vmem:[#allocation51_spill] sm:$0xff]  ;;  %v8629_v55 = vld [vmem:[%s12983_s1 + $0x1e8] sm:$0xff]   ;;  %v8628_v53 = vld [vmem:[%s12983_s1 + $0x230] sm:$0xff]  }
 0x542   :  { %8119 = vmatpush3.bf16.msra.mxu0 %v8613_v22  ;;  %v13642_v22 = vld [vmem:[#allocation7_spill] sm:$0xff] }
 0x543   :  { %8120 = vmatprep.subr.bf16.mxu0 %v13440_v31 }
 0x544   :  { %7562 = vmatpush3.bf16.msra.mxu1 %v8620_v34  ;;  %v8626_v34 = vld [vmem:[%s12983_s1 + $0x1e0] sm:$0xff]  }
 0x545   :  { %8931 = vmatmul.mubr.msk.bf16.gmra.mrb[248].mxu0 %vm13640_vm8, %v13638_v32  ;;  %7563 = vmatprep.subr.bf16.mxu1 %v8621_v30  ;;  %v8618_v30 = vld [vmem:[%s12983_s1 + $0x220] sm:$0xff]  }
 0x546   :  { %4994 = vmatprep.mubr.bf16.mxu0 %v13641_v6  ;;  %8121 = vmatpush3.bf16.msra.mxu0 %v8614_v26  ;;  %v8627_v26 = vld [vmem:[%s12983_s1 + $0x1a0] sm:$0xff]   ;;  %v8623_v6 = vld [vmem:[%s12983_s1 + $0x228] sm:$0xff]  }
 0x547   :  { %8934 = vmatmul.mubr.msk.bf16.gmra.mrb[220].mxu1 %vm13644_vm5, %v13642_v22  ;;  %8122 = vmatprep.subr.bf16.mxu0 %v13440_v31  ;;  %v13648_v32 = vld [vmem:[#allocation20_spill] sm:$0xff] }
 0x548   :  { %8937 = vmatprep.mubr.msk.bf16.mxu1 %vm9745_vm15, %v13645_v60  ;;  %7564 = vmatpush3.bf16.msra.mxu1 %v8622_v10  ;;  %v13647_v10 = vld [vmem:[#allocation4_spill] sm:$0xff]  ;;  %vm13649_vm15 = vnez %v13648_v32  ;;  %v8631_v60 = vld [vmem:[%s12983_s1 + $0x1f0] sm:$0xff]  }
 0x549   :  { %7565 = vmatprep.subr.bf16.mxu1 %v8624_v25  ;;  %v13650_v25 = vld [vmem:[#allocation26_spill] sm:$0xff]  ;;  %v13657_v32 = vld [vmem:[#allocation8_spill] sm:$0xff] }
 0x54a   :  { %8123 = vmatpush3.bf16.msra.mxu0 %v8615_v50  ;;  %v13651_v50 = vld [vmem:[#allocation10_spill] sm:$0xff] }
 0x54b   :  { %8124 = vmatprep.subr.bf16.mxu0 %v13440_v31 }
 0x54c   :  { %7566 = vmatpush3.bf16.msra.mxu1 %v8625_v4  ;;  %v13654_v4 = vld [vmem:[#allocation27_spill] sm:$0xff] }
 0x54d   :  { %8940 = vmatmul.mubr.msk.bf16.gmra.mrb[252].mxu0 %vm13649_vm15, %v13647_v10  ;;  %7567 = vmatprep.subr.bf16.mxu1 %v8626_v34  ;;  %v8634_v34 = vld [vmem:[%s12983_s1 + $0x1f8] sm:$0xff]  }
 0x54e   :  { %5002 = vmatprep.mubr.bf16.mxu0 %v13650_v25  ;;  %8125 = vmatpush3.bf16.msra.mxu0 %v8618_v30  ;;  %v13656_v30 = vld [vmem:[#allocation57_spill] sm:$0xff]  ;;  %v8635_v10 = vld [vmem:[%s12983_s1 + $0x1b8] sm:$0xff]  }
 0x54f   :  { %8943 = vmatmul.mubr.msk.bf16.gmra.mrb[224].mxu1 %vm9832_vm1, %v13651_v50  ;;  %8126 = vmatprep.subr.bf16.mxu0 %v13440_v31  ;;  %vm13655_vm1 = vnez %v13654_v4 }
 0x550   :  { %8946 = vmatprep.mubr.msk.bf16.mxu1 %vm9920_vm2, %v11981_v0  ;;  %7568 = vmatpush3.bf16.msra.mxu1 %v8627_v26  ;;  %v8632_v0 = vld [vmem:[%s12983_s1 + $0x1b0] sm:$0xff]   ;;  %v8633_v26 = vld [vmem:[%s12983_s1 + $0x238] sm:$0xff]   ;;  %vm13664_vm2 = vnez %v13612_v14 }
 0x551   :  { %7569 = vmatprep.subr.bf16.mxu1 %v8629_v55 }
 0x552   :  { %8127 = vmatpush3.bf16.msra.mxu0 %v8623_v6 }
 0x553   :  { %8128 = vmatprep.subr.bf16.mxu0 %v13440_v31 }
 0x554   :  { %7570 = vmatpush3.bf16.msra.mxu1 %v8630_v29 }
 0x555   :  { %8949 = vmatmul.mubr.msk.bf16.gmra.mrb[0].mxu0 %vm13655_vm1, %v13653_v3  ;;  %7571 = vmatprep.subr.bf16.mxu1 %v8631_v60 }
 0x556   :  { %5010 = vmatprep.mubr.bf16.mxu0 %v13656_v30  ;;  %8129 = vmatpush3.bf16.msra.mxu0 %v8628_v53 }
 0x557   :  { %8952 = vmatmul.mubr.msk.bf16.gmra.mrb[228].mxu1 %vm10013_vm13, %v12002_v5  ;;  %8130 = vmatprep.subr.bf16.mxu0 %v13440_v31  ;;  %v13660_v5 = vld [vmem:[#allocation9_spill] sm:$0xff] }
 0x558   :  { %8955 = vmatprep.mubr.msk.bf16.mxu1 %vm13602_vm3, %v12019_v52  ;;  %7572 = vmatpush3.bf16.msra.mxu1 %v8632_v0  ;;  %v13661_v52 = vld [vmem:[#allocation38_spill] sm:$0xff]  ;;  %vm13671_vm3 = vnez %v13607_v40 }
 0x559   :  { %7573 = vmatprep.subr.bf16.mxu1 %v8634_v34  ;;  %vm13662_vm13 = vnez %v13661_v52 }
 0x55a   :  { %8131 = vmatpush3.bf16.msra.mxu0 %v8633_v26 }
 0x55c   :  { %7574 = vmatpush3.bf16.msra.mxu1 %v8635_v10 }
 0x55d   :  { %8958 = vmatmul.mubr.msk.bf16.gmra.mrb[4].mxu0 %vm9712_vm4, %v13657_v32  ;;  %vm13665_vm4 = vnez %v13589_v9  ;;  %v5364_v9 = vld [vmem:[#allocation2 + $0x18] sm:$0xff] }
 0x55e   :  { %5018 = vmatprep.mubr.bf16.mxu0 %v13659_v18 }
 0x55f   :  { %8961 = vmatmul.mubr.msk.bf16.gmra.mrb[232].mxu1 %vm13606_vm10, %v12036_v11  ;;  %v5365_v11 = vld [vmem:[#allocation2 + $0x20] sm:$0xff]  ;;  %vm13670_vm10 = vnez %v13603_v15 }
 0x560   :  { %8964 = vmatprep.mubr.msk.bf16.mxu1 %vm10212_vm9, %v12053_v61  ;;  %vm13666_vm9 = vnez %v13596_v49  ;;  %v5370_v49 = vld [vmem:[#allocation2 + $0x48] sm:$0xff] }
 0x565   :  { %8967 = vmatmul.mubr.msk.bf16.gmra.mrb[8].mxu0 %vm13662_vm13, %v13660_v5 }
 0x566   :  { %5026 = vmatprep.mubr.bf16.mxu0 %v13663_v19 }
 0x567   :  { %8970 = vmatmul.mubr.msk.bf16.gmra.mrb[236].mxu1 %vm13664_vm2, %v12070_v1 }
 0x568   :  { %8973 = vmatprep.mubr.msk.bf16.mxu1 %vm13617_vm14, %v12087_v58  ;;  %v5376_v58 = vld [vmem:[#allocation2 + $0x78] sm:$0xff] }
 0x56d   :  { %8976 = vmatmul.mubr.msk.bf16.gmra.mrb[12].mxu0 %vm13665_vm4, %v11961_v38  ;;  %v12309_v38 = vpack.c.bf16 %v12099_v48, %v12103_v27 }
 0x56e   :  { %5034 = vmatprep.mubr.bf16.mxu0 %v11534_v36  ;;  %v13667_v36 = vld [vmem:[#allocation53_spill] sm:$0xff] }
 0x56f   :  { %8979 = vmatmul.mubr.msk.bf16.gmra.mrb[240].mxu1 %vm10321_vm12, %v12115_v47  ;;  %vm13668_vm14 = vnez %v13667_v36  ;;  %vm13669_vm12 = vnez %v13599_v17  ;;  %v5377_v17 = vld [vmem:[#allocation2 + $0x80] sm:$0xff] }
 0x570   :  { %8982 = vmatprep.mubr.msk.bf16.mxu1 %vm13628_vm11, %v12149_v13  ;;  %vm13672_vm11 = vnez %v13610_v42 }
 0x575   :  { %8985 = vmatmul.mubr.msk.bf16.gmra.mrb[16].mxu0 %vm13666_vm9, %v11994_v37  ;;  %v5371_v37 = vld [vmem:[#allocation2 + $0x50] sm:$0xff] }
 0x576   :  { %5042 = vmatprep.mubr.bf16.mxu0 %v11583_v23  ;;  %v5367_v23 = vld [vmem:[#allocation2 + $0x30] sm:$0xff] }
 0x577   :  { %8988 = vmatmul.mubr.msk.bf16.gmra.mrb[244].mxu1 %vm13668_vm14, %v12309_v38 }
 0x578   :  { %5633 = vmatprep.mubr.bf16.mxu1 %v5365_v11 }
 0x57d   :  { %8991 = vmatmul.mubr.msk.bf16.gmra.mrb[20].mxu0 %vm13669_vm12, %v12011_v16  ;;  %v5374_v16 = vld [vmem:[#allocation2 + $0x68] sm:$0xff] }
 0x57e   :  { %5050 = vmatprep.mubr.bf16.mxu0 %v11638_v8  ;;  %v5373_v8 = vld [vmem:[#allocation2 + $0x60] sm:$0xff] }
 0x57f   :  { %5634 = vmatmul.mubr.bf16.vlgmr.msra.gmra.mrb[248].mxu1 %v5364_v9 }
 0x580   :  { %5641 = vmatprep.mubr.bf16.mxu1 %v5368_v46 }
 0x585   :  { %8994 = vmatmul.mubr.msk.bf16.gmra.mrb[24].mxu0 %vm13670_vm10, %v12028_v41 }
 0x586   :  { %5058 = vmatprep.mubr.bf16.mxu0 %v11677_v51 }
 0x587   :  { %5642 = vmatmul.mubr.bf16.gmra.mrb[252].mxu1 %v5367_v23 }
 0x588   :  { %5649 = vmatprep.mubr.bf16.mxu1 %v5371_v37  ;;  %v12358_v37 = vpack.c.bf16 %v12138_v44, %v12127_v28  ;;  %v5366_v28 = vld [vmem:[#allocation2 + $0x28] sm:$0xff] }
 0x58d   :  { %8997 = vmatmul.mubr.msk.bf16.gmra.mrb[28].mxu0 %vm13671_vm3, %v12045_v45 }
 0x58e   :  { %5066 = vmatprep.mubr.bf16.mxu0 %v11735_v20 }
 0x58f   :  { %5650 = vmatmul.mubr.bf16.gmra.mrb[0].mxu1 %v5370_v49  ;;  %v13674_v49 = vld [vmem:[#allocation60_spill] sm:$0xff] }
 0x590   :  { %5657 = vmatprep.mubr.bf16.mxu1 %v5374_v16 }
 0x592   :  { %v7310_v51 = vpop.f32.mrb[184].mxu0 }
 0x593   :  { %v7311_v41 = vpop.f32.mrb[185].mxu0 }
 0x594   :  { %v7312_v15 = vadd.f32 %v7311_v41, %v7310_v51  ;;  %v7313_v40 = vpop.f32.mrb[186].mxu0  ;;  %v4497_v45 = vpop.f32.mrb[156].mxu1 }
 0x595   :  { %9000 = vmatmul.mubr.msk.bf16.gmra.mrb[32].mxu0 %vm13672_vm11, %v12062_v39  ;;  %v7314_v61 = vpop.f32.mrb[187].mxu0  ;;  %v8010_v12 = vpop.f32.mrb[157].mxu1 }
 0x596   :  { %5074 = vmatprep.mubr.bf16.mxu0 %v11770_v62  ;;  %v7315_v20 = vadd.f32 %v7314_v61, %v7313_v40  ;;  %v12330_v1 = vadd.f32 %v7312_v15, %v4497_v45  ;;  %v4500_v14 = vpop.f32.mrb[158].mxu1  ;;  %v5380_v62 = vld [vmem:[#allocation2 + $0x98] sm:$0xff] }
 0x597   :  { %5658 = vmatmul.mubr.bf16.gmra.mrb[4].mxu1 %v5373_v8  ;;  %v8011_v39 = vpop.f32.mrb[159].mxu1  ;;  %v5389_v8 = vld [vmem:[#allocation2 + $0xe0] sm:$0xff] }
 0x598   :  { %5665 = vmatprep.mubr.bf16.mxu1 %v5377_v17  ;;  %v12335_v42 = vadd.f32 %v7315_v20, %v4500_v14 }
 0x59a   :  { %v7316_v24 = vpop.f32.mrb[188].mxu0 }
 0x59b   :  { %v7317_v48 = vpop.f32.mrb[189].mxu0 }
 0x59c   :  { %v7318_v27 = vadd.f32 %v7317_v48, %v7316_v24  ;;  %v7319_v47 = vpop.f32.mrb[190].mxu0  ;;  %v4505_v59 = vpop.f32.mrb[160].mxu1 }
 0x59d   :  { %9003 = vmatmul.mubr.msk.bf16.gmra.mrb[36].mxu0 %vm13673_vm0, %v12079_v21  ;;  %v7320_v13 = vpop.f32.mrb[191].mxu0  ;;  %v8014_v63 = vpop.f32.mrb[161].mxu1  ;;  %v5379_v21 = vld [vmem:[#allocation2 + $0x90] sm:$0xff] }
 0x59e   :  { %5082 = vmatprep.mubr.bf16.mxu0 %v11837_v2  ;;  %v7321_v25 = vadd.f32 %v7320_v13, %v7319_v47  ;;  %v12338_v6 = vadd.f32 %v7318_v27, %v4505_v59  ;;  %v4508_v57 = vpop.f32.mrb[162].mxu1  ;;  %v5383_v2 = vld [vmem:[#allocation2 + $0xb0] sm:$0xff]  ;;  %v5369_v63 = vld [vmem:[#allocation2 + $0x40] sm:$0xff] }
 0x59f   :  { %5666 = vmatmul.mubr.bf16.gmra.mrb[8].mxu1 %v5376_v58  ;;  %v8015_v50 = vpop.f32.mrb[163].mxu1  ;;  %v5388_v58 = vld [vmem:[#allocation2 + $0xd8] sm:$0xff] }
 0x5a0   :  { %5673 = vmatprep.mubr.bf16.mxu1 %v5380_v62  ;;  %v12343_v22 = vadd.f32 %v7321_v25, %v4508_v57  ;;  %v5392_v62 = vld [vmem:[#allocation2 + $0xf8] sm:$0xff] }
 0x5a2   :  { %v7322_v29 = vpop.f32.mrb[192].mxu0 }
 0x5a3   :  { %v7323_v60 = vpop.f32.mrb[193].mxu0 }
 0x5a4   :  { %v7324_v53 = vadd.f32 %v7323_v60, %v7322_v29  ;;  %v7325_v0 = vpop.f32.mrb[194].mxu0  ;;  %v4513_v3 = vpop.f32.mrb[164].mxu1  ;;  %v5391_v29 = vld [vmem:[#allocation2 + $0xf0] sm:$0xff] }
 0x5a5   :  { %9006 = vmatmul.mubr.msk.bf16.gmra.mrb[40].mxu0 %vm10306_vm6, %v12107_v35  ;;  %v7326_v4 = vpop.f32.mrb[195].mxu0  ;;  %v8018_v34 = vpop.f32.mrb[165].mxu1  ;;  %v5382_v35 = vld [vmem:[#allocation2 + $0xa8] sm:$0xff]  ;;  %vm13675_vm6 = vnez %v13674_v49 }
 0x5a6   :  { %5090 = vmatprep.mubr.bf16.mxu0 %v11862_v54  ;;  %v7327_v30 = vadd.f32 %v7326_v4, %v7325_v0  ;;  %v12346_v26 = vadd.f32 %v7324_v53, %v4513_v3  ;;  %v4516_v33 = vpop.f32.mrb[166].mxu1  ;;  %v5386_v54 = vld [vmem:[#allocation2 + $0xc8] sm:$0xff]  ;;  %v5395_v53 = vld [vmem:[#allocation2 + $0x110] sm:$0xff] }
 0x5a7   :  { %5674 = vmatmul.mubr.bf16.gmra.mrb[12].mxu1 %v5379_v21  ;;  %v8019_v10 = vpop.f32.mrb[167].mxu1 }
 0x5a8   :  { %5681 = vmatprep.mubr.bf16.mxu1 %v5383_v2  ;;  %v12351_v32 = vadd.f32 %v7327_v30, %v4516_v33 }
 0x5ab   :  { %v7328_v55 = vpop.f32.mrb[196].mxu0 }
 0x5ac   :  { %v7329_v18 = vpop.f32.mrb[197].mxu0 }
 0x5ad   :  { %9009 = vmatmul.mubr.msk.bf16.gmra.mrb[44].mxu0 %vm10358_vm7, %v12142_v43  ;;  %v7330_v5 = vadd.f32 %v7329_v18, %v7328_v55  ;;  %v7331_v52 = vpop.f32.mrb[198].mxu0  ;;  %v5385_v43 = vld [vmem:[#allocation2 + $0xc0] sm:$0xff]  ;;  %vm13676_vm7 = vmmov 0  }
 0x5ae   :  { %5098 = vmatprep.mubr.bf16.mxu0 %v12133_v7  ;;  %v4521_v19 = vpop.f32.mrb[168].mxu1  ;;  %v7332_v11 = vpop.f32.mrb[199].mxu0 }
 0x5af   :  { %5682 = vmatmul.mubr.bf16.gmra.mrb[16].mxu1 %v5382_v35  ;;  %v8022_v9 = vpop.f32.mrb[169].mxu1  ;;  %v7333_v46 = vadd.f32 %v7332_v11, %v7331_v52  ;;  %v12354_v23 = vadd.f32 %v7330_v5, %v4521_v19  ;;  %v5372_v35 = vld [vmem:[#allocation2 + $0x58] sm:$0xff]  ;;  %v5394_v52 = vld [vmem:[#allocation2 + $0x108] sm:$0xff] }
 0x5b0   :  { %5689 = vmatprep.mubr.bf16.mxu1 %v5386_v54  ;;  %v4524_v56 = vpop.f32.mrb[170].mxu1  ;;  %v5398_v11 = vld [vmem:[#allocation2 + $0x128] sm:$0xff] }
 0x5b1   :  { %v8023_v16 = vpop.f32.mrb[171].mxu1  ;;  %v12363_v17 = vadd.f32 %v7333_v46, %v4524_v56 }
 0x5b3   :  { %v7334_v51 = vpop.f32.mrb[200].mxu0 }
 0x5b4   :  { %v7335_v41 = vpop.f32.mrb[201].mxu0 }
 0x5b5   :  { %9012 = vmatmul.mubr.msk.bf16.gmra.mrb[48].mxu0 %vm13675_vm6, %v12358_v37  ;;  %v7336_v15 = vadd.f32 %v7335_v41, %v7334_v51  ;;  %v7337_v40 = vpop.f32.mrb[202].mxu0  ;;  %v5375_v51 = vld [vmem:[#allocation2 + $0x70] sm:$0xff] }
 0x5b6   :  { %8132 = vmatprep.mubr.msk.bf16.mxu0 %vm13676_vm7, %v13440_v31  ;;  %v7338_v44 = vpop.f32.mrb[203].mxu0 }
 0x5b7   :  { %5690 = vmatmul.mubr.bf16.gmra.mrb[20].mxu1 %v5385_v43  ;;  %v4529_v45 = vpop.f32.mrb[172].mxu1  ;;  %v7339_v12 = vadd.f32 %v7338_v44, %v7337_v40  ;;  %v5397_v44 = vld [vmem:[#allocation2 + $0x120] sm:$0xff] }
 0x5b8   :  { %5697 = vmatprep.mubr.bf16.mxu1 %v5389_v8  ;;  %v8026_v61 = vpop.f32.mrb[173].mxu1  ;;  %v12367_v20 = vadd.f32 %v7336_v15, %v4529_v45 }
 0x5b9   :  { %v4532_v14 = vpop.f32.mrb[174].mxu1 }
 0x5ba   :  { %v8027_v39 = vpop.f32.mrb[175].mxu1  ;;  %v12369_v24 = vadd.f32 %v7339_v12, %v4532_v14  ;;  %v5401_v12 = vld [vmem:[#allocation2 + $0x140] sm:$0xff] }
 0x5bd   :  { %8133 = vmatmul.mubr.bf16.vlgmr.msra.gmra.mrb[52].mxu0 %v5366_v28  ;;  %v7340_v48 = vpop.f32.mrb[204].mxu0 }
 0x5be   :  { %8136 = vmatprep.mubr.msk.bf16.mxu0 %vm13676_vm7, %v13440_v31  ;;  %v7341_v27 = vpop.f32.mrb[205].mxu0 }
 0x5bf   :  { %5698 = vmatmul.mubr.bf16.gmra.mrb[24].mxu1 %v5388_v58  ;;  %v7342_v47 = vadd.f32 %v7341_v27, %v7340_v48  ;;  %v7343_v59 = vpop.f32.mrb[206].mxu0 }
 0x5c0   :  { %5705 = vmatprep.mubr.bf16.mxu1 %v5392_v62  ;;  %v7344_v25 = vpop.f32.mrb[207].mxu0 }
 0x5c1   :  { %v4537_v13 = vpop.f32.mrb[176].mxu1  ;;  %v7345_v21 = vadd.f32 %v7344_v25, %v7343_v59 }
 0x5c2   :  { %v8030_v57 = vpop.f32.mrb[177].mxu1  ;;  %v12373_v50 = vadd.f32 %v7342_v47, %v4537_v13  ;;  %v5378_v47 = vld [vmem:[#allocation2 + $0x88] sm:$0xff] }
 0x5c3   :  { %v4540_v2 = vpop.f32.mrb[178].mxu1 }
 0x5c4   :  { %v8031_v60 = vpop.f32.mrb[179].mxu1  ;;  %v12375_v0 = vadd.f32 %v7345_v21, %v4540_v2  ;;  %v5400_v21 = vld [vmem:[#allocation2 + $0x138] sm:$0xff] }
 0x5c5   :  { %8137 = vmatmul.mubr.bf16.gmra.mrb[56].mxu0 %v5369_v63 }
 0x5c6   :  { %8140 = vmatprep.mubr.msk.bf16.mxu0 %vm13676_vm7, %v13440_v31 }
 0x5c7   :  { %5706 = vmatmul.mubr.bf16.gmra.mrb[28].mxu1 %v5391_v29  ;;  %v5404_v29 = vld [vmem:[#allocation2 + $0x158] sm:$0xff] }
 0x5c8   :  { %v7346_v3 = vpop.f32.mrb[208].mxu0  ;;  %5713 = vmatprep.mubr.bf16.mxu1 %v5395_v53 }
 0x5c9   :  { %v7347_v4 = vpop.f32.mrb[209].mxu0  ;;  %v4545_v33 = vpop.f32.mrb[180].mxu1 }
 0x5ca   :  { %v7348_v34 = vadd.f32 %v7347_v4, %v7346_v3  ;;  %v7349_v30 = vpop.f32.mrb[210].mxu0  ;;  %v8034_v54 = vpop.f32.mrb[181].mxu1 }
 0x5cb   :  { %v7350_v10 = vpop.f32.mrb[211].mxu0  ;;  %v4548_v5 = vpop.f32.mrb[182].mxu1 }
 0x5cc   :  { %v7351_v55 = vadd.f32 %v7350_v10, %v7349_v30  ;;  %v12379_v18 = vadd.f32 %v7348_v34, %v4545_v33  ;;  %v8035_v19 = vpop.f32.mrb[183].mxu1  ;;  %v5381_v33 = vld [vmem:[#allocation2 + $0xa0] sm:$0xff] }
 0x5cd   :  { %8141 = vmatmul.mubr.bf16.gmra.mrb[60].mxu0 %v5372_v35 }
 0x5ce   :  { %v12381_v9 = vadd.f32 %v7351_v55, %v4548_v5  ;;  %8144 = vmatprep.mubr.msk.bf16.mxu0 %vm13676_vm7, %v13440_v31 }
 0x5cf   :  { %5714 = vmatmul.mubr.bf16.gmra.mrb[32].mxu1 %v5394_v52  ;;  %v5403_v52 = vld [vmem:[#allocation2 + $0x150] sm:$0xff] }
 0x5d0   :  { %v7352_v46 = vpop.f32.mrb[212].mxu0  ;;  %5721 = vmatprep.mubr.bf16.mxu1 %v5398_v11 }
 0x5d1   :  { %v7353_v56 = vpop.f32.mrb[213].mxu0  ;;  %v4553_v8 = vpop.f32.mrb[184].mxu1 }
 0x5d2   :  { %v7354_v43 = vadd.f32 %v7353_v56, %v7352_v46  ;;  %v7355_v16 = vpop.f32.mrb[214].mxu0  ;;  %v8038_v15 = vpop.f32.mrb[185].mxu1 }
 0x5d3   :  { %v7356_v41 = vpop.f32.mrb[215].mxu0  ;;  %v4556_v28 = vpop.f32.mrb[186].mxu1 }
 0x5d4   :  { %v7357_v40 = vadd.f32 %v7356_v41, %v7355_v16  ;;  %v12385_v45 = vadd.f32 %v7354_v43, %v4553_v8  ;;  %v8039_v61 = vpop.f32.mrb[187].mxu1 }
 0x5d5   :  { %8145 = vmatmul.mubr.bf16.gmra.mrb[64].mxu0 %v5375_v51  ;;  %v5384_v51 = vld [vmem:[#allocation2 + $0xb8] sm:$0xff] }
 0x5d6   :  { %v12387_v14 = vadd.f32 %v7357_v40, %v4556_v28  ;;  %8148 = vmatprep.mubr.msk.bf16.mxu0 %vm13676_vm7, %v13440_v31 }
 0x5d7   :  { %5722 = vmatmul.mubr.bf16.gmra.mrb[36].mxu1 %v5397_v44 }
 0x5d8   :  { %v7358_v58 = vpop.f32.mrb[216].mxu0  ;;  %5729 = vmatprep.mubr.bf16.mxu1 %v5401_v12 }
 0x5d9   :  { %v7359_v39 = vpop.f32.mrb[217].mxu0  ;;  %v4561_v27 = vpop.f32.mrb[188].mxu1 }
 0x5da   :  { %v7360_v62 = vadd.f32 %v7359_v39, %v7358_v58  ;;  %v7361_v48 = vpop.f32.mrb[218].mxu0  ;;  %v8042_v13 = vpop.f32.mrb[189].mxu1 }
 0x5db   :  { %v7362_v59 = vpop.f32.mrb[219].mxu0  ;;  %v4564_v57 = vpop.f32.mrb[190].mxu1 }
 0x5dc   :  { %v7363_v63 = vadd.f32 %v7362_v59, %v7361_v48  ;;  %v12391_v25 = vadd.f32 %v7360_v62, %v4561_v27  ;;  %v8043_v2 = vpop.f32.mrb[191].mxu1  ;;  %v5387_v27 = vld [vmem:[#allocation2 + $0xd0] sm:$0xff] }
 0x5dd   :  { %8149 = vmatmul.mubr.bf16.gmra.mrb[68].mxu0 %v5378_v47 }
 0x5de   :  { %v12393_v60 = vadd.f32 %v7363_v63, %v4564_v57  ;;  %8152 = vmatprep.mubr.msk.bf16.mxu0 %vm13676_vm7, %v13440_v31 }
 0x5df   :  { %5730 = vmatmul.mubr.bf16.gmra.mrb[40].mxu1 %v5400_v21 }
 0x5e0   :  { %v7364_v53 = vpop.f32.mrb[220].mxu0  ;;  %5737 = vmatprep.mubr.bf16.mxu1 %v5404_v29 }
 0x5e1   :  { %v7365_v3 = vpop.f32.mrb[221].mxu0  ;;  %v4569_v30 = vpop.f32.mrb[192].mxu1 }
 0x5e2   :  { %v7366_v4 = vadd.f32 %v7365_v3, %v7364_v53  ;;  %v7367_v34 = vpop.f32.mrb[222].mxu0  ;;  %v8046_v10 = vpop.f32.mrb[193].mxu1 }
 0x5e3   :  { %v7368_v35 = vpop.f32.mrb[223].mxu0  ;;  %v4572_v5 = vpop.f32.mrb[194].mxu1 }
 0x5e4   :  { %v7369_v54 = vadd.f32 %v7368_v35, %v7367_v34  ;;  %v12397_v55 = vadd.f32 %v7366_v4, %v4569_v30  ;;  %v8047_v19 = vpop.f32.mrb[195].mxu1  ;;  %v5390_v4 = vld [vmem:[#allocation2 + $0xe8] sm:$0xff] }
 0x5e5   :  { %8153 = vmatmul.mubr.bf16.gmra.mrb[72].mxu0 %v5381_v33 }
 0x5e6   :  { %v12399_v11 = vadd.f32 %v7369_v54, %v4572_v5  ;;  %8156 = vmatprep.mubr.msk.bf16.mxu0 %vm13676_vm7, %v13440_v31 }
 0x5e7   :  { %5738 = vmatmul.mubr.bf16.gmra.mrb[44].mxu1 %v5403_v52 }
 0x5e8   :  { %v7370_v46 = vpop.f32.mrb[224].mxu0  ;;  %5745 = vmatprep.mubr.bf16.mxu1 %v12133_v7 }
 0x5e9   :  { %v7371_v56 = vpop.f32.mrb[225].mxu0  ;;  %v4577_v8 = vpop.f32.mrb[196].mxu1 }
 0x5ea   :  { %v7372_v43 = vadd.f32 %v7371_v56, %v7370_v46  ;;  %v7373_v16 = vpop.f32.mrb[226].mxu0  ;;  %v8050_v15 = vpop.f32.mrb[197].mxu1 }
 0x5eb   :  { %v7374_v41 = vpop.f32.mrb[227].mxu0  ;;  %v4580_v44 = vpop.f32.mrb[198].mxu1 }
 0x5ec   :  { %v7375_v40 = vadd.f32 %v7374_v41, %v7373_v16  ;;  %v12404_v28 = vadd.f32 %v7372_v43, %v4577_v8  ;;  %v8051_v61 = vpop.f32.mrb[199].mxu1  ;;  %v5393_v16 = vld [vmem:[#allocation2 + $0x100] sm:$0xff] }
 0x5ed   :  { %8157 = vmatmul.mubr.bf16.gmra.mrb[76].mxu0 %v5384_v51 }
 0x5ee   :  { %v12406_v12 = vadd.f32 %v7375_v40, %v4580_v44  ;;  %8160 = vmatprep.mubr.msk.bf16.mxu0 %vm13676_vm7, %v13440_v31 }
 0x5ef   :  { %9015 = vmatmul.mubr.msk.bf16.gmra.mrb[48].mxu1 %vm13675_vm6, %v12358_v37 }
 0x5f0   :  { %v7376_v7 = vpop.f32.mrb[228].mxu0 }
 0x5f1   :  { %v7377_v58 = vpop.f32.mrb[229].mxu0  ;;  %v4585_v48 = vpop.f32.mrb[200].mxu1 }
 0x5f2   :  { %v7378_v39 = vadd.f32 %v7377_v58, %v7376_v7  ;;  %v7379_v62 = vpop.f32.mrb[230].mxu0  ;;  %v8054_v59 = vpop.f32.mrb[201].mxu1 }
 0x5f3   :  { %v7380_v47 = vpop.f32.mrb[231].mxu0  ;;  %v4588_v57 = vpop.f32.mrb[202].mxu1 }
 0x5f4   :  { %v7381_v13 = vadd.f32 %v7380_v47, %v7379_v62  ;;  %v12413_v63 = vadd.f32 %v7378_v39, %v4585_v48  ;;  %v8055_v21 = vpop.f32.mrb[203].mxu1 }
 0x5f5   :  { %8161 = vmatmul.mubr.bf16.gmra.mrb[80].mxu0 %v5387_v27  ;;  %v5396_v27 = vld [vmem:[#allocation2 + $0x118] sm:$0xff] }
 0x5f6   :  { %v12415_v2 = vadd.f32 %v7381_v13, %v4588_v57  ;;  %8164 = vmatprep.mubr.msk.bf16.mxu0 %vm13676_vm7, %v13440_v31 }
 0x5f8   :  { %v7382_v37 = vpop.f32.mrb[232].mxu0 }
 0x5f9   :  { %v7383_v49 = vpop.f32.mrb[233].mxu0  ;;  %v4593_v3 = vpop.f32.mrb[204].mxu1 }
 0x5fa   :  { %v7384_v29 = vadd.f32 %v7383_v49, %v7382_v37  ;;  %v7385_v53 = vpop.f32.mrb[234].mxu0  ;;  %v8058_v30 = vpop.f32.mrb[205].mxu1 }
 0x5fb   :  { %v7386_v34 = vpop.f32.mrb[235].mxu0  ;;  %v4596_v10 = vpop.f32.mrb[206].mxu1  ;;  %v5399_v30 = vld [vmem:[#allocation2 + $0x130] sm:$0xff] }
 0x5fc   :  { %v7387_v33 = vadd.f32 %v7386_v34, %v7385_v53  ;;  %v12419_v35 = vadd.f32 %v7384_v29, %v4593_v3  ;;  %v8059_v54 = vpop.f32.mrb[207].mxu1 }
 0x5fd   :  { %8165 = vmatmul.mubr.bf16.gmra.mrb[84].mxu0 %v5390_v4 }
 0x5fe   :  { %v12421_v5 = vadd.f32 %v7387_v33, %v4596_v10  ;;  %8168 = vmatprep.mubr.msk.bf16.mxu0 %vm13676_vm7, %v13440_v31 }
 0x600   :  { %v7388_v52 = vpop.f32.mrb[236].mxu0 }
 0x601   :  { %v7389_v19 = vpop.f32.mrb[237].mxu0  ;;  %v4601_v43 = vpop.f32.mrb[208].mxu1 }
 0x602   :  { %v7390_v46 = vadd.f32 %v7389_v19, %v7388_v52  ;;  %v7391_v56 = vpop.f32.mrb[238].mxu0  ;;  %v8062_v51 = vpop.f32.mrb[209].mxu1 }
 0x603   :  { %v7392_v8 = vpop.f32.mrb[239].mxu0  ;;  %v4604_v40 = vpop.f32.mrb[210].mxu1 }
 0x604   :  { %v7393_v41 = vadd.f32 %v7392_v8, %v7391_v56  ;;  %v12425_v15 = vadd.f32 %v7390_v46, %v4601_v43  ;;  %v8063_v44 = vpop.f32.mrb[211].mxu1 }
 0x605   :  { %8169 = vmatmul.mubr.bf16.gmra.mrb[88].mxu0 %v5393_v16  ;;  %v12446_v16 = vld [vmem:[%s12989_s2] ss:$0 sm:$0xff]  ;;  %s12747_s2 = smov 0  }
 0x606   :  { %v12427_v61 = vadd.f32 %v7393_v41, %v4604_v40  ;;  %8172 = vmatprep.mubr.msk.bf16.mxu0 %vm13676_vm7, %v13440_v31  ;;  %v5402_v40 = vld [vmem:[#allocation2 + $0x148] sm:$0xff] }
 0x608   :  { %v7394_v7 = vpop.f32.mrb[240].mxu0 }
 0x609   :  { %v7395_v58 = vpop.f32.mrb[241].mxu0  ;;  %v4609_v48 = vpop.f32.mrb[212].mxu1 }
 0x60a   :  { %v7396_v39 = vadd.f32 %v7395_v58, %v7394_v7  ;;  %v7397_v62 = vpop.f32.mrb[242].mxu0  ;;  %v8066_v59 = vpop.f32.mrb[213].mxu1 }
 0x60b   :  { %v7398_v47 = vpop.f32.mrb[243].mxu0  ;;  %v4612_v21 = vpop.f32.mrb[214].mxu1  ;;  %v4647_v59 = vadd.f32 %v12446_v16, %v12335_v42 }
 0x60c   :  { %v7399_v13 = vadd.f32 %v7398_v47, %v7397_v62  ;;  %v12431_v57 = vadd.f32 %v7396_v39, %v4609_v48  ;;  %v8067_v37 = vpop.f32.mrb[215].mxu1  ;;  %v4646_v39 = vadd.f32 %v12446_v16, %v12330_v1 }
 0x60d   :  { %8173 = vmatmul.mubr.bf16.gmra.mrb[92].mxu0 %v5396_v27 }
 0x60e   :  { %v12433_v49 = vadd.f32 %v7399_v13, %v4612_v21  ;;  %8176 = vmatprep.mubr.msk.bf16.mxu0 %vm13676_vm7, %v13440_v31 }
 0x610   :  { %v7439_v29 = vpop.f32.mrb[244].mxu0 }
 0x611   :  { %v7440_v53 = vpop.f32.mrb[245].mxu0 }
 0x612   :  { %v7441_v3 = vadd.f32 %v7440_v53, %v7439_v29  ;;  %v7442_v4 = vpop.f32.mrb[246].mxu0  ;;  %v8086_v34 = vpop.f32.mrb[216].mxu1 }
 0x613   :  { %v7443_v33 = vpop.f32.mrb[247].mxu0  ;;  %v5141_v10 = vpop.f32.mrb[217].mxu1 }
 0x614   :  { %v7444_v54 = vadd.f32 %v7443_v33, %v7442_v4  ;;  %v12437_v52 = vadd.f32 %v7441_v3, %v5141_v10  ;;  %v8087_v19 = vpop.f32.mrb[218].mxu1  ;;  %v5405_v4 = vld [vmem:[#allocation2 + $0x160] sm:$0xff]  ;;  %v4648_v10 = vadd.f32 %v12446_v16, %v12338_v6 }
 0x615   :  { %v5144_v46 = vpop.f32.mrb[219].mxu1  ;;  %8177 = vmatmul.mubr.bf16.gmra.mrb[96].mxu0 %v5399_v30 }
 0x616   :  { %v12439_v56 = vadd.f32 %v7444_v54, %v5144_v46  ;;  %8180 = vmatprep.mubr.msk.bf16.mxu0 %vm13676_vm7, %v13440_v31 }
 0x618   :  { %v7445_v43 = vpop.f32.mrb[248].mxu0 }
 0x619   :  { %v7446_v8 = vpop.f32.mrb[249].mxu0 }
 0x61a   :  { %v7447_v51 = vadd.f32 %v7446_v8, %v7445_v43  ;;  %v7448_v41 = vpop.f32.mrb[250].mxu0  ;;  %v8090_v44 = vpop.f32.mrb[220].mxu1  ;;  %v4649_v43 = vadd.f32 %v12446_v16, %v12343_v22 }
 0x61b   :  { %v7449_v7 = vpop.f32.mrb[251].mxu0  ;;  %v5157_v58 = vpop.f32.mrb[221].mxu1 }
 0x61c   :  { %v5150_v62 = vadd.f32 %v8086_v34, %v7447_v51  ;;  %v7450_v48 = vadd.f32 %v7449_v7, %v7448_v41  ;;  %v8091_v27 = vpop.f32.mrb[222].mxu1 }
 0x61d   :  { %8181 = vmatmul.mubr.bf16.gmra.mrb[100].mxu0 %v5402_v40  ;;  %v5160_v47 = vpop.f32.mrb[223].mxu1 }
 0x61e   :  { %v12452_v13 = vadd.f32 %v5150_v62, %v4646_v39  ;;  %v5153_v21 = vadd.f32 %v8087_v19, %v7450_v48  ;;  %8184 = vmatprep.mubr.msk.bf16.mxu0 %vm13676_vm7, %v13440_v31 }
 0x620   :  { %v12456_v37 = vadd.f32 %v5153_v21, %v4647_v59  ;;  %v7451_v29 = vpop.f32.mrb[252].mxu0  ;;  %v4650_v59 = vadd.f32 %v12446_v16, %v12346_v26 }
 0x621   :  { %v7452_v53 = vpop.f32.mrb[253].mxu0 }
 0x622   :  { %v7453_v3 = vadd.f32 %v7452_v53, %v7451_v29  ;;  %v7454_v1 = vpop.f32.mrb[254].mxu0  ;;  %v8094_v34 = vpop.f32.mrb[224].mxu1 }
 0x623   :  { %v7455_v30 = vpop.f32.mrb[255].mxu0  ;;  %v5173_v33 = vpop.f32.mrb[225].mxu1 }
 0x624   :  { %v7456_v42 = vadd.f32 %v7455_v30, %v7454_v1  ;;  %v5158_v54 = vadd.f32 %v7453_v3, %v5157_v58  ;;  %v8095_v46 = vpop.f32.mrb[226].mxu1 }
 0x625   :  { %8185 = vmatmul.mubr.bf16.gmra.mrb[104].mxu0 %v5405_v4  ;;  %v5176_v19 = vpop.f32.mrb[227].mxu1 }
 0x626   :  { %v12462_v8 = vadd.f32 %v5158_v54, %v4648_v10  ;;  %v5161_v51 = vadd.f32 %v7456_v42, %v5160_v47  ;;  %8188 = vmatprep.mubr.msk.bf16.mxu0 %vm13676_vm7, %v13440_v31  ;;  %v4651_v47 = vadd.f32 %v12446_v16, %v12351_v32 }
 0x628   :  { %v12466_v41 = vadd.f32 %v5161_v51, %v4649_v43  ;;  %v7457_v40 = vpop.f32.mrb[0].mxu0 }
 0x629   :  { %v7458_v7 = vpop.f32.mrb[1].mxu0 }
 0x62a   :  { %v7459_v39 = vadd.f32 %v7458_v7, %v7457_v40  ;;  %v7460_v6 = vpop.f32.mrb[2].mxu0  ;;  %v12468_v62 = vpop.f32.mrb[228].mxu1 }
 0x62b   :  { %v7461_v58 = vpop.f32.mrb[3].mxu0  ;;  %v5189_v48 = vpop.f32.mrb[229].mxu1 }
 0x62c   :  { %v5166_v22 = vadd.f32 %v8090_v44, %v7459_v39  ;;  %v7462_v21 = vadd.f32 %v7461_v58, %v7460_v6  ;;  %v12472_v29 = vpop.f32.mrb[230].mxu1 }
 0x62d   :  { %9018 = vmatmul.mubr.msk.bf16.gmra.mrb[108].mxu0 %vm13668_vm14, %v12309_v38  ;;  %v5192_v31 = vpop.f32.mrb[231].mxu1  ;;  %v4652_v38 = vadd.f32 %v12446_v16, %v12354_v23 }
 0x62e   :  { %v12479_v53 = vadd.f32 %v5166_v22, %v4650_v59  ;;  %v5169_v3 = vadd.f32 %v8091_v27, %v7462_v21  ;;  %v4653_v27 = vadd.f32 %v12446_v16, %v12363_v17 }
 0x630   :  { %v12481_v1 = vadd.f32 %v5169_v3, %v4651_v47  ;;  %v7463_v4 = vpop.f32.mrb[4].mxu0  ;;  %v4654_v47 = vadd.f32 %v12446_v16, %v12367_v20 }
 0x631   :  { %v7464_v30 = vpop.f32.mrb[5].mxu0 }
 0x632   :  { %v7465_v26 = vadd.f32 %v7464_v30, %v7463_v4  ;;  %v7466_v44 = vpop.f32.mrb[6].mxu0  ;;  %v12483_v10 = vpop.f32.mrb[232].mxu1 }
 0x633   :  { %v7467_v42 = vpop.f32.mrb[7].mxu0  ;;  %v12485_v54 = vpop.f32.mrb[233].mxu1 }
 0x634   :  { %v7468_v36 = vadd.f32 %v7467_v42, %v7466_v44  ;;  %v5174_v43 = vadd.f32 %v7465_v26, %v5173_v33  ;;  %v12489_v32 = vpop.f32.mrb[234].mxu1 }
 0x635   :  { %v12491_v51 = vpop.f32.mrb[235].mxu1 }
 0x636   :  { %v12495_v40 = vadd.f32 %v5174_v43, %v4652_v38  ;;  %v5177_v7 = vadd.f32 %v7468_v36, %v5176_v19  ;;  %v4655_v19 = vadd.f32 %v12446_v16, %v12369_v24 }
 0x638   :  { %v12497_v39 = vadd.f32 %v5177_v7, %v4653_v27  ;;  %v7469_v6 = vpop.f32.mrb[8].mxu0 }
 0x639   :  { %v7470_v58 = vpop.f32.mrb[9].mxu0 }
 0x63a   :  { %v7471_v59 = vadd.f32 %v7470_v58, %v7469_v6  ;;  %v7472_v22 = vpop.f32.mrb[10].mxu0  ;;  %v12499_v21 = vpop.f32.mrb[236].mxu1  ;;  %v4656_v6 = vadd.f32 %v12446_v16, %v12373_v50 }
 0x63b   :  { %v7473_v23 = vpop.f32.mrb[11].mxu0  ;;  %v12501_v33 = vpop.f32.mrb[237].mxu1 }
 0x63c   :  { %v5182_v3 = vadd.f32 %v8094_v34, %v7471_v59  ;;  %v7474_v4 = vadd.f32 %v7473_v23, %v7472_v22  ;;  %v12505_v17 = vpop.f32.mrb[238].mxu1 }
 0x63d   :  { %v12507_v30 = vpop.f32.mrb[239].mxu1 }
 0x63e   :  { %v12511_v26 = vadd.f32 %v5182_v3, %v4654_v47  ;;  %v5185_v44 = vadd.f32 %v8095_v46, %v7474_v4  ;;  %v4657_v46 = vadd.f32 %v12446_v16, %v12375_v0 }
 0x640   :  { %v12513_v42 = vadd.f32 %v5185_v44, %v4655_v19  ;;  %v7475_v38 = vpop.f32.mrb[12].mxu0 }
 0x641   :  { %v7476_v36 = vpop.f32.mrb[13].mxu0 }
 0x642   :  { %v7477_v43 = vadd.f32 %v7476_v36, %v7475_v38  ;;  %v7478_v27 = vpop.f32.mrb[14].mxu0  ;;  %v12515_v7 = vpop.f32.mrb[240].mxu1 }
 0x643   :  { %v7479_v20 = vpop.f32.mrb[15].mxu0  ;;  %v12517_v34 = vpop.f32.mrb[241].mxu1 }
 0x644   :  { %v7480_v58 = vadd.f32 %v7479_v20, %v7478_v27  ;;  %v5190_v59 = vadd.f32 %v7477_v43, %v5189_v48  ;;  %v12521_v24 = vpop.f32.mrb[242].mxu1  ;;  %v4658_v43 = vadd.f32 %v12446_v16, %v12379_v18 }
 0x645   :  { %v12523_v22 = vpop.f32.mrb[243].mxu1 }
 0x646   :  { %v12527_v23 = vadd.f32 %v5190_v59, %v4656_v6  ;;  %v5193_v47 = vadd.f32 %v7480_v58, %v5192_v31  ;;  %v4659_v6 = vadd.f32 %v12446_v16, %v12381_v9 }
 0x648   :  { %13677 = vst [vmem:[#allocation13_spill] sm:$0xff] %v12527_v23  ;;  %v12529_v3 = vadd.f32 %v5193_v47, %v4657_v46  ;;  %v7481_v4 = vpop.f32.mrb[16].mxu0 }
 0x649   :  { %v7482_v19 = vpop.f32.mrb[17].mxu0 }
 0x64a   :  { %13678 = vst [vmem:[#allocation15_spill] sm:$0xff] %v12529_v3  ;;  %v7483_v44 = vadd.f32 %v7482_v19, %v7481_v4  ;;  %v7484_v38 = vpop.f32.mrb[18].mxu0  ;;  %v12531_v36 = vpop.f32.mrb[244].mxu1 }
 0x64b   :  { %v7485_v50 = vpop.f32.mrb[19].mxu0  ;;  %v12533_v48 = vpop.f32.mrb[245].mxu1 }
 0x64c   :  { %v5198_v27 = vadd.f32 %v12468_v62, %v7483_v44  ;;  %v7486_v0 = vadd.f32 %v7485_v50, %v7484_v38  ;;  %v12538_v20 = vpop.f32.mrb[246].mxu1  ;;  %v4660_v38 = vadd.f32 %v12446_v16, %v12385_v45 }
 0x64d   :  { %v12540_v31 = vpop.f32.mrb[247].mxu1 }
 0x64e   :  { %v12544_v58 = vadd.f32 %v5198_v27, %v4658_v43  ;;  %v5201_v59 = vadd.f32 %v12472_v29, %v7486_v0  ;;  %v4661_v29 = vadd.f32 %v12446_v16, %v12387_v14 }
 0x650   :  { %v12547_v46 = vadd.f32 %v5201_v59, %v4659_v6  ;;  %v7487_v47 = vpop.f32.mrb[20].mxu0 }
 0x651   :  { %v7488_v4 = vpop.f32.mrb[21].mxu0 }
 0x652   :  { %v7489_v19 = vadd.f32 %v7488_v4, %v7487_v47  ;;  %v7490_v18 = vpop.f32.mrb[22].mxu0  ;;  %v7575_v3 = vpop.f32.mrb[248].mxu1 }
 0x653   :  { %v7491_v62 = vpop.f32.mrb[23].mxu0  ;;  %v7576_v44 = vpop.f32.mrb[249].mxu1 }
 0x654   :  { %v7492_v50 = vadd.f32 %v7491_v62, %v7490_v18  ;;  %v5206_v23 = vadd.f32 %v7489_v19, %v12485_v54  ;;  %v12552_v9 = vadd.f32 %v7576_v44, %v7575_v3  ;;  %v7578_v43 = vpop.f32.mrb[250].mxu1  ;;  %v4662_v44 = vadd.f32 %v12446_v16, %v12391_v25 }
 0x655   :  { %v7579_v27 = vpop.f32.mrb[251].mxu1 }
 0x656   :  { %v12556_v0 = vadd.f32 %v5206_v23, %v4660_v38  ;;  %v5209_v6 = vadd.f32 %v7492_v50, %v12491_v51  ;;  %v12559_v59 = vadd.f32 %v7579_v27, %v7578_v43  ;;  %v4663_v43 = vadd.f32 %v12446_v16, %v12393_v60 }
 0x658   :  { %v12561_v47 = vadd.f32 %v5209_v6, %v4661_v29  ;;  %v7493_v4 = vpop.f32.mrb[24].mxu0 }
 0x659   :  { %v7494_v45 = vpop.f32.mrb[25].mxu0 }
 0x65a   :  { %13679 = vst [vmem:[#allocation17_spill] sm:$0xff] %v12561_v47  ;;  %v7495_v18 = vadd.f32 %v7494_v45, %v7493_v4  ;;  %v7496_v62 = vpop.f32.mrb[26].mxu0  ;;  %v7581_v54 = vpop.f32.mrb[252].mxu1 }
 0x65b   :  { %v7497_v3 = vpop.f32.mrb[27].mxu0  ;;  %v7582_v19 = vpop.f32.mrb[253].mxu1 }
 0x65c   :  { %v5214_v14 = vadd.f32 %v12483_v10, %v7495_v18  ;;  %v7498_v23 = vadd.f32 %v7497_v3, %v7496_v62  ;;  %v12566_v38 = vadd.f32 %v7582_v19, %v7581_v54  ;;  %v7584_v51 = vpop.f32.mrb[254].mxu1  ;;  %v4664_v3 = vadd.f32 %v12446_v16, %v12397_v55 }
 0x65d   :  { %v7585_v50 = vpop.f32.mrb[255].mxu1 }
 0x65e   :  { %v12570_v27 = vadd.f32 %v5214_v14, %v4662_v44  ;;  %v5217_v29 = vadd.f32 %v12489_v32, %v7498_v23  ;;  %v12573_v6 = vadd.f32 %v7585_v50, %v7584_v51  ;;  %v4665_v23 = vadd.f32 %v12446_v16, %v12399_v11 }
 0x660   :  { %v12575_v4 = vadd.f32 %v5217_v29, %v4663_v43  ;;  %v7499_v45 = vpop.f32.mrb[28].mxu0 }
 0x661   :  { %v7500_v25 = vpop.f32.mrb[29].mxu0 }
 0x662   :  { %v7501_v47 = vadd.f32 %v7500_v25, %v7499_v45  ;;  %v7502_v10 = vpop.f32.mrb[30].mxu0  ;;  %v7587_v18 = vpop.f32.mrb[0].mxu1 }
 0x663   :  { %v7503_v62 = vpop.f32.mrb[31].mxu0  ;;  %v7588_v54 = vpop.f32.mrb[1].mxu1 }
 0x664   :  { %v7504_v19 = vadd.f32 %v7503_v62, %v7502_v10  ;;  %v5222_v60 = vadd.f32 %v7501_v47, %v12501_v33  ;;  %v12580_v44 = vadd.f32 %v7588_v54, %v7587_v18  ;;  %v7590_v32 = vpop.f32.mrb[2].mxu1  ;;  %v4666_v62 = vadd.f32 %v12446_v16, %v12404_v28 }
 0x665   :  { %v7591_v14 = vpop.f32.mrb[3].mxu1 }
 0x666   :  { %v12584_v51 = vadd.f32 %v5222_v60, %v4664_v3  ;;  %v5225_v50 = vadd.f32 %v7504_v19, %v12507_v30  ;;  %v12587_v43 = vadd.f32 %v7591_v14, %v7590_v32  ;;  %v4667_v60 = vadd.f32 %v12446_v16, %v12406_v12 }
 0x668   :  { %v12589_v29 = vadd.f32 %v5225_v50, %v4665_v23  ;;  %v7505_v45 = vpop.f32.mrb[32].mxu0 }
 0x669   :  { %v7506_v55 = vpop.f32.mrb[33].mxu0 }
 0x66a   :  { %v7507_v25 = vadd.f32 %v7506_v55, %v7505_v45  ;;  %v7508_v10 = vpop.f32.mrb[34].mxu0  ;;  %v7593_v33 = vpop.f32.mrb[4].mxu1 }
 0x66b   :  { %v7509_v47 = vpop.f32.mrb[35].mxu0  ;;  %v7594_v18 = vpop.f32.mrb[5].mxu1 }
 0x66c   :  { %v5230_v11 = vadd.f32 %v12499_v21, %v7507_v25  ;;  %v7510_v54 = vadd.f32 %v7509_v47, %v7508_v10  ;;  %v12594_v3 = vadd.f32 %v7594_v18, %v7593_v33  ;;  %v7596_v30 = vpop.f32.mrb[6].mxu1  ;;  %v4668_v47 = vadd.f32 %v12446_v16, %v12413_v63 }
 0x66d   :  { %v7597_v19 = vpop.f32.mrb[7].mxu1 }
 0x66e   :  { %v12598_v32 = vadd.f32 %v5230_v11, %v4666_v62  ;;  %v5233_v14 = vadd.f32 %v12505_v17, %v7510_v54  ;;  %v12601_v23 = vadd.f32 %v7597_v19, %v7596_v30  ;;  %v4669_v54 = vadd.f32 %v12446_v16, %v12415_v2 }
 0x670   :  { %v12603_v50 = vadd.f32 %v5233_v14, %v4667_v60  ;;  %v7511_v45 = vpop.f32.mrb[36].mxu0 }
 0x671   :  { %v7512_v28 = vpop.f32.mrb[37].mxu0 }
 0x672   :  { %v7513_v55 = vadd.f32 %v7512_v28, %v7511_v45  ;;  %v7514_v21 = vpop.f32.mrb[38].mxu0  ;;  %v7599_v25 = vpop.f32.mrb[8].mxu1 }
 0x673   :  { %v7515_v10 = vpop.f32.mrb[39].mxu0  ;;  %v7600_v33 = vpop.f32.mrb[9].mxu1 }
 0x674   :  { %v7516_v18 = vadd.f32 %v7515_v10, %v7514_v21  ;;  %v5238_v12 = vadd.f32 %v7513_v55, %v12517_v34  ;;  %v12608_v62 = vadd.f32 %v7600_v33, %v7599_v25  ;;  %v7602_v17 = vpop.f32.mrb[10].mxu1  ;;  %v4670_v10 = vadd.f32 %v12446_v16, %v12419_v35 }
 0x675   :  { %v7603_v11 = vpop.f32.mrb[11].mxu1 }
 0x676   :  { %v12612_v30 = vadd.f32 %v5238_v12, %v4668_v47  ;;  %v5241_v19 = vadd.f32 %v7516_v18, %v12523_v22  ;;  %v12615_v60 = vadd.f32 %v7603_v11, %v7602_v17  ;;  %v4671_v12 = vadd.f32 %v12446_v16, %v12421_v5 }
 0x678   :  { %v12617_v14 = vadd.f32 %v5241_v19, %v4669_v54  ;;  %v7517_v45 = vpop.f32.mrb[40].mxu0 }
 0x679   :  { %v7518_v63 = vpop.f32.mrb[41].mxu0 }
 0x67a   :  { %v7519_v28 = vadd.f32 %v7518_v63, %v7517_v45  ;;  %v7520_v21 = vpop.f32.mrb[42].mxu0  ;;  %v7605_v34 = vpop.f32.mrb[12].mxu1 }
 0x67b   :  { %v7521_v55 = vpop.f32.mrb[43].mxu0  ;;  %v7606_v25 = vpop.f32.mrb[13].mxu1 }
 0x67c   :  { %v5246_v2 = vadd.f32 %v12515_v7, %v7519_v28  ;;  %v7522_v33 = vadd.f32 %v7521_v55, %v7520_v21  ;;  %v12622_v47 = vadd.f32 %v7606_v25, %v7605_v34  ;;  %v7608_v22 = vpop.f32.mrb[14].mxu1  ;;  %v4672_v55 = vadd.f32 %v12446_v16, %v12425_v15 }
 0x67d   :  { %v7609_v18 = vpop.f32.mrb[15].mxu1 }
 0x67e   :  { %v12626_v17 = vadd.f32 %v5246_v2, %v4670_v10  ;;  %v5249_v11 = vadd.f32 %v12521_v24, %v7522_v33  ;;  %v12629_v54 = vadd.f32 %v7609_v18, %v7608_v22  ;;  %v4673_v33 = vadd.f32 %v12446_v16, %v12427_v61 }
 0x680   :  { %v12631_v19 = vadd.f32 %v5249_v11, %v4671_v12  ;;  %v7523_v45 = vpop.f32.mrb[44].mxu0 }
 0x681   :  { %v7524_v35 = vpop.f32.mrb[45].mxu0 }
 0x682   :  { %v7525_v63 = vadd.f32 %v7524_v35, %v7523_v45  ;;  %v7526_v7 = vpop.f32.mrb[46].mxu0  ;;  %v7611_v28 = vpop.f32.mrb[16].mxu1 }
 0x683   :  { %v7527_v21 = vpop.f32.mrb[47].mxu0  ;;  %v7612_v34 = vpop.f32.mrb[17].mxu1 }
 0x684   :  { %v7528_v25 = vadd.f32 %v7527_v21, %v7526_v7  ;;  %v5254_v5 = vadd.f32 %v7525_v63, %v12533_v48  ;;  %v12636_v10 = vadd.f32 %v7612_v34, %v7611_v28  ;;  %v7614_v24 = vpop.f32.mrb[18].mxu1  ;;  %v4674_v21 = vadd.f32 %v12446_v16, %v12431_v57 }
 0x685   :  { %v7615_v2 = vpop.f32.mrb[19].mxu1  ;;  %v5300_v57 = vadd.f32 %v12446_v16, %v12437_v52 }
 0x686   :  { %v12640_v22 = vadd.f32 %v5254_v5, %v4672_v55  ;;  %v5257_v18 = vadd.f32 %v7528_v25, %v12540_v31  ;;  %v12643_v12 = vadd.f32 %v7615_v2, %v7614_v24  ;;  %v4675_v5 = vadd.f32 %v12446_v16, %v12433_v49 }
 0x687   :  { %v5301_v49 = vadd.f32 %v12446_v16, %v12439_v56 }
 0x688   :  { %v12645_v11 = vadd.f32 %v5257_v18, %v4673_v33  ;;  %v7529_v45 = vpop.f32.mrb[48].mxu0 }
 0x689   :  { %v7530_v15 = vpop.f32.mrb[49].mxu0 }
 0x68a   :  { %v7531_v35 = vadd.f32 %v7530_v15, %v7529_v45  ;;  %v7532_v7 = vpop.f32.mrb[50].mxu0  ;;  %v7617_v48 = vpop.f32.mrb[20].mxu1 }
 0x68b   :  { %v7533_v63 = vpop.f32.mrb[51].mxu0  ;;  %v7618_v28 = vpop.f32.mrb[21].mxu1 }
 0x68c   :  { %v5262_v61 = vadd.f32 %v12531_v36, %v7531_v35  ;;  %v7534_v34 = vadd.f32 %v7533_v63, %v7532_v7  ;;  %v12650_v55 = vadd.f32 %v7618_v28, %v7617_v48  ;;  %v7620_v31 = vpop.f32.mrb[22].mxu1 }
 0x68d   :  { %v7621_v25 = vpop.f32.mrb[23].mxu1 }
 0x68e   :  { %v5330_v24 = vadd.f32 %v5262_v61, %v4674_v21  ;;  %v5265_v2 = vadd.f32 %v12538_v20, %v7534_v34  ;;  %v12655_v33 = vadd.f32 %v7621_v25, %v7620_v31 }
 0x690   :  { %5362 = vst [vmem:[#allocation3 + $0xf0] sm:$0xff] %v5330_v24  ;;  %v5331_v18 = vadd.f32 %v5265_v2, %v4675_v5  ;;  %v5788_v45 = vpop.f32.mrb[52].mxu0 }
 0x691   :  { %v5789_v36 = vadd.f32 %v12552_v9, %v5788_v45  ;;  %v8134_v15 = vpop.f32.mrb[53].mxu0 }
 0x692   :  { %5363 = vst [vmem:[#allocation3 + $0xf8] sm:$0xff] %v5331_v18  ;;  %v5791_v35 = vpop.f32.mrb[54].mxu0  ;;  %v7623_v7 = vpop.f32.mrb[24].mxu1 }
 0x693   :  { %v5937_v48 = vadd.f32 %v5789_v36, %v5300_v57  ;;  %v5792_v20 = vadd.f32 %v12559_v59, %v5791_v35  ;;  %v8135_v63 = vpop.f32.mrb[55].mxu0  ;;  %v7624_v28 = vpop.f32.mrb[25].mxu1 }
 0x694   :  { %v12663_v21 = vadd.f32 %v7624_v28, %v7623_v7  ;;  %v7626_v61 = vpop.f32.mrb[26].mxu1 }
 0x695   :  { %5967 = vst [vmem:[#allocation3] sm:$0xff] %v5937_v48  ;;  %v5938_v34 = vadd.f32 %v5792_v20, %v5301_v49  ;;  %v7627_v52 = vpop.f32.mrb[27].mxu1 }
 0x696   :  { %v12665_v31 = vadd.f32 %v7627_v52, %v7626_v61 }
 0x697   :  { %5968 = vst [vmem:[#allocation3 + $0x8] sm:$0xff] %v5938_v34 }
 0x698   :  { %v5796_v9 = vpop.f32.mrb[56].mxu0 }
 0x699   :  { %v5797_v25 = vadd.f32 %v12566_v38, %v5796_v9  ;;  %v8138_v5 = vpop.f32.mrb[57].mxu0 }
 0x69a   :  { %v5799_v24 = vpop.f32.mrb[58].mxu0  ;;  %v7629_v56 = vpop.f32.mrb[28].mxu1 }
 0x69b   :  { %v5939_v16 = vadd.f32 %v5797_v25, %v12452_v13  ;;  %v5800_v59 = vadd.f32 %v12573_v6, %v5799_v24  ;;  %v8139_v2 = vpop.f32.mrb[59].mxu0  ;;  %v7630_v18 = vpop.f32.mrb[29].mxu1 }
 0x69c   :  { %v12670_v45 = vadd.f32 %v7630_v18, %v7629_v56  ;;  %v7632_v57 = vpop.f32.mrb[30].mxu1 }
 0x69d   :  { %5969 = vst [vmem:[#allocation3 + $0x10] sm:$0xff] %v5939_v16  ;;  %v5940_v36 = vadd.f32 %v5800_v59, %v12456_v37  ;;  %v7633_v15 = vpop.f32.mrb[31].mxu1 }
 0x69e   :  { %v12673_v35 = vadd.f32 %v7633_v15, %v7632_v57 }
 0x69f   :  { %5970 = vst [vmem:[#allocation3 + $0x18] sm:$0xff] %v5940_v36 }
 0x6a0   :  { %v5804_v38 = vpop.f32.mrb[60].mxu0 }
 0x6a1   :  { %v5805_v7 = vadd.f32 %v12580_v44, %v5804_v38  ;;  %v8142_v49 = vpop.f32.mrb[61].mxu0 }
 0x6a2   :  { %v5807_v48 = vpop.f32.mrb[62].mxu0  ;;  %v7635_v13 = vpop.f32.mrb[32].mxu1 }
 0x6a3   :  { %v5941_v6 = vadd.f32 %v5805_v7, %v12462_v8  ;;  %v5808_v20 = vadd.f32 %v12587_v43, %v5807_v48  ;;  %v8143_v63 = vpop.f32.mrb[63].mxu0  ;;  %v7636_v28 = vpop.f32.mrb[33].mxu1 }
 0x6a4   :  { %v12678_v61 = vadd.f32 %v7636_v28, %v7635_v13  ;;  %v7638_v34 = vpop.f32.mrb[34].mxu1 }
 0x6a5   :  { %5971 = vst [vmem:[#allocation3 + $0x20] sm:$0xff] %v5941_v6  ;;  %v5942_v37 = vadd.f32 %v5808_v20, %v12466_v41  ;;  %v7639_v52 = vpop.f32.mrb[35].mxu1 }
 0x6a6   :  { %v12681_v9 = vadd.f32 %v7639_v52, %v7638_v34 }
 0x6a7   :  { %5972 = vst [vmem:[#allocation3 + $0x28] sm:$0xff] %v5942_v37 }
 0x6a8   :  { %v5812_v44 = vpop.f32.mrb[64].mxu0 }
 0x6a9   :  { %v5813_v25 = vadd.f32 %v12594_v3, %v5812_v44  ;;  %v8146_v5 = vpop.f32.mrb[65].mxu0 }
 0x6aa   :  { %v5815_v24 = vpop.f32.mrb[66].mxu0  ;;  %v7641_v8 = vpop.f32.mrb[36].mxu1 }
 0x6ab   :  { %v5943_v43 = vadd.f32 %v5813_v25, %v12479_v53  ;;  %v5816_v56 = vadd.f32 %v12601_v23, %v5815_v24  ;;  %v8147_v16 = vpop.f32.mrb[67].mxu0  ;;  %v7642_v59 = vpop.f32.mrb[37].mxu1 }
 0x6ac   :  { %v12686_v2 = vadd.f32 %v7642_v59, %v7641_v8  ;;  %v7644_v18 = vpop.f32.mrb[38].mxu1 }
 0x6ad   :  { %5973 = vst [vmem:[#allocation3 + $0x30] sm:$0xff] %v5943_v43  ;;  %v5944_v41 = vadd.f32 %v5816_v56, %v12481_v1  ;;  %v7645_v57 = vpop.f32.mrb[39].mxu1 }
 0x6ae   :  { %v12689_v36 = vadd.f32 %v7645_v57, %v7644_v18 }
 0x6af   :  { %5974 = vst [vmem:[#allocation3 + $0x38] sm:$0xff] %v5944_v41  ;;  %v13680_v41 = vld [vmem:[#allocation13_spill] sm:$0xff] }
 0x6b0   :  { %v5820_v3 = vpop.f32.mrb[68].mxu0 }
 0x6b1   :  { %v5821_v15 = vadd.f32 %v12608_v62, %v5820_v3  ;;  %v8150_v38 = vpop.f32.mrb[69].mxu0 }
 0x6b2   :  { %v5823_v7 = vpop.f32.mrb[70].mxu0  ;;  %v7647_v53 = vpop.f32.mrb[40].mxu1 }
 0x6b3   :  { %v5945_v23 = vadd.f32 %v5821_v15, %v12495_v40  ;;  %v5824_v49 = vadd.f32 %v12615_v60, %v5823_v7  ;;  %v8151_v48 = vpop.f32.mrb[71].mxu0  ;;  %v7648_v13 = vpop.f32.mrb[41].mxu1 }
 0x6b4   :  { %v12694_v6 = vadd.f32 %v7648_v13, %v7647_v53  ;;  %v7650_v20 = vpop.f32.mrb[42].mxu1 }
 0x6b5   :  { %5975 = vst [vmem:[#allocation3 + $0x40] sm:$0xff] %v5945_v23  ;;  %v5946_v1 = vadd.f32 %v5824_v49, %v12497_v39  ;;  %v7651_v63 = vpop.f32.mrb[43].mxu1 }
 0x6b6   :  { %v12697_v28 = vadd.f32 %v7651_v63, %v7650_v20 }
 0x6b7   :  { %5976 = vst [vmem:[#allocation3 + $0x48] sm:$0xff] %v5946_v1 }
 0x6b8   :  { %v5828_v62 = vpop.f32.mrb[72].mxu0 }
 0x6b9   :  { %v5829_v34 = vadd.f32 %v12622_v47, %v5828_v62  ;;  %v8154_v37 = vpop.f32.mrb[73].mxu0 }
 0x6ba   :  { %v5831_v52 = vpop.f32.mrb[74].mxu0  ;;  %v7653_v40 = vpop.f32.mrb[44].mxu1 }
 0x6bb   :  { %v5947_v60 = vadd.f32 %v5829_v34, %v12511_v26  ;;  %v5832_v44 = vadd.f32 %v12629_v54, %v5831_v52  ;;  %v8155_v25 = vpop.f32.mrb[75].mxu0  ;;  %v7654_v5 = vpop.f32.mrb[45].mxu1 }
 0x6bc   :  { %v12702_v24 = vadd.f32 %v7654_v5, %v7653_v40  ;;  %v7656_v8 = vpop.f32.mrb[46].mxu1  ;;  %v13682_v25 = vld [vmem:[#allocation17_spill] sm:$0xff] }
 0x6bd   :  { %5977 = vst [vmem:[#allocation3 + $0x50] sm:$0xff] %v5947_v60  ;;  %v5948_v39 = vadd.f32 %v5832_v44, %v12513_v42  ;;  %v7657_v43 = vpop.f32.mrb[47].mxu1  ;;  %v13681_v42 = vld [vmem:[#allocation15_spill] sm:$0xff] }
 0x6be   :  { %v12705_v56 = vadd.f32 %v7657_v43, %v7656_v8 }
 0x6bf   :  { %5978 = vst [vmem:[#allocation3 + $0x58] sm:$0xff] %v5948_v39 }
 0x6c0   :  { %v5836_v47 = vpop.f32.mrb[76].mxu0 }
 0x6c1   :  { %v5837_v16 = vadd.f32 %v12636_v10, %v5836_v47  ;;  %v8158_v59 = vpop.f32.mrb[77].mxu0 }
 0x6c2   :  { %v5839_v18 = vpop.f32.mrb[78].mxu0  ;;  %v7659_v26 = vpop.f32.mrb[48].mxu1 }
 0x6c3   :  { %v5949_v54 = vadd.f32 %v5837_v16, %v13680_v41  ;;  %v5840_v57 = vadd.f32 %v12643_v12, %v5839_v18  ;;  %v8159_v3 = vpop.f32.mrb[79].mxu0  ;;  %v7660_v15 = vpop.f32.mrb[49].mxu1 }
 0x6c4   :  { %v12710_v38 = vadd.f32 %v7660_v15, %v7659_v26  ;;  %v7662_v7 = vpop.f32.mrb[50].mxu1 }
 0x6c5   :  { %5979 = vst [vmem:[#allocation3 + $0x60] sm:$0xff] %v5949_v54  ;;  %v5950_v53 = vadd.f32 %v5840_v57, %v13681_v42  ;;  %v7663_v23 = vpop.f32.mrb[51].mxu1 }
 0x6c6   :  { %v12713_v49 = vadd.f32 %v7663_v23, %v7662_v7 }
 0x6c7   :  { %5980 = vst [vmem:[#allocation3 + $0x68] sm:$0xff] %v5950_v53 }
 0x6c8   :  { %v5844_v10 = vpop.f32.mrb[80].mxu0 }
 0x6c9   :  { %v5845_v48 = vadd.f32 %v12650_v55, %v5844_v10  ;;  %v8162_v13 = vpop.f32.mrb[81].mxu0 }
 0x6ca   :  { %v5847_v20 = vpop.f32.mrb[82].mxu0 }
 0x6cb   :  { %v5951_v1 = vadd.f32 %v5845_v48, %v12544_v58  ;;  %v5848_v12 = vadd.f32 %v12655_v33, %v5847_v20  ;;  %v8163_v63 = vpop.f32.mrb[83].mxu0 }
 0x6cd   :  { %5981 = vst [vmem:[#allocation3 + $0x70] sm:$0xff] %v5951_v1  ;;  %v5952_v62 = vadd.f32 %v5848_v12, %v12547_v46 }
 0x6cf   :  { %5982 = vst [vmem:[#allocation3 + $0x78] sm:$0xff] %v5952_v62 }
 0x6d0   :  { %v5852_v34 = vpop.f32.mrb[84].mxu0 }
 0x6d1   :  { %v5853_v37 = vadd.f32 %v12663_v21, %v5852_v34  ;;  %v8166_v52 = vpop.f32.mrb[85].mxu0 }
 0x6d2   :  { %v5855_v40 = vpop.f32.mrb[86].mxu0 }
 0x6d3   :  { %v5953_v60 = vadd.f32 %v5853_v37, %v12556_v0  ;;  %v5856_v55 = vadd.f32 %v12665_v31, %v5855_v40  ;;  %v8167_v44 = vpop.f32.mrb[87].mxu0 }
 0x6d5   :  { %5983 = vst [vmem:[#allocation3 + $0x80] sm:$0xff] %v5953_v60  ;;  %v5954_v58 = vadd.f32 %v5856_v55, %v13682_v25 }
 0x6d7   :  { %5984 = vst [vmem:[#allocation3 + $0x88] sm:$0xff] %v5954_v58 }
 0x6d8   :  { %v5860_v33 = vpop.f32.mrb[88].mxu0 }
 0x6d9   :  { %v5861_v5 = vadd.f32 %v12670_v45, %v5860_v33  ;;  %v8170_v8 = vpop.f32.mrb[89].mxu0 }
 0x6da   :  { %v5863_v46 = vpop.f32.mrb[90].mxu0 }
 0x6db   :  { %v5955_v39 = vadd.f32 %v5861_v5, %v12570_v27  ;;  %v5864_v21 = vadd.f32 %v12673_v35, %v5863_v46  ;;  %v8171_v43 = vpop.f32.mrb[91].mxu0 }
 0x6dd   :  { %5985 = vst [vmem:[#allocation3 + $0x90] sm:$0xff] %v5955_v39  ;;  %v5956_v0 = vadd.f32 %v5864_v21, %v12575_v4 }
 0x6df   :  { %5986 = vst [vmem:[#allocation3 + $0x98] sm:$0xff] %v5956_v0 }
 0x6e0   :  { %v5868_v31 = vpop.f32.mrb[92].mxu0 }
 0x6e1   :  { %v5869_v47 = vadd.f32 %v12678_v61, %v5868_v31  ;;  %v8174_v16 = vpop.f32.mrb[93].mxu0 }
 0x6e2   :  { %v5871_v59 = vpop.f32.mrb[94].mxu0 }
 0x6e3   :  { %v5957_v18 = vadd.f32 %v5869_v47, %v12584_v51  ;;  %v5872_v45 = vadd.f32 %v12681_v9, %v5871_v59  ;;  %v8175_v26 = vpop.f32.mrb[95].mxu0 }
 0x6e5   :  { %5987 = vst [vmem:[#allocation3 + $0xa0] sm:$0xff] %v5957_v18  ;;  %v5958_v27 = vadd.f32 %v5872_v45, %v12589_v29 }
 0x6e7   :  { %5988 = vst [vmem:[#allocation3 + $0xa8] sm:$0xff] %v5958_v27 }
 0x6e8   :  { %v5876_v35 = vpop.f32.mrb[96].mxu0 }
 0x6e9   :  { %v5877_v41 = vadd.f32 %v12686_v2, %v5876_v35  ;;  %v8178_v54 = vpop.f32.mrb[97].mxu0 }
 0x6ea   :  { %v5879_v4 = vpop.f32.mrb[98].mxu0 }
 0x6eb   :  { %v5959_v57 = vadd.f32 %v5877_v41, %v12598_v32  ;;  %v5880_v61 = vadd.f32 %v12689_v36, %v5879_v4  ;;  %v8179_v3 = vpop.f32.mrb[99].mxu0 }
 0x6ed   :  { %5989 = vst [vmem:[#allocation3 + $0xb0] sm:$0xff] %v5959_v57  ;;  %v5960_v51 = vadd.f32 %v5880_v61, %v12603_v50 }
 0x6ef   :  { %5990 = vst [vmem:[#allocation3 + $0xb8] sm:$0xff] %v5960_v51 }
 0x6f0   :  { %v5884_v9 = vpop.f32.mrb[100].mxu0 }
 0x6f1   :  { %v5885_v15 = vadd.f32 %v12694_v6, %v5884_v9  ;;  %v8182_v7 = vpop.f32.mrb[101].mxu0 }
 0x6f2   :  { %v5887_v29 = vpop.f32.mrb[102].mxu0 }
 0x6f3   :  { %v5961_v42 = vadd.f32 %v5885_v15, %v12612_v30  ;;  %v5888_v2 = vadd.f32 %v12697_v28, %v5887_v29  ;;  %v8183_v53 = vpop.f32.mrb[103].mxu0 }
 0x6f5   :  { %5991 = vst [vmem:[#allocation3 + $0xc0] sm:$0xff] %v5961_v42  ;;  %v5962_v32 = vadd.f32 %v5888_v2, %v12617_v14 }
 0x6f7   :  { %5992 = vst [vmem:[#allocation3 + $0xc8] sm:$0xff] %v5962_v32 }
 0x6f8   :  { %v5892_v36 = vpop.f32.mrb[104].mxu0 }
 0x6f9   :  { %v5893_v23 = vadd.f32 %v12702_v24, %v5892_v36  ;;  %v8186_v10 = vpop.f32.mrb[105].mxu0 }
 0x6fa   :  { %v5895_v50 = vpop.f32.mrb[106].mxu0 }
 0x6fb   :  { %v5963_v48 = vadd.f32 %v5893_v23, %v12626_v17  ;;  %v5896_v6 = vadd.f32 %v12705_v56, %v5895_v50  ;;  %v8187_v13 = vpop.f32.mrb[107].mxu0  ;;  %v9079_v56 = vmov 0.0  }
 0x6fd   :  { %5993 = vst [vmem:[#allocation3 + $0xd0] sm:$0xff] %v5963_v48  ;;  %v5964_v30 = vadd.f32 %v5896_v6, %v12631_v19 }
 0x6ff   :  { %5994 = vst [vmem:[#allocation3 + $0xd8] sm:$0xff] %v5964_v30 }
 0x700   :  { %v5900_v28 = vpop.f32.mrb[108].mxu0 }
 0x701   :  { %v5901_v20 = vadd.f32 %v12710_v38, %v5900_v28  ;;  %v8190_v1 = vpop.f32.mrb[109].mxu0 }
 0x702   :  { %v5903_v14 = vpop.f32.mrb[110].mxu0 }
 0x703   :  { %v5965_v12 = vadd.f32 %v5901_v20, %v12640_v22  ;;  %v5904_v24 = vadd.f32 %v12713_v49, %v5903_v14  ;;  %v8191_v63 = vpop.f32.mrb[111].mxu0 }
 0x705   :  { %5995 = vst [vmem:[#allocation3 + $0xe0] sm:$0xff] %v5965_v12  ;;  %v5966_v17 = vadd.f32 %v5904_v24, %v12645_v11 }
 0x707   :  { %5996 = vst [vmem:[#allocation3 + $0xe8] sm:$0xff] %v5966_v17 }
 0x708 LB: > { %s6845_s22 = sshll.u32 %s9085_s2, 7  ;;  %s6002_s2 = sadd.s32 1, %s9085_s2   ;;  %s9085_s2 = sphi %s12747_s2, %s6002_s2   ;;  %v9081_v56 = vphi %v9079_v56, %v9080_v56  }
 0x709   : > { %s6005_s23 = scalar_lea.vmem [#allocation3], %s6845_s22  ;;  %p5999_p3 = scmp.ge.s32.totalorder %s6002_s2, 2  }
 0x70a   :  { %v13683_v51 = vmov (%p5999_p3), 0.0|0.0   ;;  %v6044_v9 = vld [vmem:[%s12986_s5] sm:$0xff] (%p5999_p3)  ;;  %v6045_v15 = vld [vmem:[%s12986_s5 + $0x8] sm:$0xff] (%p5999_p3)  ;;  %v6046_v7 = vld [vmem:[%s12986_s5 + $0x10] sm:$0xff] (%p5999_p3)  ;;  %v13684_v29 = vmov (%p5999_p3), 0.0   ;;  %vm13685_vm8 = vmmov (%p5999_p3), 0  }
 0x70b   :  { %8310 = vmatprep.subr.bf16.mxu1 (%p5999_p3), %v13683_v51  ;;  %8224 = vmatprep.mubr.msk.f32.mxu1 (%p5999_p3), %vm13685_vm8, %v13684_v29  ;;  %v12768_v42 = vpack.c.bf16 (%p5999_p3), %v6045_v15, %v6044_v9  ;;  %v6047_v2 = vld [vmem:[%s12986_s5 + $0x18] sm:$0xff] (%p5999_p3)  ;;  %v6048_v32 = vld [vmem:[%s12986_s5 + $0x20] sm:$0xff] (%p5999_p3)  ;;  %v6049_v36 = vld [vmem:[%s12986_s5 + $0x28] sm:$0xff] (%p5999_p3)  ;;  %s12842_s28 = smov (%p5999_p3), 0  }
 0x70c   :  { %v12774_v53 = vpack.c.bf16 (%p5999_p3), %v6047_v2, %v6046_v7  ;;  %v12784_v23 = vpack.c.bf16 (%p5999_p3), %v6049_v36, %v6048_v32  ;;  %v6050_v10 = vld [vmem:[%s12986_s5 + $0x30] sm:$0xff] (%p5999_p3)  ;;  %v6051_v50 = vld [vmem:[%s12986_s5 + $0x38] sm:$0xff] (%p5999_p3)  ;;  %v6052_v6 = vld [vmem:[%s12986_s5 + $0x40] sm:$0xff] (%p5999_p3) }
 0x70d   :  { %8312 = vmatpush3.bf16.msra.mxu1 (%p5999_p3), %v12768_v42  ;;  %v12794_v48 = vpack.c.bf16 (%p5999_p3), %v6051_v50, %v6050_v10  ;;  %v6053_v13 = vld [vmem:[%s12986_s5 + $0x48] sm:$0xff] (%p5999_p3)  ;;  %v6054_v28 = vld [vmem:[%s12986_s5 + $0x50] sm:$0xff] (%p5999_p3)  ;;  %v6055_v20 = vld [vmem:[%s12986_s5 + $0x58] sm:$0xff] (%p5999_p3) }
 0x70e   : > { %v6006_v19 = vld [vmem:[%s6005_s23] sm:$0xff]  ;;  %v6007_v22 = vld [vmem:[%s6005_s23 + $0x8] sm:$0xff]  ;;  %v6008_v38 = vld [vmem:[%s6005_s23 + $0x10] sm:$0xff]  ;;  %8313 = vmatprep.subr.bf16.mxu1 (%p5999_p3), %v13683_v51  ;;  %v12804_v30 = vpack.c.bf16 (%p5999_p3), %v6053_v13, %v6052_v6  ;;  %v12814_v1 = vpack.c.bf16 (%p5999_p3), %v6055_v20, %v6054_v28 }
 0x70f   : > { %v6022_v49 = vadd.f32 %v6007_v22, %v6006_v19  ;;  %v6009_v62 = vld [vmem:[%s6005_s23 + $0x18] sm:$0xff]  ;;  %v6010_v11 = vld [vmem:[%s6005_s23 + $0x20] sm:$0xff]  ;;  %v6011_v52 = vld [vmem:[%s6005_s23 + $0x28] sm:$0xff] }
 0x710   : > { %v6012_v60 = vld [vmem:[%s6005_s23 + $0x30] sm:$0xff]  ;;  %v6013_v44 = vld [vmem:[%s6005_s23 + $0x38] sm:$0xff]  ;;  %v6014_v58 = vld [vmem:[%s6005_s23 + $0x40] sm:$0xff] }
 0x711   : > { %v6023_v34 = vadd.f32 %v6022_v49, %v6008_v38  ;;  %v6015_v5 = vld [vmem:[%s6005_s23 + $0x48] sm:$0xff]  ;;  %v6016_v46 = vld [vmem:[%s6005_s23 + $0x50] sm:$0xff]  ;;  %v6017_v21 = vld [vmem:[%s6005_s23 + $0x58] sm:$0xff]  ;;  %8315 = vmatpush3.bf16.msra.mxu1 (%p5999_p3), %v12774_v53  ;;  %v12840_v38 = vmov (%p5999_p3), 0.0  }
 0x712   : > { %v6018_v0 = vld [vmem:[%s6005_s23 + $0x60] sm:$0xff]  ;;  %v6019_v47 = vld [vmem:[%s6005_s23 + $0x68] sm:$0xff]  ;;  %v6020_v59 = vld [vmem:[%s6005_s23 + $0x70] sm:$0xff]  ;;  %8316 = vmatprep.subr.bf16.mxu1 (%p5999_p3), %v13683_v51 }
 0x713   : > { %v6024_v37 = vadd.f32 %v6023_v34, %v6009_v62  ;;  %v6021_v45 = vld [vmem:[%s6005_s23 + $0x78] sm:$0xff]  ;;  %v6056_v14 = vld [vmem:[%s12986_s5 + $0x60] sm:$0xff] (%p5999_p3)  ;;  %v6057_v12 = vld [vmem:[%s12986_s5 + $0x68] sm:$0xff] (%p5999_p3) }
 0x714   :  { %v12824_v24 = vpack.c.bf16 (%p5999_p3), %v6057_v12, %v6056_v14  ;;  %v6058_v63 = vld [vmem:[%s12986_s5 + $0x70] sm:$0xff] (%p5999_p3)  ;;  %v6059_v17 = vld [vmem:[%s12986_s5 + $0x78] sm:$0xff] (%p5999_p3) }
 0x715   : > { %v6025_v40 = vadd.f32 %v6024_v37, %v6010_v11  ;;  %8318 = vmatpush3.bf16.msra.mxu1 (%p5999_p3), %v12784_v23 }
 0x716   :  { %8319 = vmatprep.subr.bf16.mxu1 (%p5999_p3), %v13683_v51 }
 0x717   : > { %v6026_v55 = vadd.f32 %v6025_v40, %v6011_v52 }
 0x719   : > { %v6027_v25 = vadd.f32 %v6026_v55, %v6012_v60  ;;  %8321 = vmatpush3.bf16.msra.mxu1 (%p5999_p3), %v12794_v48 }
 0x71a   :  { %8322 = vmatprep.subr.bf16.mxu1 (%p5999_p3), %v13683_v51 }
 0x71b   : > { %v6028_v33 = vadd.f32 %v6027_v25, %v6013_v44 }
 0x71d   : > { %v6029_v8 = vadd.f32 %v6028_v33, %v6014_v58  ;;  %8324 = vmatpush3.bf16.msra.mxu1 (%p5999_p3), %v12804_v30 }
 0x71e   :  { %8325 = vmatprep.subr.bf16.mxu1 (%p5999_p3), %v13683_v51 }
 0x71f   : > { %v6030_v39 = vadd.f32 %v6029_v8, %v6015_v5 }
 0x721   : > { %v6031_v43 = vadd.f32 %v6030_v39, %v6016_v46  ;;  %8327 = vmatpush3.bf16.msra.mxu1 (%p5999_p3), %v12814_v1 }
 0x722   :  { %8328 = vmatprep.subr.bf16.mxu1 (%p5999_p3), %v13683_v51 }
 0x723   : > { %v6032_v31 = vadd.f32 %v6031_v43, %v6017_v21 }
 0x725   : > { %v6033_v16 = vadd.f32 %v6032_v31, %v6018_v0  ;;  %8330 = vmatpush3.bf16.msra.mxu1 (%p5999_p3), %v12824_v24 }
 0x726   :  { %8331 = vmatprep.subr.bf16.mxu1 (%p5999_p3), %v13683_v51 }
 0x727   : > { %v6034_v18 = vadd.f32 %v6033_v16, %v6019_v47 }
 0x729   : > { %v6035_v26 = vadd.f32 %v6034_v18, %v6020_v59 }
 0x72b   : > { %v6036_v27 = vadd.f32 %v6035_v26, %v6021_v45 }
 0x72d   : > { %v6037_v35 = vrot.slane %v6036_v27, 4 }
 0x72f   : > { %v6038_v41 = vadd.f32 %v6037_v35, %v6036_v27 }
 0x731   : > { %v6039_v54 = vrot.slane %v6038_v41, 2 }
 0x733   : > { %v6040_v4 = vadd.f32 %v6039_v54, %v6038_v41 }
 0x735   : > { %v6041_v57 = vrot.slane %v6040_v4, 1  ;;  %6001 = sbr.rel (!%p5999_p3) target bundleno = 1800 (0x708), region = 130 }
 0x737   : > { %v6042_v61 = vadd.f32 %v6041_v57, %v6040_v4 }
 0x739   : > { %v6043_v3 = vadd.f32 %v9081_v56, %v6042_v61  }
 0x73b   : > { %v9080_v56 = vmov %v6043_v3  }
 0x73c   :  { %v12834_v56 = vpack.c.bf16 %v6059_v17, %v6058_v63 }
 0x73e   :  { %8333 = vmatpush3.bf16.msra.mxu1 %v12834_v56 }
 0x741   :  { %8225 = vmatmul.mubr.f32.vlgmr.msra.gmra.mrb[52].mxu1 %v6043_v3 }
 0x814   :  { %v12838_v19 = vpop.f32.mrb[52].mxu1 }
 0x815   :  { %v8226_v22 = vpop.f32.mrb[53].mxu1 }
 0x816 LB: > { %v13686_v49 = vld [vmem:[#allocation45_spill] sm:$0xff]  ;;  %s6846_s5 = sshll.u32 %s9093_s28, 7  ;;  %s6135_s28 = sadd.s32 1, %s9093_s28   ;;  %s9093_s28 = sphi %s12842_s28, %s6135_s28   ;;  %v9089_v38 = vphi %v12840_v38, %v13687_v38  }
 0x817   : > { %v6158_v62 = vrot.slane %v12838_v19, %v13686_v49  ;;  %s12853_s29 = scalar_lea.vmem [#allocation3], %s6846_s5  ;;  %p6132_p4 = scmp.ge.s32.totalorder %s6135_s28, 2  }
 0x818   : > { %v6139_v34 = vld [vmem:[%s12853_s29] sm:$0xff]  ;;  %v6140_v11 = vld [vmem:[%s12853_s29 + $0x8] sm:$0xff]  ;;  %v6141_v37 = vld [vmem:[%s12853_s29 + $0x10] sm:$0xff]  ;;  %vm13690_vm5 = vmmov (%p6132_p4), 0   ;;  %s12911_s10 = smov (%p6132_p4), 0  }
 0x819   : > { %v6159_v52 = vsub.f32 %v6139_v34, %v6158_v62  ;;  %v6160_v40 = vsub.f32 %v6140_v11, %v6158_v62  ;;  %v6142_v60 = vld [vmem:[%s12853_s29 + $0x18] sm:$0xff]  ;;  %v6161_v55 = vsub.f32 %v6141_v37, %v6158_v62  ;;  %v6143_v44 = vld [vmem:[%s12853_s29 + $0x20] sm:$0xff]  ;;  %v6144_v5 = vld [vmem:[%s12853_s29 + $0x28] sm:$0xff] }
 0x81a   : > { %v6162_v25 = vsub.f32 %v6142_v60, %v6158_v62  ;;  %v6163_v8 = vsub.f32 %v6143_v44, %v6158_v62  ;;  %v6145_v39 = vld [vmem:[%s12853_s29 + $0x30] sm:$0xff]  ;;  %v6164_v21 = vsub.f32 %v6144_v5, %v6158_v62  ;;  %v6146_v31 = vld [vmem:[%s12853_s29 + $0x38] sm:$0xff]  ;;  %v6147_v18 = vld [vmem:[%s12853_s29 + $0x40] sm:$0xff] }
 0x81b   : > { %v6175_v58 = vmul.f32 %v6159_v52, %v6159_v52  ;;  %v6176_v33 = vmul.f32 %v6160_v40, %v6160_v40  ;;  %v6177_v46 = vmul.f32 %v6161_v55, %v6161_v55  ;;  %v6165_v47 = vsub.f32 %v6145_v39, %v6158_v62  ;;  %v6148_v35 = vld [vmem:[%s12853_s29 + $0x48] sm:$0xff]  ;;  %v6149_v57 = vld [vmem:[%s12853_s29 + $0x50] sm:$0xff]  ;;  %v6150_v9 = vld [vmem:[%s12853_s29 + $0x58] sm:$0xff] }
 0x81c   : > { %v6178_v43 = vmul.f32 %v6162_v25, %v6162_v25  ;;  %v6179_v16 = vmul.f32 %v6163_v8, %v6163_v8  ;;  %v6166_v45 = vsub.f32 %v6146_v31, %v6158_v62  ;;  %v6180_v26 = vmul.f32 %v6164_v21, %v6164_v21  ;;  %v6151_v2 = vld [vmem:[%s12853_s29 + $0x60] sm:$0xff]  ;;  %v6152_v50 = vld [vmem:[%s12853_s29 + $0x68] sm:$0xff]  ;;  %v6153_v20 = vld [vmem:[%s12853_s29 + $0x70] sm:$0xff] }
 0x81d   : > { %v6191_v0 = vadd.f32 %v6176_v33, %v6175_v58  ;;  %v6167_v41 = vsub.f32 %v6147_v18, %v6158_v62  ;;  %v6181_v54 = vmul.f32 %v6165_v47, %v6165_v47  ;;  %v6168_v61 = vsub.f32 %v6148_v35, %v6158_v62  ;;  %v6154_v17 = vld [vmem:[%s12853_s29 + $0x78] sm:$0xff] }
 0x81e   : > { %v6182_v3 = vmul.f32 %v6166_v45, %v6166_v45  ;;  %v6169_v15 = vsub.f32 %v6149_v57, %v6158_v62  ;;  %v6170_v32 = vsub.f32 %v6150_v9, %v6158_v62  ;;  %v6171_v6 = vsub.f32 %v6151_v2, %v6158_v62 }
 0x81f   : > { %v6192_v59 = vadd.f32 %v6191_v0, %v6177_v46  ;;  %v6183_v7 = vmul.f32 %v6167_v41, %v6167_v41  ;;  %v6184_v36 = vmul.f32 %v6168_v61, %v6168_v61  ;;  %v6172_v14 = vsub.f32 %v6152_v50, %v6158_v62 }
 0x820   : > { %v6185_v13 = vmul.f32 %v6169_v15, %v6169_v15  ;;  %v6186_v12 = vmul.f32 %v6170_v32, %v6170_v32  ;;  %v6173_v22 = vsub.f32 %v6153_v20, %v6158_v62  ;;  %v6187_v49 = vmul.f32 %v6171_v6, %v6171_v6 }
 0x821   : > { %v6193_v27 = vadd.f32 %v6192_v59, %v6178_v43  ;;  %v6174_v11 = vsub.f32 %v6154_v17, %v6158_v62  ;;  %v6188_v37 = vmul.f32 %v6172_v14, %v6172_v14  ;;  %v13688_v62 = vmov (%p6132_p4), 0.0|0.0  }
 0x822   : > { %v6189_v40 = vmul.f32 %v6173_v22, %v6173_v22  ;;  %8334 = vmatprep.subr.bf16.mxu1 (%p6132_p4), %v13688_v62  ;;  %v13689_v0 = vmov (%p6132_p4), 0.0  }
 0x823   : > { %v6194_v4 = vadd.f32 %v6193_v27, %v6179_v16  ;;  %v6190_v55 = vmul.f32 %v6174_v11, %v6174_v11  ;;  %8259 = vmatprep.mubr.msk.f32.mxu1 (%p6132_p4), %vm13690_vm5, %v13689_v0  ;;  %8336 = vmatpush3.bf16.msra.mxu1 (%p6132_p4), %v12768_v42 }
 0x824   :  { %8337 = vmatprep.subr.bf16.mxu1 (%p6132_p4), %v13688_v62 }
 0x825   : > { %v6195_v51 = vadd.f32 %v6194_v4, %v6180_v26 }
 0x827   : > { %v6196_v29 = vadd.f32 %v6195_v51, %v6181_v54  ;;  %8339 = vmatpush3.bf16.msra.mxu1 (%p6132_p4), %v12774_v53 }
 0x828   :  { %8340 = vmatprep.subr.bf16.mxu1 (%p6132_p4), %v13688_v62 }
 0x829   : > { %v6197_v10 = vadd.f32 %v6196_v29, %v6182_v3 }
 0x82b   : > { %v6198_v28 = vadd.f32 %v6197_v10, %v6183_v7  ;;  %8342 = vmatpush3.bf16.msra.mxu1 (%p6132_p4), %v12784_v23 }
 0x82c   :  { %8343 = vmatprep.subr.bf16.mxu1 (%p6132_p4), %v13688_v62 }
 0x82d   : > { %v6199_v63 = vadd.f32 %v6198_v28, %v6184_v36 }
 0x82f   : > { %v6200_v34 = vadd.f32 %v6199_v63, %v6185_v13  ;;  %8345 = vmatpush3.bf16.msra.mxu1 (%p6132_p4), %v12794_v48  ;;  %v6284_v48 = vld [vmem:[%s12984_s3] sm:$0x1] (%p6132_p4) }
 0x830   :  { %8346 = vmatprep.subr.bf16.mxu1 (%p6132_p4), %v13688_v62 }
 0x831   : > { %v6201_v52 = vadd.f32 %v6200_v34, %v6186_v12 }
 0x833   : > { %v6202_v60 = vadd.f32 %v6201_v52, %v6187_v49  ;;  %8348 = vmatpush3.bf16.msra.mxu1 (%p6132_p4), %v12804_v30 }
 0x834   :  { %8349 = vmatprep.subr.bf16.mxu1 (%p6132_p4), %v13688_v62 }
 0x835   : > { %v6203_v44 = vadd.f32 %v6202_v60, %v6188_v37 }
 0x837   : > { %v6204_v25 = vadd.f32 %v6203_v44, %v6189_v40  ;;  %8351 = vmatpush3.bf16.msra.mxu1 (%p6132_p4), %v12814_v1  ;;  %v12903_v1 = vld [vmem:[%s12985_s4] sm:$0x1] (%p6132_p4) }
 0x838   :  { %8352 = vmatprep.subr.bf16.mxu1 (%p6132_p4), %v13688_v62 }
 0x839   : > { %v6205_v58 = vadd.f32 %v6204_v25, %v6190_v55 }
 0x83b   : > { %v6206_v33 = vrot.slane %v6205_v58, 4  ;;  %8354 = vmatpush3.bf16.msra.mxu1 (%p6132_p4), %v12824_v24 }
 0x83c   :  { %8355 = vmatprep.subr.bf16.mxu1 (%p6132_p4), %v13688_v62 }
 0x83d   : > { %v6207_v5 = vadd.f32 %v6206_v33, %v6205_v58 }
 0x83f   : > { %v6208_v8 = vrot.slane %v6207_v5, 2  ;;  %8357 = vmatpush3.bf16.msra.mxu1 (%p6132_p4), %v12834_v56 }
 0x841   : > { %v6209_v46 = vadd.f32 %v6208_v8, %v6207_v5 }
 0x843   : > { %v6210_v39 = vrot.slane %v6209_v46, 1  ;;  %6134 = sbr.rel (!%p6132_p4) target bundleno = 2070 (0x816), region = 141 }
 0x845   : > { %v6211_v21 = vadd.f32 %v6210_v39, %v6209_v46 }
 0x847   : > { %v6212_v43 = vadd.f32 %v9089_v38, %v6211_v21  }
 0x849   : > { %v13687_v38 = vmov %v6212_v43  ;;  %8260 = vmatmul.mubr.f32.vlgmr.msra.gmra.mrb[54].mxu1 (%p6132_p4), %v6212_v43 }
 0x91c   :  { %v6279_v42 = vpop.f32.mrb[54].mxu1 }
 0x91d   :  { %v6280_v53 = vadd.f32 1e-05, %v6279_v42  ;;  %v8261_v23 = vpop.f32.mrb[55].mxu1 }
 0x91f   :  { %8654 = vrsqrt.f32 %v6280_v53 }
 0x929   :  { %v8655_v30 = vpop.eup %8654 }
 0x92a   :  { %v12898_v38 = vmul.f32 %v8655_v30, %v6284_v48 }
 0x92c   :  { %v12907_v24 = vmul.f32 %v12898_v38, %v12838_v19 }
 0x92e   :  { %v6288_v56 = vsub.f32 %v12903_v1, %v12907_v24 }
 0x92f LB: > { %v13691_v31 = vld [vmem:[#allocation45_spill] sm:$0xff]  ;;  %s6847_s3 = sshll.u32 %s9097_s10, 7  ;;  %s6294_s10 = sadd.s32 1, %s9097_s10   ;;  %s9097_s10 = sphi %s12911_s10, %s6294_s10  }
 0x930   : > { %v6317_v47 = vrot.slane %v12898_v38, %v13691_v31  ;;  %v12923_v19 = vrot.slane %v6288_v56, %v13691_v31  ;;  %s12925_s4 = scalar_lea.vmem [#allocation3], %s6847_s3  ;;  %s12936_s13 = scalar_lea.vmem %s12987_s6, %s6847_s3 }
 0x931   : > { %v6298_v16 = vld [vmem:[%s12925_s4] sm:$0xff]  ;;  %v6299_v59 = vld [vmem:[%s12925_s4 + $0x8] sm:$0xff]  ;;  %v6300_v18 = vld [vmem:[%s12925_s4 + $0x10] sm:$0xff]  ;;  %p6291_p5 = scmp.ge.s32.totalorder %s6294_s10, 2  }
 0x932   : > { %v6318_v45 = vmul.f32 %v6317_v47, %v6298_v16  ;;  %v6319_v26 = vmul.f32 %v6317_v47, %v6299_v59  ;;  %v6320_v27 = vmul.f32 %v6317_v47, %v6300_v18  ;;  %v6301_v35 = vld [vmem:[%s12925_s4 + $0x18] sm:$0xff]  ;;  %v6302_v41 = vld [vmem:[%s12925_s4 + $0x20] sm:$0xff]  ;;  %v6303_v54 = vld [vmem:[%s12925_s4 + $0x28] sm:$0xff] }
 0x933   : > { %v6321_v4 = vmul.f32 %v6317_v47, %v6301_v35  ;;  %v6322_v57 = vmul.f32 %v6317_v47, %v6302_v41  ;;  %v6323_v61 = vmul.f32 %v6317_v47, %v6303_v54  ;;  %v6304_v3 = vld [vmem:[%s12925_s4 + $0x30] sm:$0xff]  ;;  %v6305_v51 = vld [vmem:[%s12925_s4 + $0x38] sm:$0xff]  ;;  %v6306_v9 = vld [vmem:[%s12925_s4 + $0x40] sm:$0xff] }
 0x934   : > { %v6340_v15 = vadd.f32 %v12923_v19, %v6318_v45  ;;  %v6341_v7 = vadd.f32 %v12923_v19, %v6319_v26  ;;  %v6342_v29 = vadd.f32 %v12923_v19, %v6320_v27  ;;  %v6324_v2 = vmul.f32 %v6317_v47, %v6304_v3  ;;  %v6307_v32 = vld [vmem:[%s12925_s4 + $0x48] sm:$0xff]  ;;  %v6308_v36 = vld [vmem:[%s12925_s4 + $0x50] sm:$0xff]  ;;  %v6309_v10 = vld [vmem:[%s12925_s4 + $0x58] sm:$0xff] }
 0x935   : > { %v6343_v50 = vadd.f32 %v12923_v19, %v6321_v4  ;;  %v6344_v6 = vadd.f32 %v12923_v19, %v6322_v57  ;;  %v6345_v13 = vadd.f32 %v12923_v19, %v6323_v61  ;;  %v6325_v28 = vmul.f32 %v6317_v47, %v6305_v51  ;;  %v6310_v20 = vld [vmem:[%s12925_s4 + $0x60] sm:$0xff]  ;;  %v6311_v14 = vld [vmem:[%s12925_s4 + $0x68] sm:$0xff]  ;;  %v6312_v12 = vld [vmem:[%s12925_s4 + $0x70] sm:$0xff] }
 0x936   : > { %6849 = vst [vmem:[%s12936_s13 + $0x100] sm:$0xff] %v6340_v15  ;;  %6850 = vst [vmem:[%s12936_s13 + $0x108] sm:$0xff] %v6341_v7  ;;  %v6346_v63 = vadd.f32 %v12923_v19, %v6324_v2  ;;  %v6326_v17 = vmul.f32 %v6317_v47, %v6306_v9  ;;  %v6327_v22 = vmul.f32 %v6317_v47, %v6307_v32  ;;  %v6313_v34 = vld [vmem:[%s12925_s4 + $0x78] sm:$0xff] }
 0x937   : > { %6851 = vst [vmem:[%s12936_s13 + $0x110] sm:$0xff] %v6342_v29  ;;  %v6328_v49 = vmul.f32 %v6317_v47, %v6308_v36  ;;  %6852 = vst [vmem:[%s12936_s13 + $0x118] sm:$0xff] %v6343_v50  ;;  %v6347_v11 = vadd.f32 %v12923_v19, %v6325_v28  ;;  %v6329_v37 = vmul.f32 %v6317_v47, %v6309_v10 }
 0x938   : > { %6853 = vst [vmem:[%s12936_s13 + $0x120] sm:$0xff] %v6344_v6  ;;  %6854 = vst [vmem:[%s12936_s13 + $0x128] sm:$0xff] %v6345_v13  ;;  %v6330_v52 = vmul.f32 %v6317_v47, %v6310_v20  ;;  %v6331_v40 = vmul.f32 %v6317_v47, %v6311_v14  ;;  %v6348_v60 = vadd.f32 %v12923_v19, %v6326_v17  ;;  %6293 = sbr.rel (!%p6291_p5) target bundleno = 2351 (0x92f), region = 152 }
 0x939   : > { %6855 = vst [vmem:[%s12936_s13 + $0x130] sm:$0xff] %v6346_v63  ;;  %v6349_v55 = vadd.f32 %v12923_v19, %v6327_v22  ;;  %v6350_v44 = vadd.f32 %v12923_v19, %v6328_v49  ;;  %v6332_v25 = vmul.f32 %v6317_v47, %v6312_v12  ;;  %6856 = vst [vmem:[%s12936_s13 + $0x138] sm:$0xff] %v6347_v11 }
 0x93a   : > { %v6351_v58 = vadd.f32 %v12923_v19, %v6329_v37  ;;  %v6352_v33 = vadd.f32 %v12923_v19, %v6330_v52  ;;  %v6353_v5 = vadd.f32 %v12923_v19, %v6331_v40  ;;  %v6333_v8 = vmul.f32 %v6317_v47, %v6313_v34  ;;  %6857 = vst [vmem:[%s12936_s13 + $0x140] sm:$0xff] %v6348_v60 }
 0x93b   : > { %6858 = vst [vmem:[%s12936_s13 + $0x148] sm:$0xff] %v6349_v55  ;;  %6859 = vst [vmem:[%s12936_s13 + $0x150] sm:$0xff] %v6350_v44  ;;  %v6354_v46 = vadd.f32 %v12923_v19, %v6332_v25 }
 0x93c   : > { %6860 = vst [vmem:[%s12936_s13 + $0x158] sm:$0xff] %v6351_v58  ;;  %6861 = vst [vmem:[%s12936_s13 + $0x160] sm:$0xff] %v6352_v33  ;;  %v6355_v39 = vadd.f32 %v12923_v19, %v6333_v8 }
 0x93d   : > { %6862 = vst [vmem:[%s12936_s13 + $0x168] sm:$0xff] %v6353_v5  ;;  %6863 = vst [vmem:[%s12936_s13 + $0x170] sm:$0xff] %v6354_v46 }
 0x93e   : > { %6864 = vst [vmem:[%s12936_s13 + $0x178] sm:$0xff] %v6355_v39 }

</bundles_post_ra>
